<compile_context>
chip_gen: v7x
topology: tpu7x:2x2x1
jax: 0.10.0
libtpu: 0.0.40
codegen_flags: <defaults>
</compile_context>

<pallas_src>
import functools

import jax
import jax.numpy as jnp
from jax import lax
from jax.experimental import pallas as pl
from jax.experimental.pallas import tpu as pltpu

KH = KW = 5
PAD = 2


def _round_up(a: int, b: int) -> int:
    return ((a + b - 1) // b) * b


def fused_conv_kernel(x_ref, w_ref, o_ref, pt_ref, *, cin, h, w, lpad, tm):
    """One grid step = one tile of `tm` output pixels (channels-major).

    x_ref : (cin, 2*lpad + m_pad) f32  zero-padded flat image(s), resident
    w_ref : (2*cout_pad, k_pad)  f32   [W1 | b1-10] over [W2 | b2], resident
    o_ref : (cout_pad, tm)       f32   channels-major output tile
    pt_ref: (k_pad, tm)          f32   scratch: transposed im2col patches
    """
    i = pl.program_id(0)
    base = pl.multiple_of(i * tm, 128)

    # Window with halo: covers every (kh, kw) flat shift needed by this tile.
    win = x_ref[:, pl.ds(base, tm + 2 * lpad)]                    # (cin, tm+2*lpad)

    # (row, col) of every output pixel in this tile.
    lane = lax.broadcasted_iota(jnp.int32, (1, tm), 1) + i * tm
    if (w & (w - 1)) == 0 and (h & (h - 1)) == 0:                 # pow2 fast path
        col = lane & (w - 1)
        row = (lane >> (w.bit_length() - 1)) & (h - 1)
    else:
        col = lane % w
        row = (lane // w) % h

    k = KH * KW * cin
    k_pad = pt_ref.shape[0]

    # ---- in-kernel im2col: 25 shifted slices + boundary masks -> pT scratch ----
    for q in range(KH * KW):
        kh, kw = q // KW, q % KW
        d = (kh - PAD) * w + (kw - PAD)                           # flat-index shift
        sl = win[:, lpad + d: lpad + d + tm]                      # (cin, tm)
        ok = ((col + (kw - PAD) >= 0) & (col + (kw - PAD) < w) &
              (row + (kh - PAD) >= 0) & (row + (kh - PAD) < h))
        pt_ref[pl.ds(q * cin, cin), :] = jnp.where(ok, sl, 0.0)

    # Bias row (all ones) + zero tail: the fused matmul adds biases for free.
    pt_ref[pl.ds(k, 1), :] = jnp.ones((1, tm), jnp.float32)
    if k_pad - k - 1 > 0:
        pt_ref[pl.ds(k + 1, k_pad - k - 1), :] = jnp.zeros(
            (k_pad - k - 1, tm), jnp.float32)

    # ---- single wide MXU push for both convs (+ folded biases) ----
    y = jnp.dot(w_ref[...], pt_ref[...], preferred_element_type=jnp.float32)
    cph = y.shape[0] // 2
    y1 = y[:cph, :]                # conv1(x) + (b1 - 10)
    y2 = y[cph:, :]                # conv2(x) + b2
    o_ref[...] = jnp.maximum(y1 + jnp.maximum(y2, 0.0), 0.0)


def fused_model(x, w1, b1, w2, b2, *, tm=2048):
    """x: (N, Cin, H, W); w1, w2: (Cout, Cin, KH, KW); b1, b2: (Cout,)."""
    n, cin, h, w = x.shape
    cout = w1.shape[0]
    m = n * h * w

    tm = min(tm, _round_up(m, 128))
    m_pad = _round_up(m, tm)
    grid = m_pad // tm
    lpad = max(256, _round_up(PAD * w + PAD, 128))    # halo >= max |flat shift|
    k = KH * KW * cin
    k_pad = _round_up(k + 1, 8)                        # +1 bias row
    cout_pad = _round_up(cout, 8)

    # Flat zero-padded image (Cin, lpad + m_pad + lpad); the NCHW->(C, M) reshape
    # is free and only this tiny padded image hits HBM on the input side.
    x_flat = jnp.transpose(x.astype(jnp.float32), (1, 0, 2, 3)).reshape(cin, m)
    x_flat = jnp.pad(x_flat, ((0, 0), (lpad, lpad + m_pad - m)))

    # Fused weights: rows = [conv1 | pad | conv2 | pad]; cols = (kh, kw, ci)
    # flattened K, bias (with the literal -10 folded into b1) in column k.
    def wmat(wc, bc):
        wm = jnp.transpose(wc.astype(jnp.float32), (0, 2, 3, 1)).reshape(cout, k)
        wm = jnp.concatenate([wm, bc.astype(jnp.float32)[:, None]], axis=1)
        return jnp.pad(wm, ((0, cout_pad - cout), (0, k_pad - k - 1)))

    w_comb = jnp.concatenate([wmat(w1, b1 - 10.0), wmat(w2, b2)], axis=0)

    kernel = functools.partial(fused_conv_kernel, cin=cin, h=h, w=w,
                               lpad=lpad, tm=tm)
    out_cm = pl.pallas_call(
        kernel,
        out_shape=jax.ShapeDtypeStruct((cout_pad, m_pad), jnp.float32),
        grid_spec=pltpu.PrefetchScalarGridSpec(
            num_scalar_prefetch=0,
            grid=(grid,),
            in_specs=[
                pl.BlockSpec((cin, 2 * lpad + m_pad), lambda i: (0, 0)),  # image
                pl.BlockSpec((2 * cout_pad, k_pad), lambda i: (0, 0)),    # weights
            ],
            out_specs=pl.BlockSpec((cout_pad, tm), lambda i: (0, i)),
            scratch_shapes=[pltpu.VMEM((k_pad, tm), jnp.float32)],
        ),
        compiler_params=pltpu.CompilerParams(
            dimension_semantics=("parallel",)),
    )(x_flat, w_comb)

    # Channels-major -> NCHW: slice padding, free reshape, (C, N) swap is a
    # no-op for N == 1.
    return out_cm[:cout, :m].reshape(cout, n, h, w).transpose(1, 0, 2, 3)


def reference_model(x, w1, b1, w2, b2):
    dn = ("NCHW", "OIHW", "NCHW")
    pad = [(PAD, PAD), (PAD, PAD)]
    c1 = lax.conv_general_dilated(x, w1, (1, 1), pad, dimension_numbers=dn,
                                  precision=lax.Precision.HIGHEST)
    c1 = c1 + b1.reshape(1, -1, 1, 1)
    c2 = lax.conv_general_dilated(x, w2, (1, 1), pad, dimension_numbers=dn,
                                  precision=lax.Precision.HIGHEST)
    c2 = c2 + b2.reshape(1, -1, 1, 1)
    v1 = (c1 - 10.0) + jnp.maximum(c2, 0.0)
    return jnp.maximum(v1, 0.0)


if __name__ == "__main__":
    # Shapes from the module spec: x1 = randn(1, 3, 64, 64), Cout = 20.
    N, CIN, H, W = 1, 3, 64, 64
    COUT = 20

    key = jax.random.PRNGKey(0)
    kx, kw1, kb1, kw2, kb2 = jax.random.split(key, 5)

    # Scaled so the "conv1 - 10" branch is not uniformly negative and the
    # relu/add fusion path is actually exercised.
    x = 3.0 * jax.random.normal(kx, (N, CIN, H, W), dtype=jnp.float32)
    w1 = jax.random.uniform(kw1, (COUT, CIN, KH, KW), jnp.float32, -0.3, 0.3)
    b1 = jax.random.uniform(kb1, (COUT,), jnp.float32, -0.5, 0.5)
    w2 = jax.random.uniform(kw2, (COUT, CIN, KH, KW), jnp.float32, -0.3, 0.3)
    b2 = jax.random.uniform(kb2, (COUT,), jnp.float32, -0.5, 0.5)

    out = jax.block_until_ready(jax.jit(fused_model)(x, w1, b1, w2, b2))
    assert out.shape == (N, COUT, H, W), out.shape

    ref = jax.block_until_ready(reference_model(x, w1, b1, w2, b2))
    err = float(jnp.max(jnp.abs(out - ref)))
    # Tolerance is set to also cover a potential bf16-pass lowering of the f32
    # MXU matmul; with full-f32 passes the error is ~1e-4.
    assert jnp.allclose(out, ref, atol=1.5e-1, rtol=2e-2), err

    print("KERNEL_OK")
</pallas_src>

<mosaic_0001>
module attributes {stable_mosaic.version = 11 : i64} {
  func.func @fused_conv_kernel(%arg0: i32, %arg1: memref<3x4608xf32, #tpu.memory_space<vmem>>, %arg2: memref<48x80xf32, #tpu.memory_space<vmem>>, %arg3: memref<24x2048xf32, #tpu.memory_space<vmem>>, %arg4: memref<80x2048xf32, #tpu.memory_space<vmem>>) attributes {dimension_semantics = [#tpu.dimension_semantics<parallel>], iteration_bounds = array<i64: 2>, scalar_prefetch = 0 : i64, scratch_operands = 1 : i64, tpu.core_type = #tpu.core_type<tc>, window_params = [{pipeline_mode = #tpu.pipeline_mode<synchronous>, transform_indices = @transform_0, window_bounds = array<i64: 3, 4608>}, {pipeline_mode = #tpu.pipeline_mode<synchronous>, transform_indices = @transform_1, window_bounds = array<i64: 48, 80>}, {transform_indices = @transform_2, window_bounds = array<i64: 24, 2048>}]} {
    %c2048_i32 = arith.constant 2048 : i32
    %0 = arith.muli %arg0, %c2048_i32 : i32
    %1 = tpu.assume_multiple %0, 128 : i32
    %c0 = arith.constant 0 : index
    %2 = arith.index_cast %1 : i32 to index
    %3 = vector.load %arg1[%c0, %2] : memref<3x4608xf32, #tpu.memory_space<vmem>>, vector<3x2560xf32>
    %4 = tpu.iota {dimensions = array<i32: 1>} : vector<1x2048xi32>
    %c2048_i32_0 = arith.constant 2048 : i32
    %5 = arith.muli %arg0, %c2048_i32_0 : i32
    %6 = vector.broadcast %5 : i32 to vector<1x2048xi32>
    %7 = arith.addi %4, %6 : vector<1x2048xi32>
    %c63_i32 = arith.constant 63 : i32
    %8 = vector.broadcast %c63_i32 : i32 to vector<1x2048xi32>
    %9 = arith.andi %7, %8 : vector<1x2048xi32>
    %c6_i32 = arith.constant 6 : i32
    %10 = vector.broadcast %c6_i32 : i32 to vector<1x2048xi32>
    %11 = arith.shrsi %7, %10 : vector<1x2048xi32>
    %c63_i32_1 = arith.constant 63 : i32
    %12 = vector.broadcast %c63_i32_1 : i32 to vector<1x2048xi32>
    %13 = arith.andi %11, %12 : vector<1x2048xi32>
    %14 = vector.extract_strided_slice %3 {offsets = [0, 126], sizes = [3, 2048], strides = [1, 1]} : vector<3x2560xf32> to vector<3x2048xf32>
    %c-2_i32 = arith.constant -2 : i32
    %15 = vector.broadcast %c-2_i32 : i32 to vector<1x2048xi32>
    %16 = arith.addi %9, %15 : vector<1x2048xi32>
    %c0_i32 = arith.constant 0 : i32
    %17 = vector.broadcast %c0_i32 : i32 to vector<1x2048xi32>
    %18 = arith.cmpi sge, %16, %17 : vector<1x2048xi32>
    %c-2_i32_2 = arith.constant -2 : i32
    %19 = vector.broadcast %c-2_i32_2 : i32 to vector<1x2048xi32>
    %20 = arith.addi %9, %19 : vector<1x2048xi32>
    %c64_i32 = arith.constant 64 : i32
    %21 = vector.broadcast %c64_i32 : i32 to vector<1x2048xi32>
    %22 = arith.cmpi slt, %20, %21 : vector<1x2048xi32>
    %23 = arith.andi %18, %22 : vector<1x2048xi1>
    %c-2_i32_3 = arith.constant -2 : i32
    %24 = vector.broadcast %c-2_i32_3 : i32 to vector<1x2048xi32>
    %25 = arith.addi %13, %24 : vector<1x2048xi32>
    %c0_i32_4 = arith.constant 0 : i32
    %26 = vector.broadcast %c0_i32_4 : i32 to vector<1x2048xi32>
    %27 = arith.cmpi sge, %25, %26 : vector<1x2048xi32>
    %28 = arith.andi %23, %27 : vector<1x2048xi1>
    %c-2_i32_5 = arith.constant -2 : i32
    %29 = vector.broadcast %c-2_i32_5 : i32 to vector<1x2048xi32>
    %30 = arith.addi %13, %29 : vector<1x2048xi32>
    %c64_i32_6 = arith.constant 64 : i32
    %31 = vector.broadcast %c64_i32_6 : i32 to vector<1x2048xi32>
    %32 = arith.cmpi slt, %30, %31 : vector<1x2048xi32>
    %33 = arith.andi %28, %32 : vector<1x2048xi1>
    %cst = arith.constant 0.000000e+00 : f32
    %34 = vector.shape_cast %33 : vector<1x2048xi1> to vector<1x2048xi1>
    %35 = vector.broadcast %34 : vector<1x2048xi1> to vector<3x2048xi1>
    %36 = vector.broadcast %cst : f32 to vector<3x2048xf32>
    %37 = arith.select %35, %14, %36 : vector<3x2048xi1>, vector<3x2048xf32>
    %c0_7 = arith.constant 0 : index
    %c0_8 = arith.constant 0 : index
    %38 = vector.load %arg4[%c0_7, %c0_8] : memref<80x2048xf32, #tpu.memory_space<vmem>>, vector<3x2048xf32>
    tpu.vector_store %arg4[%c0_7, %c0_8], %37 {strides = array<i32>} : memref<80x2048xf32, #tpu.memory_space<vmem>>, vector<3x2048xf32>,
    %39 = vector.extract_strided_slice %3 {offsets = [0, 127], sizes = [3, 2048], strides = [1, 1]} : vector<3x2560xf32> to vector<3x2048xf32>
    %c-1_i32 = arith.constant -1 : i32
    %40 = vector.broadcast %c-1_i32 : i32 to vector<1x2048xi32>
    %41 = arith.addi %9, %40 : vector<1x2048xi32>
    %c0_i32_9 = arith.constant 0 : i32
    %42 = vector.broadcast %c0_i32_9 : i32 to vector<1x2048xi32>
    %43 = arith.cmpi sge, %41, %42 : vector<1x2048xi32>
    %c-1_i32_10 = arith.constant -1 : i32
    %44 = vector.broadcast %c-1_i32_10 : i32 to vector<1x2048xi32>
    %45 = arith.addi %9, %44 : vector<1x2048xi32>
    %c64_i32_11 = arith.constant 64 : i32
    %46 = vector.broadcast %c64_i32_11 : i32 to vector<1x2048xi32>
    %47 = arith.cmpi slt, %45, %46 : vector<1x2048xi32>
    %48 = arith.andi %43, %47 : vector<1x2048xi1>
    %c-2_i32_12 = arith.constant -2 : i32
    %49 = vector.broadcast %c-2_i32_12 : i32 to vector<1x2048xi32>
    %50 = arith.addi %13, %49 : vector<1x2048xi32>
    %c0_i32_13 = arith.constant 0 : i32
    %51 = vector.broadcast %c0_i32_13 : i32 to vector<1x2048xi32>
    %52 = arith.cmpi sge, %50, %51 : vector<1x2048xi32>
    %53 = arith.andi %48, %52 : vector<1x2048xi1>
    %c-2_i32_14 = arith.constant -2 : i32
    %54 = vector.broadcast %c-2_i32_14 : i32 to vector<1x2048xi32>
    %55 = arith.addi %13, %54 : vector<1x2048xi32>
    %c64_i32_15 = arith.constant 64 : i32
    %56 = vector.broadcast %c64_i32_15 : i32 to vector<1x2048xi32>
    %57 = arith.cmpi slt, %55, %56 : vector<1x2048xi32>
    %58 = arith.andi %53, %57 : vector<1x2048xi1>
    %cst_16 = arith.constant 0.000000e+00 : f32
    %59 = vector.shape_cast %58 : vector<1x2048xi1> to vector<1x2048xi1>
    %60 = vector.broadcast %59 : vector<1x2048xi1> to vector<3x2048xi1>
    %61 = vector.broadcast %cst_16 : f32 to vector<3x2048xf32>
    %62 = arith.select %60, %39, %61 : vector<3x2048xi1>, vector<3x2048xf32>
    %c3 = arith.constant 3 : index
    %c0_17 = arith.constant 0 : index
    %63 = vector.load %arg4[%c3, %c0_17] : memref<80x2048xf32, #tpu.memory_space<vmem>>, vector<3x2048xf32>
    tpu.vector_store %arg4[%c3, %c0_17], %62 {strides = array<i32>} : memref<80x2048xf32, #tpu.memory_space<vmem>>, vector<3x2048xf32>,
    %64 = vector.extract_strided_slice %3 {offsets = [0, 128], sizes = [3, 2048], strides = [1, 1]} : vector<3x2560xf32> to vector<3x2048xf32>
    %c0_i32_18 = arith.constant 0 : i32
    %65 = vector.broadcast %c0_i32_18 : i32 to vector<1x2048xi32>
    %66 = arith.addi %9, %65 : vector<1x2048xi32>
    %c0_i32_19 = arith.constant 0 : i32
    %67 = vector.broadcast %c0_i32_19 : i32 to vector<1x2048xi32>
    %68 = arith.cmpi sge, %66, %67 : vector<1x2048xi32>
    %c0_i32_20 = arith.constant 0 : i32
    %69 = vector.broadcast %c0_i32_20 : i32 to vector<1x2048xi32>
    %70 = arith.addi %9, %69 : vector<1x2048xi32>
    %c64_i32_21 = arith.constant 64 : i32
    %71 = vector.broadcast %c64_i32_21 : i32 to vector<1x2048xi32>
    %72 = arith.cmpi slt, %70, %71 : vector<1x2048xi32>
    %73 = arith.andi %68, %72 : vector<1x2048xi1>
    %c-2_i32_22 = arith.constant -2 : i32
    %74 = vector.broadcast %c-2_i32_22 : i32 to vector<1x2048xi32>
    %75 = arith.addi %13, %74 : vector<1x2048xi32>
    %c0_i32_23 = arith.constant 0 : i32
    %76 = vector.broadcast %c0_i32_23 : i32 to vector<1x2048xi32>
    %77 = arith.cmpi sge, %75, %76 : vector<1x2048xi32>
    %78 = arith.andi %73, %77 : vector<1x2048xi1>
    %c-2_i32_24 = arith.constant -2 : i32
    %79 = vector.broadcast %c-2_i32_24 : i32 to vector<1x2048xi32>
    %80 = arith.addi %13, %79 : vector<1x2048xi32>
    %c64_i32_25 = arith.constant 64 : i32
    %81 = vector.broadcast %c64_i32_25 : i32 to vector<1x2048xi32>
    %82 = arith.cmpi slt, %80, %81 : vector<1x2048xi32>
    %83 = arith.andi %78, %82 : vector<1x2048xi1>
    %cst_26 = arith.constant 0.000000e+00 : f32
    %84 = vector.shape_cast %83 : vector<1x2048xi1> to vector<1x2048xi1>
    %85 = vector.broadcast %84 : vector<1x2048xi1> to vector<3x2048xi1>
    %86 = vector.broadcast %cst_26 : f32 to vector<3x2048xf32>
    %87 = arith.select %85, %64, %86 : vector<3x2048xi1>, vector<3x2048xf32>
    %c6 = arith.constant 6 : index
    %c0_27 = arith.constant 0 : index
    %88 = vector.load %arg4[%c6, %c0_27] : memref<80x2048xf32, #tpu.memory_space<vmem>>, vector<3x2048xf32>
    tpu.vector_store %arg4[%c6, %c0_27], %87 {strides = array<i32>} : memref<80x2048xf32, #tpu.memory_space<vmem>>, vector<3x2048xf32>,
    %89 = vector.extract_strided_slice %3 {offsets = [0, 129], sizes = [3, 2048], strides = [1, 1]} : vector<3x2560xf32> to vector<3x2048xf32>
    %c1_i32 = arith.constant 1 : i32
    %90 = vector.broadcast %c1_i32 : i32 to vector<1x2048xi32>
    %91 = arith.addi %9, %90 : vector<1x2048xi32>
    %c0_i32_28 = arith.constant 0 : i32
    %92 = vector.broadcast %c0_i32_28 : i32 to vector<1x2048xi32>
    %93 = arith.cmpi sge, %91, %92 : vector<1x2048xi32>
    %c1_i32_29 = arith.constant 1 : i32
    %94 = vector.broadcast %c1_i32_29 : i32 to vector<1x2048xi32>
    %95 = arith.addi %9, %94 : vector<1x2048xi32>
    %c64_i32_30 = arith.constant 64 : i32
    %96 = vector.broadcast %c64_i32_30 : i32 to vector<1x2048xi32>
    %97 = arith.cmpi slt, %95, %96 : vector<1x2048xi32>
    %98 = arith.andi %93, %97 : vector<1x2048xi1>
    %c-2_i32_31 = arith.constant -2 : i32
    %99 = vector.broadcast %c-2_i32_31 : i32 to vector<1x2048xi32>
    %100 = arith.addi %13, %99 : vector<1x2048xi32>
    %c0_i32_32 = arith.constant 0 : i32
    %101 = vector.broadcast %c0_i32_32 : i32 to vector<1x2048xi32>
    %102 = arith.cmpi sge, %100, %101 : vector<1x2048xi32>
    %103 = arith.andi %98, %102 : vector<1x2048xi1>
    %c-2_i32_33 = arith.constant -2 : i32
    %104 = vector.broadcast %c-2_i32_33 : i32 to vector<1x2048xi32>
    %105 = arith.addi %13, %104 : vector<1x2048xi32>
    %c64_i32_34 = arith.constant 64 : i32
    %106 = vector.broadcast %c64_i32_34 : i32 to vector<1x2048xi32>
    %107 = arith.cmpi slt, %105, %106 : vector<1x2048xi32>
    %108 = arith.andi %103, %107 : vector<1x2048xi1>
    %cst_35 = arith.constant 0.000000e+00 : f32
    %109 = vector.shape_cast %108 : vector<1x2048xi1> to vector<1x2048xi1>
    %110 = vector.broadcast %109 : vector<1x2048xi1> to vector<3x2048xi1>
    %111 = vector.broadcast %cst_35 : f32 to vector<3x2048xf32>
    %112 = arith.select %110, %89, %111 : vector<3x2048xi1>, vector<3x2048xf32>
    %c9 = arith.constant 9 : index
    %c0_36 = arith.constant 0 : index
    %113 = vector.load %arg4[%c9, %c0_36] : memref<80x2048xf32, #tpu.memory_space<vmem>>, vector<3x2048xf32>
    tpu.vector_store %arg4[%c9, %c0_36], %112 {strides = array<i32>} : memref<80x2048xf32, #tpu.memory_space<vmem>>, vector<3x2048xf32>,
    %114 = vector.extract_strided_slice %3 {offsets = [0, 130], sizes = [3, 2048], strides = [1, 1]} : vector<3x2560xf32> to vector<3x2048xf32>
    %c2_i32 = arith.constant 2 : i32
    %115 = vector.broadcast %c2_i32 : i32 to vector<1x2048xi32>
    %116 = arith.addi %9, %115 : vector<1x2048xi32>
    %c0_i32_37 = arith.constant 0 : i32
    %117 = vector.broadcast %c0_i32_37 : i32 to vector<1x2048xi32>
    %118 = arith.cmpi sge, %116, %117 : vector<1x2048xi32>
    %c2_i32_38 = arith.constant 2 : i32
    %119 = vector.broadcast %c2_i32_38 : i32 to vector<1x2048xi32>
    %120 = arith.addi %9, %119 : vector<1x2048xi32>
    %c64_i32_39 = arith.constant 64 : i32
    %121 = vector.broadcast %c64_i32_39 : i32 to vector<1x2048xi32>
    %122 = arith.cmpi slt, %120, %121 : vector<1x2048xi32>
    %123 = arith.andi %118, %122 : vector<1x2048xi1>
    %c-2_i32_40 = arith.constant -2 : i32
    %124 = vector.broadcast %c-2_i32_40 : i32 to vector<1x2048xi32>
    %125 = arith.addi %13, %124 : vector<1x2048xi32>
    %c0_i32_41 = arith.constant 0 : i32
    %126 = vector.broadcast %c0_i32_41 : i32 to vector<1x2048xi32>
    %127 = arith.cmpi sge, %125, %126 : vector<1x2048xi32>
    %128 = arith.andi %123, %127 : vector<1x2048xi1>
    %c-2_i32_42 = arith.constant -2 : i32
    %129 = vector.broadcast %c-2_i32_42 : i32 to vector<1x2048xi32>
    %130 = arith.addi %13, %129 : vector<1x2048xi32>
    %c64_i32_43 = arith.constant 64 : i32
    %131 = vector.broadcast %c64_i32_43 : i32 to vector<1x2048xi32>
    %132 = arith.cmpi slt, %130, %131 : vector<1x2048xi32>
    %133 = arith.andi %128, %132 : vector<1x2048xi1>
    %cst_44 = arith.constant 0.000000e+00 : f32
    %134 = vector.shape_cast %133 : vector<1x2048xi1> to vector<1x2048xi1>
    %135 = vector.broadcast %134 : vector<1x2048xi1> to vector<3x2048xi1>
    %136 = vector.broadcast %cst_44 : f32 to vector<3x2048xf32>
    %137 = arith.select %135, %114, %136 : vector<3x2048xi1>, vector<3x2048xf32>
    %c12 = arith.constant 12 : index
    %c0_45 = arith.constant 0 : index
    %138 = vector.load %arg4[%c12, %c0_45] : memref<80x2048xf32, #tpu.memory_space<vmem>>, vector<3x2048xf32>
    tpu.vector_store %arg4[%c12, %c0_45], %137 {strides = array<i32>} : memref<80x2048xf32, #tpu.memory_space<vmem>>, vector<3x2048xf32>,
    %139 = vector.extract_strided_slice %3 {offsets = [0, 190], sizes = [3, 2048], strides = [1, 1]} : vector<3x2560xf32> to vector<3x2048xf32>
    %c-2_i32_46 = arith.constant -2 : i32
    %140 = vector.broadcast %c-2_i32_46 : i32 to vector<1x2048xi32>
    %141 = arith.addi %9, %140 : vector<1x2048xi32>
    %c0_i32_47 = arith.constant 0 : i32
    %142 = vector.broadcast %c0_i32_47 : i32 to vector<1x2048xi32>
    %143 = arith.cmpi sge, %141, %142 : vector<1x2048xi32>
    %c-2_i32_48 = arith.constant -2 : i32
    %144 = vector.broadcast %c-2_i32_48 : i32 to vector<1x2048xi32>
    %145 = arith.addi %9, %144 : vector<1x2048xi32>
    %c64_i32_49 = arith.constant 64 : i32
    %146 = vector.broadcast %c64_i32_49 : i32 to vector<1x2048xi32>
    %147 = arith.cmpi slt, %145, %146 : vector<1x2048xi32>
    %148 = arith.andi %143, %147 : vector<1x2048xi1>
    %c-1_i32_50 = arith.constant -1 : i32
    %149 = vector.broadcast %c-1_i32_50 : i32 to vector<1x2048xi32>
    %150 = arith.addi %13, %149 : vector<1x2048xi32>
    %c0_i32_51 = arith.constant 0 : i32
    %151 = vector.broadcast %c0_i32_51 : i32 to vector<1x2048xi32>
    %152 = arith.cmpi sge, %150, %151 : vector<1x2048xi32>
    %153 = arith.andi %148, %152 : vector<1x2048xi1>
    %c-1_i32_52 = arith.constant -1 : i32
    %154 = vector.broadcast %c-1_i32_52 : i32 to vector<1x2048xi32>
    %155 = arith.addi %13, %154 : vector<1x2048xi32>
    %c64_i32_53 = arith.constant 64 : i32
    %156 = vector.broadcast %c64_i32_53 : i32 to vector<1x2048xi32>
    %157 = arith.cmpi slt, %155, %156 : vector<1x2048xi32>
    %158 = arith.andi %153, %157 : vector<1x2048xi1>
    %cst_54 = arith.constant 0.000000e+00 : f32
    %159 = vector.shape_cast %158 : vector<1x2048xi1> to vector<1x2048xi1>
    %160 = vector.broadcast %159 : vector<1x2048xi1> to vector<3x2048xi1>
    %161 = vector.broadcast %cst_54 : f32 to vector<3x2048xf32>
    %162 = arith.select %160, %139, %161 : vector<3x2048xi1>, vector<3x2048xf32>
    %c15 = arith.constant 15 : index
    %c0_55 = arith.constant 0 : index
    %163 = vector.load %arg4[%c15, %c0_55] : memref<80x2048xf32, #tpu.memory_space<vmem>>, vector<3x2048xf32>
    tpu.vector_store %arg4[%c15, %c0_55], %162 {strides = array<i32>} : memref<80x2048xf32, #tpu.memory_space<vmem>>, vector<3x2048xf32>,
    %164 = vector.extract_strided_slice %3 {offsets = [0, 191], sizes = [3, 2048], strides = [1, 1]} : vector<3x2560xf32> to vector<3x2048xf32>
    %c-1_i32_56 = arith.constant -1 : i32
    %165 = vector.broadcast %c-1_i32_56 : i32 to vector<1x2048xi32>
    %166 = arith.addi %9, %165 : vector<1x2048xi32>
    %c0_i32_57 = arith.constant 0 : i32
    %167 = vector.broadcast %c0_i32_57 : i32 to vector<1x2048xi32>
    %168 = arith.cmpi sge, %166, %167 : vector<1x2048xi32>
    %c-1_i32_58 = arith.constant -1 : i32
    %169 = vector.broadcast %c-1_i32_58 : i32 to vector<1x2048xi32>
    %170 = arith.addi %9, %169 : vector<1x2048xi32>
    %c64_i32_59 = arith.constant 64 : i32
    %171 = vector.broadcast %c64_i32_59 : i32 to vector<1x2048xi32>
    %172 = arith.cmpi slt, %170, %171 : vector<1x2048xi32>
    %173 = arith.andi %168, %172 : vector<1x2048xi1>
    %c-1_i32_60 = arith.constant -1 : i32
    %174 = vector.broadcast %c-1_i32_60 : i32 to vector<1x2048xi32>
    %175 = arith.addi %13, %174 : vector<1x2048xi32>
    %c0_i32_61 = arith.constant 0 : i32
    %176 = vector.broadcast %c0_i32_61 : i32 to vector<1x2048xi32>
    %177 = arith.cmpi sge, %175, %176 : vector<1x2048xi32>
    %178 = arith.andi %173, %177 : vector<1x2048xi1>
    %c-1_i32_62 = arith.constant -1 : i32
    %179 = vector.broadcast %c-1_i32_62 : i32 to vector<1x2048xi32>
    %180 = arith.addi %13, %179 : vector<1x2048xi32>
    %c64_i32_63 = arith.constant 64 : i32
    %181 = vector.broadcast %c64_i32_63 : i32 to vector<1x2048xi32>
    %182 = arith.cmpi slt, %180, %181 : vector<1x2048xi32>
    %183 = arith.andi %178, %182 : vector<1x2048xi1>
    %cst_64 = arith.constant 0.000000e+00 : f32
    %184 = vector.shape_cast %183 : vector<1x2048xi1> to vector<1x2048xi1>
    %185 = vector.broadcast %184 : vector<1x2048xi1> to vector<3x2048xi1>
    %186 = vector.broadcast %cst_64 : f32 to vector<3x2048xf32>
    %187 = arith.select %185, %164, %186 : vector<3x2048xi1>, vector<3x2048xf32>
    %c18 = arith.constant 18 : index
    %c0_65 = arith.constant 0 : index
    %188 = vector.load %arg4[%c18, %c0_65] : memref<80x2048xf32, #tpu.memory_space<vmem>>, vector<3x2048xf32>
    tpu.vector_store %arg4[%c18, %c0_65], %187 {strides = array<i32>} : memref<80x2048xf32, #tpu.memory_space<vmem>>, vector<3x2048xf32>,
    %189 = vector.extract_strided_slice %3 {offsets = [0, 192], sizes = [3, 2048], strides = [1, 1]} : vector<3x2560xf32> to vector<3x2048xf32>
    %c0_i32_66 = arith.constant 0 : i32
    %190 = vector.broadcast %c0_i32_66 : i32 to vector<1x2048xi32>
    %191 = arith.addi %9, %190 : vector<1x2048xi32>
    %c0_i32_67 = arith.constant 0 : i32
    %192 = vector.broadcast %c0_i32_67 : i32 to vector<1x2048xi32>
    %193 = arith.cmpi sge, %191, %192 : vector<1x2048xi32>
    %c0_i32_68 = arith.constant 0 : i32
    %194 = vector.broadcast %c0_i32_68 : i32 to vector<1x2048xi32>
    %195 = arith.addi %9, %194 : vector<1x2048xi32>
    %c64_i32_69 = arith.constant 64 : i32
    %196 = vector.broadcast %c64_i32_69 : i32 to vector<1x2048xi32>
    %197 = arith.cmpi slt, %195, %196 : vector<1x2048xi32>
    %198 = arith.andi %193, %197 : vector<1x2048xi1>
    %c-1_i32_70 = arith.constant -1 : i32
    %199 = vector.broadcast %c-1_i32_70 : i32 to vector<1x2048xi32>
    %200 = arith.addi %13, %199 : vector<1x2048xi32>
    %c0_i32_71 = arith.constant 0 : i32
    %201 = vector.broadcast %c0_i32_71 : i32 to vector<1x2048xi32>
    %202 = arith.cmpi sge, %200, %201 : vector<1x2048xi32>
    %203 = arith.andi %198, %202 : vector<1x2048xi1>
    %c-1_i32_72 = arith.constant -1 : i32
    %204 = vector.broadcast %c-1_i32_72 : i32 to vector<1x2048xi32>
    %205 = arith.addi %13, %204 : vector<1x2048xi32>
    %c64_i32_73 = arith.constant 64 : i32
    %206 = vector.broadcast %c64_i32_73 : i32 to vector<1x2048xi32>
    %207 = arith.cmpi slt, %205, %206 : vector<1x2048xi32>
    %208 = arith.andi %203, %207 : vector<1x2048xi1>
    %cst_74 = arith.constant 0.000000e+00 : f32
    %209 = vector.shape_cast %208 : vector<1x2048xi1> to vector<1x2048xi1>
    %210 = vector.broadcast %209 : vector<1x2048xi1> to vector<3x2048xi1>
    %211 = vector.broadcast %cst_74 : f32 to vector<3x2048xf32>
    %212 = arith.select %210, %189, %211 : vector<3x2048xi1>, vector<3x2048xf32>
    %c21 = arith.constant 21 : index
    %c0_75 = arith.constant 0 : index
    %213 = vector.load %arg4[%c21, %c0_75] : memref<80x2048xf32, #tpu.memory_space<vmem>>, vector<3x2048xf32>
    tpu.vector_store %arg4[%c21, %c0_75], %212 {strides = array<i32>} : memref<80x2048xf32, #tpu.memory_space<vmem>>, vector<3x2048xf32>,
    %214 = vector.extract_strided_slice %3 {offsets = [0, 193], sizes = [3, 2048], strides = [1, 1]} : vector<3x2560xf32> to vector<3x2048xf32>
    %c1_i32_76 = arith.constant 1 : i32
    %215 = vector.broadcast %c1_i32_76 : i32 to vector<1x2048xi32>
    %216 = arith.addi %9, %215 : vector<1x2048xi32>
    %c0_i32_77 = arith.constant 0 : i32
    %217 = vector.broadcast %c0_i32_77 : i32 to vector<1x2048xi32>
    %218 = arith.cmpi sge, %216, %217 : vector<1x2048xi32>
    %c1_i32_78 = arith.constant 1 : i32
    %219 = vector.broadcast %c1_i32_78 : i32 to vector<1x2048xi32>
    %220 = arith.addi %9, %219 : vector<1x2048xi32>
    %c64_i32_79 = arith.constant 64 : i32
    %221 = vector.broadcast %c64_i32_79 : i32 to vector<1x2048xi32>
    %222 = arith.cmpi slt, %220, %221 : vector<1x2048xi32>
    %223 = arith.andi %218, %222 : vector<1x2048xi1>
    %c-1_i32_80 = arith.constant -1 : i32
    %224 = vector.broadcast %c-1_i32_80 : i32 to vector<1x2048xi32>
    %225 = arith.addi %13, %224 : vector<1x2048xi32>
    %c0_i32_81 = arith.constant 0 : i32
    %226 = vector.broadcast %c0_i32_81 : i32 to vector<1x2048xi32>
    %227 = arith.cmpi sge, %225, %226 : vector<1x2048xi32>
    %228 = arith.andi %223, %227 : vector<1x2048xi1>
    %c-1_i32_82 = arith.constant -1 : i32
    %229 = vector.broadcast %c-1_i32_82 : i32 to vector<1x2048xi32>
    %230 = arith.addi %13, %229 : vector<1x2048xi32>
    %c64_i32_83 = arith.constant 64 : i32
    %231 = vector.broadcast %c64_i32_83 : i32 to vector<1x2048xi32>
    %232 = arith.cmpi slt, %230, %231 : vector<1x2048xi32>
    %233 = arith.andi %228, %232 : vector<1x2048xi1>
    %cst_84 = arith.constant 0.000000e+00 : f32
    %234 = vector.shape_cast %233 : vector<1x2048xi1> to vector<1x2048xi1>
    %235 = vector.broadcast %234 : vector<1x2048xi1> to vector<3x2048xi1>
    %236 = vector.broadcast %cst_84 : f32 to vector<3x2048xf32>
    %237 = arith.select %235, %214, %236 : vector<3x2048xi1>, vector<3x2048xf32>
    %c24 = arith.constant 24 : index
    %c0_85 = arith.constant 0 : index
    %238 = vector.load %arg4[%c24, %c0_85] : memref<80x2048xf32, #tpu.memory_space<vmem>>, vector<3x2048xf32>
    tpu.vector_store %arg4[%c24, %c0_85], %237 {strides = array<i32>} : memref<80x2048xf32, #tpu.memory_space<vmem>>, vector<3x2048xf32>,
    %239 = vector.extract_strided_slice %3 {offsets = [0, 194], sizes = [3, 2048], strides = [1, 1]} : vector<3x2560xf32> to vector<3x2048xf32>
    %c2_i32_86 = arith.constant 2 : i32
    %240 = vector.broadcast %c2_i32_86 : i32 to vector<1x2048xi32>
    %241 = arith.addi %9, %240 : vector<1x2048xi32>
    %c0_i32_87 = arith.constant 0 : i32
    %242 = vector.broadcast %c0_i32_87 : i32 to vector<1x2048xi32>
    %243 = arith.cmpi sge, %241, %242 : vector<1x2048xi32>
    %c2_i32_88 = arith.constant 2 : i32
    %244 = vector.broadcast %c2_i32_88 : i32 to vector<1x2048xi32>
    %245 = arith.addi %9, %244 : vector<1x2048xi32>
    %c64_i32_89 = arith.constant 64 : i32
    %246 = vector.broadcast %c64_i32_89 : i32 to vector<1x2048xi32>
    %247 = arith.cmpi slt, %245, %246 : vector<1x2048xi32>
    %248 = arith.andi %243, %247 : vector<1x2048xi1>
    %c-1_i32_90 = arith.constant -1 : i32
    %249 = vector.broadcast %c-1_i32_90 : i32 to vector<1x2048xi32>
    %250 = arith.addi %13, %249 : vector<1x2048xi32>
    %c0_i32_91 = arith.constant 0 : i32
    %251 = vector.broadcast %c0_i32_91 : i32 to vector<1x2048xi32>
    %252 = arith.cmpi sge, %250, %251 : vector<1x2048xi32>
    %253 = arith.andi %248, %252 : vector<1x2048xi1>
    %c-1_i32_92 = arith.constant -1 : i32
    %254 = vector.broadcast %c-1_i32_92 : i32 to vector<1x2048xi32>
    %255 = arith.addi %13, %254 : vector<1x2048xi32>
    %c64_i32_93 = arith.constant 64 : i32
    %256 = vector.broadcast %c64_i32_93 : i32 to vector<1x2048xi32>
    %257 = arith.cmpi slt, %255, %256 : vector<1x2048xi32>
    %258 = arith.andi %253, %257 : vector<1x2048xi1>
    %cst_94 = arith.constant 0.000000e+00 : f32
    %259 = vector.shape_cast %258 : vector<1x2048xi1> to vector<1x2048xi1>
    %260 = vector.broadcast %259 : vector<1x2048xi1> to vector<3x2048xi1>
    %261 = vector.broadcast %cst_94 : f32 to vector<3x2048xf32>
    %262 = arith.select %260, %239, %261 : vector<3x2048xi1>, vector<3x2048xf32>
    %c27 = arith.constant 27 : index
    %c0_95 = arith.constant 0 : index
    %263 = vector.load %arg4[%c27, %c0_95] : memref<80x2048xf32, #tpu.memory_space<vmem>>, vector<3x2048xf32>
    tpu.vector_store %arg4[%c27, %c0_95], %262 {strides = array<i32>} : memref<80x2048xf32, #tpu.memory_space<vmem>>, vector<3x2048xf32>,
    %264 = vector.extract_strided_slice %3 {offsets = [0, 254], sizes = [3, 2048], strides = [1, 1]} : vector<3x2560xf32> to vector<3x2048xf32>
    %c-2_i32_96 = arith.constant -2 : i32
    %265 = vector.broadcast %c-2_i32_96 : i32 to vector<1x2048xi32>
    %266 = arith.addi %9, %265 : vector<1x2048xi32>
    %c0_i32_97 = arith.constant 0 : i32
    %267 = vector.broadcast %c0_i32_97 : i32 to vector<1x2048xi32>
    %268 = arith.cmpi sge, %266, %267 : vector<1x2048xi32>
    %c-2_i32_98 = arith.constant -2 : i32
    %269 = vector.broadcast %c-2_i32_98 : i32 to vector<1x2048xi32>
    %270 = arith.addi %9, %269 : vector<1x2048xi32>
    %c64_i32_99 = arith.constant 64 : i32
    %271 = vector.broadcast %c64_i32_99 : i32 to vector<1x2048xi32>
    %272 = arith.cmpi slt, %270, %271 : vector<1x2048xi32>
    %273 = arith.andi %268, %272 : vector<1x2048xi1>
    %c0_i32_100 = arith.constant 0 : i32
    %274 = vector.broadcast %c0_i32_100 : i32 to vector<1x2048xi32>
    %275 = arith.addi %13, %274 : vector<1x2048xi32>
    %c0_i32_101 = arith.constant 0 : i32
    %276 = vector.broadcast %c0_i32_101 : i32 to vector<1x2048xi32>
    %277 = arith.cmpi sge, %275, %276 : vector<1x2048xi32>
    %278 = arith.andi %273, %277 : vector<1x2048xi1>
    %c0_i32_102 = arith.constant 0 : i32
    %279 = vector.broadcast %c0_i32_102 : i32 to vector<1x2048xi32>
    %280 = arith.addi %13, %279 : vector<1x2048xi32>
    %c64_i32_103 = arith.constant 64 : i32
    %281 = vector.broadcast %c64_i32_103 : i32 to vector<1x2048xi32>
    %282 = arith.cmpi slt, %280, %281 : vector<1x2048xi32>
    %283 = arith.andi %278, %282 : vector<1x2048xi1>
    %cst_104 = arith.constant 0.000000e+00 : f32
    %284 = vector.shape_cast %283 : vector<1x2048xi1> to vector<1x2048xi1>
    %285 = vector.broadcast %284 : vector<1x2048xi1> to vector<3x2048xi1>
    %286 = vector.broadcast %cst_104 : f32 to vector<3x2048xf32>
    %287 = arith.select %285, %264, %286 : vector<3x2048xi1>, vector<3x2048xf32>
    %c30 = arith.constant 30 : index
    %c0_105 = arith.constant 0 : index
    %288 = vector.load %arg4[%c30, %c0_105] : memref<80x2048xf32, #tpu.memory_space<vmem>>, vector<3x2048xf32>
    tpu.vector_store %arg4[%c30, %c0_105], %287 {strides = array<i32>} : memref<80x2048xf32, #tpu.memory_space<vmem>>, vector<3x2048xf32>,
    %289 = vector.extract_strided_slice %3 {offsets = [0, 255], sizes = [3, 2048], strides = [1, 1]} : vector<3x2560xf32> to vector<3x2048xf32>
    %c-1_i32_106 = arith.constant -1 : i32
    %290 = vector.broadcast %c-1_i32_106 : i32 to vector<1x2048xi32>
    %291 = arith.addi %9, %290 : vector<1x2048xi32>
    %c0_i32_107 = arith.constant 0 : i32
    %292 = vector.broadcast %c0_i32_107 : i32 to vector<1x2048xi32>
    %293 = arith.cmpi sge, %291, %292 : vector<1x2048xi32>
    %c-1_i32_108 = arith.constant -1 : i32
    %294 = vector.broadcast %c-1_i32_108 : i32 to vector<1x2048xi32>
    %295 = arith.addi %9, %294 : vector<1x2048xi32>
    %c64_i32_109 = arith.constant 64 : i32
    %296 = vector.broadcast %c64_i32_109 : i32 to vector<1x2048xi32>
    %297 = arith.cmpi slt, %295, %296 : vector<1x2048xi32>
    %298 = arith.andi %293, %297 : vector<1x2048xi1>
    %c0_i32_110 = arith.constant 0 : i32
    %299 = vector.broadcast %c0_i32_110 : i32 to vector<1x2048xi32>
    %300 = arith.addi %13, %299 : vector<1x2048xi32>
    %c0_i32_111 = arith.constant 0 : i32
    %301 = vector.broadcast %c0_i32_111 : i32 to vector<1x2048xi32>
    %302 = arith.cmpi sge, %300, %301 : vector<1x2048xi32>
    %303 = arith.andi %298, %302 : vector<1x2048xi1>
    %c0_i32_112 = arith.constant 0 : i32
    %304 = vector.broadcast %c0_i32_112 : i32 to vector<1x2048xi32>
    %305 = arith.addi %13, %304 : vector<1x2048xi32>
    %c64_i32_113 = arith.constant 64 : i32
    %306 = vector.broadcast %c64_i32_113 : i32 to vector<1x2048xi32>
    %307 = arith.cmpi slt, %305, %306 : vector<1x2048xi32>
    %308 = arith.andi %303, %307 : vector<1x2048xi1>
    %cst_114 = arith.constant 0.000000e+00 : f32
    %309 = vector.shape_cast %308 : vector<1x2048xi1> to vector<1x2048xi1>
    %310 = vector.broadcast %309 : vector<1x2048xi1> to vector<3x2048xi1>
    %311 = vector.broadcast %cst_114 : f32 to vector<3x2048xf32>
    %312 = arith.select %310, %289, %311 : vector<3x2048xi1>, vector<3x2048xf32>
    %c33 = arith.constant 33 : index
    %c0_115 = arith.constant 0 : index
    %313 = vector.load %arg4[%c33, %c0_115] : memref<80x2048xf32, #tpu.memory_space<vmem>>, vector<3x2048xf32>
    tpu.vector_store %arg4[%c33, %c0_115], %312 {strides = array<i32>} : memref<80x2048xf32, #tpu.memory_space<vmem>>, vector<3x2048xf32>,
    %314 = vector.extract_strided_slice %3 {offsets = [0, 256], sizes = [3, 2048], strides = [1, 1]} : vector<3x2560xf32> to vector<3x2048xf32>
    %c0_i32_116 = arith.constant 0 : i32
    %315 = vector.broadcast %c0_i32_116 : i32 to vector<1x2048xi32>
    %316 = arith.addi %9, %315 : vector<1x2048xi32>
    %c0_i32_117 = arith.constant 0 : i32
    %317 = vector.broadcast %c0_i32_117 : i32 to vector<1x2048xi32>
    %318 = arith.cmpi sge, %316, %317 : vector<1x2048xi32>
    %c0_i32_118 = arith.constant 0 : i32
    %319 = vector.broadcast %c0_i32_118 : i32 to vector<1x2048xi32>
    %320 = arith.addi %9, %319 : vector<1x2048xi32>
    %c64_i32_119 = arith.constant 64 : i32
    %321 = vector.broadcast %c64_i32_119 : i32 to vector<1x2048xi32>
    %322 = arith.cmpi slt, %320, %321 : vector<1x2048xi32>
    %323 = arith.andi %318, %322 : vector<1x2048xi1>
    %c0_i32_120 = arith.constant 0 : i32
    %324 = vector.broadcast %c0_i32_120 : i32 to vector<1x2048xi32>
    %325 = arith.addi %13, %324 : vector<1x2048xi32>
    %c0_i32_121 = arith.constant 0 : i32
    %326 = vector.broadcast %c0_i32_121 : i32 to vector<1x2048xi32>
    %327 = arith.cmpi sge, %325, %326 : vector<1x2048xi32>
    %328 = arith.andi %323, %327 : vector<1x2048xi1>
    %c0_i32_122 = arith.constant 0 : i32
    %329 = vector.broadcast %c0_i32_122 : i32 to vector<1x2048xi32>
    %330 = arith.addi %13, %329 : vector<1x2048xi32>
    %c64_i32_123 = arith.constant 64 : i32
    %331 = vector.broadcast %c64_i32_123 : i32 to vector<1x2048xi32>
    %332 = arith.cmpi slt, %330, %331 : vector<1x2048xi32>
    %333 = arith.andi %328, %332 : vector<1x2048xi1>
    %cst_124 = arith.constant 0.000000e+00 : f32
    %334 = vector.shape_cast %333 : vector<1x2048xi1> to vector<1x2048xi1>
    %335 = vector.broadcast %334 : vector<1x2048xi1> to vector<3x2048xi1>
    %336 = vector.broadcast %cst_124 : f32 to vector<3x2048xf32>
    %337 = arith.select %335, %314, %336 : vector<3x2048xi1>, vector<3x2048xf32>
    %c36 = arith.constant 36 : index
    %c0_125 = arith.constant 0 : index
    %338 = vector.load %arg4[%c36, %c0_125] : memref<80x2048xf32, #tpu.memory_space<vmem>>, vector<3x2048xf32>
    tpu.vector_store %arg4[%c36, %c0_125], %337 {strides = array<i32>} : memref<80x2048xf32, #tpu.memory_space<vmem>>, vector<3x2048xf32>,
    %339 = vector.extract_strided_slice %3 {offsets = [0, 257], sizes = [3, 2048], strides = [1, 1]} : vector<3x2560xf32> to vector<3x2048xf32>
    %c1_i32_126 = arith.constant 1 : i32
    %340 = vector.broadcast %c1_i32_126 : i32 to vector<1x2048xi32>
    %341 = arith.addi %9, %340 : vector<1x2048xi32>
    %c0_i32_127 = arith.constant 0 : i32
    %342 = vector.broadcast %c0_i32_127 : i32 to vector<1x2048xi32>
    %343 = arith.cmpi sge, %341, %342 : vector<1x2048xi32>
    %c1_i32_128 = arith.constant 1 : i32
    %344 = vector.broadcast %c1_i32_128 : i32 to vector<1x2048xi32>
    %345 = arith.addi %9, %344 : vector<1x2048xi32>
    %c64_i32_129 = arith.constant 64 : i32
    %346 = vector.broadcast %c64_i32_129 : i32 to vector<1x2048xi32>
    %347 = arith.cmpi slt, %345, %346 : vector<1x2048xi32>
    %348 = arith.andi %343, %347 : vector<1x2048xi1>
    %c0_i32_130 = arith.constant 0 : i32
    %349 = vector.broadcast %c0_i32_130 : i32 to vector<1x2048xi32>
    %350 = arith.addi %13, %349 : vector<1x2048xi32>
    %c0_i32_131 = arith.constant 0 : i32
    %351 = vector.broadcast %c0_i32_131 : i32 to vector<1x2048xi32>
    %352 = arith.cmpi sge, %350, %351 : vector<1x2048xi32>
    %353 = arith.andi %348, %352 : vector<1x2048xi1>
    %c0_i32_132 = arith.constant 0 : i32
    %354 = vector.broadcast %c0_i32_132 : i32 to vector<1x2048xi32>
    %355 = arith.addi %13, %354 : vector<1x2048xi32>
    %c64_i32_133 = arith.constant 64 : i32
    %356 = vector.broadcast %c64_i32_133 : i32 to vector<1x2048xi32>
    %357 = arith.cmpi slt, %355, %356 : vector<1x2048xi32>
    %358 = arith.andi %353, %357 : vector<1x2048xi1>
    %cst_134 = arith.constant 0.000000e+00 : f32
    %359 = vector.shape_cast %358 : vector<1x2048xi1> to vector<1x2048xi1>
    %360 = vector.broadcast %359 : vector<1x2048xi1> to vector<3x2048xi1>
    %361 = vector.broadcast %cst_134 : f32 to vector<3x2048xf32>
    %362 = arith.select %360, %339, %361 : vector<3x2048xi1>, vector<3x2048xf32>
    %c39 = arith.constant 39 : index
    %c0_135 = arith.constant 0 : index
    %363 = vector.load %arg4[%c39, %c0_135] : memref<80x2048xf32, #tpu.memory_space<vmem>>, vector<3x2048xf32>
    tpu.vector_store %arg4[%c39, %c0_135], %362 {strides = array<i32>} : memref<80x2048xf32, #tpu.memory_space<vmem>>, vector<3x2048xf32>,
    %364 = vector.extract_strided_slice %3 {offsets = [0, 258], sizes = [3, 2048], strides = [1, 1]} : vector<3x2560xf32> to vector<3x2048xf32>
    %c2_i32_136 = arith.constant 2 : i32
    %365 = vector.broadcast %c2_i32_136 : i32 to vector<1x2048xi32>
    %366 = arith.addi %9, %365 : vector<1x2048xi32>
    %c0_i32_137 = arith.constant 0 : i32
    %367 = vector.broadcast %c0_i32_137 : i32 to vector<1x2048xi32>
    %368 = arith.cmpi sge, %366, %367 : vector<1x2048xi32>
    %c2_i32_138 = arith.constant 2 : i32
    %369 = vector.broadcast %c2_i32_138 : i32 to vector<1x2048xi32>
    %370 = arith.addi %9, %369 : vector<1x2048xi32>
    %c64_i32_139 = arith.constant 64 : i32
    %371 = vector.broadcast %c64_i32_139 : i32 to vector<1x2048xi32>
    %372 = arith.cmpi slt, %370, %371 : vector<1x2048xi32>
    %373 = arith.andi %368, %372 : vector<1x2048xi1>
    %c0_i32_140 = arith.constant 0 : i32
    %374 = vector.broadcast %c0_i32_140 : i32 to vector<1x2048xi32>
    %375 = arith.addi %13, %374 : vector<1x2048xi32>
    %c0_i32_141 = arith.constant 0 : i32
    %376 = vector.broadcast %c0_i32_141 : i32 to vector<1x2048xi32>
    %377 = arith.cmpi sge, %375, %376 : vector<1x2048xi32>
    %378 = arith.andi %373, %377 : vector<1x2048xi1>
    %c0_i32_142 = arith.constant 0 : i32
    %379 = vector.broadcast %c0_i32_142 : i32 to vector<1x2048xi32>
    %380 = arith.addi %13, %379 : vector<1x2048xi32>
    %c64_i32_143 = arith.constant 64 : i32
    %381 = vector.broadcast %c64_i32_143 : i32 to vector<1x2048xi32>
    %382 = arith.cmpi slt, %380, %381 : vector<1x2048xi32>
    %383 = arith.andi %378, %382 : vector<1x2048xi1>
    %cst_144 = arith.constant 0.000000e+00 : f32
    %384 = vector.shape_cast %383 : vector<1x2048xi1> to vector<1x2048xi1>
    %385 = vector.broadcast %384 : vector<1x2048xi1> to vector<3x2048xi1>
    %386 = vector.broadcast %cst_144 : f32 to vector<3x2048xf32>
    %387 = arith.select %385, %364, %386 : vector<3x2048xi1>, vector<3x2048xf32>
    %c42 = arith.constant 42 : index
    %c0_145 = arith.constant 0 : index
    %388 = vector.load %arg4[%c42, %c0_145] : memref<80x2048xf32, #tpu.memory_space<vmem>>, vector<3x2048xf32>
    tpu.vector_store %arg4[%c42, %c0_145], %387 {strides = array<i32>} : memref<80x2048xf32, #tpu.memory_space<vmem>>, vector<3x2048xf32>,
    %389 = vector.extract_strided_slice %3 {offsets = [0, 318], sizes = [3, 2048], strides = [1, 1]} : vector<3x2560xf32> to vector<3x2048xf32>
    %c-2_i32_146 = arith.constant -2 : i32
    %390 = vector.broadcast %c-2_i32_146 : i32 to vector<1x2048xi32>
    %391 = arith.addi %9, %390 : vector<1x2048xi32>
    %c0_i32_147 = arith.constant 0 : i32
    %392 = vector.broadcast %c0_i32_147 : i32 to vector<1x2048xi32>
    %393 = arith.cmpi sge, %391, %392 : vector<1x2048xi32>
    %c-2_i32_148 = arith.constant -2 : i32
    %394 = vector.broadcast %c-2_i32_148 : i32 to vector<1x2048xi32>
    %395 = arith.addi %9, %394 : vector<1x2048xi32>
    %c64_i32_149 = arith.constant 64 : i32
    %396 = vector.broadcast %c64_i32_149 : i32 to vector<1x2048xi32>
    %397 = arith.cmpi slt, %395, %396 : vector<1x2048xi32>
    %398 = arith.andi %393, %397 : vector<1x2048xi1>
    %c1_i32_150 = arith.constant 1 : i32
    %399 = vector.broadcast %c1_i32_150 : i32 to vector<1x2048xi32>
    %400 = arith.addi %13, %399 : vector<1x2048xi32>
    %c0_i32_151 = arith.constant 0 : i32
    %401 = vector.broadcast %c0_i32_151 : i32 to vector<1x2048xi32>
    %402 = arith.cmpi sge, %400, %401 : vector<1x2048xi32>
    %403 = arith.andi %398, %402 : vector<1x2048xi1>
    %c1_i32_152 = arith.constant 1 : i32
    %404 = vector.broadcast %c1_i32_152 : i32 to vector<1x2048xi32>
    %405 = arith.addi %13, %404 : vector<1x2048xi32>
    %c64_i32_153 = arith.constant 64 : i32
    %406 = vector.broadcast %c64_i32_153 : i32 to vector<1x2048xi32>
    %407 = arith.cmpi slt, %405, %406 : vector<1x2048xi32>
    %408 = arith.andi %403, %407 : vector<1x2048xi1>
    %cst_154 = arith.constant 0.000000e+00 : f32
    %409 = vector.shape_cast %408 : vector<1x2048xi1> to vector<1x2048xi1>
    %410 = vector.broadcast %409 : vector<1x2048xi1> to vector<3x2048xi1>
    %411 = vector.broadcast %cst_154 : f32 to vector<3x2048xf32>
    %412 = arith.select %410, %389, %411 : vector<3x2048xi1>, vector<3x2048xf32>
    %c45 = arith.constant 45 : index
    %c0_155 = arith.constant 0 : index
    %413 = vector.load %arg4[%c45, %c0_155] : memref<80x2048xf32, #tpu.memory_space<vmem>>, vector<3x2048xf32>
    tpu.vector_store %arg4[%c45, %c0_155], %412 {strides = array<i32>} : memref<80x2048xf32, #tpu.memory_space<vmem>>, vector<3x2048xf32>,
    %414 = vector.extract_strided_slice %3 {offsets = [0, 319], sizes = [3, 2048], strides = [1, 1]} : vector<3x2560xf32> to vector<3x2048xf32>
    %c-1_i32_156 = arith.constant -1 : i32
    %415 = vector.broadcast %c-1_i32_156 : i32 to vector<1x2048xi32>
    %416 = arith.addi %9, %415 : vector<1x2048xi32>
    %c0_i32_157 = arith.constant 0 : i32
    %417 = vector.broadcast %c0_i32_157 : i32 to vector<1x2048xi32>
    %418 = arith.cmpi sge, %416, %417 : vector<1x2048xi32>
    %c-1_i32_158 = arith.constant -1 : i32
    %419 = vector.broadcast %c-1_i32_158 : i32 to vector<1x2048xi32>
    %420 = arith.addi %9, %419 : vector<1x2048xi32>
    %c64_i32_159 = arith.constant 64 : i32
    %421 = vector.broadcast %c64_i32_159 : i32 to vector<1x2048xi32>
    %422 = arith.cmpi slt, %420, %421 : vector<1x2048xi32>
    %423 = arith.andi %418, %422 : vector<1x2048xi1>
    %c1_i32_160 = arith.constant 1 : i32
    %424 = vector.broadcast %c1_i32_160 : i32 to vector<1x2048xi32>
    %425 = arith.addi %13, %424 : vector<1x2048xi32>
    %c0_i32_161 = arith.constant 0 : i32
    %426 = vector.broadcast %c0_i32_161 : i32 to vector<1x2048xi32>
    %427 = arith.cmpi sge, %425, %426 : vector<1x2048xi32>
    %428 = arith.andi %423, %427 : vector<1x2048xi1>
    %c1_i32_162 = arith.constant 1 : i32
    %429 = vector.broadcast %c1_i32_162 : i32 to vector<1x2048xi32>
    %430 = arith.addi %13, %429 : vector<1x2048xi32>
    %c64_i32_163 = arith.constant 64 : i32
    %431 = vector.broadcast %c64_i32_163 : i32 to vector<1x2048xi32>
    %432 = arith.cmpi slt, %430, %431 : vector<1x2048xi32>
    %433 = arith.andi %428, %432 : vector<1x2048xi1>
    %cst_164 = arith.constant 0.000000e+00 : f32
    %434 = vector.shape_cast %433 : vector<1x2048xi1> to vector<1x2048xi1>
    %435 = vector.broadcast %434 : vector<1x2048xi1> to vector<3x2048xi1>
    %436 = vector.broadcast %cst_164 : f32 to vector<3x2048xf32>
    %437 = arith.select %435, %414, %436 : vector<3x2048xi1>, vector<3x2048xf32>
    %c48 = arith.constant 48 : index
    %c0_165 = arith.constant 0 : index
    %438 = vector.load %arg4[%c48, %c0_165] : memref<80x2048xf32, #tpu.memory_space<vmem>>, vector<3x2048xf32>
    tpu.vector_store %arg4[%c48, %c0_165], %437 {strides = array<i32>} : memref<80x2048xf32, #tpu.memory_space<vmem>>, vector<3x2048xf32>,
    %439 = vector.extract_strided_slice %3 {offsets = [0, 320], sizes = [3, 2048], strides = [1, 1]} : vector<3x2560xf32> to vector<3x2048xf32>
    %c0_i32_166 = arith.constant 0 : i32
    %440 = vector.broadcast %c0_i32_166 : i32 to vector<1x2048xi32>
    %441 = arith.addi %9, %440 : vector<1x2048xi32>
    %c0_i32_167 = arith.constant 0 : i32
    %442 = vector.broadcast %c0_i32_167 : i32 to vector<1x2048xi32>
    %443 = arith.cmpi sge, %441, %442 : vector<1x2048xi32>
    %c0_i32_168 = arith.constant 0 : i32
    %444 = vector.broadcast %c0_i32_168 : i32 to vector<1x2048xi32>
    %445 = arith.addi %9, %444 : vector<1x2048xi32>
    %c64_i32_169 = arith.constant 64 : i32
    %446 = vector.broadcast %c64_i32_169 : i32 to vector<1x2048xi32>
    %447 = arith.cmpi slt, %445, %446 : vector<1x2048xi32>
    %448 = arith.andi %443, %447 : vector<1x2048xi1>
    %c1_i32_170 = arith.constant 1 : i32
    %449 = vector.broadcast %c1_i32_170 : i32 to vector<1x2048xi32>
    %450 = arith.addi %13, %449 : vector<1x2048xi32>
    %c0_i32_171 = arith.constant 0 : i32
    %451 = vector.broadcast %c0_i32_171 : i32 to vector<1x2048xi32>
    %452 = arith.cmpi sge, %450, %451 : vector<1x2048xi32>
    %453 = arith.andi %448, %452 : vector<1x2048xi1>
    %c1_i32_172 = arith.constant 1 : i32
    %454 = vector.broadcast %c1_i32_172 : i32 to vector<1x2048xi32>
    %455 = arith.addi %13, %454 : vector<1x2048xi32>
    %c64_i32_173 = arith.constant 64 : i32
    %456 = vector.broadcast %c64_i32_173 : i32 to vector<1x2048xi32>
    %457 = arith.cmpi slt, %455, %456 : vector<1x2048xi32>
    %458 = arith.andi %453, %457 : vector<1x2048xi1>
    %cst_174 = arith.constant 0.000000e+00 : f32
    %459 = vector.shape_cast %458 : vector<1x2048xi1> to vector<1x2048xi1>
    %460 = vector.broadcast %459 : vector<1x2048xi1> to vector<3x2048xi1>
    %461 = vector.broadcast %cst_174 : f32 to vector<3x2048xf32>
    %462 = arith.select %460, %439, %461 : vector<3x2048xi1>, vector<3x2048xf32>
    %c51 = arith.constant 51 : index
    %c0_175 = arith.constant 0 : index
    %463 = vector.load %arg4[%c51, %c0_175] : memref<80x2048xf32, #tpu.memory_space<vmem>>, vector<3x2048xf32>
    tpu.vector_store %arg4[%c51, %c0_175], %462 {strides = array<i32>} : memref<80x2048xf32, #tpu.memory_space<vmem>>, vector<3x2048xf32>,
    %464 = vector.extract_strided_slice %3 {offsets = [0, 321], sizes = [3, 2048], strides = [1, 1]} : vector<3x2560xf32> to vector<3x2048xf32>
    %c1_i32_176 = arith.constant 1 : i32
    %465 = vector.broadcast %c1_i32_176 : i32 to vector<1x2048xi32>
    %466 = arith.addi %9, %465 : vector<1x2048xi32>
    %c0_i32_177 = arith.constant 0 : i32
    %467 = vector.broadcast %c0_i32_177 : i32 to vector<1x2048xi32>
    %468 = arith.cmpi sge, %466, %467 : vector<1x2048xi32>
    %c1_i32_178 = arith.constant 1 : i32
    %469 = vector.broadcast %c1_i32_178 : i32 to vector<1x2048xi32>
    %470 = arith.addi %9, %469 : vector<1x2048xi32>
    %c64_i32_179 = arith.constant 64 : i32
    %471 = vector.broadcast %c64_i32_179 : i32 to vector<1x2048xi32>
    %472 = arith.cmpi slt, %470, %471 : vector<1x2048xi32>
    %473 = arith.andi %468, %472 : vector<1x2048xi1>
    %c1_i32_180 = arith.constant 1 : i32
    %474 = vector.broadcast %c1_i32_180 : i32 to vector<1x2048xi32>
    %475 = arith.addi %13, %474 : vector<1x2048xi32>
    %c0_i32_181 = arith.constant 0 : i32
    %476 = vector.broadcast %c0_i32_181 : i32 to vector<1x2048xi32>
    %477 = arith.cmpi sge, %475, %476 : vector<1x2048xi32>
    %478 = arith.andi %473, %477 : vector<1x2048xi1>
    %c1_i32_182 = arith.constant 1 : i32
    %479 = vector.broadcast %c1_i32_182 : i32 to vector<1x2048xi32>
    %480 = arith.addi %13, %479 : vector<1x2048xi32>
    %c64_i32_183 = arith.constant 64 : i32
    %481 = vector.broadcast %c64_i32_183 : i32 to vector<1x2048xi32>
    %482 = arith.cmpi slt, %480, %481 : vector<1x2048xi32>
    %483 = arith.andi %478, %482 : vector<1x2048xi1>
    %cst_184 = arith.constant 0.000000e+00 : f32
    %484 = vector.shape_cast %483 : vector<1x2048xi1> to vector<1x2048xi1>
    %485 = vector.broadcast %484 : vector<1x2048xi1> to vector<3x2048xi1>
    %486 = vector.broadcast %cst_184 : f32 to vector<3x2048xf32>
    %487 = arith.select %485, %464, %486 : vector<3x2048xi1>, vector<3x2048xf32>
    %c54 = arith.constant 54 : index
    %c0_185 = arith.constant 0 : index
    %488 = vector.load %arg4[%c54, %c0_185] : memref<80x2048xf32, #tpu.memory_space<vmem>>, vector<3x2048xf32>
    tpu.vector_store %arg4[%c54, %c0_185], %487 {strides = array<i32>} : memref<80x2048xf32, #tpu.memory_space<vmem>>, vector<3x2048xf32>,
    %489 = vector.extract_strided_slice %3 {offsets = [0, 322], sizes = [3, 2048], strides = [1, 1]} : vector<3x2560xf32> to vector<3x2048xf32>
    %c2_i32_186 = arith.constant 2 : i32
    %490 = vector.broadcast %c2_i32_186 : i32 to vector<1x2048xi32>
    %491 = arith.addi %9, %490 : vector<1x2048xi32>
    %c0_i32_187 = arith.constant 0 : i32
    %492 = vector.broadcast %c0_i32_187 : i32 to vector<1x2048xi32>
    %493 = arith.cmpi sge, %491, %492 : vector<1x2048xi32>
    %c2_i32_188 = arith.constant 2 : i32
    %494 = vector.broadcast %c2_i32_188 : i32 to vector<1x2048xi32>
    %495 = arith.addi %9, %494 : vector<1x2048xi32>
    %c64_i32_189 = arith.constant 64 : i32
    %496 = vector.broadcast %c64_i32_189 : i32 to vector<1x2048xi32>
    %497 = arith.cmpi slt, %495, %496 : vector<1x2048xi32>
    %498 = arith.andi %493, %497 : vector<1x2048xi1>
    %c1_i32_190 = arith.constant 1 : i32
    %499 = vector.broadcast %c1_i32_190 : i32 to vector<1x2048xi32>
    %500 = arith.addi %13, %499 : vector<1x2048xi32>
    %c0_i32_191 = arith.constant 0 : i32
    %501 = vector.broadcast %c0_i32_191 : i32 to vector<1x2048xi32>
    %502 = arith.cmpi sge, %500, %501 : vector<1x2048xi32>
    %503 = arith.andi %498, %502 : vector<1x2048xi1>
    %c1_i32_192 = arith.constant 1 : i32
    %504 = vector.broadcast %c1_i32_192 : i32 to vector<1x2048xi32>
    %505 = arith.addi %13, %504 : vector<1x2048xi32>
    %c64_i32_193 = arith.constant 64 : i32
    %506 = vector.broadcast %c64_i32_193 : i32 to vector<1x2048xi32>
    %507 = arith.cmpi slt, %505, %506 : vector<1x2048xi32>
    %508 = arith.andi %503, %507 : vector<1x2048xi1>
    %cst_194 = arith.constant 0.000000e+00 : f32
    %509 = vector.shape_cast %508 : vector<1x2048xi1> to vector<1x2048xi1>
    %510 = vector.broadcast %509 : vector<1x2048xi1> to vector<3x2048xi1>
    %511 = vector.broadcast %cst_194 : f32 to vector<3x2048xf32>
    %512 = arith.select %510, %489, %511 : vector<3x2048xi1>, vector<3x2048xf32>
    %c57 = arith.constant 57 : index
    %c0_195 = arith.constant 0 : index
    %513 = vector.load %arg4[%c57, %c0_195] : memref<80x2048xf32, #tpu.memory_space<vmem>>, vector<3x2048xf32>
    tpu.vector_store %arg4[%c57, %c0_195], %512 {strides = array<i32>} : memref<80x2048xf32, #tpu.memory_space<vmem>>, vector<3x2048xf32>,
    %514 = vector.extract_strided_slice %3 {offsets = [0, 382], sizes = [3, 2048], strides = [1, 1]} : vector<3x2560xf32> to vector<3x2048xf32>
    %c-2_i32_196 = arith.constant -2 : i32
    %515 = vector.broadcast %c-2_i32_196 : i32 to vector<1x2048xi32>
    %516 = arith.addi %9, %515 : vector<1x2048xi32>
    %c0_i32_197 = arith.constant 0 : i32
    %517 = vector.broadcast %c0_i32_197 : i32 to vector<1x2048xi32>
    %518 = arith.cmpi sge, %516, %517 : vector<1x2048xi32>
    %c-2_i32_198 = arith.constant -2 : i32
    %519 = vector.broadcast %c-2_i32_198 : i32 to vector<1x2048xi32>
    %520 = arith.addi %9, %519 : vector<1x2048xi32>
    %c64_i32_199 = arith.constant 64 : i32
    %521 = vector.broadcast %c64_i32_199 : i32 to vector<1x2048xi32>
    %522 = arith.cmpi slt, %520, %521 : vector<1x2048xi32>
    %523 = arith.andi %518, %522 : vector<1x2048xi1>
    %c2_i32_200 = arith.constant 2 : i32
    %524 = vector.broadcast %c2_i32_200 : i32 to vector<1x2048xi32>
    %525 = arith.addi %13, %524 : vector<1x2048xi32>
    %c0_i32_201 = arith.constant 0 : i32
    %526 = vector.broadcast %c0_i32_201 : i32 to vector<1x2048xi32>
    %527 = arith.cmpi sge, %525, %526 : vector<1x2048xi32>
    %528 = arith.andi %523, %527 : vector<1x2048xi1>
    %c2_i32_202 = arith.constant 2 : i32
    %529 = vector.broadcast %c2_i32_202 : i32 to vector<1x2048xi32>
    %530 = arith.addi %13, %529 : vector<1x2048xi32>
    %c64_i32_203 = arith.constant 64 : i32
    %531 = vector.broadcast %c64_i32_203 : i32 to vector<1x2048xi32>
    %532 = arith.cmpi slt, %530, %531 : vector<1x2048xi32>
    %533 = arith.andi %528, %532 : vector<1x2048xi1>
    %cst_204 = arith.constant 0.000000e+00 : f32
    %534 = vector.shape_cast %533 : vector<1x2048xi1> to vector<1x2048xi1>
    %535 = vector.broadcast %534 : vector<1x2048xi1> to vector<3x2048xi1>
    %536 = vector.broadcast %cst_204 : f32 to vector<3x2048xf32>
    %537 = arith.select %535, %514, %536 : vector<3x2048xi1>, vector<3x2048xf32>
    %c60 = arith.constant 60 : index
    %c0_205 = arith.constant 0 : index
    %538 = vector.load %arg4[%c60, %c0_205] : memref<80x2048xf32, #tpu.memory_space<vmem>>, vector<3x2048xf32>
    tpu.vector_store %arg4[%c60, %c0_205], %537 {strides = array<i32>} : memref<80x2048xf32, #tpu.memory_space<vmem>>, vector<3x2048xf32>,
    %539 = vector.extract_strided_slice %3 {offsets = [0, 383], sizes = [3, 2048], strides = [1, 1]} : vector<3x2560xf32> to vector<3x2048xf32>
    %c-1_i32_206 = arith.constant -1 : i32
    %540 = vector.broadcast %c-1_i32_206 : i32 to vector<1x2048xi32>
    %541 = arith.addi %9, %540 : vector<1x2048xi32>
    %c0_i32_207 = arith.constant 0 : i32
    %542 = vector.broadcast %c0_i32_207 : i32 to vector<1x2048xi32>
    %543 = arith.cmpi sge, %541, %542 : vector<1x2048xi32>
    %c-1_i32_208 = arith.constant -1 : i32
    %544 = vector.broadcast %c-1_i32_208 : i32 to vector<1x2048xi32>
    %545 = arith.addi %9, %544 : vector<1x2048xi32>
    %c64_i32_209 = arith.constant 64 : i32
    %546 = vector.broadcast %c64_i32_209 : i32 to vector<1x2048xi32>
    %547 = arith.cmpi slt, %545, %546 : vector<1x2048xi32>
    %548 = arith.andi %543, %547 : vector<1x2048xi1>
    %c2_i32_210 = arith.constant 2 : i32
    %549 = vector.broadcast %c2_i32_210 : i32 to vector<1x2048xi32>
    %550 = arith.addi %13, %549 : vector<1x2048xi32>
    %c0_i32_211 = arith.constant 0 : i32
    %551 = vector.broadcast %c0_i32_211 : i32 to vector<1x2048xi32>
    %552 = arith.cmpi sge, %550, %551 : vector<1x2048xi32>
    %553 = arith.andi %548, %552 : vector<1x2048xi1>
    %c2_i32_212 = arith.constant 2 : i32
    %554 = vector.broadcast %c2_i32_212 : i32 to vector<1x2048xi32>
    %555 = arith.addi %13, %554 : vector<1x2048xi32>
    %c64_i32_213 = arith.constant 64 : i32
    %556 = vector.broadcast %c64_i32_213 : i32 to vector<1x2048xi32>
    %557 = arith.cmpi slt, %555, %556 : vector<1x2048xi32>
    %558 = arith.andi %553, %557 : vector<1x2048xi1>
    %cst_214 = arith.constant 0.000000e+00 : f32
    %559 = vector.shape_cast %558 : vector<1x2048xi1> to vector<1x2048xi1>
    %560 = vector.broadcast %559 : vector<1x2048xi1> to vector<3x2048xi1>
    %561 = vector.broadcast %cst_214 : f32 to vector<3x2048xf32>
    %562 = arith.select %560, %539, %561 : vector<3x2048xi1>, vector<3x2048xf32>
    %c63 = arith.constant 63 : index
    %c0_215 = arith.constant 0 : index
    %563 = vector.load %arg4[%c63, %c0_215] : memref<80x2048xf32, #tpu.memory_space<vmem>>, vector<3x2048xf32>
    tpu.vector_store %arg4[%c63, %c0_215], %562 {strides = array<i32>} : memref<80x2048xf32, #tpu.memory_space<vmem>>, vector<3x2048xf32>,
    %564 = vector.extract_strided_slice %3 {offsets = [0, 384], sizes = [3, 2048], strides = [1, 1]} : vector<3x2560xf32> to vector<3x2048xf32>
    %c0_i32_216 = arith.constant 0 : i32
    %565 = vector.broadcast %c0_i32_216 : i32 to vector<1x2048xi32>
    %566 = arith.addi %9, %565 : vector<1x2048xi32>
    %c0_i32_217 = arith.constant 0 : i32
    %567 = vector.broadcast %c0_i32_217 : i32 to vector<1x2048xi32>
    %568 = arith.cmpi sge, %566, %567 : vector<1x2048xi32>
    %c0_i32_218 = arith.constant 0 : i32
    %569 = vector.broadcast %c0_i32_218 : i32 to vector<1x2048xi32>
    %570 = arith.addi %9, %569 : vector<1x2048xi32>
    %c64_i32_219 = arith.constant 64 : i32
    %571 = vector.broadcast %c64_i32_219 : i32 to vector<1x2048xi32>
    %572 = arith.cmpi slt, %570, %571 : vector<1x2048xi32>
    %573 = arith.andi %568, %572 : vector<1x2048xi1>
    %c2_i32_220 = arith.constant 2 : i32
    %574 = vector.broadcast %c2_i32_220 : i32 to vector<1x2048xi32>
    %575 = arith.addi %13, %574 : vector<1x2048xi32>
    %c0_i32_221 = arith.constant 0 : i32
    %576 = vector.broadcast %c0_i32_221 : i32 to vector<1x2048xi32>
    %577 = arith.cmpi sge, %575, %576 : vector<1x2048xi32>
    %578 = arith.andi %573, %577 : vector<1x2048xi1>
    %c2_i32_222 = arith.constant 2 : i32
    %579 = vector.broadcast %c2_i32_222 : i32 to vector<1x2048xi32>
    %580 = arith.addi %13, %579 : vector<1x2048xi32>
    %c64_i32_223 = arith.constant 64 : i32
    %581 = vector.broadcast %c64_i32_223 : i32 to vector<1x2048xi32>
    %582 = arith.cmpi slt, %580, %581 : vector<1x2048xi32>
    %583 = arith.andi %578, %582 : vector<1x2048xi1>
    %cst_224 = arith.constant 0.000000e+00 : f32
    %584 = vector.shape_cast %583 : vector<1x2048xi1> to vector<1x2048xi1>
    %585 = vector.broadcast %584 : vector<1x2048xi1> to vector<3x2048xi1>
    %586 = vector.broadcast %cst_224 : f32 to vector<3x2048xf32>
    %587 = arith.select %585, %564, %586 : vector<3x2048xi1>, vector<3x2048xf32>
    %c66 = arith.constant 66 : index
    %c0_225 = arith.constant 0 : index
    %588 = vector.load %arg4[%c66, %c0_225] : memref<80x2048xf32, #tpu.memory_space<vmem>>, vector<3x2048xf32>
    tpu.vector_store %arg4[%c66, %c0_225], %587 {strides = array<i32>} : memref<80x2048xf32, #tpu.memory_space<vmem>>, vector<3x2048xf32>,
    %589 = vector.extract_strided_slice %3 {offsets = [0, 385], sizes = [3, 2048], strides = [1, 1]} : vector<3x2560xf32> to vector<3x2048xf32>
    %c1_i32_226 = arith.constant 1 : i32
    %590 = vector.broadcast %c1_i32_226 : i32 to vector<1x2048xi32>
    %591 = arith.addi %9, %590 : vector<1x2048xi32>
    %c0_i32_227 = arith.constant 0 : i32
    %592 = vector.broadcast %c0_i32_227 : i32 to vector<1x2048xi32>
    %593 = arith.cmpi sge, %591, %592 : vector<1x2048xi32>
    %c1_i32_228 = arith.constant 1 : i32
    %594 = vector.broadcast %c1_i32_228 : i32 to vector<1x2048xi32>
    %595 = arith.addi %9, %594 : vector<1x2048xi32>
    %c64_i32_229 = arith.constant 64 : i32
    %596 = vector.broadcast %c64_i32_229 : i32 to vector<1x2048xi32>
    %597 = arith.cmpi slt, %595, %596 : vector<1x2048xi32>
    %598 = arith.andi %593, %597 : vector<1x2048xi1>
    %c2_i32_230 = arith.constant 2 : i32
    %599 = vector.broadcast %c2_i32_230 : i32 to vector<1x2048xi32>
    %600 = arith.addi %13, %599 : vector<1x2048xi32>
    %c0_i32_231 = arith.constant 0 : i32
    %601 = vector.broadcast %c0_i32_231 : i32 to vector<1x2048xi32>
    %602 = arith.cmpi sge, %600, %601 : vector<1x2048xi32>
    %603 = arith.andi %598, %602 : vector<1x2048xi1>
    %c2_i32_232 = arith.constant 2 : i32
    %604 = vector.broadcast %c2_i32_232 : i32 to vector<1x2048xi32>
    %605 = arith.addi %13, %604 : vector<1x2048xi32>
    %c64_i32_233 = arith.constant 64 : i32
    %606 = vector.broadcast %c64_i32_233 : i32 to vector<1x2048xi32>
    %607 = arith.cmpi slt, %605, %606 : vector<1x2048xi32>
    %608 = arith.andi %603, %607 : vector<1x2048xi1>
    %cst_234 = arith.constant 0.000000e+00 : f32
    %609 = vector.shape_cast %608 : vector<1x2048xi1> to vector<1x2048xi1>
    %610 = vector.broadcast %609 : vector<1x2048xi1> to vector<3x2048xi1>
    %611 = vector.broadcast %cst_234 : f32 to vector<3x2048xf32>
    %612 = arith.select %610, %589, %611 : vector<3x2048xi1>, vector<3x2048xf32>
    %c69 = arith.constant 69 : index
    %c0_235 = arith.constant 0 : index
    %613 = vector.load %arg4[%c69, %c0_235] : memref<80x2048xf32, #tpu.memory_space<vmem>>, vector<3x2048xf32>
    tpu.vector_store %arg4[%c69, %c0_235], %612 {strides = array<i32>} : memref<80x2048xf32, #tpu.memory_space<vmem>>, vector<3x2048xf32>,
    %614 = vector.extract_strided_slice %3 {offsets = [0, 386], sizes = [3, 2048], strides = [1, 1]} : vector<3x2560xf32> to vector<3x2048xf32>
    %c2_i32_236 = arith.constant 2 : i32
    %615 = vector.broadcast %c2_i32_236 : i32 to vector<1x2048xi32>
    %616 = arith.addi %9, %615 : vector<1x2048xi32>
    %c0_i32_237 = arith.constant 0 : i32
    %617 = vector.broadcast %c0_i32_237 : i32 to vector<1x2048xi32>
    %618 = arith.cmpi sge, %616, %617 : vector<1x2048xi32>
    %c2_i32_238 = arith.constant 2 : i32
    %619 = vector.broadcast %c2_i32_238 : i32 to vector<1x2048xi32>
    %620 = arith.addi %9, %619 : vector<1x2048xi32>
    %c64_i32_239 = arith.constant 64 : i32
    %621 = vector.broadcast %c64_i32_239 : i32 to vector<1x2048xi32>
    %622 = arith.cmpi slt, %620, %621 : vector<1x2048xi32>
    %623 = arith.andi %618, %622 : vector<1x2048xi1>
    %c2_i32_240 = arith.constant 2 : i32
    %624 = vector.broadcast %c2_i32_240 : i32 to vector<1x2048xi32>
    %625 = arith.addi %13, %624 : vector<1x2048xi32>
    %c0_i32_241 = arith.constant 0 : i32
    %626 = vector.broadcast %c0_i32_241 : i32 to vector<1x2048xi32>
    %627 = arith.cmpi sge, %625, %626 : vector<1x2048xi32>
    %628 = arith.andi %623, %627 : vector<1x2048xi1>
    %c2_i32_242 = arith.constant 2 : i32
    %629 = vector.broadcast %c2_i32_242 : i32 to vector<1x2048xi32>
    %630 = arith.addi %13, %629 : vector<1x2048xi32>
    %c64_i32_243 = arith.constant 64 : i32
    %631 = vector.broadcast %c64_i32_243 : i32 to vector<1x2048xi32>
    %632 = arith.cmpi slt, %630, %631 : vector<1x2048xi32>
    %633 = arith.andi %628, %632 : vector<1x2048xi1>
    %cst_244 = arith.constant 0.000000e+00 : f32
    %634 = vector.shape_cast %633 : vector<1x2048xi1> to vector<1x2048xi1>
    %635 = vector.broadcast %634 : vector<1x2048xi1> to vector<3x2048xi1>
    %636 = vector.broadcast %cst_244 : f32 to vector<3x2048xf32>
    %637 = arith.select %635, %614, %636 : vector<3x2048xi1>, vector<3x2048xf32>
    %c72 = arith.constant 72 : index
    %c0_245 = arith.constant 0 : index
    %638 = vector.load %arg4[%c72, %c0_245] : memref<80x2048xf32, #tpu.memory_space<vmem>>, vector<3x2048xf32>
    tpu.vector_store %arg4[%c72, %c0_245], %637 {strides = array<i32>} : memref<80x2048xf32, #tpu.memory_space<vmem>>, vector<3x2048xf32>,
    %cst_246 = arith.constant 1.000000e+00 : f32
    %639 = vector.broadcast %cst_246 : f32 to vector<1x2048xf32>
    %c75 = arith.constant 75 : index
    %c0_247 = arith.constant 0 : index
    %640 = vector.load %arg4[%c75, %c0_247] : memref<80x2048xf32, #tpu.memory_space<vmem>>, vector<1x2048xf32>
    tpu.vector_store %arg4[%c75, %c0_247], %639 {strides = array<i32>} : memref<80x2048xf32, #tpu.memory_space<vmem>>, vector<1x2048xf32>,
    %cst_248 = arith.constant 0.000000e+00 : f32
    %641 = vector.broadcast %cst_248 : f32 to vector<4x2048xf32>
    %c76 = arith.constant 76 : index
    %c0_249 = arith.constant 0 : index
    %642 = vector.load %arg4[%c76, %c0_249] : memref<80x2048xf32, #tpu.memory_space<vmem>>, vector<4x2048xf32>
    tpu.vector_store %arg4[%c76, %c0_249], %641 {strides = array<i32>} : memref<80x2048xf32, #tpu.memory_space<vmem>>, vector<4x2048xf32>,
    %c0_250 = arith.constant 0 : index
    %c0_251 = arith.constant 0 : index
    %643 = vector.load %arg2[%c0_250, %c0_251] : memref<48x80xf32, #tpu.memory_space<vmem>>, vector<48x80xf32>
    %c0_252 = arith.constant 0 : index
    %c0_253 = arith.constant 0 : index
    %644 = vector.load %arg4[%c0_252, %c0_253] : memref<80x2048xf32, #tpu.memory_space<vmem>>, vector<80x2048xf32>
    %cst_254 = arith.constant dense<0.000000e+00> : vector<48x2048xf32>
    %645 = tpu.matmul %643, %644, %cst_254 {dimension_numbers = #tpu.dot_dimension_numbers<[1], [0], [0], [1], [0, 0, 1, 1], [], []>} : vector<48x80xf32>, vector<80x2048xf32>, vector<48x2048xf32> -> vector<48x2048xf32>
    %646 = vector.extract_strided_slice %645 {offsets = [0, 0], sizes = [24, 2048], strides = [1, 1]} : vector<48x2048xf32> to vector<24x2048xf32>
    %647 = vector.extract_strided_slice %645 {offsets = [24, 0], sizes = [24, 2048], strides = [1, 1]} : vector<48x2048xf32> to vector<24x2048xf32>
    %cst_255 = arith.constant 0.000000e+00 : f32
    %648 = vector.broadcast %cst_255 : f32 to vector<24x2048xf32>
    %649 = arith.maximumf %647, %648 : vector<24x2048xf32>
    %650 = arith.addf %646, %649 : vector<24x2048xf32>
    %cst_256 = arith.constant 0.000000e+00 : f32
    %651 = vector.broadcast %cst_256 : f32 to vector<24x2048xf32>
    %652 = arith.maximumf %650, %651 : vector<24x2048xf32>
    %c0_257 = arith.constant 0 : index
    %c0_258 = arith.constant 0 : index
    %653 = vector.load %arg3[%c0_257, %c0_258] : memref<24x2048xf32, #tpu.memory_space<vmem>>, vector<24x2048xf32>
    tpu.vector_store %arg3[%c0_257, %c0_258], %652 {strides = array<i32>} : memref<24x2048xf32, #tpu.memory_space<vmem>>, vector<24x2048xf32>,
    return
  }
  func.func @transform_0(%arg0: i32) -> (i32, i32) {
    %c0_i32 = arith.constant 0 : i32
    %c0_i32_0 = arith.constant 0 : i32
    %c0_i32_1 = arith.constant 0 : i32
    return %c0_i32, %c0_i32_0 : i32, i32
  }
  func.func @transform_1(%arg0: i32) -> (i32, i32) {
    %c0_i32 = arith.constant 0 : i32
    %c0_i32_0 = arith.constant 0 : i32
    %c0_i32_1 = arith.constant 0 : i32
    return %c0_i32, %c0_i32_0 : i32, i32
  }
  func.func @transform_2(%arg0: i32) -> (i32, i32) {
    %c0_i32 = arith.constant 0 : i32
    %c0_i32_0 = arith.constant 0 : i32
    return %c0_i32, %arg0 : i32, i32
  }
}

</mosaic_0001>

<bundles_post_ra>
// kernel: fused_model.1
= control target key start
LH: loop header
LB: loop body
LE: loop exit
PB: predicated region body
PF: predicated region fallthrough
CT: control target
= control target key end

     0   :  { %s6636_s9 = smov 0   ;;  %s6638_s10 = smov 0   ;;  %s12401_s0 = inlined_call_operand.vmem [shape: f32[3,4608], index: 0, kind: input, shape index: {}]   ;;  %s12402_s1 = inlined_call_operand.vmem [shape: f32[48,80], index: 1, kind: input, shape index: {}]   ;;  %s12403_s2 = inlined_call_operand.vmem [shape: f32[24,4096], index: 2, kind: output, shape index: {}]  }
   0x1   :  { %s6640_s11 = smov 0  }
   0x2 LB: > { %s6649_s12 = sadd.s32 4294967295, %s6608_s11   ;;  %s6651_s13 = sadd.s32 1, %s6608_s11   ;;  %s6608_s11 = sphi %s6640_s11, %s14248_s11   ;;  %s6604_s10 = sphi %s6638_s10, %s14247_s10   ;;  %s6600_s9 = sphi %s6636_s9, %s14246_s9  }
   0x3   : > { %s58_s14 = ssub.s32 %s6608_s11, %s6651_s13  ;;  %s61_s15 = sadd.s32 1, %s6604_s10 }
   0x4   : > { %p59_p0 = scmp.eq.s32.totalorder %s58_s14, 0  ;;  %p71_p1 = scmp.ne.s32.totalorder %s6604_s10, %s6600_s9 }
   0x5   : > { %p72_p2 = scmp.eq.s32.totalorder %s6649_s12, 1  ;;  %p6303_p3 = scmp.ge.s32.totalorder %s6608_s11, 1 }
   0x6   : > { %s6659_s16 = scalar_select %p59_p0, %s6604_s10, %s61_s15  }
   0x7   : > { %p6661_p4 = por %p72_p2, %p71_p1  ;;  %p102_p5 = scmp.lt.s32.totalorder %s6608_s11, 3 }
   0x9   : > { %p103_p6 = pnand %p6303_p3, %p102_p5 }
   0xb   : > { %106 = sbr.rel (%p103_p6) target bundleno = 1301 (0x515), region = 28 }
  0x12   : > { %s6304_s18 = sshll.u32 %s6649_s12, 11  ;;  %v134_v0 = vlaneseq  ;;  %s6610_s24 = smov 1   ;;  %v12744_v23 = vmov 0  ;;  %v12746_v24 = vmov 0  ;;  %v12748_v32 = vmov 0 }
  0x13   : > { %s120_s19 = sshra.s32 %s6304_s18, 7  ;;  %v6682_v5 = vstv %s6304_s18  ;;  %s6611_s25 = smov 127   ;;  %v6616_v43 = vmov 1.0   ;;  %v12445_v44 = vmov 0.0   ;;  %v12752_v53 = vmov 0 }
  0x14   : > { %s6305_s20 = sshll.u32 %s120_s19, 2  ;;  %v6666_v1 = vand.u32 127, %v134_v0  ;;  %12740 = vst [vmem:[#allocation5_spill] sm:$0xff] %v6682_v5  ;;  %s6612_s26 = smov 126   ;;  %4939 = vst [vmem:[#allocation2 + $0x488] sm:$0xf0] %v12445_v44  ;;  %5203 = vmatprep.mubr.f32.mxu0 %v12445_v44  ;;  %5304 = vmatprep.mubr.f32.mxu1 %v12445_v44 }
  0x15   : > { %s6671_s23 = scalar_lea.vmem %s12401_s0, %s6305_s20  ;;  %s6613_s27 = smov 66   ;;  %4933 = vst [vmem:[#allocation2 + $0x483] ss:$8 sm:$0xf] %v6616_v43  ;;  %4938 = vst [vmem:[#allocation2 + $0x480] sm:$0xf0] %v12445_v44 }
  0x16   : > { %12739 = vst [vmem:[#allocation4_spill] sm:$0xff] %v6666_v1  ;;  %v6674_v2 = vld [vmem:[%s6671_s23 + $0x10] sm:$0x77]  ;;  %v6677_v3 = vld [vmem:[%s6671_s23 + $0x8] sm:$0x77]  ;;  %v137_v8 = vadd.s32 256, %v6666_v1  ;;  %v152_v45 = vadd.s32 %v6682_v5, %v6666_v1 }
  0x17   : > { %v6680_v4 = vld [vmem:[%s6671_s23] sm:$0x77]  ;;  %644 = vrot.lane.b32.xlu1 %v6674_v2, %s6610_s24  ;;  %640 = vrot.lane.b32.xlu0 %v6677_v3, %s6610_s24  ;;  %v6690_v6 = vcombine.high %v6677_v3, %v6677_v3  ;;  %v138_v9 = vadd.s32 384, %v6666_v1  ;;  %v6710_v13 = vcombine.high %v6674_v2, %v6674_v2  ;;  %v136_v17 = vadd.s32 128, %v6666_v1  ;;  %s6614_s28 = smov 2   ;;  %s6615_s29 = smov 65  }
  0x18   : > { %v6694_v7 = vcombine.high %v6680_v4, %v6680_v4  ;;  %v154_v10 = vadd.s32 %v6682_v5, %v137_v8  ;;  %4934 = vst [vmem:[#allocation2 + $0x483] ss:$8 sm:$0xf0] %v6616_v43  ;;  %4936 = vst [vmem:[#allocation2 + $0x4c3] ss:$8 sm:$0xf] %v6616_v43 }
  0x19   : > { %12741 = vst [vmem:[#allocation6_spill] sm:$0xff] %v6690_v6  ;;  %v155_v11 = vadd.s32 %v6682_v5, %v138_v9  ;;  %12743 = vst [vmem:[#allocation8_spill] sm:$0xff] %v6710_v13  ;;  %v153_v22 = vadd.s32 %v6682_v5, %v136_v17  ;;  %s6618_s30 = smov 64   ;;  %s6619_s3 = smov 62   ;;  %v6898_v46 = vand.u32 63, %v152_v45  ;;  %v184_v52 = vshra.s32 %v152_v45, 6 }
  0x1a   : > { %12742 = vst [vmem:[#allocation7_spill] sm:$0xff] %v6694_v7  ;;  %v186_v12 = vshra.s32 %v154_v10, 6  ;;  %v6721_v18 = vand.u32 63, %v154_v10  ;;  %4937 = vst [vmem:[#allocation2 + $0x4c3] ss:$8 sm:$0xf0] %v6616_v43 }
  0x1b   : > { %642 = vrot.lane.b32.xlu1 %v6690_v6, %s6610_s24  ;;  %638 = vrot.lane.b32.xlu0 %v6694_v7, %s6610_s24  ;;  %v187_v14 = vshra.s32 %v155_v11, 6  ;;  %v6723_v19 = vand.u32 63, %v155_v11  ;;  %v185_v25 = vshra.s32 %v153_v22, 6  ;;  %v6763_v26 = vand.u32 63, %v153_v22  ;;  %4940 = vst [vmem:[#allocation2 + $0x490] sm:$0xf0] %v12445_v44 }
  0x1c   : > { %v6712_v15 = vand.u32 63, %v186_v12  ;;  %vm785_vm0 = vcmp.ge.s32.totalorder %v6721_v18, 0  ;;  %vm801_vm1 = vcmp.lt.s32.totalorder %v6721_v18, 64  ;;  %4941 = vst [vmem:[#allocation2 + $0x498] sm:$0xf0] %v12445_v44  ;;  %12751 = vst [vmem:[#allocation10_spill] sm:$0xff] %v6898_v46 }
  0x1d   : > { %v6718_v16 = vand.u32 63, %v187_v14  ;;  %vm786_vm2 = vcmp.ge.s32.totalorder %v6723_v19, 0  ;;  %vm802_vm3 = vcmp.lt.s32.totalorder %v6723_v19, 64  ;;  %vm6740_vm4 = vmand %vm785_vm0, %vm801_vm1  ;;  %vm784_vm14 = vcmp.ge.s32.totalorder %v6763_v26, 0  ;;  %4942 = vst [vmem:[#allocation2 + $0x4a0] sm:$0xf0] %v12445_v44 }
  0x1e   : > { %v6726_v20 = vadd.s32 4294967294, %v6712_v15  ;;  %v12745_v23 = vsel %vm6740_vm4, 4294967295, %v12744_v23  ;;  %vm6745_vm6 = vmand %vm786_vm2, %vm802_vm3  ;;  %vm800_vm15 = vcmp.lt.s32.totalorder %v6763_v26, 64  ;;  %v6778_v30 = vand.u32 63, %v185_v25  ;;  %4943 = vst [vmem:[#allocation2 + $0x4a8] sm:$0xf0] %v12445_v44 }
  0x1f   : > { %1132 = vrot.lane.b32.xlu1 %v6690_v6, %s6611_s25  ;;  %1130 = vrot.lane.b32.xlu0 %v6677_v3, %s6611_s25  ;;  %v6735_v21 = vadd.s32 4294967294, %v6718_v16  ;;  %v12747_v24 = vsel %vm6745_vm6, 4294967295, %v12746_v24  ;;  %vm6780_vm0 = vmand %vm784_vm14, %vm800_vm15  ;;  %vm12412_vm2 = vcmp.ge.s32.totalorder %v6712_v15, 0  ;;  %4944 = vst [vmem:[#allocation2 + $0x4b0] sm:$0xf0] %v12445_v44  ;;  %v217_v47 = vadd.s32 4294967294, %v6763_v26 }
  0x20   : > { %vm12417_vm5 = vcmp.ge.s32.totalorder %v6726_v20, 0  ;;  %vm12409_vm9 = vcmp.lt.s32.totalorder %v6726_v20, 64  ;;  %v12749_v32 = vsel %vm6780_vm0, 4294967295, %v12748_v32  ;;  %vm12413_vm1 = vcmp.ge.s32.totalorder %v6778_v30, 0  ;;  %4945 = vst [vmem:[#allocation2 + $0x4b8] sm:$0xf0] %v12445_v44 }
  0x21   : > { %vm12416_vm7 = vcmp.ge.s32.totalorder %v6735_v21, 0  ;;  %vm833_vm8 = vmand %vm6740_vm4, %vm12417_vm5  ;;  %vm12408_vm11 = vcmp.lt.s32.totalorder %v6735_v21, 64  ;;  %12750 = vst [vmem:[#allocation9_spill] sm:$0xff] %v12749_v32  ;;  %v6805_v33 = vadd.s32 2, %v6778_v30  ;;  %v6815_v38 = vadd.s32 4294967294, %v6778_v30  ;;  %s6620_s4 = smov 63  }
  0x22   : > { %vm834_vm10 = vmand %vm6745_vm6, %vm12416_vm7  ;;  %4946 = vst [vmem:[#allocation2 + $0x4c0] sm:$0xf0] %v12445_v44  ;;  %v6902_v48 = vadd.s32 4294967295, %v6778_v30  ;;  %v508_v49 = vadd.s32 4294967295, %v6898_v46  ;;  %v218_v50 = vadd.s32 4294967294, %v6721_v18  ;;  %v509_v51 = vadd.s32 4294967295, %v6763_v26 }
  0x23   : > { %1136 = vrot.lane.b32.xlu1 %v6710_v13, %s6611_s25  ;;  %1134 = vrot.lane.b32.xlu0 %v6674_v2, %s6611_s25  ;;  %vm849_vm12 = vmand %vm833_vm8, %vm12409_vm9  ;;  %vm12405_vm8 = vcmp.lt.s32.totalorder %v6778_v30, 64  ;;  %vm12411_vm15 = vcmp.ge.s32.totalorder %v6805_v33, 0  ;;  %4947 = vst [vmem:[#allocation2 + $0x4c8] sm:$0xf0] %v12445_v44  ;;  %v6922_v54 = vadd.s32 4294967295, %v6712_v15  ;;  %v510_v55 = vadd.s32 4294967295, %v6721_v18 }
  0x24   : > { %vm850_vm13 = vmand %vm834_vm10, %vm12408_vm11  ;;  %v905_v27 = vsel %vm849_vm12, %v6690_v6, 0.0  ;;  %vm12404_vm12 = vcmp.lt.s32.totalorder %v6712_v15, 64  ;;  %4948 = vst [vmem:[#allocation2 + $0x4d0] sm:$0xf0] %v12445_v44  ;;  %vm524_vm11 = vcmp.ge.s32.totalorder %v508_v49, 0  ;;  %vm540_vm9 = vcmp.lt.s32.totalorder %v508_v49, 64 }
  0x25   : > { %v906_v28 = vsel %vm850_vm13, %v6674_v2, 0.0  ;;  %v937_v29 = vrot.slane %v905_v27, 2  ;;  %vm2966_vm3 = vmand %vm6780_vm0, %vm12413_vm1  ;;  %4949 = vst [vmem:[#allocation2 + $0x4d8] sm:$0xf0] %v12445_v44  ;;  %v12755_v56 = vmov 0  ;;  %v511_v57 = vadd.s32 4294967295, %v6723_v19 }
  0x26   : > { %v938_v31 = vrot.slane %v906_v28, 2  ;;  %vm2967_vm10 = vmand %vm6740_vm4, %vm12412_vm2  ;;  %4950 = vst [vmem:[#allocation2 + $0x4e0] sm:$0xf0] %v12445_v44  ;;  %vm525_vm2 = vcmp.ge.s32.totalorder %v509_v51, 0  ;;  %vm541_vm1 = vcmp.lt.s32.totalorder %v509_v51, 64  ;;  %v6943_v59 = vand.u32 63, %v184_v52 }
  0x27   : > { %1407 = vrot.lane.b32.xlu1 %v6690_v6, %s6612_s26  ;;  %1405 = vrot.lane.b32.xlu0 %v6677_v3, %s6612_s26  ;;  %969 = vst [vmem:[#allocation2 + $0x90] ss:$-124 sps:$4 sm:$0xc1] %v937_v29   ;;  %vm2982_vm13 = vmand %vm2966_vm3, %vm12405_vm8  ;;  %vm12407_vm3 = vcmp.lt.s32.totalorder %v6805_v33, 64  ;;  %v6941_v58 = vld [vmem:[%s6671_s23 + $0x18] sm:$0x77] }
  0x28   : > { %970 = vst [vmem:[#allocation2 + $0x98] ss:$-124 sps:$4 sm:$0xc1] %v938_v31   ;;  %vm2983_vm14 = vmand %vm2967_vm10, %vm12404_vm12  ;;  %v3031_v34 = vsel %vm2982_vm13, %v6690_v6, 0.0  ;;  %vm12406_vm12 = vcmp.lt.s32.totalorder %v6815_v38, 64  ;;  %v12757_v60 = vmov 0  ;;  %v7164_v51 = vcombine.high %v6941_v58, %v6941_v58 }
  0x29   : > { %v3032_v35 = vsel %vm2983_vm14, %v6674_v2, 0.0  ;;  %v3063_v36 = vrot.slane %v3031_v34, 4  ;;  %vm4540_vm10 = vmand %vm6780_vm0, %vm12411_vm15  ;;  %vm12410_vm14 = vcmp.ge.s32.totalorder %v6815_v38, 0  ;;  %4951 = vst [vmem:[#allocation2 + $0x4e8] sm:$0xf0] %v12445_v44  ;;  %v6951_v61 = vadd.s32 1, %v6778_v30 }
  0x2a   : > { %v3064_v37 = vrot.slane %v3032_v35, 4  ;;  %vm4556_vm13 = vmand %vm4540_vm10, %vm12407_vm3  ;;  %4952 = vst [vmem:[#allocation2 + $0x4f0] sm:$0xf0] %v12445_v44  ;;  %vm542_vm7 = vcmp.lt.s32.totalorder %v510_v55, 64  ;;  %v12760_v62 = vmov 0  ;;  %v6958_v63 = vadd.s32 1, %v6712_v15 }
  0x2b   : > { %1411 = vrot.lane.b32.xlu1 %v6710_v13, %s6612_s26  ;;  %1409 = vrot.lane.b32.xlu0 %v6674_v2, %s6612_s26  ;;  %3095 = vst [vmem:[#allocation2 + $0x208] sm:$0x70] %v3063_v36  ;;  %v4604_v39 = vsel %vm4556_vm13, %v6674_v2, 0.0  ;;  %vm832_vm8 = vmand %vm6780_vm0, %vm12410_vm14  ;;  %vm249_vm13 = vcmp.lt.s32.totalorder %v217_v47, 64  ;;  %v12763_v0 = vmov 0  ;;  %v1000_v8 = vadd.s32 1, %v6763_v26 }
  0x2c   : > { %3096 = vst [vmem:[#allocation2 + $0x210] sm:$0x70] %v3064_v37  ;;  %v4636_v40 = vrot.slane %v4604_v39, 6  ;;  %vm848_vm10 = vmand %vm832_vm8, %vm12406_vm12  ;;  %vm233_vm8 = vcmp.ge.s32.totalorder %v217_v47, 0  ;;  %vm12414_vm12 = vcmp.lt.s32.totalorder %v6902_v48, 64  ;;  %v12768_v9 = vmov 0 }
  0x2d   : > { %v904_v41 = vsel %vm848_vm10, %v6677_v3, 0.0  ;;  %4953 = vst [vmem:[#allocation2 + $0x4f8] sm:$0xf0] %v12445_v44  ;;  %vm12415_vm10 = vcmp.ge.s32.totalorder %v6902_v48, 0  ;;  %vm6917_vm3 = vmand %vm233_vm8, %vm249_vm13  ;;  %vm234_vm8 = vcmp.ge.s32.totalorder %v218_v50, 0  ;;  %vm250_vm13 = vcmp.lt.s32.totalorder %v218_v50, 64 }
  0x2e   : > { %4668 = vst [vmem:[#allocation2 + $0x408] sm:$0x1c] %v4636_v40  ;;  %v936_v42 = vrot.slane %v904_v41, 2  ;;  %v12753_v53 = vsel %vm6917_vm3, 4294967295, %v12752_v53  ;;  %12754 = vst [vmem:[#allocation11_spill] sm:$0xff] %v6922_v54  ;;  %v12771_v10 = vmov 0 }
  0x2f   : > { %1666 = vrot.lane.b32.xlu1 %v6690_v6, %s6613_s27  ;;  %1664 = vrot.lane.b32.xlu0 %v6677_v3, %s6613_s27  ;;  %vm1583_vm14 = vmand %vm6917_vm3, %vm12415_vm10  ;;  %12759 = vst [vmem:[#allocation12_spill] sm:$0xff] %v6951_v61  ;;  %vm526_vm10 = vcmp.ge.s32.totalorder %v510_v55, 0  ;;  %v1001_v11 = vadd.s32 1, %v6721_v18  ;;  %v1002_v12 = vadd.s32 1, %v6723_v19  ;;  %vm12775_vm6 = vcmp.ge.s32.totalorder %v6726_v20, 0  ;;  %s115_s14 = sand.u32 1, %s6600_s9  }
  0x30   : > { %968 = vst [vmem:[#allocation2 + $0x88] ss:$-124 sps:$4 sm:$0xc1] %v936_v42   ;;  %vm6931_vm15 = vmand %vm1583_vm14, %vm12414_vm12  ;;  %vm12420_vm12 = vcmp.ge.s32.totalorder %v6922_v54, 0  ;;  %v12782_v22 = vmov 0  ;;  %v12785_v25 = vmov 0 }
  0x31   : > { %v12756_v56 = vsel %vm6931_vm15, 4294967295, %v12755_v56  ;;  %vm6945_vm14 = vmand %vm524_vm11, %vm540_vm9  ;;  %12762 = vst [vmem:[#allocation13_spill] sm:$0xff] %v6958_v63  ;;  %vm12421_vm9 = vcmp.lt.s32.totalorder %v6922_v54, 64  ;;  %vm527_vm11 = vcmp.ge.s32.totalorder %v511_v57, 0  ;;  %v12788_v27 = vmov 0  ;;  %s11709_s9 = smul.u32 384, %s115_s14 }
  0x32   : > { %v12758_v60 = vsel %vm6945_vm14, 4294967295, %v12757_v60  ;;  %vm6953_vm5 = vmand %vm234_vm8, %vm250_vm13  ;;  %vm543_vm8 = vcmp.lt.s32.totalorder %v511_v57, 64  ;;  %v12792_v28 = vmov 0  ;;  %v12797_v29 = vmov 0 }
  0x33   : > { %1670 = vrot.lane.b32.xlu1 %v6710_v13, %s6613_s27  ;;  %1668 = vrot.lane.b32.xlu0 %v6674_v2, %s6613_s27  ;;  %v12761_v62 = vsel %vm6953_vm5, 4294967295, %v12760_v62  ;;  %vm6960_vm0 = vmand %vm525_vm2, %vm541_vm1  ;;  %vm12427_vm1 = vcmp.ge.s32.totalorder %v6951_v61, 0  ;;  %v12800_v31 = vmov 0  ;;  %v12803_v34 = vmov 0  ;;  %s11764_s15 = scalar_lea.vmem [#allocation3], %s11709_s9 }
  0x34   : > { %v12764_v0 = vsel %vm6960_vm0, 4294967295, %v12763_v0  ;;  %vm1584_vm13 = vmand %vm6953_vm5, %vm12420_vm12  ;;  %vm12781_vm12 = vcmp.ge.s32.totalorder %v6778_v30, 0  ;;  %v12810_v36 = vmov 0  ;;  %v12813_v37 = vmov 0 }
  0x35   : > { %vm6973_vm15 = vmand %vm526_vm10, %vm542_vm7  ;;  %v12816_v39 = vmov 0  ;;  %v12819_v40 = vmov 0  ;;  %v1276_v41 = vadd.s32 2, %v6763_v26  ;;  %v1275_v43 = vadd.s32 2, %v6898_v46 }
  0x36   : > { %vm6985_vm2 = vmand %vm1584_vm13, %vm12421_vm9  ;;  %vm1032_vm13 = vcmp.lt.s32.totalorder %v1000_v8, 64  ;;  %v12829_v45 = vmov 0  ;;  %v12832_v47 = vmov 0  ;;  %v12835_v49 = vmov 0 }
  0x37   : > { %1128 = vrot.lane.b32.xlu1 %v6694_v7, %s6611_s25  ;;  %636 = vrot.lane.b32.xlu0 %v6680_v4, %s6610_s24  ;;  %v12769_v9 = vsel %vm6985_vm2, 4294967295, %v12768_v9  ;;  %vm6990_vm10 = vmand %vm527_vm11, %vm543_vm8  ;;  %vm12774_vm2 = vcmp.ge.s32.totalorder %v6958_v63, 0  ;;  %vm12787_vm8 = vcmp.lt.s32.totalorder %v6951_v61, 64  ;;  %v1277_v50 = vadd.s32 2, %v6721_v18 }
  0x38   : > { %12770 = vst [vmem:[#allocation15_spill] sm:$0xff] %v12769_v9  ;;  %v12772_v10 = vsel %vm6990_vm10, 4294967295, %v12771_v10  ;;  %vm3456_vm11 = vmand %vm6917_vm3, %vm12427_vm1  ;;  %vm12778_vm1 = vcmp.ge.s32.totalorder %v6735_v21, 0  ;;  %vm12791_vm3 = vcmp.lt.s32.totalorder %v6958_v63, 64  ;;  %v12838_v18 = vmov 0 }
  0x39   : > { %12773 = vst [vmem:[#allocation16_spill] sm:$0xff] %v12772_v10  ;;  %vm3457_vm4 = vmand %vm6953_vm5, %vm12774_vm2  ;;  %vm1033_vm5 = vcmp.lt.s32.totalorder %v1001_v11, 64  ;;  %v1278_v52 = vadd.s32 2, %v6723_v19  ;;  %v12841_v55 = vmov 0  ;;  %v12844_v57 = vmov 0 }
  0x3a   : > { %vm7016_vm14 = vmand %vm6973_vm15, %vm12775_vm6  ;;  %vm12784_vm6 = vcmp.ge.s32.totalorder %v6712_v15, 0  ;;  %v12867_v14 = vmov 0  ;;  %v12871_v17 = vmov 0  ;;  %v216_v35 = vadd.s32 4294967294, %v6898_v46 }
  0x3b   : > { %1662 = vrot.lane.b32.xlu1 %v6694_v7, %s6613_s27  ;;  %1403 = vrot.lane.b32.xlu0 %v6694_v7, %s6612_s26  ;;  %vm7024_vm9 = vmand %vm6990_vm10, %vm12778_vm1  ;;  %vm12799_vm1 = vcmp.ge.s32.totalorder %v6805_v33, 0  ;;  %v7313_v42 = vadd.s32 4294967295, %v6718_v16  ;;  %v139_v26 = vadd.s32 512, %v6666_v1  ;;  %v12903_v1 = vmov 0 }
  0x3c   : > { %vm7032_vm2 = vmand %vm6960_vm0, %vm12781_vm12  ;;  %vm1017_vm12 = vcmp.ge.s32.totalorder %v1001_v11, 0  ;;  %v12859_v11 = vmov 0  ;;  %v12907_v32 = vmov 0  ;;  %v12911_v63 = vmov 0 }
  0x3d   : > { %v12783_v22 = vsel %vm7032_vm2, 4294967295, %v12782_v22  ;;  %vm7040_vm7 = vmand %vm6973_vm15, %vm12784_vm6  ;;  %v7394_v54 = vadd.s32 4294967295, %v6943_v59  ;;  %v13136_v9 = vmov 0 }
  0x3e   : > { %v12786_v25 = vsel %vm7040_vm7, 4294967295, %v12785_v25  ;;  %vm7046_vm10 = vmand %vm3456_vm11, %vm12787_vm8  ;;  %vm12796_vm11 = vnez %v12758_v60  ;;  %vm1034_vm7 = vcmp.lt.s32.totalorder %v1002_v12, 64 }
  0x3f   : > { %413 = vrot.lane.b32.xlu1 %v6677_v3, %s6614_s28  ;;  %411 = vrot.lane.b32.xlu0 %v6694_v7, %s6614_s28  ;;  %v12789_v27 = vsel %vm7046_vm10, 4294967295, %v12788_v27  ;;  %vm7052_vm2 = vmand %vm3457_vm4, %vm12791_vm3  ;;  %vm12802_vm3 = vcmp.ge.s32.totalorder %v6815_v38, 0 }
  0x40   : > { %12790 = vst [vmem:[#allocation17_spill] sm:$0xff] %v12789_v27  ;;  %v12793_v28 = vsel %vm7052_vm2, 4294967295, %v12792_v28  ;;  %vm7072_vm4 = vmand %vm6960_vm0, %vm12799_vm1 }
  0x41   : > { %12794 = vst [vmem:[#allocation18_spill] sm:$0xff] %v12793_v28  ;;  %v12801_v31 = vsel %vm7072_vm4, 4294967295, %v12800_v31  ;;  %vm1018_vm4 = vcmp.ge.s32.totalorder %v1002_v12, 0  ;;  %v12863_v12 = vmov 0  ;;  %v12932_v28 = vmov 0 }
  0x43   : > { %417 = vrot.lane.b32.xlu1 %v6674_v2, %s6614_s28  ;;  %415 = vrot.lane.b32.xlu0 %v6690_v6, %s6614_s28 }
  0x47   : > { %419 = vrot.lane.b32.xlu1 %v6710_v13, %s6614_s28  ;;  %409 = vrot.lane.b32.xlu0 %v6680_v4, %s6614_s28  ;;  %v999_v4 = vadd.s32 1, %v6898_v46 }
  0x49   : > { %vm12808_vm1 = vcmp.lt.s32.totalorder %v999_v4, 64  ;;  %vm12809_vm10 = vcmp.ge.s32.totalorder %v999_v4, 0  ;;  %v12852_v4 = vmov 0 }
  0x4b   : > { %1893 = vrot.lane.b32.xlu1 %v6690_v6, %s6615_s29  ;;  %1891 = vrot.lane.b32.xlu0 %v6677_v3, %s6615_s29 }
  0x4f   : > { %1897 = vrot.lane.b32.xlu1 %v6710_v13, %s6615_s29  ;;  %1895 = vrot.lane.b32.xlu0 %v6674_v2, %s6615_s29 }
  0x53   : > { %2104 = vrot.lane.b32.xlu1 %v6690_v6, %s6618_s30  ;;  %2102 = vrot.lane.b32.xlu0 %v6677_v3, %s6618_s30 }
  0x57   : > { %2108 = vrot.lane.b32.xlu1 %v6710_v13, %s6618_s30  ;;  %2106 = vrot.lane.b32.xlu0 %v6674_v2, %s6618_s30 }
  0x5b   : > { %2478 = vrot.lane.b32.xlu1 %v6690_v6, %s6619_s3  ;;  %2476 = vrot.lane.b32.xlu0 %v6677_v3, %s6619_s3 }
  0x5f   : > { %2482 = vrot.lane.b32.xlu1 %v6710_v13, %s6619_s3  ;;  %2480 = vrot.lane.b32.xlu0 %v6674_v2, %s6619_s3 }
  0x63   : > { %2100 = vrot.lane.b32.xlu1 %v6694_v7, %s6618_s30  ;;  %1889 = vrot.lane.b32.xlu0 %v6694_v7, %s6615_s29 }
  0x67   : > { %2313 = vrot.lane.b32.xlu1 %v6677_v3, %s6620_s4  ;;  %2474 = vrot.lane.b32.xlu0 %v6694_v7, %s6619_s3  ;;  %v6978_v3 = vadd.s32 2, %v6943_v59 }
  0x69   : > { %vm12795_vm6 = vcmp.ge.s32.totalorder %v6978_v3, 0 }
  0x6a   : > { %vm7064_vm8 = vmand %vm12796_vm11, %vm12795_vm6  ;;  %vm12805_vm6 = vcmp.ge.s32.totalorder %v6943_v59, 0 }
  0x6b   : > { %2317 = vrot.lane.b32.xlu1 %v6674_v2, %s6620_s4  ;;  %2315 = vrot.lane.b32.xlu0 %v6690_v6, %s6620_s4  ;;  %v12765_v2 = vmov 0  ;;  %v12798_v29 = vsel %vm7064_vm8, 4294967295, %v12797_v29  ;;  %vm7088_vm2 = vmand %vm12796_vm11, %vm12805_vm6  ;;  %vm12840_vm11 = vcmp.lt.s32.totalorder %v6726_v20, 64  ;;  %v12895_v6 = vmov 0 }
  0x6c   : > { %v12766_v2 = vsel %vm6973_vm15, 4294967295, %v12765_v2  ;;  %vm7080_vm15 = vmand %vm6960_vm0, %vm12802_vm3  ;;  %vm12812_vm3 = vcmp.ge.s32.totalorder %v1000_v8, 0  ;;  %v12855_v8 = vmov 0 }
  0x6d   : > { %12767 = vst [vmem:[#allocation14_spill] sm:$0xff] %v12766_v2  ;;  %v12804_v34 = vsel %vm7080_vm15, 4294967295, %v12803_v34  ;;  %vm7094_vm8 = vmand %vm12809_vm10, %vm12808_vm1  ;;  %vm12822_vm10 = vcmp.ge.s32.totalorder %v6815_v38, 0  ;;  %vm12831_vm1 = vcmp.ge.s32.totalorder %v6735_v21, 0 }
  0x6e   : > { %v12811_v36 = vsel %vm7094_vm8, 4294967295, %v12810_v36  ;;  %vm7099_vm0 = vmand %vm12812_vm3, %vm1032_vm13 }
  0x6f   : > { %2311 = vrot.lane.b32.xlu1 %v6694_v7, %s6620_s4  ;;  %2319 = vrot.lane.b32.xlu0 %v6710_v13, %s6620_s4  ;;  %v12814_v37 = vsel %vm7099_vm0, 4294967295, %v12813_v37  ;;  %vm7103_vm15 = vmand %vm1017_vm12, %vm1033_vm5  ;;  %vm12828_vm12 = vcmp.ge.s32.totalorder %v6726_v20, 0 }
  0x70   : > { %12815 = vst [vmem:[#allocation19_spill] sm:$0xff] %v12814_v37  ;;  %v12817_v39 = vsel %vm7103_vm15, 4294967295, %v12816_v39  ;;  %vm7107_vm6 = vmand %vm1018_vm4, %vm1034_vm7  ;;  %vm12825_vm7 = vcmp.ge.s32.totalorder %v6943_v59, 0  ;;  %v7310_v37 = vadd.s32 4294967294, %v6723_v19 }
  0x71   : > { %12818 = vst [vmem:[#allocation20_spill] sm:$0xff] %v12817_v39  ;;  %v12820_v40 = vsel %vm7107_vm6, 4294967295, %v12819_v40  ;;  %vm7120_vm5 = vmand %vm7099_vm0, %vm12822_vm10  ;;  %vm12834_vm10 = vcmp.ge.s32.totalorder %v6778_v30, 0  ;;  %v12892_v39 = vmov 0 }
  0x72   : > { %12821 = vst [vmem:[#allocation21_spill] sm:$0xff] %v12820_v40  ;;  %vm7128_vm13 = vmand %vm7094_vm8, %vm12825_vm7  ;;  %v12889_v40 = vmov 0 }
  0x73   : > { %1138 = vrot.lane.b32.xlu1 %v6941_v58, %s6611_s25  ;;  %646 = vrot.lane.b32.xlu0 %v6710_v13, %s6610_s24  ;;  %vm7137_vm4 = vmand %vm7103_vm15, %vm12828_vm12 }
  0x74   : > { %v12830_v45 = vsel %vm7137_vm4, 4294967295, %v12829_v45  ;;  %vm7145_vm3 = vmand %vm7107_vm6, %vm12831_vm1  ;;  %vm12837_vm6 = vcmp.ge.s32.totalorder %v6712_v15, 0 }
  0x75   : > { %v12833_v47 = vsel %vm7145_vm3, 4294967295, %v12832_v47  ;;  %vm7153_vm7 = vmand %vm7099_vm0, %vm12834_vm10  ;;  %vm12843_vm10 = vcmp.lt.s32.totalorder %v6735_v21, 64 }
  0x76   : > { %v12836_v49 = vsel %vm7153_vm7, 4294967295, %v12835_v49  ;;  %vm7172_vm12 = vmand %vm7103_vm15, %vm12837_vm6  ;;  %vm12846_vm6 = vcmp.lt.s32.totalorder %v6778_v30, 64  ;;  %vm12847_vm15 = vnez %v12783_v22  ;;  %v12874_v22 = vmov 0 }
  0x77   : > { %1672 = vrot.lane.b32.xlu1 %v6941_v58, %s6613_s27  ;;  %1413 = vrot.lane.b32.xlu0 %v6941_v58, %s6612_s26  ;;  %v12839_v18 = vsel %vm7172_vm12, 4294967295, %v12838_v18  ;;  %vm7181_vm7 = vmand %vm7016_vm14, %vm12840_vm11  ;;  %vm12850_vm14 = vcmp.lt.s32.totalorder %v6712_v15, 64  ;;  %vm12851_vm11 = vnez %v12786_v25 }
  0x78   : > { %v12842_v55 = vsel %vm7181_vm7, 4294967295, %v12841_v55  ;;  %vm7189_vm1 = vmand %vm7024_vm9, %vm12843_vm10  ;;  %vm12854_vm9 = vcmp.ge.s32.totalorder %v6978_v3, 0 }
  0x79   : > { %v12845_v57 = vsel %vm7189_vm1, 4294967295, %v12844_v57  ;;  %vm7197_vm12 = vmand %vm12847_vm15, %vm12846_vm6  ;;  %vm1291_vm15 = vcmp.ge.s32.totalorder %v1275_v43, 0  ;;  %vm1307_vm6 = vcmp.lt.s32.totalorder %v1275_v43, 64  ;;  %vm12858_vm1 = vcmp.ge.s32.totalorder %v1276_v41, 0 }
  0x7a   : > { %vm7205_vm7 = vmand %vm12851_vm11, %vm12850_vm14  ;;  %vm12861_vm14 = vcmp.lt.s32.totalorder %v6978_v3, 64  ;;  %vm12862_vm11 = vnez %v12798_v29  ;;  %v12879_v29 = vmov 0 }
  0x7b   : > { %648 = vrot.lane.b32.xlu1 %v6941_v58, %s6610_s24  ;;  %421 = vrot.lane.b32.xlu0 %v6941_v58, %s6614_s28  ;;  %v12853_v4 = vsel %vm7205_vm7, 4294967295, %v12852_v4  ;;  %vm7213_vm10 = vmand %vm7094_vm8, %vm12854_vm9  ;;  %vm12865_vm9 = vcmp.lt.s32.totalorder %v6805_v33, 64  ;;  %vm12866_vm8 = vnez %v12801_v31  ;;  %v7272_v31 = vld [vmem:[%s6671_s23 + $0x20] sm:$0x77] }
  0x7c   : > { %v12856_v8 = vsel %vm7213_vm10, 4294967295, %v12855_v8  ;;  %vm7227_vm7 = vmand %vm12862_vm11, %vm12861_vm14  ;;  %vm12873_vm14 = vcmp.lt.s32.totalorder %v6943_v59, 64  ;;  %v7326_v19 = vcombine.high %v7272_v31, %v7272_v31 }
  0x7d   : > { %v12864_v12 = vsel %vm7227_vm7, 4294967295, %v12863_v12  ;;  %vm7235_vm10 = vmand %vm12866_vm8, %vm12865_vm9  ;;  %vm12876_vm8 = vcmp.ge.s32.totalorder %v6805_v33, 0 }
  0x7e   : > { %v12868_v14 = vsel %vm7235_vm10, 4294967295, %v12867_v14  ;;  %vm7251_vm11 = vmand %vm7088_vm2, %vm12873_vm14  ;;  %vm1294_vm14 = vcmp.ge.s32.totalorder %v1278_v52, 0 }
  0x7f   : > { %2321 = vrot.lane.b32.xlu1 %v6941_v58, %s6620_s4  ;;  %2110 = vrot.lane.b32.xlu0 %v6941_v58, %s6618_s30  ;;  %v12875_v22 = vsel %vm7251_vm11, 4294967295, %v12874_v22  ;;  %vm7259_vm9 = vmand %vm7099_vm0, %vm12876_vm8  ;;  %vm1310_vm11 = vcmp.lt.s32.totalorder %v1278_v52, 64  ;;  %vm12881_vm8 = vcmp.ge.s32.totalorder %v6815_v38, 0  ;;  %v12886_v52 = vmov 0 }
  0x80   : > { %vm7267_vm2 = vmand %vm1291_vm15, %vm1307_vm6  ;;  %vm12885_vm15 = vcmp.lt.s32.totalorder %v6815_v38, 64 }
  0x81   : > { %v12880_v29 = vsel %vm7267_vm2, 4294967295, %v12879_v29  ;;  %vm7292_vm6 = vmand %vm7120_vm5, %vm12885_vm15  ;;  %vm12902_vm15 = vnez %v12830_v45  ;;  %v12915_v45 = vmov 0 }
  0x82   : > { %v12887_v52 = vsel %vm7292_vm6, 4294967295, %v12886_v52  ;;  %vm7315_vm5 = vmand %vm1294_vm14, %vm1310_vm11  ;;  %vm12901_vm14 = vcmp.lt.s32.totalorder %v6726_v20, 64  ;;  %vm12910_vm6 = vnez %v12836_v49  ;;  %v7378_v49 = vadd.s32 4294967294, %v6943_v59 }
  0x83   : > { %1899 = vrot.lane.b32.xlu1 %v6941_v58, %s6615_s29  ;;  %2484 = vrot.lane.b32.xlu0 %v6941_v58, %s6619_s3  ;;  %v12848_v58 = vmov 0  ;;  %v12896_v6 = vsel %vm7315_vm5, 4294967295, %v12895_v6 }
  0x84   : > { %v12849_v58 = vsel %vm7197_vm12, 4294967295, %v12848_v58  ;;  %vm12857_vm12 = vcmp.lt.s32.totalorder %v1276_v41, 64  ;;  %v7284_v41 = vadd.s32 1, %v6943_v59  ;;  %12897 = vst [vmem:[#allocation24_spill] sm:$0xff] %v12896_v6 }
  0x85   : > { %vm7219_vm3 = vmand %vm12858_vm1, %vm12857_vm12  ;;  %vm12869_vm12 = vcmp.lt.s32.totalorder %v6815_v38, 64  ;;  %vm12870_vm1 = vnez %v12804_v34 }
  0x86   : > { %v12860_v11 = vsel %vm7219_vm3, 4294967295, %v12859_v11  ;;  %vm7243_vm4 = vmand %vm12870_vm1, %vm12869_vm12  ;;  %vm1309_vm1 = vcmp.lt.s32.totalorder %v1277_v50, 64 }
  0x87   : > { %v12872_v17 = vsel %vm7243_vm4, 4294967295, %v12871_v17  ;;  %1415 = vrot.lane.b32.xlu1 %v7164_v51, %s6612_s26  ;;  %1140 = vrot.lane.b32.xlu0 %v7164_v51, %s6611_s25  ;;  %vm7278_vm12 = vmand %vm7219_vm3, %vm12881_vm8  ;;  %vm12888_vm8 = vcmp.lt.s32.totalorder %v6943_v59, 64  ;;  %vm12891_vm4 = vcmp.ge.s32.totalorder %v1277_v50, 0 }
  0x88   : > { %vm7300_vm0 = vmand %vm7128_vm13, %vm12888_vm8  ;;  %vm12905_vm13 = vcmp.lt.s32.totalorder %v6735_v21, 64 }
  0x89   : > { %v7286_v43 = vpop.permute.xlu1 %644  ;;  %v641_v44 = vpop.permute.xlu0 %640  ;;  %v12890_v40 = vsel %vm7300_vm0, 4294967295, %v12889_v40  ;;  %vm7305_vm10 = vmand %vm12891_vm4, %vm1309_vm1  ;;  %vm12898_vm1 = vcmp.ge.s32.totalorder %v6943_v59, 0  ;;  %vm12906_vm4 = vnez %v12833_v47  ;;  %v7559_v47 = vadd.s32 2, %v6712_v15 }
  0x8a   : > { %12884 = vst [vmem:[#allocation22_spill] sm:$0xff] %v7286_v43  ;;  %v12893_v39 = vsel %vm7305_vm10, 4294967295, %v12892_v39  ;;  %vm7332_vm11 = vmand %vm7267_vm2, %vm12898_vm1  ;;  %vm12909_vm1 = vcmp.lt.s32.totalorder %v6778_v30, 64 }
  0x8b   : > { %12894 = vst [vmem:[#allocation23_spill] sm:$0xff] %v12893_v39  ;;  %652 = vrot.lane.b32.xlu1 %v7272_v31, %s6610_s24  ;;  %650 = vrot.lane.b32.xlu0 %v7164_v51, %s6610_s24  ;;  %vm7340_vm8 = vmand %vm12902_vm15, %vm12901_vm14  ;;  %vm12913_vm14 = vcmp.lt.s32.totalorder %v6712_v15, 64  ;;  %vm12914_vm15 = vnez %v12839_v18  ;;  %v12948_v39 = vmov 0 }
  0x8c   : > { %v12904_v1 = vsel %vm7340_vm8, 4294967295, %v12903_v1  ;;  %vm7348_vm0 = vmand %vm12906_vm4, %vm12905_vm13  ;;  %vm12917_vm13 = vcmp.ge.s32.totalorder %v6726_v20, 0 }
  0x8d   : > { %v12908_v32 = vsel %vm7348_vm0, 4294967295, %v12907_v32  ;;  %vm7356_vm7 = vmand %vm12910_vm6, %vm12909_vm1  ;;  %v643_v18 = vpop.permute.xlu1 %642  ;;  %v7380_v10 = vpop.permute.xlu0 %638  ;;  %vm12924_vm1 = vcmask 7168  }
  0x8e   : > { %v12912_v63 = vsel %vm7356_vm7, 4294967295, %v12911_v63  ;;  %vm7364_vm8 = vmand %vm12914_vm15, %vm12913_vm14  ;;  %12920 = vst [vmem:[#allocation25_spill] sm:$0xff] %v7380_v10  ;;  %vm12921_vm14 = vcmp.ge.s32.totalorder %v6735_v21, 0  ;;  %v673_v7 = vsel %vm12924_vm1, %v641_v44, %v643_v18  ;;  %vm12931_vm7 = vcmp.lt.s32.totalorder %v6805_v33, 64 }
  0x8f   : > { %v12916_v45 = vsel %vm7364_vm8, 4294967295, %v12915_v45  ;;  %vm7372_vm4 = vmand %vm7305_vm10, %vm12917_vm13  ;;  %1144 = vrot.lane.b32.xlu1 %v7326_v19, %s6611_s25  ;;  %1142 = vrot.lane.b32.xlu0 %v7272_v31, %s6611_s25 }
  0x90   : > { %vm7386_vm15 = vmand %vm7315_vm5, %vm12921_vm14  ;;  %vm12927_vm14 = vcmp.lt.s32.totalorder %v6978_v3, 64  ;;  %vm12928_vm5 = vnez %v12856_v8  ;;  %v7426_v8 = vadd.s32 %v6682_v5, %v139_v26  ;;  %v12945_v5 = vmov 0 }
  0x91   : > { %vm12925_vm8 = vmmov %vm12924_vm1  ;;  %v7480_v27 = vpop.permute.xlu0 %1130 }
  0x92   : > { %v674_v46 = vsel %vm12925_vm8, %v643_v18, %v7286_v43  ;;  %vm12926_vm0 = vmmov %vm12924_vm1  ;;  %vm12934_vm8 = vcmp.ge.s32.totalorder %v6778_v30, 0  ;;  %vm12938_vm1 = vnez %v12845_v57 }
  0x93   : > { %v672_v6 = vsel %vm12926_vm0, %v7380_v10, %v641_v44  ;;  %vm7405_vm13 = vmand %vm12928_vm5, %vm12927_vm14  ;;  %vm12937_vm5 = vnez %v12842_v55  ;;  %v706_v25 = vsel %vm12938_vm1, %v674_v46, 0.0  ;;  %vm12944_vm1 = vcmp.lt.s32.totalorder %v6815_v38, 64  ;;  %1419 = vrot.lane.b32.xlu1 %v7326_v19, %s6612_s26  ;;  %1417 = vrot.lane.b32.xlu0 %v7272_v31, %s6612_s26 }
  0x94   : > { %vm7413_vm6 = vmand %vm7259_vm9, %vm12931_vm7  ;;  %v705_v18 = vsel %vm12937_vm5, %v673_v7, 0.0  ;;  %vm12939_vm7 = vnez %v12849_v58  ;;  %vm12940_vm9 = vnez %v12853_v4  ;;  %v738_v58 = vrot.slane %v706_v25, 5  ;;  %v1133_v25 = vpop.permute.xlu1 %1132 }
  0x95   : > { %v12933_v28 = vsel %vm7413_vm6, 4294967295, %v12932_v28  ;;  %vm7421_vm0 = vmand %vm7219_vm3, %vm12934_vm8  ;;  %v2886_v43 = vsel %vm12939_vm7, %v673_v7, 0.0  ;;  %v2887_v10 = vsel %vm12940_vm9, %v674_v46, 0.0  ;;  %vm12941_vm8 = vcmp.ge.s32.totalorder %v6712_v15, 0 }
  0x96   : > { %vm7444_vm5 = vmand %vm7305_vm10, %vm12941_vm8  ;;  %v737_v57 = vrot.slane %v705_v18, 5  ;;  %v2918_v26 = vrot.slane %v2886_v43, 7  ;;  %v2919_v4 = vrot.slane %v2887_v10, 7  ;;  %vm12947_vm9 = vcmp.lt.s32.totalorder %v6943_v59, 64  ;;  %770 = vst [vmem:[#allocation2 + $0x18] sm:$0x38] %v738_v58 }
  0x97   : > { %vm7452_vm7 = vmand %vm7278_vm12, %vm12944_vm1  ;;  %vm12950_vm14 = vcmp.ge.s32.totalorder %v6978_v3, 0  ;;  %vm12953_vm12 = vnez %v12864_v12  ;;  %vm12954_vm1 = vnez %v12868_v14  ;;  %vm12970_vm6 = vnez %v12890_v40  ;;  %1676 = vrot.lane.b32.xlu1 %v7272_v31, %s6613_s27  ;;  %1674 = vrot.lane.b32.xlu0 %v7164_v51, %s6613_s27 }
  0x98   : > { %v12946_v5 = vsel %vm7452_vm7, 4294967295, %v12945_v5  ;;  %vm7460_vm8 = vmand %vm7332_vm11, %vm12947_vm9  ;;  %v4443_v34 = vsel %vm12953_vm12, %v673_v7, 0.0  ;;  %v4444_v43 = vsel %vm12954_vm1, %v674_v46, 0.0  ;;  %vm12955_vm7 = vnez %v12872_v17  ;;  %769 = vst [vmem:[#allocation2 + $0x10] sm:$0x38] %v737_v57  ;;  %v7561_v55 = vpop.permute.xlu1 %1136  ;;  %v13118_v57 = vld [vmem:[#allocation10_spill] sm:$0xff] }
  0x99   : > { %v12949_v39 = vsel %vm7460_vm8, 4294967295, %v12948_v39  ;;  %vm7468_vm10 = vmand %vm7267_vm2, %vm12950_vm14  ;;  %v704_v50 = vsel %vm12955_vm7, %v672_v6, 0.0  ;;  %vm12956_vm11 = vnez %v12875_v22  ;;  %vm12957_vm9 = vcmp.lt.s32.totalorder %v216_v35, 64  ;;  %2950 = vst [vmem:[#allocation2 + $0x208] sm:$0xe] %v2918_v26 }
  0x9a   : > { %v2885_v18 = vsel %vm12956_vm11, %v672_v6, 0.0  ;;  %vm12958_vm14 = vcmp.ge.s32.totalorder %v216_v35, 0  ;;  %2951 = vst [vmem:[#allocation2 + $0x210] sm:$0xe] %v2919_v4  ;;  %v4475_v7 = vrot.slane %v4443_v34, 1  ;;  %v4476_v46 = vrot.slane %v4444_v43, 1  ;;  %v1135_v4 = vpop.permute.xlu0 %1134 }
  0x9b   : > { %vm7484_vm2 = vmand %vm12958_vm14, %vm12957_vm9  ;;  %v736_v12 = vrot.slane %v704_v50, 5  ;;  %v2917_v14 = vrot.slane %v2885_v18, 7  ;;  %vm12961_vm7 = vcmp.lt.s32.totalorder %v7310_v37, 64  ;;  %vm12962_vm12 = vcmp.ge.s32.totalorder %v7310_v37, 0  ;;  %423 = vrot.lane.b32.xlu1 %v7164_v51, %s6614_s28  ;;  %1678 = vrot.lane.b32.xlu0 %v7326_v19, %s6613_s27 }
  0x9c   : > { %vm7492_vm1 = vmand %vm12962_vm12, %vm12961_vm7  ;;  %v12963_v6 = vmov 0  ;;  %vm12965_vm11 = vcmask 1039360   ;;  %vm12966_vm9 = vcmp.ge.s32.totalorder %v6805_v33, 0  ;;  %4507 = vst [vmem:[#allocation2 + $0x400] ss:$-124 sps:$4 sm:$0x83] %v4475_v7   ;;  %vm12969_vm8 = vnez %v12887_v52 }
  0x9d   : > { %v12964_v6 = vsel %vm7492_vm1, 4294967295, %v12963_v6  ;;  %v1164_v17 = vsel %vm12965_vm11, %v7480_v27, %v1133_v25  ;;  %vm7506_vm14 = vmand %vm7219_vm3, %vm12966_vm9  ;;  %4508 = vst [vmem:[#allocation2 + $0x408] ss:$-124 sps:$4 sm:$0x83] %v4476_v46   ;;  %vm12971_vm9 = vcmp.lt.s32.totalorder %v6726_v20, 64  ;;  %vm12974_vm12 = vcmp.lt.s32.totalorder %v6735_v21, 64 }
  0x9e   : > { %768 = vst [vmem:[#allocation2 + $0x8] sm:$0x38] %v736_v12  ;;  %2949 = vst [vmem:[#allocation2 + $0x200] sm:$0xe] %v2917_v14  ;;  %v1196_v37 = vsel %vm12969_vm8, %v1164_v17, 0.0  ;;  %v3179_v35 = vsel %vm12970_vm6, %v1164_v17, 0.0 }
  0x9f   : > { %vm7521_vm3 = vmand %vm7372_vm4, %vm12971_vm9  ;;  %vm12977_vm8 = vcmp.lt.s32.totalorder %v6778_v30, 64  ;;  %vm12980_vm4 = vcmp.lt.s32.totalorder %v6712_v15, 64  ;;  %v12981_v52 = vmov 0  ;;  %v1228_v44 = vrot.slane %v1196_v37, 7  ;;  %427 = vrot.lane.b32.xlu1 %v7326_v19, %s6614_s28  ;;  %425 = vrot.lane.b32.xlu0 %v7272_v31, %s6614_s28 }
  0xa0   : > { %vm7529_vm7 = vmand %vm7386_vm15, %vm12974_vm12  ;;  %vm12983_vm15 = vcmp.ge.s32.totalorder %v7284_v41, 0  ;;  %v3211_v26 = vrot.slane %v3179_v35, 1  ;;  %v7572_v43 = vand.u32 63, %v7426_v8  ;;  %v188_v50 = vshra.s32 %v7426_v8, 6 }
  0xa1   : > { %vm7537_vm6 = vmand %vm7421_vm0, %vm12977_vm8  ;;  %vm12991_vm0 = vcmp.lt.s32.totalorder %v6978_v3, 64  ;;  %v12992_v46 = vmov 0  ;;  %v12995_v12 = vmov 0  ;;  %1260 = vst [vmem:[#allocation2 + $0x88] sm:$0xe] %v1228_v44 }
  0xa2   : > { %vm7545_vm9 = vmand %vm7444_vm5, %vm12980_vm4  ;;  %vm12986_vm5 = vcmp.ge.s32.totalorder %v7313_v42, 0  ;;  %3243 = vst [vmem:[#allocation2 + $0x280] ss:$-124 sps:$4 sm:$0x83] %v3211_v26   ;;  %v1408_v26 = vpop.permute.xlu1 %1407  ;;  %v7645_v2 = vadd.s32 4294967294, %v7572_v43 }
  0xa3   : > { %v12982_v52 = vsel %vm7545_vm9, 4294967295, %v12981_v52  ;;  %vm7553_vm12 = vmand %vm7484_vm2, %vm12983_vm15  ;;  %1903 = vrot.lane.b32.xlu1 %v7272_v31, %s6615_s29  ;;  %1901 = vrot.lane.b32.xlu0 %v7164_v51, %s6615_s29 }
  0xa4   : > { %vm7567_vm8 = vmand %vm7492_vm1, %vm12986_vm5  ;;  %vm12994_vm5 = vcmp.lt.s32.totalorder %v6805_v33, 64 }
  0xa5   : > { %vm12989_vm4 = vmmov %vm12965_vm11 }
  0xa6   : > { %v1165_v18 = vsel %vm12989_vm4, %v1133_v25, %v1135_v4  ;;  %vm12990_vm15 = vmmov %vm12989_vm4  ;;  %vm12997_vm4 = vcmp.ge.s32.totalorder %v7378_v49, 0 }
  0xa7   : > { %v1166_v7 = vsel %vm12990_vm15, %v1135_v4, %v7561_v55  ;;  %vm7582_vm11 = vmand %vm7468_vm10, %vm12991_vm0  ;;  %vm12998_vm15 = vnez %v12811_v36  ;;  %vm13005_vm0 = vcmp.ge.s32.totalorder %v7378_v49, 0  ;;  %vm13006_vm10 = vnez %v12758_v60  ;;  %v7640_v4 = vpop.permute.xlu0 %1405  ;;  %2112 = vrot.lane.b32.xlu1 %v7164_v51, %s6618_s30  ;;  %1905 = vrot.lane.b32.xlu0 %v7326_v19, %s6615_s29 }
  0xa8   : > { %v12993_v46 = vsel %vm7582_vm11, 4294967295, %v12992_v46  ;;  %vm7590_vm1 = vmand %vm7506_vm14, %vm12994_vm5  ;;  %vm13001_vm11 = vnez %v12904_v1  ;;  %vm13002_vm14 = vnez %v12908_v32  ;;  %vm13003_vm5 = vnez %v12912_v63 }
  0xa9   : > { %v12996_v12 = vsel %vm7590_vm1, 4294967295, %v12995_v12  ;;  %vm7598_vm9 = vmand %vm12998_vm15, %vm12997_vm4  ;;  %v1197_v10 = vsel %vm13001_vm11, %v1165_v18, 0.0  ;;  %v1198_v25 = vsel %vm13002_vm14, %v1166_v7, 0.0  ;;  %v3180_v14 = vsel %vm13003_vm5, %v1165_v18, 0.0 }
  0xaa   : > { %vm13004_vm4 = vnez %v12916_v45  ;;  %vm7620_vm11 = vmand %vm13006_vm10, %vm13005_vm0  ;;  %v1229_v32 = vrot.slane %v1197_v10, 7  ;;  %v1230_v63 = vrot.slane %v1198_v25, 7  ;;  %v3212_v22 = vrot.slane %v3180_v14, 1 }
  0xab   : > { %v3181_v17 = vsel %vm13004_vm4, %v1166_v7, 0.0  ;;  %vm13009_vm14 = vcmp.lt.s32.totalorder %v7284_v41, 64  ;;  %v13010_v45 = vmov 0  ;;  %vm13012_vm4 = vcmp.ge.s32.totalorder %v6718_v16, 0  ;;  %2116 = vrot.lane.b32.xlu1 %v7326_v19, %s6618_s30  ;;  %2114 = vrot.lane.b32.xlu0 %v7272_v31, %s6618_s30 }
  0xac   : > { %v3213_v37 = vrot.slane %v3181_v17, 1  ;;  %vm7628_vm5 = vmand %vm7553_vm12, %vm13009_vm14  ;;  %vm13013_vm15 = vnez %v12747_v24  ;;  %v4752_v35 = vsel %vm7405_vm13, %v1165_v18, 0.0  ;;  %vm13014_vm10 = vnez %v12933_v28  ;;  %1261 = vst [vmem:[#allocation2 + $0x90] sm:$0xe] %v1229_v32 }
  0xad   : > { %v13011_v45 = vsel %vm7628_vm5, 4294967295, %v13010_v45  ;;  %vm2968_vm0 = vmand %vm13013_vm15, %vm13012_vm4  ;;  %v4753_v44 = vsel %vm13014_vm10, %v1166_v7, 0.0  ;;  %v7642_v10 = vand.u32 63, %v188_v50  ;;  %vm13015_vm12 = vcmp.lt.s32.totalorder %v6718_v16, 64  ;;  %1262 = vst [vmem:[#allocation2 + $0x98] sm:$0xe] %v1230_v63 }
  0xae   : > { %vm7649_vm14 = vmand %vm2968_vm0, %vm13015_vm12  ;;  %3244 = vst [vmem:[#allocation2 + $0x288] ss:$-124 sps:$4 sm:$0x83] %v3212_v22   ;;  %v4784_v61 = vrot.slane %v4752_v35, 3  ;;  %v4785_v28 = vrot.slane %v4753_v44, 3  ;;  %vm13018_vm13 = vcmask 1031168   ;;  %vm13022_vm0 = vnez %v12946_v5  ;;  %v1410_v35 = vpop.permute.xlu0 %1409 }
  0xaf   : > { %3245 = vst [vmem:[#allocation2 + $0x290] ss:$-124 sps:$4 sm:$0x83] %v3213_v37   ;;  %v1439_v18 = vsel %vm13018_vm13, %v7640_v4, %v1408_v26  ;;  %vm13019_vm10 = vcmp.ge.s32.totalorder %v7394_v54, 0  ;;  %v13020_v50 = vmov 0  ;;  %v3033_v7 = vsel %vm7649_vm14, %v6710_v13, 0.0  ;;  %v7696_v37 = vpop.permute.xlu1 %1411  ;;  %2488 = vrot.lane.b32.xlu1 %v7272_v31, %s6619_s3  ;;  %2486 = vrot.lane.b32.xlu0 %v7164_v51, %s6619_s3 }
  0xb0   : > { %vm7659_vm4 = vmand %vm7484_vm2, %vm13019_vm10  ;;  %v1471_v14 = vsel %vm13022_vm0, %v1439_v18, 0.0  ;;  %vm13023_vm12 = vnez %v12949_v39  ;;  %vm13024_vm13 = vcmp.ge.s32.totalorder %v7378_v49, 0  ;;  %vm13025_vm10 = vnez %v12880_v29  ;;  %4816 = vst [vmem:[#allocation2 + $0x400] sm:$0xe0] %v4784_v61 }
  0xb1   : > { %v13021_v50 = vsel %vm7659_vm4, 4294967295, %v13020_v50  ;;  %v3343_v17 = vsel %vm13023_vm12, %v1439_v18, 0.0  ;;  %vm7678_vm15 = vmand %vm13025_vm10, %vm13024_vm13  ;;  %v13026_v32 = vmov 0  ;;  %v3065_v63 = vrot.slane %v3033_v7, 4  ;;  %4817 = vst [vmem:[#allocation2 + $0x408] sm:$0xe0] %v4785_v28 }
  0xb2   : > { %v13027_v32 = vsel %vm7678_vm15, 4294967295, %v13026_v32  ;;  %vm12494_vm14 = vcmp.ge.s32.totalorder %v7559_v47, 0  ;;  %v1503_v5 = vrot.slane %v1471_v14, 4  ;;  %v3375_v39 = vrot.slane %v3343_v17, 6 }
  0xb3   : > { %vm13028_vm0 = vcmp.lt.s32.totalorder %v7313_v42, 64  ;;  %vm12495_vm13 = vcmp.lt.s32.totalorder %v7559_v47, 64  ;;  %vm13031_vm10 = vnez %v12745_v23  ;;  %3097 = vst [vmem:[#allocation2 + $0x218] sm:$0x70] %v3065_v63  ;;  %vm13036_vm4 = vcmp.ge.s32.totalorder %v6815_v38, 0  ;;  %v1667_v34 = vpop.permute.xlu1 %1666  ;;  %2323 = vrot.lane.b32.xlu1 %v7164_v51, %s6620_s4  ;;  %2490 = vrot.lane.b32.xlu0 %v7326_v19, %s6619_s3 }
  0xb4   : > { %vm7687_vm12 = vmand %vm7567_vm8, %vm13028_vm0  ;;  %1535 = vst [vmem:[#allocation2 + $0x88] sm:$0x70] %v1503_v5  ;;  %vm13037_vm1 = vnez %v12753_v53  ;;  %v7719_v28 = vadd.s32 4294967294, %v7642_v10  ;;  %v13056_v1 = vmov 0  ;;  %v13097_v53 = vld [vmem:[#allocation15_spill] sm:$0xff] }
  0xb5   : > { %vm4541_vm15 = vmand %vm13031_vm10, %vm12494_vm14  ;;  %3407 = vst [vmem:[#allocation2 + $0x280] sm:$0x1c] %v3375_v39  ;;  %vm13034_vm14 = vcmask 1031168   ;;  %v13048_v39 = vmov 0 }
  0xb6   : > { %vm7703_vm0 = vmand %vm4541_vm15, %vm12495_vm13  ;;  %v1440_v44 = vsel %vm13034_vm14, %v1408_v26, %v1410_v35  ;;  %vm13040_vm15 = vnez %v12982_v52  ;;  %v13045_v52 = vmov 0  ;;  %vm13052_vm13 = vnez %v12993_v46 }
  0xb7   : > { %vm13035_vm10 = vmmov %vm13034_vm14  ;;  %v4605_v18 = vsel %vm7703_vm0, %v6710_v13, 0.0  ;;  %v1472_v26 = vsel %vm7521_vm3, %v1440_v44, 0.0  ;;  %v3344_v14 = vsel %vm7537_vm6, %v1440_v44, 0.0  ;;  %vm13050_vm0 = vcmp.ge.s32.totalorder %v6902_v48, 0  ;;  %2327 = vrot.lane.b32.xlu1 %v7326_v19, %s6620_s4  ;;  %2325 = vrot.lane.b32.xlu0 %v7272_v31, %s6620_s4 }
  0xb8   : > { %v1441_v25 = vsel %vm13035_vm10, %v1410_v35, %v7696_v37  ;;  %vm7714_vm5 = vmand %vm13037_vm1, %vm13036_vm4  ;;  %vm13041_vm4 = vcmp.ge.s32.totalorder %v6943_v59, 0  ;;  %v1504_v58 = vrot.slane %v1472_v26, 4  ;;  %v3376_v63 = vrot.slane %v3344_v14, 6  ;;  %v7768_v26 = vpop.permute.xlu0 %1664 }
  0xb9   : > { %v1473_v7 = vsel %vm7529_vm7, %v1441_v25, 0.0  ;;  %v3345_v17 = vsel %vm13040_vm15, %v1441_v25, 0.0  ;;  %vm7740_vm3 = vmand %vm7484_vm2, %vm13041_vm4  ;;  %vm13044_vm7 = vcmp.lt.s32.totalorder %v7378_v49, 64  ;;  %vm13051_vm15 = vnez %v12764_v0 }
  0xba   : > { %v1505_v40 = vrot.slane %v1473_v7, 4  ;;  %v3377_v5 = vrot.slane %v3345_v17, 6  ;;  %vm7748_vm6 = vmand %vm7598_vm9, %vm13044_vm7  ;;  %v4900_v8 = vsel %vm13052_vm13, %v1440_v44, 0.0  ;;  %vm13053_vm9 = vnez %v12996_v12  ;;  %1536 = vst [vmem:[#allocation2 + $0x90] sm:$0x70] %v1504_v58 }
  0xbb   : > { %v13046_v52 = vsel %vm7748_vm6, 4294967295, %v13045_v52  ;;  %vm13047_vm10 = vmmov %vm13044_vm7  ;;  %v4901_v35 = vsel %vm13053_vm9, %v1441_v25, 0.0  ;;  %vm13059_vm13 = vnez %v12964_v6  ;;  %v13060_v46 = vmov 0  ;;  %3408 = vst [vmem:[#allocation2 + $0x288] sm:$0x1c] %v3376_v63  ;;  %654 = vrot.lane.b32.xlu0 %v7326_v19, %s6610_s24 }
  0xbc   : > { %vm7756_vm14 = vmand %vm7620_vm11, %vm13047_vm10  ;;  %vm13054_vm11 = vcmp.ge.s32.totalorder %v6726_v20, 0  ;;  %vm13055_vm10 = vnez %v12761_v62  ;;  %vm13062_vm9 = vcmp.ge.s32.totalorder %v6778_v30, 0  ;;  %v13063_v12 = vmov 0  ;;  %1537 = vst [vmem:[#allocation2 + $0x98] sm:$0x70] %v1505_v40 }
  0xbd   : > { %v13049_v39 = vsel %vm7756_vm14, 4294967295, %v13048_v39  ;;  %vm1826_vm4 = vmand %vm13051_vm15, %vm13050_vm0  ;;  %vm13058_vm0 = vcmp.ge.s32.totalorder %v6735_v21, 0  ;;  %v4637_v44 = vrot.slane %v4605_v18, 6  ;;  %v13066_v25 = vmov 0  ;;  %3409 = vst [vmem:[#allocation2 + $0x290] sm:$0x1c] %v3377_v5  ;;  %v1669_v5 = vpop.permute.xlu0 %1668 }
  0xbe   : > { %vm7775_vm8 = vmand %vm13055_vm10, %vm13054_vm11  ;;  %vm13065_vm11 = vcmp.lt.s32.totalorder %v6902_v48, 64  ;;  %4916 = vst [vmem:[#allocation2 + $0x480] sm:$0x7] %v4900_v8  ;;  %v13070_v18 = vmov 0  ;;  %v13076_v58 = vmov 0  ;;  %vm13082_vm6 = vcmp.lt.s32.totalorder %v7378_v49, 64 }
  0xbf   : > { %v13057_v1 = vsel %vm7775_vm8, 4294967295, %v13056_v1  ;;  %vm7783_vm14 = vmand %vm13059_vm13, %vm13058_vm0  ;;  %4917 = vst [vmem:[#allocation2 + $0x488] sm:$0x7] %v4901_v35  ;;  %vm13068_vm0 = vcmask 539648  }
  0xc0   : > { %v13061_v46 = vsel %vm7783_vm14, 4294967295, %v13060_v46  ;;  %vm7791_vm7 = vmand %vm13037_vm1, %vm13062_vm9  ;;  %v1698_v7 = vsel %vm13068_vm0, %v7768_v26, %v1667_v34  ;;  %vm13069_vm9 = vcmp.ge.s32.totalorder %v6712_v15, 0  ;;  %vm13074_vm0 = vcmp.lt.s32.totalorder %v7645_v2, 64  ;;  %4669 = vst [vmem:[#allocation2 + $0x410] sm:$0x1c] %v4637_v44 }
  0xc1   : > { %v13064_v12 = vsel %vm7791_vm7, 4294967295, %v13063_v12  ;;  %vm7797_vm8 = vmand %vm1826_vm4, %vm13065_vm11  ;;  %vm13072_vm4 = vnez %v12756_v56  ;;  %vm13073_vm11 = vnez %v13011_v45  ;;  %v13174_v44 = vmov 0 }
  0xc2   : > { %v13067_v25 = vsel %vm7797_vm8, 4294967295, %v13066_v25  ;;  %vm7807_vm7 = vmand %vm13055_vm10, %vm13069_vm9  ;;  %v1730_v14 = vsel %vm13072_vm4, %v1698_v7, 0.0  ;;  %v3539_v17 = vsel %vm13073_vm11, %v1698_v7, 0.0  ;;  %vm13075_vm8 = vcmp.ge.s32.totalorder %v7645_v2, 0 }
  0xc3   : > { %v13071_v18 = vsel %vm7807_vm7, 4294967295, %v13070_v18  ;;  %vm7823_vm9 = vmand %vm13075_vm8, %vm13074_vm0  ;;  %v1762_v56 = vrot.slane %v1730_v14, 1  ;;  %v3571_v45 = vrot.slane %v3539_v17, 3  ;;  %vm13078_vm4 = vcmp.lt.s32.totalorder %v7394_v54, 64  ;;  %v13099_v17 = vld [vmem:[#allocation17_spill] sm:$0xff] }
  0xc4   : > { %v13077_v58 = vsel %vm7823_vm9, 4294967295, %v13076_v58  ;;  %vm13079_vm11 = vnez %v13021_v50  ;;  %vm13083_vm8 = vnez %v13027_v32  ;;  %v13084_v2 = vmov 0  ;;  %v7852_v50 = vpop.permute.xlu1 %1670 }
  0xc5   : > { %vm7832_vm14 = vmand %vm13079_vm11, %vm13078_vm4  ;;  %vm13086_vm7 = vcmp.ge.s32.totalorder %v6978_v3, 0  ;;  %vm13089_vm4 = vcmp.ge.s32.totalorder %v6805_v33, 0  ;;  %1794 = vst [vmem:[#allocation2 + $0x108] ss:$-124 sps:$4 sm:$0x83] %v1762_v56   ;;  %v13101_v56 = vld [vmem:[#allocation18_spill] sm:$0xff] }
  0xc6   : > { %vm7840_vm0 = vmand %vm13083_vm8, %vm13082_vm6  ;;  %3603 = vst [vmem:[#allocation2 + $0x280] sm:$0xe0] %v3571_v45  ;;  %vm13092_vm6 = vcmask 539648   ;;  %vm13094_vm8 = vcmp.ge.s32.totalorder %v7719_v28, 0  ;;  %v13171_v32 = vmov 0 }
  0xc7   : > { %v13085_v2 = vsel %vm7840_vm0, 4294967295, %v13084_v2  ;;  %vm7848_vm10 = vmand %vm7484_vm2, %vm13086_vm7  ;;  %v1699_v8 = vsel %vm13092_vm6, %v1667_v34, %v1669_v5 }
  0xc8   : > { %vm7858_vm11 = vmand %vm13037_vm1, %vm13089_vm4  ;;  %vm13098_vm1 = vnez %v13097_v53  ;;  %vm13100_vm4 = vnez %v13099_v17 }
  0xc9   : > { %vm13093_vm7 = vmmov %vm13092_vm6  ;;  %v1731_v7 = vsel %vm13098_vm1, %v1699_v8, 0.0  ;;  %v3540_v34 = vsel %vm13100_vm4, %v1699_v8, 0.0  ;;  %vm13102_vm6 = vnez %v13101_v56  ;;  %vm13109_vm4 = vcmp.lt.s32.totalorder %v6943_v59, 64 }
  0xca   : > { %v1700_v35 = vsel %vm13093_vm7, %v1669_v5, %v7852_v50  ;;  %vm7869_vm0 = vmand %vm7823_vm9, %vm13094_vm8  ;;  %vm13103_vm7 = vcmp.ge.s32.totalorder %v6718_v16, 0  ;;  %v1763_v22 = vrot.slane %v1731_v7, 1  ;;  %v3572_v8 = vrot.slane %v3540_v34, 3  ;;  %v13112_v7 = vld [vmem:[#allocation12_spill] sm:$0xff]  ;;  %v13120_v34 = vld [vmem:[#allocation25_spill] sm:$0xff] }
  0xcb   : > { %v1732_v14 = vsel %vm7687_vm12, %v1700_v35, 0.0  ;;  %v3541_v45 = vsel %vm13102_vm6, %v1700_v35, 0.0  ;;  %vm7889_vm8 = vmand %vm13059_vm13, %vm13103_vm7  ;;  %vm13106_vm12 = vcmp.lt.s32.totalorder %v6815_v38, 64  ;;  %v13107_v35 = vmov 0  ;;  %v1129_v38 = vpop.permute.xlu1 %1128 }
  0xcc   : > { %v1764_v53 = vrot.slane %v1732_v14, 1  ;;  %v3573_v17 = vrot.slane %v3541_v45, 3  ;;  %vm7897_vm1 = vmand %vm7714_vm5, %vm13106_vm12  ;;  %v13110_v56 = vmov 0  ;;  %vm13113_vm7 = vcmp.ge.s32.totalorder %v13112_v7, 0  ;;  %v637_v14 = vpop.permute.xlu0 %636  ;;  %3604 = vst [vmem:[#allocation2 + $0x288] sm:$0xe0] %v3572_v8 }
  0xcd   : > { %v13108_v35 = vsel %vm7897_vm1, 4294967295, %v13107_v35  ;;  %vm7905_vm6 = vmand %vm7740_vm3, %vm13109_vm4  ;;  %vm13114_vm5 = vcmp.ge.s32.totalorder %v7559_v47, 0  ;;  %vm13115_vm12 = vnez %v12761_v62  ;;  %1795 = vst [vmem:[#allocation2 + $0x110] ss:$-124 sps:$4 sm:$0x83] %v1763_v22   ;;  %v13123_v62 = vmov 0 }
  0xce   : > { %v13111_v56 = vsel %vm7905_vm6, 4294967295, %v13110_v56  ;;  %vm3620_vm13 = vmand %vm13051_vm15, %vm13113_vm7  ;;  %1796 = vst [vmem:[#allocation2 + $0x118] ss:$-124 sps:$4 sm:$0x83] %v1764_v53   ;;  %vm13119_vm15 = vcmask 1039360   ;;  %vm13121_vm7 = vcmask 7168   ;;  %vm13126_vm3 = vnez %v13049_v39 }
  0xcf   : > { %vm7917_vm9 = vmand %vm13115_vm12, %vm13114_vm5  ;;  %3605 = vst [vmem:[#allocation2 + $0x290] sm:$0xe0] %v3573_v17  ;;  %v1163_v0 = vsel %vm13119_vm15, %v1129_v38, %v7480_v27  ;;  %v671_v45 = vsel %vm13121_vm7, %v637_v14, %v13120_v34  ;;  %vm13122_vm6 = vcmp.lt.s32.totalorder %v13112_v7, 64  ;;  %vm13125_vm12 = vnez %v13046_v52  ;;  %v6565_v27 = vld [vmem:[%s6671_s23 + $0x8] sm:$0x77] }
  0xd0   : > { %vm7929_vm5 = vmand %vm3620_vm13, %vm13122_vm6  ;;  %v1195_v13 = vsel %vm13125_vm12, %v1163_v0, 0.0  ;;  %v703_v22 = vsel %vm13126_vm3, %v671_v45, 0.0  ;;  %vm13127_vm15 = vcmp.ge.s32.totalorder %v7378_v49, 0  ;;  %vm13130_vm6 = vcmp.lt.s32.totalorder %v6726_v20, 64  ;;  %v13184_v45 = vld [vmem:[#allocation11_spill] sm:$0xff] }
  0xd1   : > { %v13124_v62 = vsel %vm7929_vm5, 4294967295, %v13123_v62  ;;  %vm7945_vm13 = vmand %vm7484_vm2, %vm13127_vm15  ;;  %v1227_v53 = vrot.slane %v1195_v13, 7  ;;  %v735_v52 = vrot.slane %v703_v22, 5  ;;  %vm13131_vm3 = vnez %v13057_v1  ;;  %v1404_v1 = vpop.permute.xlu0 %1403  ;;  %v13186_v22 = vld [vmem:[#allocation14_spill] sm:$0xff] }
  0xd2   : > { %vm7953_vm7 = vmand %vm13131_vm3, %vm13130_vm6  ;;  %v13132_v39 = vmov 0  ;;  %vm13134_vm12 = vcmp.lt.s32.totalorder %v6735_v21, 64  ;;  %vm13135_vm4 = vnez %v13061_v46  ;;  %vm13138_vm2 = vcmp.lt.s32.totalorder %v6778_v30, 64  ;;  %v1663_v30 = vpop.permute.xlu1 %1662 }
  0xd3   : > { %v13133_v39 = vsel %vm7953_vm7, 4294967295, %v13132_v39  ;;  %vm7961_vm5 = vmand %vm13135_vm4, %vm13134_vm12  ;;  %vm13139_vm15 = vnez %v13064_v12  ;;  %vm13142_vm6 = vcmp.lt.s32.totalorder %v6712_v15, 64  ;;  %vm13143_vm3 = vnez %v13071_v18  ;;  %1259 = vst [vmem:[#allocation2 + $0x80] sm:$0xe] %v1227_v53 }
  0xd4   : > { %v13137_v9 = vsel %vm7961_vm5, 4294967295, %v13136_v9  ;;  %vm7969_vm1 = vmand %vm13139_vm15, %vm13138_vm2  ;;  %v13144_v20 = vmov 0  ;;  %vm13146_vm4 = vcmp.lt.s32.totalorder %v13118_v57, 64  ;;  %vm13147_vm12 = vcmp.ge.s32.totalorder %v13118_v57, 0  ;;  %767 = vst [vmem:[#allocation2] sm:$0x38] %v735_v52 }
  0xd5   : > { %vm7977_vm7 = vmand %vm13143_vm3, %vm13142_vm6  ;;  %v13148_v21 = vmov 0  ;;  %vm13150_vm2 = vcmp.lt.s32.totalorder %v6978_v3, 64  ;;  %vm13153_vm3 = vcmp.ge.s32.totalorder %v7378_v49, 0  ;;  %vm13159_vm6 = vnez %v13085_v2  ;;  %v412_v57 = vpop.permute.xlu0 %411  ;;  %v13194_v52 = vld [vmem:[#allocation16_spill] sm:$0xff] }
  0xd6   : > { %v13145_v20 = vsel %vm7977_vm7, 4294967295, %v13144_v20  ;;  %vm7985_vm5 = vmand %vm13147_vm12, %vm13146_vm4  ;;  %vm13154_vm12 = vcmask 539648   ;;  %vm13155_vm7 = vcmask 1031168   ;;  %v414_v61 = vpop.permute.xlu1 %413 }
  0xd7   : > { %v13149_v21 = vsel %vm7985_vm5, 4294967295, %v13148_v21  ;;  %vm7993_vm15 = vmand %vm7848_vm10, %vm13150_vm2  ;;  %v1697_v46 = vsel %vm13154_vm12, %v1663_v30, %v7768_v26  ;;  %v1438_v12 = vsel %vm13155_vm7, %v1404_v1, %v7640_v4  ;;  %vm13156_vm10 = vcmp.lt.s32.totalorder %v7378_v49, 64  ;;  %v13163_v26 = vld [vmem:[#allocation7_spill] sm:$0xff]  ;;  %v13218_v4 = vld [vmem:[#allocation9_spill] sm:$0xff] }
  0xd8   : > { %vm831_vm4 = vmand %vm7985_vm5, %vm13153_vm3  ;;  %v1729_v63 = vsel %vm7832_vm14, %v1697_v46, 0.0  ;;  %v1470_v8 = vsel %vm13159_vm6, %v1438_v12, 0.0  ;;  %vm12501_vm3 = vcmask 15360   ;;  %vm13160_vm7 = vcmp.lt.s32.totalorder %v6805_v33, 64 }
  0xd9   : > { %vm8008_vm2 = vmand %vm831_vm4, %vm13156_vm10  ;;  %v1761_v2 = vrot.slane %v1729_v63, 1  ;;  %v1502_v17 = vrot.slane %v1470_v8, 4  ;;  %vm13164_vm14 = vcmp.lt.s32.totalorder %v7719_v28, 64  ;;  %vm13167_vm12 = vcmp.lt.s32.totalorder %v6718_v16, 64  ;;  %v416_v12 = vpop.permute.xlu0 %415 }
  0xda   : > { %vm8024_vm4 = vmand %vm7858_vm11, %vm13160_vm7  ;;  %v903_v40 = vsel %vm8008_vm2, %v13163_v26, 0.0  ;;  %v13168_v33 = vmov 0  ;;  %vm13170_vm10 = vcmp.lt.s32.totalorder %v7559_v47, 64  ;;  %v418_v46 = vpop.permute.xlu1 %417 }
  0xdb   : > { %vm8035_vm6 = vmand %vm7869_vm0, %vm13164_vm14  ;;  %vm13173_vm0 = vcmp.lt.s32.totalorder %v7378_v49, 64  ;;  %vm13177_vm14 = vnez %v12758_v60  ;;  %v935_v14 = vrot.slane %v903_v40, 2  ;;  %1793 = vst [vmem:[#allocation2 + $0x100] ss:$-124 sps:$4 sm:$0x83] %v1761_v2   ;;  %v445_v49 = vsel %vm12501_vm3, %v412_v57, %v414_v61 }
  0xdc   : > { %vm8043_vm11 = vmand %vm7889_vm8, %vm13167_vm12  ;;  %vm13176_vm8 = vcmp.ge.s32.totalorder %v7284_v41, 0  ;;  %1534 = vst [vmem:[#allocation2 + $0x80] sm:$0x70] %v1502_v17  ;;  %vm13187_vm3 = vnez %v13186_v22 }
  0xdd   : > { %v13169_v33 = vsel %vm8043_vm11, 4294967295, %v13168_v33  ;;  %vm8051_vm2 = vmand %vm7917_vm9, %vm13170_vm10  ;;  %vm13180_vm9 = vcmp.ge.s32.totalorder %v6943_v59, 0  ;;  %vm13181_vm10 = vcmp.lt.s32.totalorder %v6943_v59, 64  ;;  %967 = vst [vmem:[#allocation2 + $0x80] ss:$-124 sps:$4 sm:$0xc1] %v935_v14   ;;  %vm13205_vm11 = vnez %v13137_v9  ;;  %v410_v59 = vpop.permute.xlu0 %409 }
  0xde   : > { %v13172_v32 = vsel %vm8051_vm2, 4294967295, %v13171_v32  ;;  %vm8059_vm7 = vmand %vm7945_vm13, %vm13173_vm0  ;;  %v8148_v14 = vld [vmem:[%s6671_s23 + $0x28] sm:$0x77] }
  0xdf   : > { %v13175_v44 = vsel %vm8059_vm7, 4294967295, %v13174_v44  ;;  %vm8067_vm12 = vmand %vm13177_vm14, %vm13176_vm8  ;;  %vm13182_vm8 = vnez %v13108_v35  ;;  %vm13183_vm14 = vnez %v13111_v56  ;;  %v13191_v56 = vmov 0  ;;  %1146 = vrot.lane.b32.xlu1 %v8148_v14, %s6611_s25  ;;  %1421 = vrot.lane.b32.xlu0 %v8148_v14, %s6612_s26 }
  0xe0   : > { %vm2965_vm13 = vmand %vm7985_vm5, %vm13180_vm9  ;;  %v477_v0 = vsel %vm13182_vm8, %v445_v49, 0.0  ;;  %v2721_v34 = vsel %vm13183_vm14, %v445_v49, 0.0  ;;  %vm13185_vm9 = vcmp.ge.s32.totalorder %v13184_v45, 0  ;;  %vm13190_vm14 = vcmp.lt.s32.totalorder %v7284_v41, 64 }
  0xe1   : > { %vm2981_vm0 = vmand %vm2965_vm13, %vm13181_vm10  ;;  %493 = vst [vmem:[#allocation2 + $0x8] sm:$0x7] %v477_v0  ;;  %v2753_v53 = vrot.slane %v2721_v34, 2  ;;  %vm13193_vm10 = vcmp.ge.s32.totalorder %v7313_v42, 0  ;;  %vm13195_vm8 = vnez %v13194_v52  ;;  %v8174_v34 = vpop.permute.xlu1 %419 }
  0xe2   : > { %vm8090_vm7 = vmand %vm13187_vm3, %vm13185_vm9  ;;  %v3030_v35 = vsel %vm2981_vm0, %v6565_v27, 0.0  ;;  %vm13198_vm0 = vcmp.ge.s32.totalorder %v6978_v3, 0 }
  0xe3   : > { %vm8099_vm13 = vmand %vm8067_vm12, %vm13190_vm14  ;;  %v3062_v1 = vrot.slane %v3030_v35, 4  ;;  %2785 = vst [vmem:[#allocation2 + $0x200] ss:$-124 sps:$4 sm:$0xc1] %v2753_v53   ;;  %vm13199_vm12 = vcmask 15360   ;;  %v13225_v35 = vld [vmem:[#allocation6_spill] sm:$0xff]  ;;  %1680 = vrot.lane.b32.xlu1 %v8148_v14, %s6613_s27  ;;  %429 = vrot.lane.b32.xlu0 %v8148_v14, %s6614_s28 }
  0xe4   : > { %v13192_v56 = vsel %vm8099_vm13, 4294967295, %v13191_v56  ;;  %vm8107_vm9 = vmand %vm13195_vm8, %vm13193_vm10  ;;  %v446_v18 = vsel %vm13199_vm12, %v414_v61, %v416_v12  ;;  %vm13201_vm10 = vcmp.lt.s32.totalorder %v6978_v3, 64  ;;  %vm13204_vm13 = vnez %v13133_v39  ;;  %v13207_v3 = vld [vmem:[#allocation13_spill] sm:$0xff]  ;;  %v4979_v61 = vld [vmem:[#allocation2 + $0x98] sm:$0xff] }
  0xe5   : > { %vm4539_vm2 = vmand %vm7985_vm5, %vm13198_vm0  ;;  %3094 = vst [vmem:[#allocation2 + $0x200] sm:$0x70] %v3062_v1  ;;  %v478_v26 = vsel %vm13204_vm13, %v446_v18, 0.0  ;;  %v2722_v2 = vsel %vm7969_vm1, %v446_v18, 0.0  ;;  %vm13206_vm0 = vnez %v13145_v20  ;;  %v4295_v20 = vsel %vm7993_vm15, %v446_v18, 0.0  ;;  %v4976_v39 = vld [vmem:[#allocation2 + $0x80] sm:$0xff] }
  0xe6   : > { %vm13200_vm14 = vmmov %vm13199_vm12  ;;  %494 = vst [vmem:[#allocation2 + $0x10] sm:$0x7] %v478_v26  ;;  %v2754_v9 = vrot.slane %v2722_v2, 2  ;;  %vm13211_vm1 = vcmp.lt.s32.totalorder %v13184_v45, 64  ;;  %vm13214_vm12 = vcmp.lt.s32.totalorder %v7313_v42, 64  ;;  %vm13217_vm15 = vcmp.ge.s32.totalorder %v6902_v48, 0 }
  0xe7   : > { %v447_v63 = vsel %vm13200_vm14, %v416_v12, %v418_v46  ;;  %vm8119_vm8 = vmand %vm4539_vm2, %vm13201_vm10  ;;  %vm13208_vm2 = vcmp.ge.s32.totalorder %v13207_v3, 0  ;;  %v4327_v49 = vrot.slane %v4295_v20, 4  ;;  %656 = vrot.lane.b32.xlu1 %v8148_v14, %s6610_s24  ;;  %2118 = vrot.lane.b32.xlu0 %v8148_v14, %s6618_s30 }
  0xe8   : > { %v479_v40 = vsel %vm13205_vm11, %v447_v63, 0.0  ;;  %v2723_v17 = vsel %vm13206_vm0, %v447_v63, 0.0  ;;  %vm8139_vm13 = vmand %vm13187_vm3, %vm13208_vm2  ;;  %v4296_v5 = vsel %vm8024_vm4, %v447_v63, 0.0  ;;  %vm13219_vm4 = vnez %v13218_v4  ;;  %2786 = vst [vmem:[#allocation2 + $0x208] ss:$-124 sps:$4 sm:$0xc1] %v2754_v9   ;;  %v1894_v9 = vpop.permute.xlu1 %1893 }
  0xe9   : > { %495 = vst [vmem:[#allocation2 + $0x18] sm:$0x7] %v479_v40  ;;  %v2755_v13 = vrot.slane %v2723_v17, 2  ;;  %vm8154_vm11 = vmand %vm8090_vm7, %vm13211_vm1  ;;  %v4328_v0 = vrot.slane %v4296_v5, 4  ;;  %vm13222_vm7 = vcmp.ge.s32.totalorder %v7284_v41, 0  ;;  %v4603_v53 = vsel %vm8119_vm8, %v13225_v35, 0.0 }
  0xea   : > { %vm8162_vm14 = vmand %vm8107_vm9, %vm13214_vm12  ;;  %vm13226_vm0 = vcmask 15360   ;;  %vm13228_vm12 = vcmp.lt.s32.totalorder %v13207_v3, 64  ;;  %v4635_v18 = vrot.slane %v4603_v53, 6  ;;  %4359 = vst [vmem:[#allocation2 + $0x380] sm:$0x70] %v4327_v49  ;;  %vm13231_vm8 = vnez %v13169_v33  ;;  %v4961_v26 = vld [vmem:[#allocation2 + $0x8] sm:$0xff] }
  0xeb   : > { %vm8170_vm10 = vmand %vm13219_vm4, %vm13217_vm15  ;;  %2787 = vst [vmem:[#allocation2 + $0x210] ss:$-124 sps:$4 sm:$0xc1] %v2755_v13   ;;  %v448_v30 = vsel %vm13226_vm0, %v418_v46, %v8174_v34  ;;  %v4977_v40 = vld [vmem:[#allocation2 + $0x88] sm:$0xff]  ;;  %vm13245_vm1 = vnez %v12747_v24  ;;  %v8242_v13 = vpop.permute.xlu0 %1891  ;;  %v4978_v49 = vld [vmem:[#allocation2 + $0x90] sm:$0xff]  ;;  %2329 = vrot.lane.b32.xlu1 %v8148_v14, %s6620_s4  ;;  %2492 = vrot.lane.b32.xlu0 %v8148_v14, %s6619_s3 }
  0xec   : > { %vm8180_vm9 = vmand %vm7985_vm5, %vm13222_vm7  ;;  %4360 = vst [vmem:[#allocation2 + $0x388] sm:$0x70] %v4328_v0  ;;  %v480_v63 = vsel %vm8035_vm6, %v448_v30, 0.0  ;;  %v2724_v46 = vsel %vm13231_vm8, %v448_v30, 0.0  ;;  %vm13232_vm7 = vnez %v13172_v32  ;;  %vm13235_vm6 = vnez %v12745_v23  ;;  %v13288_v0 = vld [vmem:[#allocation24_spill] sm:$0xff] }
  0xed   : > { %vm13227_vm2 = vmmov %vm13226_vm0  ;;  %vm13233_vm0 = vnez %v13175_v44  ;;  %496 = vst [vmem:[#allocation2 + $0x20] sm:$0x7] %v480_v63  ;;  %v2756_v33 = vrot.slane %v2724_v46, 2  ;;  %v6359_v44 = vpack.c.bf16 %v4977_v40, %v4961_v26  ;;  %v4962_v35 = vld [vmem:[#allocation2 + $0x10] sm:$0xff] }
  0xee   : > { %v444_v1 = vsel %vm13227_vm2, %v410_v59, %v412_v57  ;;  %vm8194_vm15 = vmand %vm8139_vm13, %vm13228_vm12  ;;  %v4297_v57 = vsel %vm13232_vm7, %v448_v30, 0.0  ;;  %vm13234_vm13 = vcmp.ge.s32.totalorder %v13184_v45, 0  ;;  %vm13238_vm12 = vcmp.lt.s32.totalorder %v6902_v48, 64  ;;  %4667 = vst [vmem:[#allocation2 + $0x400] sm:$0x1c] %v4635_v18  ;;  %v8296_v18 = vpop.permute.xlu1 %1897 }
  0xef   : > { %v476_v8 = vsel %vm13233_vm0, %v444_v1, 0.0  ;;  %vm8214_vm2 = vmand %vm13235_vm6, %vm13234_vm13  ;;  %v4329_v32 = vrot.slane %v4297_v57, 4  ;;  %vm13241_vm7 = vcmp.lt.s32.totalorder %v7284_v41, 64  ;;  %vm13244_vm13 = vcmp.ge.s32.totalorder %v7313_v42, 0  ;;  %6360 = vmatprep.subr.bf16.mxu0 %v6359_v44  ;;  %v1896_v63 = vpop.permute.xlu0 %1895  ;;  %1907 = vrot.lane.b32.xlu1 %v8148_v14, %s6615_s29 }
  0xf0   : > { %492 = vst [vmem:[#allocation2] sm:$0x7] %v476_v8  ;;  %vm8222_vm8 = vmand %vm8170_vm10, %vm13238_vm12  ;;  %vm13248_vm10 = vcmp.ge.s32.totalorder %v13112_v7, 0  ;;  %vm13251_vm12 = vcmask 531456   ;;  %v4963_v27 = vld [vmem:[#allocation2 + $0x18] sm:$0xff]  ;;  %v6381_v53 = vpack.c.bf16 %v4978_v49, %v4962_v35  ;;  %v13266_v1 = vmov 0 }
  0xf1   : > { %vm8230_vm0 = vmand %vm8180_vm9, %vm13241_vm7  ;;  %2788 = vst [vmem:[#allocation2 + $0x218] ss:$-124 sps:$4 sm:$0xc1] %v2756_v33   ;;  %v1925_v5 = vsel %vm13251_vm12, %v8242_v13, %v1894_v9  ;;  %vm13252_vm7 = vcmp.ge.s32.totalorder %v13207_v3, 0  ;;  %vm13257_vm12 = vcmp.ge.s32.totalorder %v6902_v48, 0 }
  0xf2   : > { %vm8238_vm3 = vmand %vm13245_vm1, %vm13244_vm13  ;;  %4361 = vst [vmem:[#allocation2 + $0x390] sm:$0x70] %v4329_v32  ;;  %vm13262_vm1 = vcmp.lt.s32.totalorder %v7313_v42, 64  ;;  %v2105_v20 = vpop.permute.xlu1 %2104 }
  0xf3   : > { %vm8248_vm9 = vmand %vm13219_vm4, %vm13248_vm10  ;;  %vm13255_vm4 = vnez %v13067_v25  ;;  %vm13256_vm10 = vnez %v13192_v56  ;;  %v6379_v25 = vpack.c.bf16 %v4979_v61, %v4963_v27  ;;  %v13260_v56 = vmov 0  ;;  %v13285_v61 = vld [vmem:[#allocation23_spill] sm:$0xff] }
  0xf4   : > { %vm8258_vm13 = vmand %vm13235_vm6, %vm13252_vm7  ;;  %v1957_v4 = vsel %vm13255_vm4, %v1925_v5, 0.0  ;;  %v3687_v59 = vsel %vm13256_vm10, %v1925_v5, 0.0  ;;  %vm13258_vm6 = vnez %v12860_v11  ;;  %vm13259_vm4 = vcmp.lt.s32.totalorder %v13184_v45, 64  ;;  %v8345_v5 = vpop.permute.xlu0 %2102 }
  0xf5   : > { %vm2411_vm7 = vmand %vm13258_vm6, %vm13257_vm12  ;;  %v1989_v23 = vrot.slane %v1957_v4, 6  ;;  %3703 = vst [vmem:[#allocation2 + $0x300] sm:$0x7] %v3687_v59  ;;  %vm13265_vm12 = vcmp.lt.s32.totalorder %v6902_v48, 64  ;;  %6380 = vmatprep.subr.bf16.mxu1 %v6379_v25  ;;  %v8463_v4 = vld [vmem:[%s6671_s23 + $0x30] sm:$0x77] }
  0xf6   : > { %vm8278_vm10 = vmand %vm8214_vm2, %vm13259_vm4  ;;  %vm13268_vm2 = vcmp.ge.s32.totalorder %v7284_v41, 0  ;;  %vm13269_vm4 = vnez %v12880_v29  ;;  %6382 = vmatpush1.bf16.msra.mxu1 %v6381_v53  ;;  %v8387_v25 = vpop.permute.xlu1 %2108  ;;  %v8488_v17 = vcombine.high %v8463_v4, %v8463_v4 }
  0xf7   : > { %v13261_v56 = vsel %vm8278_vm10, 4294967295, %v13260_v56  ;;  %vm8286_vm5 = vmand %vm8238_vm3, %vm13262_vm1  ;;  %2021 = vst [vmem:[#allocation2 + $0x108] sm:$0x1c] %v1989_v23  ;;  %vm13272_vm3 = vcmask 531456   ;;  %v4960_v44 = vld [vmem:[#allocation2] sm:$0xff] }
  0xf8   : > { %vm8292_vm6 = vmand %vm2411_vm7, %vm13265_vm12  ;;  %v1926_v57 = vsel %vm13272_vm3, %v1894_v9, %v1896_v63  ;;  %vm12504_vm7 = vcmask 523264   ;;  %vm13274_vm12 = vcmp.lt.s32.totalorder %v13112_v7, 64  ;;  %v6361_v12 = vpack.c.bf16 %v4976_v39, %v4960_v44 }
  0xf9   : > { %v13267_v1 = vsel %vm8292_vm6, 4294967295, %v13266_v1  ;;  %vm8302_vm10 = vmand %vm13269_vm4, %vm13268_vm2  ;;  %v1958_v40 = vsel %vm8154_vm11, %v1926_v57, 0.0  ;;  %vm13277_vm2 = vnez %v13124_v62  ;;  %v2136_v49 = vsel %vm12504_vm7, %v8345_v5, %v2105_v20 }
  0xfa   : > { %vm13273_vm1 = vmmov %vm13272_vm3  ;;  %v3688_v33 = vsel %vm13277_vm2, %v1926_v57, 0.0  ;;  %v1990_v62 = vrot.slane %v1958_v40, 6  ;;  %vm13286_vm3 = vnez %v13285_v61  ;;  %6362 = vmatpush1.bf16.msra.mxu0 %v6361_v12  ;;  %v2168_v59 = vsel %vm8222_vm8, %v2136_v49, 0.0  ;;  %v2479_v31 = vpop.permute.xlu1 %2478 }
  0xfb   : > { %v1927_v8 = vsel %vm13273_vm1, %v1896_v63, %v8296_v18  ;;  %vm8313_vm6 = vmand %vm8248_vm9, %vm13274_vm12  ;;  %vm13278_vm9 = vcmp.lt.s32.totalorder %v13207_v3, 64  ;;  %3704 = vst [vmem:[#allocation2 + $0x308] sm:$0x7] %v3688_v33  ;;  %vm13287_vm12 = vcmp.ge.s32.totalorder %v7313_v42, 0  ;;  %v3787_v27 = vsel %vm8230_vm0, %v2136_v49, 0.0 }
  0xfc   : > { %v1959_v38 = vsel %vm8162_vm14, %v1927_v8, 0.0  ;;  %v3689_v32 = vsel %vm8194_vm15, %v1927_v8, 0.0  ;;  %vm8333_vm11 = vmand %vm8258_vm13, %vm13278_vm9  ;;  %vm13281_vm14 = vcmp.lt.s32.totalorder %v7284_v41, 64  ;;  %vm13284_vm13 = vcmp.ge.s32.totalorder %v13184_v45, 0  ;;  %2022 = vst [vmem:[#allocation2 + $0x110] sm:$0x1c] %v1990_v62 }
  0xfd   : > { %v1991_v15 = vrot.slane %v1959_v38, 6  ;;  %3705 = vst [vmem:[#allocation2 + $0x310] sm:$0x7] %v3689_v32  ;;  %vm8341_vm15 = vmand %vm8302_vm10, %vm13281_vm14  ;;  %vm13289_vm10 = vnez %v13288_v0  ;;  %vm13292_vm9 = vcmp.ge.s32.totalorder %v13112_v7, 0  ;;  %vm13293_vm14 = vnez %v12860_v11  ;;  %v2107_v11 = vpop.permute.xlu0 %2106 }
  0xfe   : > { %vm2412_vm1 = vmand %vm13286_vm3, %vm13284_vm13  ;;  %v2200_v35 = vrot.slane %v2168_v59, 3  ;;  %v3819_v23 = vrot.slane %v3787_v27, 5  ;;  %vm13297_vm8 = vcmp.ge.s32.totalorder %v13207_v3, 0  ;;  %v8400_v57 = vcombine.high %v8148_v14, %v8148_v14  ;;  %v8473_v9 = vpop.permute.xlu1 %2482  ;;  %v13327_v27 = vld [vmem:[#allocation19_spill] sm:$0xff] }
  0xff   : > { %2023 = vst [vmem:[#allocation2 + $0x118] sm:$0x1c] %v1991_v15  ;;  %vm8357_vm2 = vmand %vm13289_vm10, %vm13287_vm12  ;;  %vm13294_vm12 = vcmp.lt.s32.totalorder %v13184_v45, 64  ;;  %vm13365_vm10 = vcmask 515072   ;;  %v13389_v62 = vmov 0 }
 0x100   : > { %vm4032_vm13 = vmand %vm13293_vm14, %vm13292_vm9  ;;  %vm13300_vm9 = vcmp.lt.s32.totalorder %v13112_v7, 64  ;;  %2232 = vst [vmem:[#allocation2 + $0x108] sm:$0xe0] %v2200_v35  ;;  %1423 = vrot.lane.b32.xlu1 %v8400_v57, %s6612_s26  ;;  %1148 = vrot.lane.b32.xlu0 %v8400_v57, %s6611_s25  ;;  %v512_v35 = vadd.s32 4294967295, %v7572_v43 }
 0x101   : > { %vm8375_vm7 = vmand %vm2412_vm1, %vm13294_vm12  ;;  %3851 = vst [vmem:[#allocation2 + $0x300] sm:$0x38] %v3819_v23  ;;  %vm13303_vm1 = vcmask 523264   ;;  %v8434_v14 = vpop.permute.xlu0 %2476 }
 0x102   : > { %vm8383_vm0 = vmand %vm13286_vm3, %vm13297_vm8  ;;  %v2137_v63 = vsel %vm13303_vm1, %v2105_v20, %v2107_v11  ;;  %vm12506_vm8 = vcmask 506880   ;;  %vm13305_vm3 = vcmp.lt.s32.totalorder %v7313_v42, 64 }
 0x103   : > { %vm8391_vm14 = vmand %vm4032_vm13, %vm13300_vm9  ;;  %vm13308_vm9 = vnez %v13261_v56  ;;  %v3788_v33 = vsel %vm8313_vm6, %v2137_v63, 0.0 }
 0x104   : > { %vm13304_vm12 = vmmov %vm13303_vm1  ;;  %v2169_v40 = vsel %vm13308_vm9, %v2137_v63, 0.0  ;;  %v3820_v44 = vrot.slane %v3788_v33, 5  ;;  %660 = vrot.lane.b32.xlu1 %v8463_v4, %s6610_s24  ;;  %658 = vrot.lane.b32.xlu0 %v8400_v57, %s6610_s24 }
 0x105   : > { %v2138_v46 = vsel %vm13304_vm12, %v2107_v11, %v8387_v25  ;;  %vm8406_vm13 = vmand %vm8357_vm2, %vm13305_vm3  ;;  %vm13309_vm3 = vcmp.ge.s32.totalorder %v7394_v54, 0  ;;  %vm13310_vm2 = vnez %v13149_v21  ;;  %v2201_v56 = vrot.slane %v2169_v40, 3  ;;  %v2481_v59 = vpop.permute.xlu0 %2480  ;;  %v13332_v11 = vld [vmem:[#allocation20_spill] sm:$0xff] }
 0x106   : > { %v2170_v38 = vsel %vm8286_vm5, %v2138_v46, 0.0  ;;  %v3789_v32 = vsel %vm8333_vm11, %v2138_v46, 0.0  ;;  %vm2036_vm1 = vmand %vm13310_vm2, %vm13309_vm3  ;;  %vm13311_vm5 = vcmp.lt.s32.totalorder %v13207_v3, 64  ;;  %vm13315_vm12 = vnez %v12758_v60  ;;  %3852 = vst [vmem:[#allocation2 + $0x308] sm:$0x38] %v3820_v44  ;;  %v2101_v44 = vpop.permute.xlu1 %2100 }
 0x107   : > { %v2202_v30 = vrot.slane %v2170_v38, 3  ;;  %v3821_v39 = vrot.slane %v3789_v32, 5  ;;  %vm8430_vm6 = vmand %vm8383_vm0, %vm13311_vm5  ;;  %2233 = vst [vmem:[#allocation2 + $0x110] sm:$0xe0] %v2201_v56  ;;  %v2510_v21 = vsel %vm12506_vm8, %v8434_v14, %v2479_v31  ;;  %vm13316_vm0 = vcmp.lt.s32.totalorder %v7394_v54, 64  ;;  %v13379_v56 = vld [vmem:[#allocation4_spill] sm:$0xff] }
 0x108   : > { %vm13314_vm11 = vmmov %vm13309_vm3  ;;  %vm13319_vm2 = vnez %v13267_v1  ;;  %v4099_v60 = vsel %vm8341_vm15, %v2510_v21, 0.0  ;;  %v2511_v23 = vsel %vm12506_vm8, %v2479_v31, %v2481_v59  ;;  %v2512_v29 = vsel %vm12506_vm8, %v2481_v59, %v8473_v9  ;;  %1152 = vrot.lane.b32.xlu1 %v8488_v17, %s6611_s25  ;;  %1150 = vrot.lane.b32.xlu0 %v8463_v4, %s6611_s25 }
 0x109   : > { %vm1825_vm9 = vmand %vm13315_vm12, %vm13314_vm11  ;;  %2234 = vst [vmem:[#allocation2 + $0x118] sm:$0xe0] %v2202_v30  ;;  %v2542_v15 = vsel %vm13319_vm2, %v2510_v21, 0.0  ;;  %v4131_v49 = vrot.slane %v4099_v60, 7  ;;  %vm13326_vm12 = vcmp.ge.s32.totalorder %v6902_v48, 0  ;;  %vm13333_vm2 = vnez %v13332_v11  ;;  %v13391_v11 = vld [vmem:[#allocation22_spill] sm:$0xff] }
 0x10a   : > { %3853 = vst [vmem:[#allocation2 + $0x310] sm:$0x38] %v3821_v39  ;;  %vm8444_vm3 = vmand %vm2036_vm1, %vm13316_vm0  ;;  %v2574_v20 = vrot.slane %v2542_v15, 5  ;;  %vm13323_vm1 = vcmp.ge.s32.totalorder %v7394_v54, 0  ;;  %v2543_v63 = vsel %vm8375_vm7, %v2511_v23, 0.0  ;;  %v2544_v46 = vsel %vm8406_vm13, %v2512_v29, 0.0  ;;  %v1890_v39 = vpop.permute.xlu0 %1889  ;;  %v2314_v60 = vpop.permute.xlu1 %2313 }
 0x10b   : > { %vm13320_vm5 = vmmov %vm13316_vm0  ;;  %4163 = vst [vmem:[#allocation2 + $0x380] sm:$0xe] %v4131_v49  ;;  %v4100_v40 = vsel %vm8391_vm14, %v2511_v23, 0.0  ;;  %v4101_v38 = vsel %vm8430_vm6, %v2512_v29, 0.0  ;;  %v2575_v8 = vrot.slane %v2543_v63, 5  ;;  %v2576_v53 = vrot.slane %v2544_v46, 5 }
 0x10c   : > { %vm8458_vm11 = vmand %vm1825_vm9, %vm13320_vm5  ;;  %vm13328_vm9 = vnez %v13327_v27  ;;  %2606 = vst [vmem:[#allocation2 + $0x188] sm:$0x38] %v2574_v20  ;;  %v4132_v33 = vrot.slane %v4100_v40, 7  ;;  %v4133_v32 = vrot.slane %v4101_v38, 7  ;;  %vm13337_vm14 = vcmp.lt.s32.totalorder %v6902_v48, 64  ;;  %1427 = vrot.lane.b32.xlu1 %v8488_v17, %s6612_s26  ;;  %1425 = vrot.lane.b32.xlu0 %v8463_v4, %s6612_s26 }
 0x10d   : > { %vm8469_vm15 = vmand %vm13269_vm4, %vm13323_vm1  ;;  %vm13331_vm4 = vcmp.ge.s32.totalorder %v13184_v45, 0  ;;  %vm13334_vm1 = vcmp.lt.s32.totalorder %v7394_v54, 64  ;;  %vm13340_vm6 = vcmp.lt.s32.totalorder %v13184_v45, 64  ;;  %2607 = vst [vmem:[#allocation2 + $0x190] sm:$0x38] %v2575_v8  ;;  %v1003_v15 = vadd.s32 1, %v7572_v43 }
 0x10e   : > { %vm8479_vm0 = vmand %vm13328_vm9, %vm13326_vm12  ;;  %2608 = vst [vmem:[#allocation2 + $0x198] sm:$0x38] %v2576_v53  ;;  %v2475_v12 = vpop.permute.xlu0 %2474  ;;  %v2318_v49 = vpop.permute.xlu1 %2317  ;;  %v140_v30 = vadd.s32 640, %v13379_v56 }
 0x10f   : > { %vm2249_vm5 = vmand %vm13333_vm2, %vm13331_vm4  ;;  %vm13344_vm4 = vnez %v12811_v36  ;;  %4164 = vst [vmem:[#allocation2 + $0x388] sm:$0xe] %v4132_v33  ;;  %v13359_v36 = vld [vmem:[#allocation21_spill] sm:$0xff] }
 0x110   : > { %vm8510_vm7 = vmand %vm8469_vm15, %vm13334_vm1  ;;  %vm13343_vm15 = vcmp.ge.s32.totalorder %v7284_v41, 0  ;;  %4165 = vst [vmem:[#allocation2 + $0x390] sm:$0xe] %v4133_v32  ;;  %1684 = vrot.lane.b32.xlu1 %v8463_v4, %s6613_s27  ;;  %1682 = vrot.lane.b32.xlu0 %v8400_v57, %s6613_s27 }
 0x111   : > { %vm8518_vm13 = vmand %vm8479_vm0, %vm13337_vm14  ;;  %vm13345_vm0 = vcmask 523264   ;;  %vm13346_vm14 = vcmask 531456  }
 0x112   : > { %vm8524_vm12 = vmand %vm2249_vm5, %vm13340_vm6  ;;  %v2135_v48 = vsel %vm13345_vm0, %v2101_v44, %v8345_v5  ;;  %v1924_v45 = vsel %vm13346_vm14, %v1890_v39, %v8242_v13  ;;  %vm13347_vm5 = vcmp.ge.s32.totalorder %v13112_v7, 0  ;;  %vm13355_vm14 = vcmp.lt.s32.totalorder %v7394_v54, 64  ;;  %v2316_v1 = vpop.permute.xlu0 %2315  ;;  %v2312_v2 = vpop.permute.xlu1 %2311 }
 0x113   : > { %vm3867_vm1 = vmand %vm13344_vm4, %vm13343_vm15  ;;  %v2167_v26 = vsel %vm8444_vm3, %v2135_v48, 0.0  ;;  %v1956_v31 = vsel %vm8458_vm11, %v1924_v45, 0.0  ;;  %vm13348_vm15 = vcmp.lt.s32.totalorder %v7284_v41, 64  ;;  %vm13354_vm11 = vcmp.ge.s32.totalorder %v7394_v54, 0 }
 0x114   : > { %vm3868_vm6 = vmand %vm13328_vm9, %vm13347_vm5  ;;  %v2199_v5 = vrot.slane %v2167_v26, 3  ;;  %v1988_v21 = vrot.slane %v1956_v31, 6  ;;  %vm13351_vm9 = vcmp.lt.s32.totalorder %v13112_v7, 64  ;;  %v2509_v41 = vsel %vm12506_vm8, %v2475_v12, %v8434_v14  ;;  %431 = vrot.lane.b32.xlu1 %v8400_v57, %s6614_s28  ;;  %1686 = vrot.lane.b32.xlu0 %v8488_v17, %s6613_s27  ;;  %v13393_v12 = vld [vmem:[#allocation5_spill] sm:$0xff] }
 0x115   : > { %vm8550_vm0 = vmand %vm3867_vm1, %vm13348_vm15  ;;  %v13356_v7 = vmov 0  ;;  %v2541_v20 = vsel %vm8510_vm7, %v2509_v41, 0.0  ;;  %vm13360_vm15 = vnez %v13359_v36  ;;  %vm1019_vm7 = vcmp.ge.s32.totalorder %v1003_v15, 0  ;;  %v4993_v14 = vld [vmem:[#allocation2 + $0x108] sm:$0xff] }
 0x116   : > { %vm8556_vm3 = vmand %vm3868_vm6, %vm13351_vm9  ;;  %2231 = vst [vmem:[#allocation2 + $0x100] sm:$0xe0] %v2199_v5  ;;  %vm13358_vm6 = vcmp.ge.s32.totalorder %v7313_v42, 0  ;;  %v2573_v54 = vrot.slane %v2541_v20, 5  ;;  %vm13364_vm8 = vcmp.ge.s32.totalorder %v13207_v3, 0  ;;  %v2347_v59 = vsel %vm13365_vm10, %v2314_v60, %v2316_v1  ;;  %v8624_v8 = vpop.permute.xlu0 %2319  ;;  %v8666_v13 = vpop.permute.xlu1 %1138 }
 0x117   : > { %vm2247_vm1 = vmand %vm13344_vm4, %vm13354_vm11  ;;  %2020 = vst [vmem:[#allocation2 + $0x100] sm:$0x1c] %v1988_v21  ;;  %vm13361_vm11 = vcmp.lt.s32.totalorder %v7313_v42, 64  ;;  %v2379_v23 = vsel %vm8518_vm13, %v2347_v59, 0.0  ;;  %v3935_v63 = vsel %vm8550_vm0, %v2347_v59, 0.0  ;;  %v157_v41 = vadd.s32 %v13393_v12, %v140_v30 }
 0x118   : > { %vm8569_vm5 = vmand %vm2247_vm1, %vm13355_vm14  ;;  %vm1035_vm14 = vcmp.lt.s32.totalorder %v1003_v15, 64  ;;  %2605 = vst [vmem:[#allocation2 + $0x180] sm:$0x38] %v2573_v54  ;;  %v3967_v40 = vrot.slane %v3935_v63, 2  ;;  %435 = vrot.lane.b32.xlu1 %v8488_v17, %s6614_s28  ;;  %433 = vrot.lane.b32.xlu0 %v8463_v4, %s6614_s28  ;;  %v8700_v54 = vadd.s32 1, %v6718_v16  ;;  %v4995_v63 = vld [vmem:[#allocation2 + $0x118] sm:$0xff] }
 0x119   : > { %v13357_v7 = vsel %vm8569_vm5, 4294967295, %v13356_v7  ;;  %vm2250_vm9 = vmand %vm13360_vm15, %vm13358_vm6  ;;  %vm13367_vm5 = vcmp.lt.s32.totalorder %v13207_v3, 64  ;;  %v13370_v3 = vmov 0  ;;  %2395 = vst [vmem:[#allocation2 + $0x188] sm:$0x7] %v2379_v23 }
 0x11a   : > { %vm8585_vm1 = vmand %vm2250_vm9, %vm13361_vm11  ;;  %3999 = vst [vmem:[#allocation2 + $0x380] ss:$-124 sps:$4 sm:$0xc1] %v3967_v40   ;;  %v8668_v5 = vpop.permute.xlu0 %646  ;;  %v8708_v23 = vpop.permute.xlu1 %1672 }
 0x11b   : > { %vm3869_vm4 = vmand %vm13333_vm2, %vm13364_vm8  ;;  %vm13372_vm8 = vcmp.ge.s32.totalorder %v7719_v28, 0 }
 0x11c   : > { %vm13366_vm6 = vmmov %vm13365_vm10  ;;  %1911 = vrot.lane.b32.xlu1 %v8463_v4, %s6615_s29  ;;  %1909 = vrot.lane.b32.xlu0 %v8400_v57, %s6615_s29 }
 0x11d   : > { %v2348_v27 = vsel %vm13366_vm6, %v2316_v1, %v2318_v49  ;;  %vm8597_vm9 = vmand %vm3869_vm4, %vm13367_vm5  ;;  %vm13378_vm4 = vcmp.ge.s32.totalorder %v6718_v16, 0 }
 0x11e   : > { %v2380_v29 = vsel %vm8524_vm12, %v2348_v27, 0.0  ;;  %v3936_v46 = vsel %vm8556_vm3, %v2348_v27, 0.0  ;;  %vm8616_vm10 = vmand %vm1019_vm7, %vm1035_vm14  ;;  %vm13373_vm12 = vcmp.lt.s32.totalorder %v7719_v28, 64  ;;  %vm528_vm7 = vcmp.ge.s32.totalorder %v512_v35, 0  ;;  %v4992_v53 = vld [vmem:[#allocation2 + $0x100] sm:$0xff] }
 0x11f   : > { %v13371_v3 = vsel %vm8616_vm10, 4294967295, %v13370_v3  ;;  %2396 = vst [vmem:[#allocation2 + $0x190] sm:$0x7] %v2380_v29  ;;  %v3968_v38 = vrot.slane %v3936_v46, 2  ;;  %vm1067_vm13 = vmand %vm8616_vm10, %vm13372_vm8  ;;  %vm13380_vm14 = vnez %v13357_v7  ;;  %v1279_v29 = vadd.s32 2, %v7572_v43  ;;  %v5025_v46 = vld [vmem:[#allocation2 + $0x208] sm:$0xff] }
 0x120   : > { %vm8628_vm0 = vmand %vm1067_vm13, %vm13373_vm12  ;;  %vm544_vm13 = vcmp.lt.s32.totalorder %v512_v35, 64  ;;  %vm13385_vm12 = vcmp.lt.s32.totalorder %v7559_v47, 64  ;;  %2120 = vrot.lane.b32.xlu1 %v8400_v57, %s6618_s30  ;;  %1913 = vrot.lane.b32.xlu0 %v8488_v17, %s6615_s29 }
 0x121   : > { %4000 = vst [vmem:[#allocation2 + $0x388] ss:$-124 sps:$4 sm:$0xc1] %v3968_v38   ;;  %vm13376_vm3 = vmmov %vm13366_vm6  ;;  %vm13381_vm6 = vcmp.lt.s32.totalorder %v6718_v16, 64 }
 0x122   : > { %v2346_v33 = vsel %vm13376_vm3, %v2312_v2, %v2314_v60  ;;  %vm13377_vm5 = vmmov %vm13376_vm3  ;;  %v8682_v60 = vadd.s32 4294967295, %v7642_v10  ;;  %v189_v2 = vshra.s32 %v157_v41, 6 }
 0x123   : > { %v2349_v32 = vsel %vm13377_vm5, %v2318_v49, %v8624_v8  ;;  %vm3113_vm11 = vmand %vm13360_vm15, %vm13378_vm4  ;;  %v2378_v44 = vsel %vm13380_vm14, %v2346_v33, 0.0  ;;  %vm13388_vm5 = vcmask 1039360   ;;  %v5009_v49 = vld [vmem:[#allocation2 + $0x188] sm:$0xff] }
 0x124   : > { %v2381_v39 = vsel %vm8585_vm1, %v2349_v32, 0.0  ;;  %v3937_v48 = vsel %vm8597_vm9, %v2349_v32, 0.0  ;;  %vm8652_vm8 = vmand %vm3113_vm11, %vm13381_vm6  ;;  %2394 = vst [vmem:[#allocation2 + $0x180] sm:$0x7] %v2378_v44  ;;  %vm13384_vm1 = vcmp.ge.s32.totalorder %v7559_v47, 0  ;;  %v1167_v21 = vsel %vm13388_vm5, %v7561_v55, %v8666_v13  ;;  %2124 = vrot.lane.b32.xlu1 %v8488_v17, %s6618_s30  ;;  %2122 = vrot.lane.b32.xlu0 %v8463_v4, %s6618_s30 }
 0x125   : > { %2397 = vst [vmem:[#allocation2 + $0x198] sm:$0x7] %v2381_v39  ;;  %v3969_v26 = vrot.slane %v3937_v48, 2  ;;  %vm4685_vm9 = vmand %vm13333_vm2, %vm13384_vm1  ;;  %vm13392_vm2 = vcmask 7168   ;;  %v1199_v7 = vsel %vm8628_vm0, %v1167_v21, 0.0  ;;  %v3182_v55 = vsel %vm8652_vm8, %v1167_v21, 0.0 }
 0x126   : > { %vm8662_vm3 = vmand %vm4685_vm9, %vm13385_vm12  ;;  %v675_v15 = vsel %vm13392_vm2, %v13391_v11, %v8668_v5  ;;  %vm13394_vm11 = vcmp.ge.s32.totalorder %v7719_v28, 0  ;;  %v1231_v1 = vrot.slane %v1199_v7, 7  ;;  %v3214_v59 = vrot.slane %v3182_v55, 1  ;;  %v5010_v33 = vld [vmem:[#allocation2 + $0x190] sm:$0xff]  ;;  %v5024_v7 = vld [vmem:[#allocation2 + $0x200] sm:$0xff] }
 0x127   : > { %4001 = vst [vmem:[#allocation2 + $0x390] ss:$-124 sps:$4 sm:$0xc1] %v3969_v26   ;;  %vm8674_vm4 = vmand %vm528_vm7, %vm544_vm13  ;;  %v4754_v20 = vsel %vm8662_vm3, %v1167_v21, 0.0  ;;  %vm13395_vm0 = vcmp.lt.s32.totalorder %v7719_v28, 64  ;;  %v6363_v42 = vpack.c.bf16 %v5009_v49, %v4993_v14  ;;  %vm13396_vm6 = vcmp.ge.s32.totalorder %v6718_v16, 0 }
 0x128   : > { %v13390_v62 = vsel %vm8674_vm4, 4294967295, %v13389_v62  ;;  %vm576_vm7 = vmand %vm8674_vm4, %vm13394_vm11  ;;  %v4786_v27 = vrot.slane %v4754_v20, 3  ;;  %vm13397_vm8 = vnez %v13194_v52  ;;  %1263 = vst [vmem:[#allocation2 + $0xa0] sm:$0xe] %v1231_v1  ;;  %vm13398_vm1 = vcmp.lt.s32.totalorder %v6718_v16, 64  ;;  %v5041_v26 = vld [vmem:[#allocation2 + $0x288] sm:$0xff]  ;;  %2496 = vrot.lane.b32.xlu1 %v8463_v4, %s6619_s3  ;;  %2494 = vrot.lane.b32.xlu0 %v8400_v57, %s6619_s3 }
 0x129   : > { %vm592_vm14 = vmand %vm576_vm7, %vm13395_vm0  ;;  %3246 = vst [vmem:[#allocation2 + $0x298] ss:$-124 sps:$4 sm:$0x83] %v3214_v59   ;;  %vm12510_vm12 = vcmp.ge.s32.totalorder %v8682_v60, 0  ;;  %6364 = vmatprep.subr.bf16.mxu0 %v6363_v42  ;;  %vm13401_vm3 = vcmp.ge.s32.totalorder %v7559_v47, 0  ;;  %vm13402_vm5 = vnez %v13186_v22  ;;  %vm12509_vm11 = vcmp.lt.s32.totalorder %v8682_v60, 64 }
 0x12a   : > { %vm2820_vm13 = vmand %vm13397_vm8, %vm13396_vm6  ;;  %v707_v35 = vsel %vm592_vm14, %v675_v15, 0.0  ;;  %4818 = vst [vmem:[#allocation2 + $0x410] sm:$0xe0] %v4786_v27  ;;  %vm12508_vm7 = vcmp.ge.s32.totalorder %v8700_v54, 0  ;;  %vm12507_vm0 = vcmp.lt.s32.totalorder %v8700_v54, 64  ;;  %vm13403_vm14 = vcmp.lt.s32.totalorder %v7559_v47, 64 }
 0x12b   : > { %vm8713_vm9 = vmand %vm2820_vm13, %vm13398_vm1  ;;  %v739_v38 = vrot.slane %v707_v35, 5  ;;  %v5008_v30 = vld [vmem:[#allocation2 + $0x180] sm:$0xff]  ;;  %vm13404_vm13 = vcmask 539648   ;;  %vm13405_vm1 = vnez %v13077_v58  ;;  %v8740_v21 = vand.u32 63, %v157_v41  ;;  %v4994_v11 = vld [vmem:[#allocation2 + $0x110] sm:$0xff] }
 0x12c   : > { %vm4377_vm2 = vmand %vm13402_vm5, %vm13401_vm3  ;;  %v2888_v32 = vsel %vm8713_vm9, %v675_v15, 0.0  ;;  %v5011_v44 = vld [vmem:[#allocation2 + $0x198] sm:$0xff]  ;;  %v1701_v39 = vsel %vm13404_vm13, %v7852_v50, %v8708_v23  ;;  %v6365_v48 = vpack.c.bf16 %v5008_v30, %v4992_v53  ;;  %vm1295_vm3 = vcmp.ge.s32.totalorder %v1279_v29, 0  ;;  %v5040_v41 = vld [vmem:[#allocation2 + $0x280] sm:$0xff]  ;;  %2331 = vrot.lane.b32.xlu1 %v8400_v57, %s6620_s4  ;;  %2498 = vrot.lane.b32.xlu0 %v8488_v17, %s6619_s3 }
 0x12d   : > { %vm4393_vm6 = vmand %vm4377_vm2, %vm13403_vm14  ;;  %771 = vst [vmem:[#allocation2 + $0x20] sm:$0x38] %v739_v38  ;;  %v2920_v22 = vrot.slane %v2888_v32, 7  ;;  %v6383_v45 = vpack.c.bf16 %v5011_v44, %v4995_v63  ;;  %vm1311_vm5 = vcmp.lt.s32.totalorder %v1279_v29, 64  ;;  %v8750_v20 = vand.u32 63, %v189_v2  ;;  %v5057_v59 = vld [vmem:[#allocation2 + $0x308] sm:$0xff] }
 0x12e   : > { %v4445_v31 = vsel %vm4393_vm6, %v675_v15, 0.0  ;;  %vm1586_vm9 = vmand %vm13405_vm1, %vm12510_vm12  ;;  %v8748_v15 = vpop.permute.xlu0 %1413  ;;  %6366 = vmatpush1.bf16.msra.mxu0 %v6365_v48  ;;  %v6367_v14 = vpack.c.bf16 %v5041_v26, %v5025_v46  ;;  %v6385_v49 = vpack.c.bf16 %v5010_v33, %v4994_v11  ;;  %vm13408_vm14 = vnez %v12964_v6  ;;  %v5073_v27 = vld [vmem:[#allocation2 + $0x388] sm:$0xff]  ;;  %v5056_v2 = vld [vmem:[#allocation2 + $0x300] sm:$0xff] }
 0x12f   : > { %2952 = vst [vmem:[#allocation2 + $0x218] sm:$0xe] %v2920_v22  ;;  %v4477_v55 = vrot.slane %v4445_v31, 1  ;;  %vm8744_vm2 = vmand %vm1586_vm9, %vm12509_vm11  ;;  %6384 = vmatprep.subr.bf16.mxu1 %v6383_v45  ;;  %v6369_v35 = vpack.c.bf16 %v5040_v41, %v5024_v7  ;;  %v13409_v46 = vmov 0  ;;  %v513_v38 = vadd.s32 4294967295, %v8740_v21  ;;  %v5072_v53 = vld [vmem:[#allocation2 + $0x380] sm:$0xff] }
 0x130   : > { %vm3458_vm6 = vmand %vm13408_vm14, %vm12508_vm7  ;;  %v1733_v1 = vsel %vm8744_vm2, %v1701_v39, 0.0  ;;  %6368 = vmatprep.subr.bf16.mxu0 %v6367_v14  ;;  %6386 = vmatpush1.bf16.msra.mxu1 %v6385_v49  ;;  %vm13411_vm2 = vcmask 1031168   ;;  %v8779_v29 = vadd.s32 4294967294, %v8750_v20  ;;  %v6371_v32 = vpack.c.bf16 %v5073_v27, %v5057_v59  ;;  %v5089_v48 = vld [vmem:[#allocation2 + $0x408] sm:$0xff]  ;;  %v5104_v45 = vld [vmem:[#allocation2 + $0x480] sm:$0xff] }
 0x131   : > { %4509 = vst [vmem:[#allocation2 + $0x410] ss:$-124 sps:$4 sm:$0x83] %v4477_v55   ;;  %vm3490_vm13 = vmand %vm3458_vm6, %vm12507_vm0  ;;  %v1765_v42 = vrot.slane %v1733_v1, 1  ;;  %v1442_v40 = vsel %vm13411_vm2, %v7696_v37, %v8748_v15  ;;  %vm13412_vm6 = vcmp.ge.s32.totalorder %v7719_v28, 0  ;;  %v5105_v37 = vld [vmem:[#allocation2 + $0x488] sm:$0xff]  ;;  %v6373_v44 = vpack.c.bf16 %v5072_v53, %v5056_v2  ;;  %2335 = vrot.lane.b32.xlu1 %v8488_v17, %s6620_s4  ;;  %2333 = vrot.lane.b32.xlu0 %v8463_v4, %s6620_s4 }
 0x132   : > { %v3542_v63 = vsel %vm3490_vm13, %v1701_v39, 0.0  ;;  %vm8766_vm9 = vmand %vm1295_vm3, %vm1311_vm5  ;;  %6370 = vmatpush1.bf16.msra.mxu0 %v6369_v35  ;;  %vm13413_vm3 = vcmp.lt.s32.totalorder %v7719_v28, 64  ;;  %vm13414_vm2 = vcmp.ge.s32.totalorder %v6718_v16, 0  ;;  %vm13416_vm7 = vcmp.lt.s32.totalorder %v6718_v16, 64  ;;  %v8793_v39 = vpop.permute.xlu1 %648  ;;  %v8848_v1 = vld [vmem:[%s6671_s23 + $0x18] sm:$0x77]  ;;  %v8871_v53 = vpop.permute.xlu0 %421 }
 0x133   : > { %v13410_v46 = vsel %vm8766_vm9, 4294967295, %v13409_v46  ;;  %1797 = vst [vmem:[#allocation2 + $0x120] ss:$-124 sps:$4 sm:$0x83] %v1765_v42   ;;  %v3574_v33 = vrot.slane %v3542_v63, 3  ;;  %vm1343_vm13 = vmand %vm8766_vm9, %vm13412_vm6  ;;  %vm13415_vm6 = vnez %v13288_v0  ;;  %6372 = vmatprep.subr.bf16.mxu0 %v6371_v32  ;;  %vm13417_vm12 = vcmp.ge.s32.totalorder %v7559_v47, 0 }
 0x134   : > { %vm1359_vm5 = vmand %vm1343_vm13, %vm13413_vm3  ;;  %vm545_vm3 = vcmp.lt.s32.totalorder %v513_v38, 64  ;;  %vm13418_vm9 = vnez %v13285_v61  ;;  %v6375_v31 = vpack.c.bf16 %v5105_v37, %v5089_v48  ;;  %vm788_vm13 = vcmp.ge.s32.totalorder %v8740_v21, 0  ;;  %v5088_v61 = vld [vmem:[#allocation2 + $0x400] sm:$0xff]  ;;  %v5026_v42 = vld [vmem:[#allocation2 + $0x210] sm:$0xff] }
 0x135   : > { %3606 = vst [vmem:[#allocation2 + $0x298] sm:$0xe0] %v3574_v33  ;;  %vm3278_vm0 = vmand %vm13415_vm6, %vm13414_vm2  ;;  %v1474_v30 = vsel %vm1359_vm5, %v1442_v40, 0.0  ;;  %vm12514_vm5 = vcmp.ge.s32.totalorder %v8779_v29, 0  ;;  %vm13419_vm2 = vcmp.lt.s32.totalorder %v7559_v47, 64  ;;  %v13421_v55 = vmov 0  ;;  %662 = vrot.lane.b32.xlu0 %v8488_v17, %s6610_s24 }
 0x136   : > { %vm3294_vm11 = vmand %vm3278_vm0, %vm13416_vm7  ;;  %v1506_v22 = vrot.slane %v1474_v30, 4  ;;  %6374 = vmatpush1.bf16.msra.mxu0 %v6373_v44  ;;  %vm12517_vm0 = vcmp.lt.s32.totalorder %v8779_v29, 64  ;;  %v6377_v50 = vpack.c.bf16 %v5104_v45, %v5088_v61  ;;  %v8823_v14 = vadd.s32 2, %v6718_v16  ;;  %v8863_v35 = vld [vmem:[%s6671_s23 + $0x38] sm:$0x77]  ;;  %v5042_v33 = vld [vmem:[#allocation2 + $0x290] sm:$0xff] }
 0x137   : > { %vm4834_vm15 = vmand %vm13418_vm9, %vm13417_vm12  ;;  %v3346_v26 = vsel %vm3294_vm11, %v1442_v40, 0.0  ;;  %vm13420_vm12 = vcmp.ge.s32.totalorder %v513_v38, 0  ;;  %vm13423_vm9 = vcmask 7168   ;;  %6376 = vmatprep.subr.bf16.mxu0 %v6375_v31  ;;  %v221_v41 = vadd.s32 4294967294, %v8740_v21  ;;  %1154 = vrot.lane.b32.xlu1 %v8863_v35, %s6611_s25 }
 0x138   : > { %vm4850_vm7 = vmand %vm4834_vm15, %vm13419_vm2  ;;  %1538 = vst [vmem:[#allocation2 + $0xa0] sm:$0x70] %v1506_v22  ;;  %v3378_v11 = vrot.slane %v3346_v26, 6  ;;  %vm804_vm15 = vcmp.lt.s32.totalorder %v8740_v21, 64  ;;  %v676_v47 = vsel %vm13423_vm9, %v8668_v5, %v8793_v39  ;;  %v13424_v5 = vmov 0  ;;  %v8901_v26 = vpop.permute.xlu1 %2321 }
 0x139   : > { %v4902_v7 = vsel %vm4850_vm7, %v1442_v40, 0.0  ;;  %vm8810_vm11 = vmand %vm13420_vm12, %vm545_vm3  ;;  %vm12516_vm12 = vcmp.ge.s32.totalorder %v7642_v10, 0  ;;  %v5027_v40 = vld [vmem:[#allocation2 + $0x218] sm:$0xff]  ;;  %v6389_v37 = vpack.c.bf16 %v5042_v33, %v5026_v42  ;;  %v13427_v22 = vmov 0  ;;  %1429 = vrot.lane.b32.xlu0 %v8863_v35, %s6612_s26 }
 0x13a   : > { %v13422_v55 = vsel %vm8810_vm11, 4294967295, %v13421_v55  ;;  %3410 = vst [vmem:[#allocation2 + $0x298] sm:$0x1c] %v3378_v11  ;;  %4918 = vst [vmem:[#allocation2 + $0x490] sm:$0x7] %v4902_v7  ;;  %6378 = vmatpush1.bf16.msra.mxu0 %v6377_v50  ;;  %v13442_v50 = vmov 0.0  }
 0x13b   : > { %vm577_vm2 = vmand %vm8810_vm11, %vm12514_vm5  ;;  %1688 = vrot.lane.b32.xlu1 %v8863_v35, %s6613_s27 }
 0x13c   : > { %vm593_vm3 = vmand %vm577_vm2, %vm12517_vm0  ;;  %vm12520_vm2 = vcmp.ge.s32.totalorder %v8823_v14, 0 }
 0x13d   : > { %vm8829_vm7 = vmand %vm788_vm13, %vm804_vm15  ;;  %v708_v49 = vsel %vm593_vm3, %v676_v47, 0.0  ;;  %vm12515_vm13 = vcmp.lt.s32.totalorder %v7642_v10, 64  ;;  %437 = vrot.lane.b32.xlu0 %v8863_v35, %s6614_s28 }
 0x13e   : > { %v13425_v5 = vsel %vm8829_vm7, 4294967295, %v13424_v5  ;;  %vm836_vm9 = vmand %vm8829_vm7, %vm12514_vm5  ;;  %v740_v16 = vrot.slane %v708_v49, 5  ;;  %vm12521_vm5 = vcmp.lt.s32.totalorder %v8823_v14, 64 }
 0x13f   : > { %vm852_vm15 = vmand %vm836_vm9, %vm12517_vm0  ;;  %vm13426_vm0 = vnez %v12747_v24  ;;  %664 = vrot.lane.b32.xlu1 %v8863_v35, %s6610_s24 }
 0x140   : > { %v908_v59 = vsel %vm852_vm15, %v8848_v1, 0.0  ;;  %vm2821_vm3 = vmand %vm8674_vm4, %vm12516_vm12  ;;  %772 = vst [vmem:[#allocation2 + $0x28] sm:$0x38] %v740_v16  ;;  %vm253_vm12 = vcmp.lt.s32.totalorder %v221_v41, 64  ;;  %v13443_v16 = vmov 0 }
 0x141   : > { %v940_v27 = vrot.slane %v908_v59, 2  ;;  %vm2837_vm9 = vmand %vm2821_vm3, %vm12515_vm13  ;;  %v5043_v38 = vld [vmem:[#allocation2 + $0x298] sm:$0xff]  ;;  %vm237_vm13 = vcmp.ge.s32.totalorder %v221_v41, 0  ;;  %2126 = vrot.lane.b32.xlu0 %v8863_v35, %s6618_s30 }
 0x142   : > { %vm4378_vm15 = vmand %vm13397_vm8, %vm12520_vm2  ;;  %v2889_v63 = vsel %vm2837_vm9, %v676_v47, 0.0  ;;  %v6387_v4 = vpack.c.bf16 %v5043_v38, %v5027_v40  ;;  %v8980_v40 = vpop.permute.xlu1 %1899 }
 0x143   : > { %972 = vst [vmem:[#allocation2 + $0xa8] ss:$-124 sps:$4 sm:$0xc1] %v940_v27   ;;  %vm4394_vm3 = vmand %vm4378_vm15, %vm12521_vm5  ;;  %v2921_v2 = vrot.slane %v2889_v63, 7  ;;  %2337 = vrot.lane.b32.xlu1 %v8863_v35, %s6620_s4  ;;  %v13448_v27 = vld [vmem:[#allocation8_spill] sm:$0xff] }
 0x144   : > { %vm4542_vm7 = vmand %vm13426_vm0, %vm12520_vm2  ;;  %v4446_v32 = vsel %vm4394_vm3, %v676_v47, 0.0  ;;  %6388 = vmatprep.subr.bf16.mxu1 %v6387_v4  ;;  %vm13429_vm2 = vcmask 15360  }
 0x145   : > { %vm4558_vm9 = vmand %vm4542_vm7, %vm12521_vm5  ;;  %2953 = vst [vmem:[#allocation2 + $0x220] sm:$0xe] %v2921_v2  ;;  %v4478_v30 = vrot.slane %v4446_v32, 1  ;;  %v449_v48 = vsel %vm13429_vm2, %v8174_v34, %v8871_v53  ;;  %6390 = vmatpush1.bf16.msra.mxu1 %v6389_v37  ;;  %vm13430_vm7 = vcmp.ge.s32.totalorder %v8779_v29, 0  ;;  %vm13433_vm5 = vcmp.lt.s32.totalorder %v7642_v10, 64  ;;  %2500 = vrot.lane.b32.xlu0 %v8863_v35, %s6619_s3 }
 0x146   : > { %v4606_v44 = vsel %vm4558_vm9, %v8848_v1, 0.0  ;;  %vm8882_vm15 = vmand %vm237_vm13, %vm253_vm12  ;;  %vm13431_vm12 = vcmp.lt.s32.totalorder %v8779_v29, 64  ;;  %vm13432_vm9 = vcmp.ge.s32.totalorder %v7642_v10, 0  ;;  %v141_v37 = vadd.s32 768, %v13379_v56  ;;  %v9033_v52 = vpop.permute.xlu1 %1415 }
 0x147   : > { %v13428_v22 = vsel %vm8882_vm15, 4294967295, %v13427_v22  ;;  %v4638_v45 = vrot.slane %v4606_v44, 6  ;;  %4510 = vst [vmem:[#allocation2 + $0x418] ss:$-124 sps:$4 sm:$0x83] %v4478_v30   ;;  %vm317_vm3 = vmand %vm8882_vm15, %vm13430_vm7  ;;  %vm13434_vm7 = vcmp.ge.s32.totalorder %v8823_v14, 0  ;;  %1915 = vrot.lane.b32.xlu1 %v8863_v35, %s6615_s29 }
 0x148   : > { %vm349_vm13 = vmand %vm317_vm3, %vm13431_vm12  ;;  %vm13435_vm12 = vcmp.lt.s32.totalorder %v8823_v14, 64  ;;  %v142_v44 = vadd.s32 896, %v13379_v56 }
 0x149   : > { %4670 = vst [vmem:[#allocation2 + $0x418] sm:$0x1c] %v4638_v45  ;;  %vm2641_vm2 = vmand %vm13405_vm1, %vm13432_vm9  ;;  %v481_v34 = vsel %vm349_vm13, %v449_v48, 0.0  ;;  %vm13436_vm9 = vcmask 515072  }
 0x14a   : > { %vm2673_vm11 = vmand %vm2641_vm2, %vm13433_vm5  ;;  %497 = vst [vmem:[#allocation2 + $0x28] sm:$0x7] %v481_v34  ;;  %v2350_v61 = vsel %vm13436_vm9, %v8624_v8, %v8901_v26  ;;  %vm13437_vm5 = vcmp.ge.s32.totalorder %v8682_v60, 0  ;;  %v8933_v8 = vld [vmem:[%s12402_s1] sm:$0xff]  ;;  %vm13440_vm9 = vnez %v13359_v36 }
 0x14b   : > { %vm4214_vm3 = vmand %vm13408_vm14, %vm13434_vm7  ;;  %v2725_v31 = vsel %vm2673_vm11, %v449_v48, 0.0  ;;  %vm13438_vm14 = vcmp.lt.s32.totalorder %v8682_v60, 64  ;;  %vm787_vm7 = vcmp.ge.s32.totalorder %v7572_v43, 0 }
 0x14c   : > { %vm4246_vm13 = vmand %vm4214_vm3, %vm13435_vm12  ;;  %v2757_v11 = vrot.slane %v2725_v31, 2  ;;  %vm803_vm3 = vcmp.lt.s32.totalorder %v7572_v43, 64  ;;  %vm12525_vm12 = vcmask 654336   ;;  %v8943_v43 = vpop.permute.xlu0 %2110 }
 0x14d   : > { %v4298_v7 = vsel %vm4246_vm13, %v449_v48, 0.0  ;;  %vm2251_vm2 = vmand %vm8616_vm10, %vm13437_vm5  ;;  %vm13439_vm13 = vcmp.ge.s32.totalorder %v8700_v54, 0  ;;  %6306 = vmatmul.mubr.msk.f32.vlgmr.msra.gmra.mrb[0].mxu0 %vm12525_vm12, %v8933_v8 }
 0x14e   : > { %2789 = vst [vmem:[#allocation2 + $0x220] ss:$-124 sps:$4 sm:$0xc1] %v2757_v11   ;;  %v4330_v6 = vrot.slane %v4298_v7, 4  ;;  %vm2267_vm11 = vmand %vm2251_vm2, %vm13438_vm14  ;;  %vm13441_vm2 = vcmp.lt.s32.totalorder %v8700_v54, 64  ;;  %5209 = vmatprep.mubr.f32.mxu0 %v13442_v50  ;;  %v159_v11 = vadd.s32 %v13393_v12, %v142_v44  ;;  %v13462_v7 = vmov 0 }
 0x14f   : > { %vm3870_vm5 = vmand %vm13440_vm9, %vm13439_vm13  ;;  %v2382_v47 = vsel %vm2267_vm11, %v2350_v61, 0.0  ;;  %vm13445_vm11 = vcmp.ge.s32.totalorder %v7719_v28, 0 }
 0x150   : > { %4362 = vst [vmem:[#allocation2 + $0x398] sm:$0x70] %v4330_v6  ;;  %vm3886_vm14 = vmand %vm3870_vm5, %vm13441_vm2  ;;  %vm13446_vm5 = vcmp.lt.s32.totalorder %v7719_v28, 64  ;;  %v8974_v28 = vcombine.high %v8863_v35, %v8863_v35  ;;  %v9002_v24 = vpop.permute.xlu0 %2484 }
 0x151   : > { %2398 = vst [vmem:[#allocation2 + $0x1a0] sm:$0x7] %v2382_v47  ;;  %v3938_v49 = vsel %vm3886_vm14, %v2350_v61, 0.0  ;;  %vm8946_vm1 = vmand %vm787_vm7, %vm803_vm3  ;;  %vm13447_vm7 = vcmask 523264   ;;  %vm13449_vm3 = vcmp.ge.s32.totalorder %v8682_v60, 0  ;;  %v1004_v47 = vadd.s32 1, %v8740_v21 }
 0x152   : > { %v13444_v16 = vsel %vm8946_vm1, 4294967295, %v13443_v16  ;;  %v3970_v41 = vrot.slane %v3938_v49, 2  ;;  %vm835_vm13 = vmand %vm8946_vm1, %vm13445_vm11  ;;  %v2139_v59 = vsel %vm13447_vm7, %v8387_v25, %v8943_v43  ;;  %vm13450_vm11 = vcmp.lt.s32.totalorder %v8682_v60, 64  ;;  %1431 = vrot.lane.b32.xlu1 %v8974_v28, %s6612_s26  ;;  %1156 = vrot.lane.b32.xlu0 %v8974_v28, %s6611_s25 }
 0x153   : > { %vm851_vm2 = vmand %vm835_vm13, %vm13446_vm5  ;;  %vm13451_vm13 = vcmp.ge.s32.totalorder %v7642_v10, 0  ;;  %vm1020_vm15 = vcmp.ge.s32.totalorder %v1004_v47, 0 }
 0x154   : > { %4002 = vst [vmem:[#allocation2 + $0x398] ss:$-124 sps:$4 sm:$0xc1] %v3970_v41   ;;  %v907_v42 = vsel %vm851_vm2, %v13448_v27, 0.0  ;;  %vm2040_vm14 = vmand %vm8946_vm1, %vm13449_vm3  ;;  %vm13452_vm2 = vcmp.lt.s32.totalorder %v7642_v10, 64  ;;  %vm13453_vm3 = vcmp.ge.s32.totalorder %v8700_v54, 0  ;;  %v9067_v27 = vpop.permute.xlu0 %1140 }
 0x155   : > { %v939_v63 = vrot.slane %v907_v42, 2  ;;  %vm2056_vm12 = vmand %vm2040_vm14, %vm13450_vm11  ;;  %v191_v41 = vshra.s32 %v159_v11, 6  ;;  %v9069_v42 = vand.u32 63, %v159_v11 }
 0x156   : > { %vm2969_vm5 = vmand %vm8946_vm1, %vm13451_vm13  ;;  %v2171_v25 = vsel %vm2056_vm12, %v2139_v59, 0.0  ;;  %vm13454_vm12 = vcmp.lt.s32.totalorder %v8700_v54, 64  ;;  %vm13455_vm13 = vcmask 531456   ;;  %666 = vrot.lane.b32.xlu0 %v8974_v28, %s6610_s24 }
 0x157   : > { %971 = vst [vmem:[#allocation2 + $0xa0] ss:$-124 sps:$4 sm:$0xc1] %v939_v63   ;;  %vm2985_vm7 = vmand %vm2969_vm5, %vm13452_vm2  ;;  %v2203_v38 = vrot.slane %v2171_v25, 3  ;;  %v1928_v35 = vsel %vm13455_vm13, %v8296_v18, %v8980_v40  ;;  %vm13456_vm5 = vcmp.ge.s32.totalorder %v8682_v60, 0  ;;  %v1280_v18 = vadd.s32 2, %v8740_v21 }
 0x158   : > { %v3034_v2 = vsel %vm2985_vm7, %v8848_v1, 0.0  ;;  %vm3722_vm14 = vmand %vm13426_vm0, %vm13453_vm3  ;;  %v9007_v1 = vld [vmem:[%s6671_s23 + $0x40] sm:$0x77]  ;;  %vm13457_vm0 = vcmp.lt.s32.totalorder %v8682_v60, 64  ;;  %vm13458_vm13 = vcmask 506880  }
 0x159   : > { %v3066_v4 = vrot.slane %v3034_v2, 4  ;;  %vm3738_vm11 = vmand %vm3722_vm14, %vm13454_vm12  ;;  %2235 = vst [vmem:[#allocation2 + $0x120] sm:$0xe0] %v2203_v38  ;;  %v2513_v45 = vsel %vm13458_vm13, %v8473_v9, %v9002_v24  ;;  %668 = vrot.lane.b32.xlu1 %v9007_v1, %s6610_s24  ;;  %v158_v9 = vadd.s32 %v13393_v12, %v141_v37  ;;  %vm13461_vm13 = vcmp.lt.s32.totalorder %v8700_v54, 64  ;;  %v5074_v37 = vld [vmem:[#allocation2 + $0x390] sm:$0xff] }
 0x15a   : > { %v3790_v33 = vsel %vm3738_vm11, %v2139_v59, 0.0  ;;  %vm1829_vm2 = vmand %vm8674_vm4, %vm13456_vm5  ;;  %1158 = vrot.lane.b32.xlu0 %v9007_v1, %s6611_s25  ;;  %v9081_v2 = vand.u32 63, %v191_v41 }
 0x15b   : > { %3098 = vst [vmem:[#allocation2 + $0x220] sm:$0x70] %v3066_v4  ;;  %v3822_v32 = vrot.slane %v3790_v33, 5  ;;  %vm1845_vm7 = vmand %vm1829_vm2, %vm13457_vm0  ;;  %v9085_v4 = vcombine.high %v9007_v1, %v9007_v1  ;;  %v13472_v33 = vmov 0 }
 0x15c   : > { %vm3622_vm14 = vmand %vm13397_vm8, %vm13453_vm3  ;;  %v1960_v30 = vsel %vm1845_vm7, %v1928_v35, 0.0  ;;  %vm13459_vm8 = vnez %v13410_v46  ;;  %vm1296_vm3 = vcmp.ge.s32.totalorder %v1280_v18, 0  ;;  %v9114_v44 = vadd.s32 4294967294, %v9081_v2 }
 0x15d   : > { %3854 = vst [vmem:[#allocation2 + $0x318] sm:$0x38] %v3822_v32  ;;  %vm3638_vm11 = vmand %vm3622_vm14, %vm13454_vm12  ;;  %v1992_v48 = vrot.slane %v1960_v30, 6  ;;  %vm1312_vm14 = vcmp.lt.s32.totalorder %v1280_v18, 64  ;;  %vm13460_vm12 = vcmp.ge.s32.totalorder %v8700_v54, 0  ;;  %v190_v54 = vshra.s32 %v158_v9, 6  ;;  %1160 = vrot.lane.b32.xlu1 %v9085_v4, %s6611_s25 }
 0x15e   : > { %v3690_v34 = vsel %vm3638_vm11, %v1928_v35, 0.0  ;;  %vm2414_vm2 = vmand %vm13459_vm8, %vm13456_vm5  ;;  %1433 = vrot.lane.b32.xlu0 %v9007_v1, %s6612_s26  ;;  %13471 = vst [vmem:[#allocation15_spill] sm:$0xff] %v9085_v4  ;;  %v515_v18 = vadd.s32 4294967295, %v9069_v42 }
 0x15f   : > { %2024 = vst [vmem:[#allocation2 + $0x120] sm:$0x1c] %v1992_v48  ;;  %3706 = vst [vmem:[#allocation2 + $0x318] sm:$0x7] %v3690_v34  ;;  %v9077_v25 = vand.u32 63, %v190_v54 }
 0x160   : > { %vm2430_vm7 = vmand %vm2414_vm2, %vm13457_vm0  ;;  %vm13464_vm0 = vcmask 1031168  }
 0x161   : > { %vm4034_vm11 = vmand %vm13415_vm6, %vm13460_vm12  ;;  %v2545_v31 = vsel %vm2430_vm7, %v2513_v45, 0.0  ;;  %v1443_v6 = vsel %vm13464_vm0, %v8748_v15, %v9033_v52  ;;  %vm13465_vm7 = vcmp.ge.s32.totalorder %v8779_v29, 0  ;;  %v9063_v15 = vand.u32 63, %v158_v9  ;;  %v5058_v9 = vld [vmem:[#allocation2 + $0x310] sm:$0xff]  ;;  %1435 = vrot.lane.b32.xlu1 %v9085_v4, %s6612_s26 }
 0x162   : > { %vm4050_vm5 = vmand %vm4034_vm11, %vm13461_vm13  ;;  %v2577_v61 = vrot.slane %v2545_v31, 5  ;;  %vm13467_vm11 = vcmp.ge.s32.totalorder %v7642_v10, 0  ;;  %1690 = vrot.lane.b32.xlu0 %v8974_v28, %s6613_s27  ;;  %v6393_v11 = vpack.c.bf16 %v5074_v37, %v5058_v9 }
 0x163   : > { %v4102_v60 = vsel %vm4050_vm5, %v2513_v45, 0.0  ;;  %vm9043_vm2 = vmand %vm1296_vm3, %vm1312_vm14  ;;  %vm13466_vm3 = vcmp.lt.s32.totalorder %v8779_v29, 64  ;;  %vm13468_vm5 = vcmp.lt.s32.totalorder %v7642_v10, 64  ;;  %v514_v32 = vadd.s32 4294967295, %v9063_v15 }
 0x164   : > { %v13463_v7 = vsel %vm9043_vm2, 4294967295, %v13462_v7  ;;  %2609 = vst [vmem:[#allocation2 + $0x1a0] sm:$0x38] %v2577_v61  ;;  %v4134_v49 = vrot.slane %v4102_v60, 7  ;;  %vm1344_vm12 = vmand %vm9043_vm2, %vm13465_vm7  ;;  %vm1036_vm7 = vcmp.lt.s32.totalorder %v1004_v47, 64  ;;  %v651_v60 = vpop.permute.xlu0 %650 }
 0x165   : > { %vm1360_vm14 = vmand %vm1344_vm12, %vm13466_vm3  ;;  %vm13469_vm12 = vcmp.ge.s32.totalorder %v8823_v14, 0  ;;  %1692 = vrot.lane.b32.xlu1 %v9007_v1, %s6613_s27 }
 0x166   : > { %4166 = vst [vmem:[#allocation2 + $0x398] sm:$0xe] %v4134_v49  ;;  %vm3279_vm13 = vmand %vm13459_vm8, %vm13467_vm11  ;;  %v1475_v21 = vsel %vm1360_vm14, %v1443_v6, 0.0  ;;  %vm13470_vm14 = vcmp.lt.s32.totalorder %v8823_v14, 64  ;;  %v5059_v48 = vld [vmem:[#allocation2 + $0x318] sm:$0xff]  ;;  %1694 = vrot.lane.b32.xlu0 %v9085_v4, %s6613_s27  ;;  %v13484_v49 = vmov 0 }
 0x167   : > { %vm3295_vm0 = vmand %vm3279_vm13, %vm13468_vm5  ;;  %v1507_v59 = vrot.slane %v1475_v21, 4  ;;  %vm13475_vm5 = vcmp.ge.s32.totalorder %v8779_v29, 0  ;;  %vm13488_vm8 = vcmp.lt.s32.totalorder %v9114_v44, 64 }
 0x168   : > { %vm4835_vm3 = vmand %vm13415_vm6, %vm13469_vm12  ;;  %v3347_v63 = vsel %vm3295_vm0, %v1443_v6, 0.0  ;;  %vm13474_vm6 = vcmask 1039360   ;;  %vm13477_vm12 = vcmp.ge.s32.totalorder %v7642_v10, 0 }
 0x169   : > { %vm4851_vm11 = vmand %vm4835_vm3, %vm13470_vm14  ;;  %1539 = vst [vmem:[#allocation2 + $0xa8] sm:$0x70] %v1507_v59  ;;  %v3379_v38 = vrot.slane %v3347_v63, 6  ;;  %v1168_v0 = vsel %vm13474_vm6, %v8666_v13, %v9067_v27  ;;  %v9107_v13 = vadd.s32 4294967294, %v9077_v25  ;;  %vm13478_vm14 = vcmp.lt.s32.totalorder %v7642_v10, 64  ;;  %439 = vrot.lane.b32.xlu1 %v8974_v28, %s6614_s28 }
 0x16a   : > { %v4903_v35 = vsel %vm4851_vm11, %v1443_v6, 0.0  ;;  %vm9087_vm13 = vmand %vm1020_vm15, %vm1036_vm7  ;;  %vm13476_vm15 = vcmp.lt.s32.totalorder %v8779_v29, 64  ;;  %v9129_v6 = vpop.permute.xlu1 %652  ;;  %441 = vrot.lane.b32.xlu0 %v9007_v1, %s6614_s28  ;;  %v9178_v59 = vadd.s32 2, %v8750_v20 }
 0x16b   : > { %v13473_v33 = vsel %vm9087_vm13, 4294967295, %v13472_v33  ;;  %3411 = vst [vmem:[#allocation2 + $0x2a0] sm:$0x1c] %v3379_v38  ;;  %4919 = vst [vmem:[#allocation2 + $0x498] sm:$0x7] %v4903_v35  ;;  %vm12528_vm6 = vcmp.ge.s32.totalorder %v9107_v13, 0 }
 0x16c   : > { %vm1068_vm0 = vmand %vm9087_vm13, %vm13475_vm5  ;;  %vm546_vm5 = vcmp.lt.s32.totalorder %v514_v32, 64 }
 0x16d   : > { %vm1084_vm7 = vmand %vm1068_vm0, %vm13476_vm15  ;;  %v5075_v45 = vld [vmem:[#allocation2 + $0x398] sm:$0xff]  ;;  %vm13479_vm0 = vcmp.ge.s32.totalorder %v8823_v14, 0  ;;  %1917 = vrot.lane.b32.xlu1 %v8974_v28, %s6615_s29 }
 0x16e   : > { %vm3114_vm3 = vmand %vm8616_vm10, %vm13477_vm12  ;;  %v1200_v30 = vsel %vm1084_vm7, %v1168_v0, 0.0  ;;  %v6391_v34 = vpack.c.bf16 %v5075_v45, %v5059_v48  ;;  %vm531_vm7 = vcmp.ge.s32.totalorder %v515_v18, 0  ;;  %vm547_vm12 = vcmp.lt.s32.totalorder %v515_v18, 64  ;;  %1919 = vrot.lane.b32.xlu0 %v9007_v1, %s6615_s29 }
 0x16f   : > { %vm3130_vm11 = vmand %vm3114_vm3, %vm13478_vm14  ;;  %v1232_v29 = vrot.slane %v1200_v30, 7  ;;  %vm13480_vm3 = vcmp.lt.s32.totalorder %v8823_v14, 64  ;;  %vm12540_vm10 = vcmp.lt.s32.totalorder %v8750_v20, 64 }
 0x170   : > { %vm4686_vm15 = vmand %vm13440_vm9, %vm13479_vm0  ;;  %v3183_v31 = vsel %vm3130_vm11, %v1168_v0, 0.0  ;;  %6392 = vmatprep.subr.bf16.mxu1 %v6391_v34  ;;  %vm12534_vm9 = vcmp.ge.s32.totalorder %v9114_v44, 0  ;;  %vm13481_vm11 = vcmp.ge.s32.totalorder %v514_v32, 0  ;;  %v5106_v32 = vld [vmem:[#allocation2 + $0x490] sm:$0xff] }
 0x171   : > { %vm4702_vm14 = vmand %vm4686_vm15, %vm13480_vm3  ;;  %1264 = vst [vmem:[#allocation2 + $0xa8] sm:$0xe] %v1232_v29  ;;  %v3215_v61 = vrot.slane %v3183_v31, 1  ;;  %6394 = vmatpush1.bf16.msra.mxu1 %v6393_v11  ;;  %vm12537_vm15 = vcmp.lt.s32.totalorder %v9107_v13, 64  ;;  %v5090_v34 = vld [vmem:[#allocation2 + $0x410] sm:$0xff]  ;;  %1921 = vrot.lane.b32.xlu1 %v9085_v4, %s6615_s29 }
 0x172   : > { %v4755_v36 = vsel %vm4702_vm14, %v1168_v0, 0.0  ;;  %vm9134_vm0 = vmand %vm13481_vm11, %vm546_vm5  ;;  %vm13486_vm11 = vcmask 7168   ;;  %v5107_v48 = vld [vmem:[#allocation2 + $0x498] sm:$0xff]  ;;  %2128 = vrot.lane.b32.xlu0 %v8974_v28, %s6618_s30  ;;  %v6397_v31 = vpack.c.bf16 %v5106_v32, %v5090_v34  ;;  %v13493_v32 = vmov 0 }
 0x173   : > { %3247 = vst [vmem:[#allocation2 + $0x2a0] ss:$-124 sps:$4 sm:$0x83] %v3215_v61   ;;  %v4787_v14 = vrot.slane %v4755_v36, 3  ;;  %vm9141_vm3 = vmand %vm531_vm7, %vm547_vm12  ;;  %v677_v54 = vsel %vm13486_vm11, %v8793_v39, %v651_v60  ;;  %vm12541_vm12 = vcmp.ge.s32.totalorder %v8750_v20, 0  ;;  %v9170_v39 = vadd.s32 2, %v7642_v10 }
 0x174   : > { %v13485_v49 = vsel %vm9141_vm3, 4294967295, %v13484_v49  ;;  %vm578_vm5 = vmand %vm9134_vm0, %vm12528_vm6  ;;  %vm12538_vm6 = vcmp.ge.s32.totalorder %v9077_v25, 0  ;;  %v1005_v61 = vadd.s32 1, %v9063_v15 }
 0x175   : > { %4819 = vst [vmem:[#allocation2 + $0x418] sm:$0xe0] %v4787_v14  ;;  %vm579_vm7 = vmand %vm9141_vm3, %vm12534_vm9  ;;  %vm12539_vm9 = vcmp.lt.s32.totalorder %v9077_v25, 64  ;;  %2130 = vrot.lane.b32.xlu1 %v9007_v1, %s6618_s30 }
 0x176   : > { %vm13487_vm14 = vmmov %vm13486_vm11  ;;  %2132 = vrot.lane.b32.xlu0 %v9085_v4, %s6618_s30 }
 0x177   : > { %v678_v41 = vsel %vm13487_vm14, %v651_v60, %v9129_v6  ;;  %vm594_vm11 = vmand %vm578_vm5, %vm12537_vm15  ;;  %vm13489_vm14 = vnez %v13422_v55  ;;  %v1006_v60 = vadd.s32 1, %v9069_v42 }
 0x178   : > { %vm595_vm2 = vmand %vm579_vm7, %vm13488_vm8  ;;  %v709_v21 = vsel %vm594_vm11, %v677_v54, 0.0  ;;  %vm12544_vm7 = vcmp.ge.s32.totalorder %v9170_v39, 0  ;;  %vm13490_vm11 = vnez %v13425_v5 }
 0x179   : > { %vm2822_vm3 = vmand %vm13489_vm14, %vm12541_vm12  ;;  %v710_v63 = vsel %vm595_vm2, %v678_v41, 0.0  ;;  %v741_v38 = vrot.slane %v709_v21, 5  ;;  %2502 = vrot.lane.b32.xlu1 %v8974_v28, %s6619_s3 }
 0x17a   : > { %vm2823_vm8 = vmand %vm9134_vm0, %vm12538_vm6  ;;  %v742_v35 = vrot.slane %v710_v63, 5  ;;  %vm12545_vm6 = vcmp.ge.s32.totalorder %v9178_v59, 0  ;;  %2504 = vrot.lane.b32.xlu0 %v9007_v1, %s6619_s3 }
 0x17b   : > { %vm2838_vm5 = vmand %vm2822_vm3, %vm12540_vm10  ;;  %773 = vst [vmem:[#allocation2 + $0x30] sm:$0x38] %v741_v38 }
 0x17c   : > { %vm2839_vm2 = vmand %vm2823_vm8, %vm12539_vm9  ;;  %774 = vst [vmem:[#allocation2 + $0x38] sm:$0x38] %v742_v35  ;;  %v2890_v0 = vsel %vm2838_vm5, %v677_v54, 0.0  ;;  %v5091_v30 = vld [vmem:[#allocation2 + $0x418] sm:$0xff]  ;;  %vm12546_vm8 = vcmp.lt.s32.totalorder %v9170_v39, 64  ;;  %vm12542_vm5 = vcmp.lt.s32.totalorder %v9178_v59, 64 }
 0x17d   : > { %vm2970_vm15 = vmand %vm13490_vm11, %vm12541_vm12  ;;  %v2891_v18 = vsel %vm2839_vm2, %v678_v41, 0.0  ;;  %v2922_v37 = vrot.slane %v2890_v0, 7  ;;  %v6395_v29 = vpack.c.bf16 %v5107_v48, %v5091_v30  ;;  %vm1021_vm12 = vcmp.ge.s32.totalorder %v1005_v61, 0  ;;  %v9249_v0 = vpop.permute.xlu1 %1144  ;;  %2506 = vrot.lane.b32.xlu1 %v9085_v4, %s6619_s3 }
 0x17e   : > { %vm2986_vm3 = vmand %vm2970_vm15, %vm12540_vm10  ;;  %v2923_v45 = vrot.slane %v2891_v18, 7  ;;  %2717 = vrot.lane.b32.xlu0 %v9085_v4, %s6614_s28 }
 0x17f   : > { %v3035_v9 = vsel %vm2986_vm3, %v7164_v51, 0.0  ;;  %vm4379_vm2 = vmand %vm8674_vm4, %vm12544_vm7  ;;  %2954 = vst [vmem:[#allocation2 + $0x228] sm:$0xe] %v2922_v37  ;;  %6396 = vmatprep.subr.bf16.mxu1 %v6395_v29  ;;  %vm1022_vm4 = vcmp.ge.s32.totalorder %v1006_v60, 0  ;;  %v13495_v37 = vmov 0 }
 0x180   : > { %v3067_v11 = vrot.slane %v3035_v9, 4  ;;  %vm4380_vm15 = vmand %vm13489_vm14, %vm12545_vm6  ;;  %2955 = vst [vmem:[#allocation2 + $0x230] sm:$0xe] %v2923_v45  ;;  %6398 = vmatpush1.bf16.msra.mxu1 %v6397_v31  ;;  %v1281_v9 = vadd.s32 2, %v9063_v15  ;;  %v1282_v31 = vadd.s32 2, %v9069_v42 }
 0x181   : > { %vm4395_vm3 = vmand %vm4379_vm2, %vm12546_vm8  ;;  %2339 = vrot.lane.b32.xlu1 %v8974_v28, %s6620_s4 }
 0x182   : > { %3099 = vst [vmem:[#allocation2 + $0x228] sm:$0x70] %v3067_v11  ;;  %vm4396_vm9 = vmand %vm4380_vm15, %vm12542_vm5  ;;  %v4447_v36 = vsel %vm4395_vm3, %v677_v54, 0.0  ;;  %vm1037_vm15 = vcmp.lt.s32.totalorder %v1005_v61, 64  ;;  %vm13491_vm3 = vcmask 654336   ;;  %2341 = vrot.lane.b32.xlu0 %v9007_v1, %s6620_s4 }
 0x183   : > { %vm4543_vm10 = vmand %vm8946_vm1, %vm12544_vm7  ;;  %v4448_v14 = vsel %vm4396_vm9, %v678_v41, 0.0  ;;  %v4479_v21 = vrot.slane %v4447_v36, 1  ;;  %6312 = vmatmul.mubr.msk.f32.vlgmr.msra.gmra.mrb[0].mxu1 %vm13491_vm3, %v8933_v8  ;;  %vm1038_vm7 = vcmp.lt.s32.totalorder %v1006_v60, 64  ;;  %vm13492_vm9 = vcmp.lt.s32.totalorder %v9178_v59, 64  ;;  %v1143_v41 = vpop.permute.xlu0 %1142  ;;  %v9246_v8 = vld [vmem:[%s6671_s23 + $0x20] sm:$0x77] }
 0x184   : > { %vm4544_vm2 = vmand %vm13490_vm11, %vm12545_vm6  ;;  %v4480_v63 = vrot.slane %v4448_v14, 1  ;;  %5310 = vmatprep.mubr.f32.mxu1 %v13442_v50  ;;  %vm13498_vm3 = vcmask 1039360   ;;  %vm13524_vm11 = vcmp.ge.s32.totalorder %v9077_v25, 0 }
 0x185   : > { %vm4559_vm5 = vmand %vm4543_vm10, %vm12546_vm8  ;;  %4511 = vst [vmem:[#allocation2 + $0x420] ss:$-124 sps:$4 sm:$0x83] %v4479_v21   ;;  %v1169_v30 = vsel %vm13498_vm3, %v9067_v27, %v1143_v41  ;;  %vm13503_vm8 = vcmp.ge.s32.totalorder %v8750_v20, 0  ;;  %2343 = vrot.lane.b32.xlu1 %v9085_v4, %s6620_s4 }
 0x186   : > { %vm4560_vm6 = vmand %vm4544_vm2, %vm13492_vm9  ;;  %v4607_v54 = vsel %vm4559_vm5, %v7164_v51, 0.0  ;;  %4512 = vst [vmem:[#allocation2 + $0x428] ss:$-124 sps:$4 sm:$0x83] %v4480_v63   ;;  %vm13497_vm2 = vcmp.ge.s32.totalorder %v9107_v13, 0  ;;  %2881 = vrot.lane.b32.xlu0 %v9085_v4, %s6610_s24 }
 0x187   : > { %v4608_v38 = vsel %vm4560_vm6, %v9246_v8, 0.0  ;;  %v4639_v35 = vrot.slane %v4607_v54, 6  ;;  %vm9253_vm10 = vmand %vm1021_vm12, %vm1037_vm15  ;;  %vm13499_vm12 = vcmp.ge.s32.totalorder %v9114_v44, 0  ;;  %vm13501_vm15 = vcmp.lt.s32.totalorder %v9107_v13, 64  ;;  %v1418_v14 = vpop.permute.xlu0 %1417  ;;  %v9316_v54 = vpop.permute.xlu1 %1419 }
 0x188   : > { %v13494_v32 = vsel %vm9253_vm10, 4294967295, %v13493_v32  ;;  %v4640_v18 = vrot.slane %v4608_v38, 6  ;;  %vm9258_vm5 = vmand %vm1022_vm4, %vm1038_vm7 }
 0x189   : > { %v13496_v37 = vsel %vm9258_vm5, 4294967295, %v13495_v37  ;;  %4671 = vst [vmem:[#allocation2 + $0x420] sm:$0x1c] %v4639_v35  ;;  %vm1069_vm6 = vmand %vm9253_vm10, %vm13497_vm2  ;;  %vm13502_vm2 = vcmp.lt.s32.totalorder %v9114_v44, 64  ;;  %v13514_v35 = vmov 0 }
 0x18a   : > { %4672 = vst [vmem:[#allocation2 + $0x428] sm:$0x1c] %v4640_v18  ;;  %vm1070_vm4 = vmand %vm9258_vm5, %vm13499_vm12  ;;  %vm13504_vm12 = vcmp.ge.s32.totalorder %v9077_v25, 0  ;;  %vm13511_vm5 = vcmp.lt.s32.totalorder %v9178_v59, 64 }
 0x18b   : > { %vm13500_vm7 = vmmov %vm13498_vm3 }
 0x18c   : > { %v1170_v48 = vsel %vm13500_vm7, %v1143_v41, %v9249_v0  ;;  %vm1085_vm9 = vmand %vm1069_vm6, %vm13501_vm15  ;;  %vm13505_vm6 = vcmp.lt.s32.totalorder %v8750_v20, 64  ;;  %v13512_v41 = vmov 0 }
 0x18d   : > { %vm1086_vm3 = vmand %vm1070_vm4, %vm13502_vm2  ;;  %v1201_v27 = vsel %vm1085_vm9, %v1169_v30, 0.0  ;;  %vm13507_vm9 = vcmp.ge.s32.totalorder %v9170_v39, 0  ;;  %vm13508_vm2 = vnez %v13371_v3 }
 0x18e   : > { %vm3115_vm1 = vmand %vm9087_vm13, %vm13503_vm8  ;;  %v1202_v45 = vsel %vm1086_vm3, %v1170_v48, 0.0  ;;  %v1233_v29 = vrot.slane %v1201_v27, 7  ;;  %vm13506_vm8 = vcmp.lt.s32.totalorder %v9077_v25, 64 }
 0x18f   : > { %vm3116_vm7 = vmand %vm9253_vm10, %vm13504_vm12  ;;  %v1234_v34 = vrot.slane %v1202_v45, 7 }
 0x190   : > { %vm3131_vm4 = vmand %vm3115_vm1, %vm13505_vm6  ;;  %1265 = vst [vmem:[#allocation2 + $0xb0] sm:$0xe] %v1233_v29  ;;  %vm13509_vm1 = vcmp.ge.s32.totalorder %v9178_v59, 0  ;;  %vm1297_vm6 = vcmp.ge.s32.totalorder %v1281_v9, 0  ;;  %v222_v29 = vadd.s32 4294967294, %v9063_v15 }
 0x191   : > { %vm3132_vm15 = vmand %vm3116_vm7, %vm13506_vm8  ;;  %1266 = vst [vmem:[#allocation2 + $0xb8] sm:$0xe] %v1234_v34  ;;  %v3184_v11 = vsel %vm3131_vm4, %v1169_v30, 0.0  ;;  %vm1313_vm7 = vcmp.lt.s32.totalorder %v1281_v9, 64  ;;  %vm13510_vm4 = vcmp.lt.s32.totalorder %v9170_v39, 64  ;;  %v9356_v34 = vadd.s32 4294967295, %v8750_v20 }
 0x192   : > { %vm4687_vm3 = vmand %vm13508_vm2, %vm13507_vm9  ;;  %v3185_v61 = vsel %vm3132_vm15, %v1170_v48, 0.0  ;;  %v3216_v60 = vrot.slane %v3184_v11, 1  ;;  %vm1298_vm15 = vcmp.ge.s32.totalorder %v1282_v31, 0  ;;  %vm1314_vm9 = vcmp.lt.s32.totalorder %v1282_v31, 64 }
 0x193   : > { %vm4688_vm12 = vmand %vm9087_vm13, %vm13509_vm1  ;;  %v3217_v1 = vrot.slane %v3185_v61, 1  ;;  %v9361_v31 = vadd.s32 4294967295, %v9077_v25 }
 0x194   : > { %vm4703_vm8 = vmand %vm4687_vm3, %vm13510_vm4  ;;  %3248 = vst [vmem:[#allocation2 + $0x2a8] ss:$-124 sps:$4 sm:$0x83] %v3216_v60  }
 0x195   : > { %vm4704_vm10 = vmand %vm4688_vm12, %vm13511_vm5  ;;  %3249 = vst [vmem:[#allocation2 + $0x2b0] ss:$-124 sps:$4 sm:$0x83] %v3217_v1   ;;  %v4756_v36 = vsel %vm4703_vm8, %v1169_v30, 0.0  ;;  %vm13516_vm5 = vcmp.ge.s32.totalorder %v9107_v13, 0  ;;  %vm13517_vm12 = vcmask 1031168  }
 0x196   : > { %v4757_v21 = vsel %vm4704_vm10, %v1170_v48, 0.0  ;;  %v4788_v63 = vrot.slane %v4756_v36, 3  ;;  %vm9318_vm1 = vmand %vm1297_vm6, %vm1313_vm7  ;;  %v1444_v18 = vsel %vm13517_vm12, %v9033_v52, %v1418_v14  ;;  %vm13518_vm6 = vcmp.ge.s32.totalorder %v9114_v44, 0  ;;  %v1675_v36 = vpop.permute.xlu0 %1674 }
 0x197   : > { %v13513_v41 = vsel %vm9318_vm1, 4294967295, %v13512_v41  ;;  %v4789_v38 = vrot.slane %v4757_v21, 3  ;;  %vm9324_vm3 = vmand %vm1298_vm15, %vm1314_vm9  ;;  %vm13520_vm8 = vcmp.lt.s32.totalorder %v9107_v13, 64  ;;  %vm13521_vm9 = vcmp.lt.s32.totalorder %v9114_v44, 64  ;;  %v9379_v21 = vpop.permute.xlu1 %1676 }
 0x198   : > { %v13515_v35 = vsel %vm9324_vm3, 4294967295, %v13514_v35  ;;  %4820 = vst [vmem:[#allocation2 + $0x420] sm:$0xe0] %v4788_v63  ;;  %vm1345_vm10 = vmand %vm9318_vm1, %vm13516_vm5  ;;  %vm13522_vm5 = vcmp.ge.s32.totalorder %v8750_v20, 0  ;;  %v9375_v1 = vadd.s32 1, %v7642_v10  ;;  %v9383_v63 = vadd.s32 1, %v8750_v20 }
 0x199   : > { %4821 = vst [vmem:[#allocation2 + $0x428] sm:$0xe0] %v4789_v38  ;;  %vm1346_vm7 = vmand %vm9324_vm3, %vm13518_vm6  ;;  %v143_v38 = vadd.s32 1024, %v13379_v56  ;;  %vm13538_vm3 = vcmp.lt.s32.totalorder %v9356_v34, 64 }
 0x19a   : > { %vm13519_vm4 = vmmov %vm13517_vm12  ;;  %vm13523_vm12 = vnez %v13463_v7 }
 0x19b   : > { %v1445_v30 = vsel %vm13519_vm4, %v1418_v14, %v9316_v54  ;;  %vm1361_vm15 = vmand %vm1345_vm10, %vm13520_vm8  ;;  %vm13525_vm10 = vcmp.lt.s32.totalorder %v8750_v20, 64 }
 0x19c   : > { %vm1362_vm2 = vmand %vm1346_vm7, %vm13521_vm9  ;;  %v1476_v48 = vsel %vm1361_vm15, %v1444_v18, 0.0  ;;  %vm13526_vm7 = vcmp.lt.s32.totalorder %v9077_v25, 64 }
 0x19d   : > { %vm3280_vm13 = vmand %vm13523_vm12, %vm13522_vm5  ;;  %v1477_v52 = vsel %vm1362_vm2, %v1445_v30, 0.0  ;;  %v1508_v27 = vrot.slane %v1476_v48, 4  ;;  %vm13528_vm2 = vnez %v13410_v46  ;;  %vm238_vm5 = vcmp.ge.s32.totalorder %v222_v29, 0 }
 0x19e   : > { %vm3281_vm6 = vmand %vm9318_vm1, %vm13524_vm11  ;;  %v1509_v45 = vrot.slane %v1477_v52, 4  ;;  %vm13527_vm11 = vcmp.ge.s32.totalorder %v9170_v39, 0  ;;  %v160_v52 = vadd.s32 %v13393_v12, %v143_v38  ;;  %vm12562_vm1 = vcmp.lt.s32.totalorder %v9375_v1, 64 }
 0x19f   : > { %vm3296_vm4 = vmand %vm3280_vm13, %vm13525_vm10  ;;  %1540 = vst [vmem:[#allocation2 + $0xb0] sm:$0x70] %v1508_v27  ;;  %vm13529_vm13 = vcmp.ge.s32.totalorder %v9178_v59, 0  ;;  %vm13530_vm10 = vcmp.lt.s32.totalorder %v9170_v39, 64 }
 0x1a0   : > { %vm3297_vm8 = vmand %vm3281_vm6, %vm13526_vm7  ;;  %1541 = vst [vmem:[#allocation2 + $0xb8] sm:$0x70] %v1509_v45  ;;  %v3348_v9 = vsel %vm3296_vm4, %v1444_v18, 0.0  ;;  %vm254_vm6 = vcmp.lt.s32.totalorder %v222_v29, 64  ;;  %vm12557_vm7 = vcmp.ge.s32.totalorder %v9356_v34, 0  ;;  %v9419_v29 = vpop.permute.xlu1 %423 }
 0x1a1   : > { %vm4836_vm15 = vmand %vm13528_vm2, %vm13527_vm11  ;;  %v3349_v11 = vsel %vm3297_vm8, %v1445_v30, 0.0  ;;  %v3380_v61 = vrot.slane %v3348_v9, 6  ;;  %vm13531_vm8 = vcmp.lt.s32.totalorder %v9178_v59, 64 }
 0x1a2   : > { %vm4837_vm9 = vmand %vm13523_vm12, %vm13529_vm13  ;;  %v3381_v60 = vrot.slane %v3349_v11, 6  ;;  %vm13535_vm13 = vcmask 539648   ;;  %v192_v11 = vshra.s32 %v160_v52, 6 }
 0x1a3   : > { %vm4852_vm4 = vmand %vm4836_vm15, %vm13530_vm10  ;;  %3412 = vst [vmem:[#allocation2 + $0x2a8] sm:$0x1c] %v3380_v61  ;;  %vm13534_vm10 = vnez %v13428_v22 }
 0x1a4   : > { %vm4853_vm11 = vmand %vm4837_vm9, %vm13531_vm8  ;;  %3413 = vst [vmem:[#allocation2 + $0x2b0] sm:$0x1c] %v3381_v60  ;;  %v4904_v14 = vsel %vm4852_vm4, %v1444_v18, 0.0  ;;  %vm12565_vm8 = vcmp.lt.s32.totalorder %v9361_v31, 64  ;;  %v1702_v18 = vsel %vm13535_vm13, %v8708_v23, %v1675_v36 }
 0x1a5   : > { %v4905_v48 = vsel %vm4853_vm11, %v1445_v30, 0.0  ;;  %4920 = vst [vmem:[#allocation2 + $0x4a0] sm:$0x7] %v4904_v14  ;;  %vm9388_vm15 = vmand %vm238_vm5, %vm254_vm6  ;;  %vm13536_vm11 = vcmp.ge.s32.totalorder %v9361_v31, 0  ;;  %vm12564_vm6 = vcmp.ge.s32.totalorder %v9375_v1, 0 }
 0x1a6   : > { %4921 = vst [vmem:[#allocation2 + $0x4a8] sm:$0x7] %v4905_v48  ;;  %vm1587_vm4 = vmand %vm13534_vm10, %vm12557_vm7  ;;  %vm12563_vm7 = vcmp.ge.s32.totalorder %v9383_v63, 0  ;;  %v9438_v48 = vadd.s32 4294967295, %v9081_v2 }
 0x1a7   : > { %vm1588_vm5 = vmand %vm9388_vm15, %vm13536_vm11  ;;  %vm13539_vm11 = vnez %v13077_v58  ;;  %v13547_v58 = vmov 0 }
 0x1a8   : > { %vm13537_vm9 = vmmov %vm13535_vm13 }
 0x1a9   : > { %v1703_v30 = vsel %vm13537_vm9, %v1675_v36, %v9379_v21  ;;  %vm1619_vm2 = vmand %vm1587_vm4, %vm13538_vm3  ;;  %vm12561_vm9 = vcmp.lt.s32.totalorder %v9383_v63, 64  ;;  %v223_v36 = vadd.s32 4294967294, %v9069_v42 }
 0x1aa   : > { %vm1620_vm13 = vmand %vm1588_vm5, %vm12565_vm8  ;;  %v1734_v23 = vsel %vm1619_vm2, %v1702_v18, 0.0  ;;  %vm13540_vm5 = vcmask 15360  }
 0x1ab   : > { %vm3459_vm12 = vmand %vm13539_vm11, %vm12564_vm6  ;;  %v1735_v27 = vsel %vm1620_vm13, %v1703_v30, 0.0  ;;  %v1766_v45 = vrot.slane %v1734_v23, 1  ;;  %v450_v60 = vsel %vm13540_vm5, %v8871_v53, %v9419_v29  ;;  %vm13541_vm13 = vcmp.ge.s32.totalorder %v9107_v13, 0 }
 0x1ac   : > { %vm3460_vm3 = vmand %vm13534_vm10, %vm12563_vm7  ;;  %v1767_v9 = vrot.slane %v1735_v27, 1  ;;  %v9440_v23 = vand.u32 63, %v160_v52  ;;  %v9445_v53 = vadd.s32 1, %v9077_v25  ;;  %vm255_vm7 = vcmp.lt.s32.totalorder %v223_v36, 64  ;;  %v9455_v52 = vpop.permute.xlu0 %1678 }
 0x1ad   : > { %vm3491_vm2 = vmand %vm3459_vm12, %vm12562_vm1  ;;  %1798 = vst [vmem:[#allocation2 + $0x128] ss:$-124 sps:$4 sm:$0x83] %v1766_v45   ;;  %vm239_vm1 = vcmp.ge.s32.totalorder %v223_v36, 0 }
 0x1ae   : > { %vm3492_vm4 = vmand %vm3460_vm3, %vm12561_vm9  ;;  %1799 = vst [vmem:[#allocation2 + $0x130] ss:$-124 sps:$4 sm:$0x83] %v1767_v9   ;;  %v3543_v61 = vsel %vm3491_vm2, %v1702_v18, 0.0  ;;  %vm13542_vm3 = vcmp.lt.s32.totalorder %v9107_v13, 64  ;;  %v224_v9 = vadd.s32 4294967294, %v9440_v23 }
 0x1af   : > { %v3544_v14 = vsel %vm3492_vm4, %v1703_v30, 0.0  ;;  %v3575_v38 = vrot.slane %v3543_v61, 3  ;;  %vm318_vm12 = vmand %vm9388_vm15, %vm13541_vm13  ;;  %vm13543_vm4 = vcmp.ge.s32.totalorder %v8750_v20, 0  ;;  %v9451_v30 = vand.u32 63, %v192_v11  ;;  %v4980_v11 = vld [vmem:[#allocation2 + $0xa0] sm:$0xff]  ;;  %v4965_v61 = vld [vmem:[#allocation2 + $0x28] sm:$0xff] }
 0x1b0   : > { %v3576_v27 = vrot.slane %v3544_v14, 3  ;;  %vm350_vm2 = vmand %vm318_vm12, %vm13542_vm3  ;;  %vm13544_vm13 = vcmp.lt.s32.totalorder %v8750_v20, 64  ;;  %vm13545_vm12 = vcmp.ge.s32.totalorder %v9170_v39, 0  ;;  %v426_v36 = vpop.permute.xlu0 %425 }
 0x1b1   : > { %3607 = vst [vmem:[#allocation2 + $0x2a0] sm:$0xe0] %v3575_v38  ;;  %vm2642_vm5 = vmand %vm13534_vm10, %vm13543_vm4  ;;  %v482_v18 = vsel %vm350_vm2, %v450_v60, 0.0  ;;  %vm12571_vm4 = vcmp.ge.s32.totalorder %v9438_v48, 0  ;;  %vm13546_vm2 = vcmp.lt.s32.totalorder %v9170_v39, 64  ;;  %v9476_v39 = vadd.s32 4294967294, %v9451_v30 }
 0x1b2   : > { %3608 = vst [vmem:[#allocation2 + $0x2a8] sm:$0xe0] %v3576_v27  ;;  %vm2674_vm9 = vmand %vm2642_vm5, %vm13544_vm13  ;;  %vm12569_vm5 = vcmp.lt.s32.totalorder %v9438_v48, 64  ;;  %vm12568_vm13 = vcmp.ge.s32.totalorder %v9445_v53, 0 }
 0x1b3   : > { %498 = vst [vmem:[#allocation2 + $0x30] sm:$0x7] %v482_v18  ;;  %vm4215_vm3 = vmand %vm13539_vm11, %vm13545_vm12  ;;  %v2726_v45 = vsel %vm2674_vm9, %v450_v60, 0.0  ;;  %vm13549_vm11 = vcmask 539648   ;;  %vm240_vm9 = vcmp.ge.s32.totalorder %v224_v9, 0  ;;  %vm256_vm12 = vcmp.lt.s32.totalorder %v224_v9, 64 }
 0x1b4   : > { %vm4247_vm6 = vmand %vm4215_vm3, %vm13546_vm2  ;;  %v2758_v20 = vrot.slane %v2726_v45, 2  ;;  %v4981_v14 = vld [vmem:[#allocation2 + $0xa8] sm:$0xff]  ;;  %v1704_v27 = vsel %vm13549_vm11, %v9379_v21, %v9455_v52  ;;  %v4964_v45 = vld [vmem:[#allocation2 + $0x20] sm:$0xff]  ;;  %vm12572_vm11 = vcmp.ge.s32.totalorder %v9476_v39, 0  ;;  %v13550_v9 = vmov 0 }
 0x1b5   : > { %v4299_v38 = vsel %vm4247_vm6, %v450_v60, 0.0  ;;  %vm9468_vm8 = vmand %vm239_vm1, %vm255_vm7  ;;  %v6399_v18 = vpack.c.bf16 %v4981_v14, %v4965_v61  ;;  %vm12570_vm1 = vcmp.lt.s32.totalorder %v9445_v53, 64  ;;  %v6401_v60 = vpack.c.bf16 %v4980_v11, %v4964_v45  ;;  %v9491_v11 = vpop.permute.xlu1 %427 }
 0x1b6   : > { %v13548_v58 = vsel %vm9468_vm8, 4294967295, %v13547_v58  ;;  %2790 = vst [vmem:[#allocation2 + $0x228] ss:$-124 sps:$4 sm:$0xc1] %v2758_v20   ;;  %v4331_v4 = vrot.slane %v4299_v38, 4  ;;  %vm1589_vm6 = vmand %vm9468_vm8, %vm12571_vm4  ;;  %vm12579_vm4 = vcmp.ge.s32.totalorder %v9081_v2, 0 }
 0x1b7   : > { %vm1621_vm7 = vmand %vm1589_vm6, %vm12569_vm5  ;;  %6400 = vmatprep.subr.bf16.mxu0 %v6399_v18  ;;  %vm12575_vm5 = vcmp.lt.s32.totalorder %v9476_v39, 64 }
 0x1b8   : > { %4363 = vst [vmem:[#allocation2 + $0x3a0] sm:$0x70] %v4331_v4  ;;  %vm3461_vm3 = vmand %vm9388_vm15, %vm12568_vm13  ;;  %v1736_v21 = vsel %vm1621_vm7, %v1704_v27, 0.0  ;;  %6402 = vmatpush1.bf16.msra.mxu0 %v6401_v60  ;;  %vm13552_vm13 = vcmp.ge.s32.totalorder %v9114_v44, 0 }
 0x1b9   : > { %vm3493_vm2 = vmand %vm3461_vm3, %vm12570_vm1  ;;  %v1768_v20 = vrot.slane %v1736_v21, 1  ;;  %vm13553_vm3 = vcmask 15360  }
 0x1ba   : > { %v3545_v61 = vsel %vm3493_vm2, %v1704_v27, 0.0  ;;  %vm9494_vm6 = vmand %vm240_vm9, %vm256_vm12  ;;  %v451_v14 = vsel %vm13553_vm3, %v9419_v29, %v426_v36  ;;  %vm13555_vm2 = vcmp.lt.s32.totalorder %v9114_v44, 64  ;;  %v9515_v27 = vadd.s32 2, %v9077_v25 }
 0x1bb   : > { %v13551_v9 = vsel %vm9494_vm6, 4294967295, %v13550_v9  ;;  %1800 = vst [vmem:[#allocation2 + $0x138] ss:$-124 sps:$4 sm:$0x83] %v1768_v20   ;;  %v3577_v4 = vrot.slane %v3545_v61, 3  ;;  %vm319_vm7 = vmand %vm9468_vm8, %vm13552_vm13  ;;  %v1902_v20 = vpop.permute.xlu0 %1901  ;;  %v1904_v61 = vpop.permute.xlu1 %1903 }
 0x1bc   : > { %vm320_vm9 = vmand %vm9494_vm6, %vm12572_vm11 }
 0x1bd   : > { %vm13554_vm12 = vmmov %vm13553_vm3  ;;  %3609 = vst [vmem:[#allocation2 + $0x2b0] sm:$0xe0] %v3577_v4  ;;  %vm13556_vm3 = vcmp.ge.s32.totalorder %v9077_v25, 0 }
 0x1be   : > { %v452_v38 = vsel %vm13554_vm12, %v426_v36, %v9491_v11  ;;  %vm351_vm1 = vmand %vm319_vm7, %vm13555_vm2  ;;  %vm12578_vm12 = vcmp.lt.s32.totalorder %v9081_v2, 64  ;;  %vm13557_vm2 = vcmp.lt.s32.totalorder %v9077_v25, 64 }
 0x1bf   : > { %vm352_vm13 = vmand %vm320_vm9, %vm12575_vm5  ;;  %v483_v29 = vsel %vm351_vm1, %v451_v14, 0.0  ;;  %vm12577_vm1 = vcmp.ge.s32.totalorder %v9515_v27, 0  ;;  %vm12576_vm5 = vcmp.lt.s32.totalorder %v9515_v27, 64  ;;  %v9579_v55 = vpop.permute.xlu0 %1905 }
 0x1c0   : > { %vm2643_vm11 = vmand %vm9388_vm15, %vm13556_vm3  ;;  %v484_v18 = vsel %vm352_vm13, %v452_v38, 0.0  ;;  %499 = vst [vmem:[#allocation2 + $0x38] sm:$0x7] %v483_v29  ;;  %vm13558_vm3 = vcmp.ge.s32.totalorder %v9178_v59, 0 }
 0x1c1   : > { %vm2644_vm7 = vmand %vm9468_vm8, %vm12579_vm4  ;;  %500 = vst [vmem:[#allocation2 + $0x40] sm:$0x7] %v484_v18  ;;  %vm13589_vm4 = vcmp.ge.s32.totalorder %v9114_v44, 0 }
 0x1c2   : > { %vm2675_vm6 = vmand %vm2643_vm11, %vm13557_vm2  ;;  %vm13559_vm2 = vcmp.lt.s32.totalorder %v9178_v59, 64 }
 0x1c3   : > { %vm2676_vm9 = vmand %vm2644_vm7, %vm12578_vm12  ;;  %v2727_v45 = vsel %vm2675_vm6, %v451_v14, 0.0 }
 0x1c4   : > { %vm4216_vm13 = vmand %vm13534_vm10, %vm13558_vm3  ;;  %v2728_v60 = vsel %vm2676_vm9, %v452_v38, 0.0  ;;  %v2759_v21 = vrot.slane %v2727_v45, 2  ;;  %vm13560_vm10 = vcmp.ge.s32.totalorder %v9356_v34, 0  ;;  %vm13562_vm3 = vcmp.ge.s32.totalorder %v9361_v31, 0  ;;  %v2113_v45 = vpop.permute.xlu1 %2112 }
 0x1c5   : > { %vm4217_vm11 = vmand %vm9388_vm15, %vm12577_vm1  ;;  %v2760_v36 = vrot.slane %v2728_v60, 2  ;;  %vm13561_vm15 = vcmask 531456  }
 0x1c6   : > { %vm4248_vm7 = vmand %vm4216_vm13, %vm13559_vm2  ;;  %2791 = vst [vmem:[#allocation2 + $0x230] ss:$-124 sps:$4 sm:$0xc1] %v2759_v21   ;;  %v1929_v10 = vsel %vm13561_vm15, %v8980_v40, %v1902_v20 }
 0x1c7   : > { %vm4249_vm6 = vmand %vm4217_vm11, %vm12576_vm5  ;;  %2792 = vst [vmem:[#allocation2 + $0x238] ss:$-124 sps:$4 sm:$0xc1] %v2760_v36   ;;  %v4300_v22 = vsel %vm4248_vm7, %v451_v14, 0.0  ;;  %vm13564_vm11 = vcmp.lt.s32.totalorder %v9356_v34, 64 }
 0x1c8   : > { %v4301_v4 = vsel %vm4249_vm6, %v452_v38, 0.0  ;;  %v4332_v29 = vrot.slane %v4300_v22, 4  ;;  %vm1830_vm9 = vmand %vm13489_vm14, %vm13560_vm10  ;;  %vm13565_vm6 = vcmp.lt.s32.totalorder %v9361_v31, 64  ;;  %vm13566_vm10 = vcmp.ge.s32.totalorder %v9375_v1, 0 }
 0x1c9   : > { %v4333_v18 = vrot.slane %v4301_v4, 4  ;;  %vm1831_vm13 = vmand %vm9134_vm0, %vm13562_vm3  ;;  %vm13568_vm3 = vcmp.ge.s32.totalorder %v9383_v63, 0 }
 0x1ca   : > { %vm13563_vm2 = vmmov %vm13561_vm15  ;;  %4364 = vst [vmem:[#allocation2 + $0x3a8] sm:$0x70] %v4332_v29  ;;  %vm13567_vm15 = vnez %v13390_v62 }
 0x1cb   : > { %v1930_v59 = vsel %vm13563_vm2, %v1902_v20, %v1904_v61  ;;  %vm1846_vm7 = vmand %vm1830_vm9, %vm13564_vm11  ;;  %4365 = vst [vmem:[#allocation2 + $0x3b0] sm:$0x70] %v4333_v18  ;;  %vm13569_vm9 = vcmp.lt.s32.totalorder %v9375_v1, 64 }
 0x1cc   : > { %vm1847_vm5 = vmand %vm1831_vm13, %vm13565_vm6  ;;  %v1961_v14 = vsel %vm1846_vm7, %v1929_v10, 0.0  ;;  %vm13570_vm13 = vcmp.lt.s32.totalorder %v9383_v63, 64  ;;  %vm13571_vm6 = vcmask 523264  }
 0x1cd   : > { %vm3623_vm1 = vmand %vm13567_vm15, %vm13566_vm10  ;;  %v1962_v40 = vsel %vm1847_vm5, %v1930_v59, 0.0  ;;  %v1993_v38 = vrot.slane %v1961_v14, 6  ;;  %v2140_v62 = vsel %vm13571_vm6, %v8943_v43, %v2113_v45  ;;  %vm13572_vm5 = vcmp.ge.s32.totalorder %v9356_v34, 0 }
 0x1ce   : > { %vm3624_vm2 = vmand %vm13489_vm14, %vm13568_vm3  ;;  %v1994_v60 = vrot.slane %v1962_v40, 6  ;;  %vm13573_vm10 = vnez %v13425_v5  ;;  %vm13575_vm3 = vcmp.ge.s32.totalorder %v9375_v1, 0  ;;  %vm13579_vm6 = vcmp.ge.s32.totalorder %v9438_v48, 0 }
 0x1cf   : > { %vm3639_vm11 = vmand %vm3623_vm1, %vm13569_vm9  ;;  %2025 = vst [vmem:[#allocation2 + $0x128] sm:$0x1c] %v1993_v38  ;;  %vm13574_vm1 = vcmp.lt.s32.totalorder %v9356_v34, 64 }
 0x1d0   : > { %vm3640_vm7 = vmand %vm3624_vm2, %vm13570_vm13  ;;  %2026 = vst [vmem:[#allocation2 + $0x130] sm:$0x1c] %v1994_v60  ;;  %v3691_v21 = vsel %vm3639_vm11, %v1929_v10, 0.0  ;;  %vm13576_vm2 = vnez %v13444_v16  ;;  %vm13577_vm11 = vcmp.lt.s32.totalorder %v9375_v1, 64 }
 0x1d1   : > { %v3692_v36 = vsel %vm3640_vm7, %v1930_v59, 0.0  ;;  %3707 = vst [vmem:[#allocation2 + $0x320] sm:$0x7] %v3691_v21  ;;  %vm2041_vm14 = vmand %vm13573_vm10, %vm13572_vm5  ;;  %vm13578_vm7 = vcmask 531456   ;;  %vm13580_vm5 = vnez %v13485_v49  ;;  %v9623_v59 = vpop.permute.xlu1 %2116 }
 0x1d2   : > { %3708 = vst [vmem:[#allocation2 + $0x328] sm:$0x7] %v3692_v36  ;;  %vm2057_vm15 = vmand %vm2041_vm14, %vm13574_vm1  ;;  %v1931_v22 = vsel %vm13578_vm7, %v1904_v61, %v9579_v55  ;;  %vm13581_vm14 = vcmp.lt.s32.totalorder %v9438_v48, 64  ;;  %vm13583_vm7 = vcmp.lt.s32.totalorder %v9445_v53, 64 }
 0x1d3   : > { %vm3723_vm9 = vmand %vm13576_vm2, %vm13575_vm3  ;;  %v2172_v20 = vsel %vm2057_vm15, %v2140_v62, 0.0  ;;  %vm789_vm15 = vcmp.ge.s32.totalorder %v9063_v15, 0  ;;  %vm805_vm3 = vcmp.lt.s32.totalorder %v9063_v15, 64  ;;  %vm13582_vm2 = vcmp.ge.s32.totalorder %v9445_v53, 0 }
 0x1d4   : > { %vm3739_vm13 = vmand %vm3723_vm9, %vm13577_vm11  ;;  %v2204_v43 = vrot.slane %v2172_v20, 3  ;;  %vm790_vm11 = vcmp.ge.s32.totalorder %v9069_v42, 0  ;;  %v13586_v15 = vmov 0 }
 0x1d5   : > { %v3791_v4 = vsel %vm3739_vm13, %v2140_v62, 0.0  ;;  %vm1832_vm12 = vmand %vm13580_vm5, %vm13579_vm6  ;;  %vm806_vm13 = vcmp.lt.s32.totalorder %v9069_v42, 64  ;;  %v2115_v42 = vpop.permute.xlu0 %2114 }
 0x1d6   : > { %2236 = vst [vmem:[#allocation2 + $0x128] sm:$0xe0] %v2204_v43  ;;  %v3823_v29 = vrot.slane %v3791_v4, 5  ;;  %vm1848_vm1 = vmand %vm1832_vm12, %vm13581_vm14 }
 0x1d7   : > { %vm3625_vm9 = vmand %vm9134_vm0, %vm13582_vm2  ;;  %v1963_v16 = vsel %vm1848_vm1, %v1931_v22, 0.0  ;;  %vm13588_vm1 = vcmp.ge.s32.totalorder %v9107_v13, 0 }
 0x1d8   : > { %3855 = vst [vmem:[#allocation2 + $0x320] sm:$0x38] %v3823_v29  ;;  %vm3641_vm6 = vmand %vm3625_vm9, %vm13583_vm7  ;;  %v1995_v61 = vrot.slane %v1963_v16, 6  ;;  %vm13592_vm7 = vcmp.ge.s32.totalorder %v9361_v31, 0 }
 0x1d9   : > { %v3693_v10 = vsel %vm3641_vm6, %v1931_v22, 0.0  ;;  %vm9607_vm12 = vmand %vm789_vm15, %vm805_vm3  ;;  %vm13590_vm15 = vcmp.lt.s32.totalorder %v9107_v13, 64 }
 0x1da   : > { %2027 = vst [vmem:[#allocation2 + $0x138] sm:$0x1c] %v1995_v61  ;;  %3709 = vst [vmem:[#allocation2 + $0x330] sm:$0x7] %v3693_v10  ;;  %v2487_v61 = vpop.permute.xlu0 %2486 }
 0x1db   : > { %vm9611_vm14 = vmand %vm790_vm11, %vm806_vm13  ;;  %vm13591_vm11 = vcmp.lt.s32.totalorder %v9114_v44, 64 }
 0x1dc   : > { %v13587_v15 = vsel %vm9611_vm14, 4294967295, %v13586_v15  ;;  %vm837_vm2 = vmand %vm9607_vm12, %vm13588_vm1  ;;  %vm13594_vm1 = vcmp.ge.s32.totalorder %v9438_v48, 0 }
 0x1dd   : > { %vm838_vm9 = vmand %vm9611_vm14, %vm13589_vm4  ;;  %vm13593_vm4 = vcmask 523264  }
 0x1de   : > { %vm853_vm3 = vmand %vm837_vm2, %vm13590_vm15  ;;  %v2141_v60 = vsel %vm13593_vm4, %v2113_v45, %v2115_v42  ;;  %vm13596_vm15 = vcmp.lt.s32.totalorder %v9361_v31, 64 }
 0x1df   : > { %vm854_vm13 = vmand %vm838_vm9, %vm13591_vm11  ;;  %v909_v14 = vsel %vm853_vm3, %v7164_v51, 0.0  ;;  %vm13597_vm11 = vcmp.lt.s32.totalorder %v9438_v48, 64 }
 0x1e0   : > { %v910_v40 = vsel %vm854_vm13, %v9246_v8, 0.0  ;;  %v941_v38 = vrot.slane %v909_v14, 2  ;;  %vm2042_vm6 = vmand %vm9607_vm12, %vm13592_vm7  ;;  %vm13598_vm7 = vcmp.ge.s32.totalorder %v9077_v25, 0 }
 0x1e1   : > { %v942_v21 = vrot.slane %v910_v40, 2  ;;  %vm2043_vm2 = vmand %vm9611_vm14, %vm13594_vm1  ;;  %vm13599_vm1 = vcmp.ge.s32.totalorder %v9081_v2, 0  ;;  %v2489_v40 = vpop.permute.xlu1 %2488 }
 0x1e2   : > { %vm13595_vm9 = vmmov %vm13593_vm4  ;;  %973 = vst [vmem:[#allocation2 + $0xb0] ss:$-124 sps:$4 sm:$0xc1] %v941_v38  }
 0x1e3   : > { %v2142_v13 = vsel %vm13595_vm9, %v2115_v42, %v9623_v59  ;;  %vm2058_vm3 = vmand %vm2042_vm6, %vm13596_vm15  ;;  %974 = vst [vmem:[#allocation2 + $0xb8] ss:$-124 sps:$4 sm:$0xc1] %v942_v21   ;;  %vm13600_vm6 = vcmp.lt.s32.totalorder %v9077_v25, 64 }
 0x1e4   : > { %vm2059_vm13 = vmand %vm2043_vm2, %vm13597_vm11  ;;  %v2173_v51 = vsel %vm2058_vm3, %v2141_v60, 0.0  ;;  %vm13601_vm2 = vcmp.lt.s32.totalorder %v9081_v2, 64  ;;  %vm13602_vm11 = vcmp.ge.s32.totalorder %v9383_v63, 0 }
 0x1e5   : > { %vm2971_vm4 = vmand %vm9607_vm12, %vm13598_vm7  ;;  %v2174_v44 = vsel %vm2059_vm13, %v2142_v13, 0.0  ;;  %v2205_v45 = vrot.slane %v2173_v51, 3  ;;  %vm13603_vm7 = vcmp.ge.s32.totalorder %v9445_v53, 0 }
 0x1e6   : > { %vm2972_vm9 = vmand %vm9611_vm14, %vm13599_vm1  ;;  %v2206_v62 = vrot.slane %v2174_v44, 3  ;;  %vm13604_vm1 = vcmp.lt.s32.totalorder %v9383_v63, 64 }
 0x1e7   : > { %vm2987_vm15 = vmand %vm2971_vm4, %vm13600_vm6  ;;  %2237 = vst [vmem:[#allocation2 + $0x130] sm:$0xe0] %v2205_v45  ;;  %vm13605_vm6 = vcmp.lt.s32.totalorder %v9445_v53, 64  ;;  %v2324_v45 = vpop.permute.xlu1 %2323 }
 0x1e8   : > { %vm2988_vm3 = vmand %vm2972_vm9, %vm13601_vm2  ;;  %v3036_v36 = vsel %vm2987_vm15, %v9246_v8, 0.0  ;;  %2238 = vst [vmem:[#allocation2 + $0x138] sm:$0xe0] %v2206_v62 }
 0x1e9   : > { %v3037_v20 = vsel %vm2988_vm3, %v7326_v19, 0.0  ;;  %v3068_v43 = vrot.slane %v3036_v36, 4  ;;  %vm3724_vm13 = vmand %vm13573_vm10, %vm13602_vm11  ;;  %v4966_v25 = vld [vmem:[#allocation2 + $0x30] sm:$0xff]  ;;  %vm13606_vm10 = vcmp.ge.s32.totalorder %v9515_v27, 0  ;;  %vm13607_vm3 = vcmp.lt.s32.totalorder %v9515_v27, 64 }
 0x1ea   : > { %v3069_v22 = vrot.slane %v3037_v20, 4  ;;  %vm3725_vm4 = vmand %vm9607_vm12, %vm13603_vm7  ;;  %v4967_v8 = vld [vmem:[#allocation2 + $0x38] sm:$0xff]  ;;  %v4982_v16 = vld [vmem:[#allocation2 + $0xb0] sm:$0xff]  ;;  %vm13609_vm7 = vnez %v13463_v7  ;;  %v9708_v20 = vpop.permute.xlu0 %2490 }
 0x1eb   : > { %3100 = vst [vmem:[#allocation2 + $0x230] sm:$0x70] %v3068_v43  ;;  %vm3740_vm9 = vmand %vm3724_vm13, %vm13604_vm1  ;;  %v4983_v4 = vld [vmem:[#allocation2 + $0xb8] sm:$0xff]  ;;  %v6421_v14 = vpack.c.bf16 %v4982_v16, %v4966_v25  ;;  %vm13608_vm13 = vcmp.ge.s32.totalorder %v9356_v34, 0  ;;  %vm13611_vm1 = vcmp.ge.s32.totalorder %v9361_v31, 0 }
 0x1ec   : > { %3101 = vst [vmem:[#allocation2 + $0x238] sm:$0x70] %v3069_v22  ;;  %vm3741_vm15 = vmand %vm3725_vm4, %vm13605_vm6  ;;  %v3792_v29 = vsel %vm3740_vm9, %v2141_v60, 0.0  ;;  %v6419_v5 = vpack.c.bf16 %v4983_v4, %v4967_v8  ;;  %vm13612_vm9 = vnez %v13513_v41  ;;  %v9715_v7 = vld [vmem:[%s6671_s23 + $0x48] sm:$0x77] }
 0x1ed   : > { %vm4545_vm2 = vmand %vm9607_vm12, %vm13606_vm10  ;;  %v3793_v10 = vsel %vm3741_vm15, %v2142_v13, 0.0  ;;  %v3824_v42 = vrot.slane %v3792_v29, 5  ;;  %vm13610_vm12 = vcmask 506880   ;;  %vm13614_vm10 = vcmp.lt.s32.totalorder %v9356_v34, 64  ;;  %3175 = vrot.lane.b32.xlu1 %v9715_v7, %s6611_s25  ;;  %3339 = vrot.lane.b32.xlu0 %v9715_v7, %s6612_s26  ;;  %v9745_v29 = vpop.permute.xlu1 %2327 }
 0x1ee   : > { %vm4561_vm11 = vmand %vm4545_vm2, %vm13607_vm3  ;;  %v3825_v38 = vrot.slane %v3793_v10, 5  ;;  %6420 = vmatprep.subr.bf16.mxu1 %v6419_v5  ;;  %v2514_v18 = vsel %vm13610_vm12, %v9002_v24, %v2487_v61  ;;  %vm13615_vm3 = vcmp.lt.s32.totalorder %v9361_v31, 64  ;;  %v4996_v10 = vld [vmem:[#allocation2 + $0x120] sm:$0xff] }
 0x1ef   : > { %v4609_v21 = vsel %vm4561_vm11, %v7326_v19, 0.0  ;;  %3856 = vst [vmem:[#allocation2 + $0x328] sm:$0x38] %v3824_v42  ;;  %6422 = vmatpush1.bf16.msra.mxu1 %v6421_v14  ;;  %vm2415_vm4 = vmand %vm13609_vm7, %vm13608_vm13  ;;  %vm13616_vm13 = vcmp.ge.s32.totalorder %v9375_v1, 0 }
 0x1f0   : > { %v4641_v60 = vrot.slane %v4609_v21, 6  ;;  %3857 = vst [vmem:[#allocation2 + $0x330] sm:$0x38] %v3825_v38  ;;  %vm2416_vm6 = vmand %vm13612_vm9, %vm13611_vm1  ;;  %vm13618_vm1 = vcmp.ge.s32.totalorder %v9383_v63, 0  ;;  %v5012_v38 = vld [vmem:[#allocation2 + $0x1a0] sm:$0xff]  ;;  %v5029_v21 = vld [vmem:[#allocation2 + $0x228] sm:$0xff] }
 0x1f1   : > { %vm13613_vm15 = vmmov %vm13610_vm12  ;;  %vm13617_vm12 = vnez %v13410_v46  ;;  %3535 = vrot.lane.b32.xlu1 %v9715_v7, %s6613_s27  ;;  %3783 = vrot.lane.b32.xlu0 %v9715_v7, %s6618_s30  ;;  %s6358_s30 = sshll.u32 (%p6661_p4), %s6649_s12, 7 }
 0x1f2   : > { %v2515_v13 = vsel %vm13613_vm15, %v2487_v61, %v2489_v40  ;;  %vm2431_vm2 = vmand %vm2415_vm4, %vm13614_vm10  ;;  %4673 = vst [vmem:[#allocation2 + $0x430] sm:$0x1c] %v4641_v60  ;;  %vm13619_vm4 = vcmp.lt.s32.totalorder %v9375_v1, 64  ;;  %s12296_s5 = scalar_lea.vmem (%p6661_p4), %s12403_s2, %s6358_s30 }
 0x1f3   : > { %vm2432_vm11 = vmand %vm2416_vm6, %vm13615_vm3  ;;  %v2546_v51 = vsel %vm2431_vm2, %v2514_v18, 0.0  ;;  %vm13620_vm6 = vcmp.lt.s32.totalorder %v9383_v63, 64  ;;  %vm13621_vm3 = vcmask 515072  }
 0x1f4   : > { %vm4035_vm14 = vmand %vm13617_vm12, %vm13616_vm13  ;;  %v2547_v24 = vsel %vm2432_vm11, %v2515_v13, 0.0  ;;  %v2578_v44 = vrot.slane %v2546_v51, 5  ;;  %v2351_v36 = vsel %vm13621_vm3, %v8901_v26, %v2324_v45  ;;  %vm13622_vm11 = vcmp.ge.s32.totalorder %v9356_v34, 0 }
 0x1f5   : > { %vm4036_vm15 = vmand %vm13609_vm7, %vm13618_vm1  ;;  %v2579_v62 = vrot.slane %v2547_v24, 5  ;;  %vm13623_vm7 = vnez %v13473_v33  ;;  %vm13625_vm1 = vcmp.ge.s32.totalorder %v9375_v1, 0  ;;  %vm13629_vm3 = vcmp.ge.s32.totalorder %v9438_v48, 0  ;;  %3931 = vrot.lane.b32.xlu1 %v9715_v7, %s6620_s4  ;;  %4095 = vrot.lane.b32.xlu0 %v9715_v7, %s6619_s3  ;;  %v9786_v33 = vpop.permute.xlu1 %1146  ;;  %v5109_v24 = vld [vmem:[#allocation2 + $0x4a8] sm:$0xff] }
 0x1f6   : > { %vm4051_vm10 = vmand %vm4035_vm14, %vm13619_vm4  ;;  %2610 = vst [vmem:[#allocation2 + $0x1a8] sm:$0x38] %v2578_v44  ;;  %vm13624_vm14 = vcmp.lt.s32.totalorder %v9356_v34, 64 }
 0x1f7   : > { %vm4052_vm2 = vmand %vm4036_vm15, %vm13620_vm6  ;;  %2611 = vst [vmem:[#allocation2 + $0x1b0] sm:$0x38] %v2579_v62  ;;  %v4103_v46 = vsel %vm4051_vm10, %v2514_v18, 0.0  ;;  %vm13626_vm15 = vnez %v13371_v3  ;;  %vm13627_vm10 = vcmp.lt.s32.totalorder %v9375_v1, 64  ;;  %v2326_v3 = vpop.permute.xlu0 %2325  ;;  %v4997_v18 = vld [vmem:[#allocation2 + $0x128] sm:$0xff] }
 0x1f8   : > { %v4104_v43 = vsel %vm4052_vm2, %v2515_v13, 0.0  ;;  %v4135_v22 = vrot.slane %v4103_v46, 7  ;;  %vm2252_vm13 = vmand %vm13623_vm7, %vm13622_vm11  ;;  %vm13628_vm2 = vcmask 506880   ;;  %vm13630_vm11 = vnez %v13515_v35  ;;  %v9780_v62 = vld [vmem:[%s12402_s1 + $0x8] sm:$0xff]  ;;  %v5044_v46 = vld [vmem:[#allocation2 + $0x2a0] sm:$0xff] }
 0x1f9   : > { %v4136_v25 = vrot.slane %v4104_v43, 7  ;;  %vm2268_vm12 = vmand %vm2252_vm13, %vm13624_vm14  ;;  %v2516_v34 = vsel %vm13628_vm2, %v2489_v40, %v9708_v20  ;;  %vm13631_vm14 = vcmp.lt.s32.totalorder %v9438_v48, 64  ;;  %v1007_v40 = vadd.s32 1, %v9440_v23  ;;  %4291 = vrot.lane.b32.xlu1 %v9715_v7, %s6614_s28  ;;  %4439 = vrot.lane.b32.xlu0 %v9715_v7, %s6610_s24 }
 0x1fa   : > { %4167 = vst [vmem:[#allocation2 + $0x3a0] sm:$0xe] %v4135_v22  ;;  %vm3871_vm4 = vmand %vm13626_vm15, %vm13625_vm1  ;;  %v2383_v26 = vsel %vm2268_vm12, %v2351_v36, 0.0  ;;  %vm13632_vm12 = vcmp.ge.s32.totalorder %v9445_v53, 0  ;;  %vm13633_vm15 = vcmp.lt.s32.totalorder %v9445_v53, 64  ;;  %v516_v43 = vadd.s32 4294967295, %v9440_v23 }
 0x1fb   : > { %4168 = vst [vmem:[#allocation2 + $0x3a8] sm:$0xe] %v4136_v25  ;;  %vm3887_vm6 = vmand %vm3871_vm4, %vm13627_vm10  ;;  %vm13634_vm10 = vcmp.ge.s32.totalorder %v9361_v31, 0  ;;  %v5028_v22 = vld [vmem:[#allocation2 + $0x220] sm:$0xff] }
 0x1fc   : > { %2399 = vst [vmem:[#allocation2 + $0x1a8] sm:$0x7] %v2383_v26  ;;  %v3939_v8 = vsel %vm3887_vm6, %v2351_v36, 0.0  ;;  %vm2417_vm13 = vmand %vm13630_vm11, %vm13629_vm3  ;;  %vm13635_vm6 = vnez %v13494_v32  ;;  %vm13636_vm3 = vcmask 515072  }
 0x1fd   : > { %v3971_v4 = vrot.slane %v3939_v8, 2  ;;  %vm2433_vm8 = vmand %vm2417_vm13, %vm13631_vm14  ;;  %v2352_v61 = vsel %vm13636_vm3, %v2324_v45, %v2326_v3  ;;  %vm13638_vm13 = vnez %v13496_v37  ;;  %v5045_v45 = vld [vmem:[#allocation2 + $0x2a8] sm:$0xff]  ;;  %3683 = vrot.lane.b32.xlu1 %v9715_v7, %s6615_s29 }
 0x1fe   : > { %vm4037_vm1 = vmand %vm13612_vm9, %vm13632_vm12  ;;  %v2548_v1 = vsel %vm2433_vm8, %v2516_v34, 0.0  ;;  %vm13637_vm8 = vcmp.ge.s32.totalorder %v9438_v48, 0 }
 0x1ff   : > { %4003 = vst [vmem:[#allocation2 + $0x3a0] ss:$-124 sps:$4 sm:$0xc1] %v3971_v4   ;;  %vm4053_vm4 = vmand %vm4037_vm1, %vm13633_vm15  ;;  %v2580_v5 = vrot.slane %v2548_v1, 5  ;;  %vm13640_vm1 = vcmp.lt.s32.totalorder %v9361_v31, 64  ;;  %v6405_v31 = vpack.c.bf16 %v5012_v38, %v4996_v10  ;;  %v144_v4 = vadd.s32 1152, %v13379_v56 }
 0x200   : > { %v4105_v16 = vsel %vm4053_vm4, %v2516_v34, 0.0  ;;  %vm2253_vm2 = vmand %vm13635_vm6, %vm13634_vm10  ;;  %vm13641_vm4 = vcmp.lt.s32.totalorder %v9438_v48, 64  ;;  %v6407_v48 = vpack.c.bf16 %v5045_v45, %v5029_v21  ;;  %v6409_v34 = vpack.c.bf16 %v5044_v46, %v5028_v22  ;;  %v9838_v38 = vld [vmem:[%s12402_s1 + $0x10] sm:$0xff] }
 0x201   : > { %2612 = vst [vmem:[#allocation2 + $0x1b8] sm:$0x38] %v2580_v5  ;;  %v4137_v42 = vrot.slane %v4105_v16, 7  ;;  %vm2254_vm14 = vmand %vm13638_vm13, %vm13637_vm8  ;;  %v9827_v16 = vpop.permute.xlu0 %654  ;;  %v1283_v22 = vadd.s32 2, %v9440_v23 }
 0x202   : > { %vm13639_vm12 = vmmov %vm13636_vm3  ;;  %vm13642_vm3 = vcmp.ge.s32.totalorder %v9383_v63, 0 }
 0x203   : > { %v2353_v14 = vsel %vm13639_vm12, %v2326_v3, %v9745_v29  ;;  %vm2269_vm15 = vmand %vm2253_vm2, %vm13640_vm1  ;;  %v5013_v60 = vld [vmem:[#allocation2 + $0x1a8] sm:$0xff]  ;;  %4169 = vst [vmem:[#allocation2 + $0x3b0] sm:$0xe] %v4137_v42  ;;  %vm13645_vm2 = vcmp.ge.s32.totalorder %v9445_v53, 0  ;;  %vm1023_vm12 = vcmp.ge.s32.totalorder %v1007_v40, 0  ;;  %vm13646_vm1 = vcmask 654336  }
 0x204   : > { %vm2270_vm10 = vmand %vm2254_vm14, %vm13641_vm4  ;;  %v2384_v13 = vsel %vm2269_vm15, %v2352_v61, 0.0  ;;  %v6403_v51 = vpack.c.bf16 %v5013_v60, %v4997_v18  ;;  %6307 = vmatmul.mubr.msk.f32.gmra.mrb[2].mxu0 %vm13646_vm1, %v9780_v62  ;;  %vm13647_vm15 = vcmp.lt.s32.totalorder %v9383_v63, 64  ;;  %v13650_v63 = vmov 0  ;;  %v4998_v3 = vld [vmem:[#allocation2 + $0x130] sm:$0xff] }
 0x205   : > { %vm9773_vm8 = vmand %vm13623_vm7, %vm13642_vm3  ;;  %v2385_v44 = vsel %vm2270_vm10, %v2353_v14, 0.0  ;;  %2400 = vst [vmem:[#allocation2 + $0x1b0] sm:$0x7] %v2384_v13  ;;  %vm1039_vm7 = vcmp.lt.s32.totalorder %v1007_v40, 64  ;;  %5215 = vmatprep.mubr.f32.mxu0 %v13442_v50  ;;  %vm13648_vm10 = vcmp.lt.s32.totalorder %v9445_v53, 64  ;;  %v13661_v18 = vmov 0 }
 0x206   : > { %vm3873_vm14 = vmand %vm13635_vm6, %vm13645_vm2  ;;  %2401 = vst [vmem:[#allocation2 + $0x1b8] sm:$0x7] %v2385_v44  ;;  %6404 = vmatprep.subr.bf16.mxu0 %v6403_v51  ;;  %v9856_v13 = vadd.s32 4294967295, %v9451_v30  ;;  %v161_v51 = vadd.s32 %v13393_v12, %v144_v4  ;;  %v5076_v45 = vld [vmem:[#allocation2 + $0x3a0] sm:$0xff] }
 0x207   : > { %vm3888_vm4 = vmand %vm9773_vm8, %vm13647_vm15  ;;  %6406 = vmatpush1.bf16.msra.mxu0 %v6405_v31  ;;  %vm13652_vm8 = vcmask 1039360   ;;  %v5060_v31 = vld [vmem:[#allocation2 + $0x320] sm:$0xff] }
 0x208   : > { %vm3889_vm3 = vmand %vm3873_vm14, %vm13648_vm10  ;;  %v3940_v36 = vsel %vm3888_vm4, %v2352_v61, 0.0  ;;  %6408 = vmatprep.subr.bf16.mxu0 %v6407_v48  ;;  %v1171_v53 = vsel %vm13652_vm8, %v9249_v0, %v9786_v33  ;;  %vm13653_vm14 = vcmp.ge.s32.totalorder %v9476_v39, 0  ;;  %vm13655_vm4 = vcmp.ge.s32.totalorder %v9081_v2, 0  ;;  %v4999_v61 = vld [vmem:[#allocation2 + $0x138] sm:$0xff] }
 0x209   : > { %vm13649_vm2 = vmmov %vm13646_vm1  ;;  %v3941_v25 = vsel %vm3889_vm3, %v2353_v14, 0.0  ;;  %v3972_v26 = vrot.slane %v3940_v36, 2  ;;  %vm13656_vm3 = vcmp.lt.s32.totalorder %v9081_v2, 64  ;;  %vm532_vm8 = vcmp.ge.s32.totalorder %v516_v43, 0 }
 0x20a   : > { %6313 = vmatmul.mubr.msk.f32.gmra.mrb[2].mxu1 %vm13649_vm2, %v9780_v62  ;;  %vm9802_vm1 = vmand %vm1023_vm12, %vm1039_vm7  ;;  %v3973_v8 = vrot.slane %v3941_v25, 2  ;;  %vm13654_vm12 = vcmp.lt.s32.totalorder %v9476_v39, 64 }
 0x20b   : > { %v13651_v63 = vsel %vm9802_vm1, 4294967295, %v13650_v63  ;;  %5316 = vmatprep.mubr.f32.mxu1 %v13442_v50  ;;  %vm1071_vm15 = vmand %vm9802_vm1, %vm13653_vm14  ;;  %4004 = vst [vmem:[#allocation2 + $0x3a8] ss:$-124 sps:$4 sm:$0xc1] %v3972_v26   ;;  %6410 = vmatpush1.bf16.msra.mxu0 %v6409_v34  ;;  %vm548_vm14 = vcmp.lt.s32.totalorder %v516_v43, 64  ;;  %v9874_v43 = vpop.permute.xlu1 %1680  ;;  %v6413_v34 = vpack.c.bf16 %v5076_v45, %v5060_v31  ;;  %vm13683_vm1 = vcmp.ge.s32.totalorder %v9515_v27, 0 }
 0x20c   : > { %vm1087_vm7 = vmand %vm1071_vm15, %vm13654_vm12  ;;  %4005 = vst [vmem:[#allocation2 + $0x3b0] ss:$-124 sps:$4 sm:$0xc1] %v3973_v8   ;;  %v5014_v1 = vld [vmem:[#allocation2 + $0x1b0] sm:$0xff]  ;;  %vm13657_vm15 = vcmp.ge.s32.totalorder %v9515_v27, 0  ;;  %v5093_v8 = vld [vmem:[#allocation2 + $0x428] sm:$0xff] }
 0x20d   : > { %vm3117_vm10 = vmand %vm13638_vm13, %vm13655_vm4  ;;  %v1203_v0 = vsel %vm1087_vm7, %v1171_v53, 0.0  ;;  %v5015_v10 = vld [vmem:[#allocation2 + $0x1b8] sm:$0xff]  ;;  %v6425_v42 = vpack.c.bf16 %v5014_v1, %v4998_v3  ;;  %vm13658_vm7 = vcmp.lt.s32.totalorder %v9515_v27, 64  ;;  %v6415_v4 = vpack.c.bf16 %v5109_v24, %v5093_v8  ;;  %v5108_v3 = vld [vmem:[#allocation2 + $0x4a0] sm:$0xff] }
 0x20e   : > { %vm3133_vm2 = vmand %vm3117_vm10, %vm13656_vm3  ;;  %v1235_v5 = vrot.slane %v1203_v0, 7  ;;  %v6423_v40 = vpack.c.bf16 %v5015_v10, %v4999_v61  ;;  %vm13659_vm10 = vcmask 654336   ;;  %v9896_v61 = vand.u32 63, %v161_v51  ;;  %v5092_v10 = vld [vmem:[#allocation2 + $0x420] sm:$0xff] }
 0x20f   : > { %vm4689_vm12 = vmand %vm13635_vm6, %vm13657_vm15  ;;  %v3186_v14 = vsel %vm3133_vm2, %v1171_v53, 0.0  ;;  %6308 = vmatmul.mubr.msk.f32.gmra.mrb[4].mxu0 %vm13659_vm10, %v9838_v38  ;;  %vm13663_vm2 = vcmask 7168   ;;  %vm13665_vm15 = vcmp.lt.s32.totalorder %v9476_v39, 64  ;;  %v13675_v24 = vmov 0 }
 0x210   : > { %vm4705_vm4 = vmand %vm4689_vm12, %vm13658_vm7  ;;  %1267 = vst [vmem:[#allocation2 + $0xc0] sm:$0xe] %v1235_v5  ;;  %v3218_v21 = vrot.slane %v3186_v14, 1  ;;  %v679_v60 = vsel %vm13663_vm2, %v9129_v6, %v9827_v16  ;;  %6424 = vmatprep.subr.bf16.mxu1 %v6423_v40  ;;  %5221 = vmatprep.mubr.f32.mxu0 %v13442_v50  ;;  %v9868_v6 = vadd.s32 1, %v9081_v2  ;;  %vm13666_vm7 = vcmp.ge.s32.totalorder %v9081_v2, 0 }
 0x211   : > { %vm13660_vm3 = vmmov %vm13659_vm10  ;;  %v4758_v32 = vsel %vm4705_vm4, %v1171_v53, 0.0  ;;  %6426 = vmatpush1.bf16.msra.mxu1 %v6425_v42  ;;  %vm13667_vm10 = vcmp.lt.s32.totalorder %v9081_v2, 64  ;;  %vm12584_vm2 = vcmp.ge.s32.totalorder %v9856_v13, 0  ;;  %v193_v53 = vshra.s32 %v161_v51, 6 }
 0x212   : > { %6314 = vmatmul.mubr.msk.f32.gmra.mrb[4].mxu1 %vm13660_vm3, %v9838_v38  ;;  %vm9848_vm6 = vmand %vm532_vm8, %vm548_vm14  ;;  %3250 = vst [vmem:[#allocation2 + $0x2b8] ss:$-124 sps:$4 sm:$0x83] %v3218_v21   ;;  %v4790_v44 = vrot.slane %v4758_v32, 3  ;;  %vm13664_vm8 = vcmp.ge.s32.totalorder %v9476_v39, 0  ;;  %v5061_v48 = vld [vmem:[#allocation2 + $0x328] sm:$0xff]  ;;  %v6417_v40 = vpack.c.bf16 %v5108_v3, %v5092_v10 }
 0x213   : > { %v13662_v18 = vsel %vm9848_vm6, 4294967295, %v13661_v18  ;;  %vm580_vm14 = vmand %vm9848_vm6, %vm13664_vm8  ;;  %5322 = vmatprep.mubr.f32.mxu1 %v13442_v50  ;;  %v5077_v46 = vld [vmem:[#allocation2 + $0x3a8] sm:$0xff]  ;;  %vm13668_vm8 = vcmp.ge.s32.totalorder %v9515_v27, 0  ;;  %v9902_v14 = vand.u32 63, %v193_v53  ;;  %v9911_v32 = vld [vmem:[%s12402_s1 + $0x18] sm:$0xff]  ;;  %v517_v31 = vadd.s32 4294967295, %v9896_v61 }
 0x214   : > { %vm596_vm12 = vmand %vm580_vm14, %vm13665_vm15  ;;  %4822 = vst [vmem:[#allocation2 + $0x430] sm:$0xe0] %v4790_v44  ;;  %v6411_v25 = vpack.c.bf16 %v5077_v46, %v5061_v48  ;;  %vm1299_vm15 = vcmp.ge.s32.totalorder %v1283_v22, 0 }
 0x215   : > { %vm2824_vm4 = vmand %vm13580_vm5, %vm13666_vm7  ;;  %v711_v36 = vsel %vm596_vm12, %v679_v60, 0.0  ;;  %vm13669_vm12 = vcmp.lt.s32.totalorder %v9515_v27, 64  ;;  %v9934_v48 = vadd.s32 4294967294, %v9902_v14 }
 0x216   : > { %vm2840_vm3 = vmand %vm2824_vm4, %vm13667_vm10  ;;  %v743_v26 = vrot.slane %v711_v36, 5  ;;  %6412 = vmatprep.subr.bf16.mxu0 %v6411_v25  ;;  %vm12586_vm4 = vcmp.ge.s32.totalorder %v9868_v6, 0  ;;  %vm13670_vm10 = vcmask 539648   ;;  %v9945_v36 = vpop.permute.xlu1 %656 }
 0x217   : > { %vm4381_vm14 = vmand %vm9134_vm0, %vm13668_vm8  ;;  %v2892_v0 = vsel %vm2840_vm3, %v679_v60, 0.0  ;;  %v1705_v5 = vsel %vm13670_vm10, %v9455_v52, %v9874_v43  ;;  %6414 = vmatpush1.bf16.msra.mxu0 %v6413_v34  ;;  %vm13671_vm0 = vnez %v13551_v9  ;;  %vm12587_vm8 = vcmp.lt.s32.totalorder %v9868_v6, 64  ;;  %v9900_v52 = vpop.permute.xlu0 %1421 }
 0x218   : > { %vm4397_vm7 = vmand %vm4381_vm14, %vm13669_vm12  ;;  %775 = vst [vmem:[#allocation2 + $0x40] sm:$0x38] %v743_v26  ;;  %v2924_v1 = vrot.slane %v2892_v0, 7  ;;  %6416 = vmatprep.subr.bf16.mxu0 %v6415_v4  ;;  %vm13672_vm14 = vcmp.lt.s32.totalorder %v9856_v13, 64  ;;  %vm1315_vm10 = vcmp.lt.s32.totalorder %v1283_v22, 64  ;;  %v13688_v34 = vmov 0 }
 0x219   : > { %v4449_v47 = vsel %vm4397_vm7, %v679_v60, 0.0  ;;  %vm1590_vm3 = vmand %vm13671_vm0, %vm12584_vm2  ;;  %vm13673_vm7 = vnez %v13548_v58  ;;  %v225_v0 = vadd.s32 4294967294, %v9896_v61  ;;  %v9997_v4 = vld [vmem:[%s6671_s23 + $0x28] sm:$0x77] }
 0x21a   : > { %2956 = vst [vmem:[#allocation2 + $0x238] sm:$0xe] %v2924_v1  ;;  %v4481_v42 = vrot.slane %v4449_v47, 1  ;;  %vm1622_vm12 = vmand %vm1590_vm3, %vm13672_vm14  ;;  %vm13674_vm14 = vcmask 654336  }
 0x21b   : > { %vm3462_vm2 = vmand %vm13673_vm7, %vm12586_vm4  ;;  %v1737_v21 = vsel %vm1622_vm12, %v1705_v5, 0.0  ;;  %6418 = vmatpush1.bf16.msra.mxu0 %v6417_v40  ;;  %6315 = vmatmul.mubr.msk.f32.gmra.mrb[6].mxu1 %vm13674_vm14, %v9911_v32  ;;  %vm13677_vm12 = vcmask 1031168   ;;  %vm13684_vm7 = vcmp.lt.s32.totalorder %v9515_v27, 64  ;;  %v9969_v27 = vadd.s32 2, %v9081_v2 }
 0x21c   : > { %4513 = vst [vmem:[#allocation2 + $0x430] ss:$-124 sps:$4 sm:$0x83] %v4481_v42   ;;  %vm3494_vm3 = vmand %vm3462_vm2, %vm12587_vm8  ;;  %v1769_v60 = vrot.slane %v1737_v21, 1  ;;  %v1446_v44 = vsel %vm13677_vm12, %v9316_v54, %v9900_v52  ;;  %5328 = vmatprep.mubr.f32.mxu1 %v13442_v50  ;;  %vm13679_vm2 = vcmp.ge.s32.totalorder %v9476_v39, 0  ;;  %vm13682_vm12 = vcmp.lt.s32.totalorder %v9081_v2, 64  ;;  %v10015_v21 = vpop.permute.xlu0 %429 }
 0x21d   : > { %v3546_v51 = vsel %vm3494_vm3, %v1705_v5, 0.0  ;;  %vm9918_vm13 = vmand %vm1299_vm15, %vm1315_vm10  ;;  %vm13680_vm10 = vcmp.lt.s32.totalorder %v9476_v39, 64  ;;  %v5030_v5 = vld [vmem:[#allocation2 + $0x230] sm:$0xff] }
 0x21e   : > { %v13676_v24 = vsel %vm9918_vm13, 4294967295, %v13675_v24  ;;  %vm13678_vm4 = vmmov %vm13674_vm14  ;;  %1801 = vst [vmem:[#allocation2 + $0x140] ss:$-124 sps:$4 sm:$0x83] %v1769_v60   ;;  %v3578_v45 = vrot.slane %v3546_v51, 3  ;;  %v5046_v51 = vld [vmem:[#allocation2 + $0x2b0] sm:$0xff] }
 0x21f   : > { %6309 = vmatmul.mubr.msk.f32.gmra.mrb[6].mxu0 %vm13678_vm4, %v9911_v32  ;;  %vm1347_vm15 = vmand %vm9918_vm13, %vm13679_vm2  ;;  %vm13681_vm4 = vcmp.ge.s32.totalorder %v9081_v2, 0  ;;  %vm533_vm2 = vcmp.ge.s32.totalorder %v517_v31, 0  ;;  %vm549_vm13 = vcmp.lt.s32.totalorder %v517_v31, 64  ;;  %v9986_v2 = vld [vmem:[%s12402_s1 + $0x20] sm:$0xff]  ;;  %v6429_v31 = vpack.c.bf16 %v5046_v51, %v5030_v5 }
 0x220   : > { %5227 = vmatprep.mubr.f32.mxu0 %v13442_v50  ;;  %vm1363_vm3 = vmand %vm1347_vm15, %vm13680_vm10  ;;  %3610 = vst [vmem:[#allocation2 + $0x2b8] sm:$0xe0] %v3578_v45  ;;  %vm12596_vm10 = vcmp.ge.s32.totalorder %v9934_v48, 0  ;;  %v10093_v5 = vpop.permute.xlu0 %2118 }
 0x221   : > { %vm3282_vm14 = vmand %vm13630_vm11, %vm13681_vm4  ;;  %v1478_v54 = vsel %vm1363_vm3, %v1446_v44, 0.0  ;;  %vm12595_vm3 = vcmp.lt.s32.totalorder %v9934_v48, 64  ;;  %vm808_vm11 = vcmp.lt.s32.totalorder %v9896_v61, 64  ;;  %v5031_v10 = vld [vmem:[#allocation2 + $0x238] sm:$0xff] }
 0x222   : > { %vm3298_vm8 = vmand %vm3282_vm14, %vm13682_vm12  ;;  %v1510_v46 = vrot.slane %v1478_v54, 4  ;;  %vm792_vm12 = vcmp.ge.s32.totalorder %v9896_v61, 0 }
 0x223   : > { %vm4838_vm15 = vmand %vm13612_vm9, %vm13683_vm1  ;;  %v3350_v22 = vsel %vm3298_vm8, %v1446_v44, 0.0  ;;  %vm13687_vm9 = vcmask 7168  }
 0x224   : > { %vm4854_vm4 = vmand %vm4838_vm15, %vm13684_vm7  ;;  %1542 = vst [vmem:[#allocation2 + $0xc0] sm:$0x70] %v1510_v46  ;;  %v3382_v25 = vrot.slane %v3350_v22, 6  ;;  %v680_v41 = vsel %vm13687_vm9, %v9827_v16, %v9945_v36  ;;  %vm12593_vm7 = vcmp.ge.s32.totalorder %v9451_v30, 0  ;;  %vm12594_vm15 = vcmp.lt.s32.totalorder %v9451_v30, 64 }
 0x225   : > { %v4906_v26 = vsel %vm4854_vm4, %v1446_v44, 0.0  ;;  %vm9955_vm14 = vmand %vm533_vm2, %vm549_vm13  ;;  %vm12597_vm4 = vcmp.ge.s32.totalorder %v9969_v27, 0  ;;  %v13693_v46 = vmov 0 }
 0x226   : > { %3414 = vst [vmem:[#allocation2 + $0x2b8] sm:$0x1c] %v3382_v25  ;;  %4922 = vst [vmem:[#allocation2 + $0x4b0] sm:$0x7] %v4906_v26  ;;  %v10034_v25 = vld [vmem:[%s12402_s1 + $0x28] sm:$0xff] }
 0x227   : > { %vm581_vm1 = vmand %vm9955_vm14, %vm12596_vm10 }
 0x228   : > { %vm597_vm13 = vmand %vm581_vm1, %vm12595_vm3 }
 0x229   : > { %vm9973_vm8 = vmand %vm792_vm12, %vm808_vm11  ;;  %v712_v16 = vsel %vm597_vm13, %v680_v41, 0.0  ;;  %vm13690_vm12 = vcmask 654336   ;;  %vm12598_vm13 = vcmp.lt.s32.totalorder %v9969_v27, 64 }
 0x22a   : > { %v13689_v34 = vsel %vm9973_vm8, 4294967295, %v13688_v34  ;;  %vm840_vm2 = vmand %vm9973_vm8, %vm12596_vm10  ;;  %v744_v8 = vrot.slane %v712_v16, 5  ;;  %6310 = vmatmul.mubr.msk.f32.gmra.mrb[8].mxu0 %vm13690_vm12, %v9986_v2  ;;  %v10054_v16 = vpop.permute.xlu1 %2329 }
 0x22b   : > { %vm856_vm11 = vmand %vm840_vm2, %vm12595_vm3  ;;  %5233 = vmatprep.mubr.f32.mxu0 %v13442_v50  ;;  %vm13695_vm3 = vcmask 15360  }
 0x22c   : > { %vm13691_vm9 = vmmov %vm13690_vm12  ;;  %v912_v3 = vsel %vm856_vm11, %v9997_v4, 0.0  ;;  %776 = vst [vmem:[#allocation2 + $0x48] sm:$0x38] %v744_v8  ;;  %v453_v22 = vsel %vm13695_vm3, %v9491_v11, %v10015_v21  ;;  %v10067_v8 = vld [vmem:[%s12402_s1] sm:$0xff] }
 0x22d   : > { %6316 = vmatmul.mubr.msk.f32.gmra.mrb[8].mxu1 %vm13691_vm9, %v9986_v2  ;;  %vm2825_vm1 = vmand %vm9848_vm6, %vm12593_vm7  ;;  %v944_v1 = vrot.slane %v912_v3, 2  ;;  %v5047_v42 = vld [vmem:[#allocation2 + $0x2b8] sm:$0xff]  ;;  %vm241_vm9 = vcmp.ge.s32.totalorder %v225_v0, 0  ;;  %vm257_vm7 = vcmp.lt.s32.totalorder %v225_v0, 64 }
 0x22e   : > { %5334 = vmatprep.mubr.f32.mxu1 %v13442_v50  ;;  %vm2841_vm2 = vmand %vm2825_vm1, %vm12594_vm15  ;;  %v6427_v60 = vpack.c.bf16 %v5047_v42, %v5031_v10  ;;  %vm13692_vm1 = vnez %v13587_v15 }
 0x22f   : > { %vm4382_vm11 = vmand %vm13580_vm5, %vm12597_vm4  ;;  %v2893_v47 = vsel %vm2841_vm2, %v680_v41, 0.0  ;;  %976 = vst [vmem:[#allocation2 + $0xc8] ss:$-124 sps:$4 sm:$0xc1] %v944_v1  }
 0x230   : > { %vm4398_vm12 = vmand %vm4382_vm11, %vm12598_vm13  ;;  %v2925_v40 = vrot.slane %v2893_v47, 7  ;;  %6428 = vmatprep.subr.bf16.mxu1 %v6427_v60 }
 0x231   : > { %vm4546_vm15 = vmand %vm13692_vm1, %vm12597_vm4  ;;  %v4450_v44 = vsel %vm4398_vm12, %v680_v41, 0.0  ;;  %6430 = vmatpush1.bf16.msra.mxu1 %v6429_v31  ;;  %v4747_v41 = vcombine.high %v9715_v7, %v9715_v7  ;;  %vm13698_vm12 = vcmp.lt.s32.totalorder %v9934_v48, 64 }
 0x232   : > { %vm4562_vm2 = vmand %vm4546_vm15, %vm12598_vm13  ;;  %2957 = vst [vmem:[#allocation2 + $0x240] sm:$0xe] %v2925_v40  ;;  %v4482_v45 = vrot.slane %v4450_v44, 1  ;;  %vm13696_vm15 = vcmask 654336  }
 0x233   : > { %v4610_v54 = vsel %vm4562_vm2, %v9997_v4, 0.0  ;;  %vm10024_vm11 = vmand %vm241_vm9, %vm257_vm7  ;;  %6311 = vmatmul.mubr.msk.f32.gmra.mrb[10].mxu0 %vm13696_vm15, %v10034_v25  ;;  %vm13699_vm2 = vcmp.ge.s32.totalorder %v9451_v30, 0  ;;  %4896 = vrot.lane.b32.xlu1 %v4747_v41, %s6612_s26 }
 0x234   : > { %v13694_v46 = vsel %vm10024_vm11, 4294967295, %v13693_v46  ;;  %v4642_v26 = vrot.slane %v4610_v54, 6  ;;  %4514 = vst [vmem:[#allocation2 + $0x438] ss:$-124 sps:$4 sm:$0x83] %v4482_v45   ;;  %vm321_vm7 = vmand %vm10024_vm11, %vm12596_vm10  ;;  %5405 = vmatprep.mubr.f32.mxu0 %v13442_v50  ;;  %4748 = vrot.lane.b32.xlu0 %v4747_v41, %s6611_s25  ;;  %v1284_v54 = vadd.s32 2, %v9896_v61 }
 0x235   : > { %vm13697_vm3 = vmmov %vm13696_vm15  ;;  %vm13700_vm15 = vcmp.lt.s32.totalorder %v9451_v30, 64 }
 0x236   : > { %6317 = vmatmul.mubr.msk.f32.gmra.mrb[10].mxu1 %vm13697_vm3, %v10034_v25  ;;  %vm353_vm9 = vmand %vm321_vm7, %vm13698_vm12  ;;  %4674 = vst [vmem:[#allocation2 + $0x438] sm:$0x1c] %v4642_v26  ;;  %vm13701_vm3 = vnez %v13548_v58  ;;  %v146_v26 = vadd.s32 1408, %v13379_v56 }
 0x237   : > { %5506 = vmatprep.mubr.f32.mxu1 %v13442_v50  ;;  %vm2645_vm10 = vmand %vm13671_vm0, %vm13699_vm2  ;;  %v485_v11 = vsel %vm353_vm9, %v453_v22, 0.0  ;;  %vm13702_vm9 = vcmask 654336   ;;  %vm13707_vm0 = vcmp.ge.s32.totalorder %v9868_v6, 0 }
 0x238   : > { %vm2677_vm7 = vmand %vm2645_vm10, %vm13700_vm15  ;;  %501 = vst [vmem:[#allocation2 + $0x48] sm:$0x7] %v485_v11  ;;  %6318 = vmatmul.mubr.msk.f32.vlgmr.msra.gmra.mrb[12].mxu0 %vm13702_vm9, %v10067_v8  ;;  %vm13703_vm10 = vcmask 515072   ;;  %vm13704_vm15 = vcmp.ge.s32.totalorder %v9856_v13, 0  ;;  %vm13706_vm9 = vcmp.lt.s32.totalorder %v9856_v13, 64 }
 0x239   : > { %vm4218_vm12 = vmand %vm13701_vm3, %vm12597_vm4  ;;  %v2729_v7 = vsel %vm2677_vm7, %v453_v22, 0.0  ;;  %v2354_v3 = vsel %vm13703_vm10, %v9745_v29, %v10054_v16  ;;  %5411 = vmatprep.mubr.f32.mxu0 %v13442_v50  ;;  %vm13705_vm7 = vnez %v13651_v63  ;;  %vm13708_vm10 = vnez %v13496_v37 }
 0x23a   : > { %vm4250_vm2 = vmand %vm4218_vm12, %vm12598_vm13  ;;  %v2761_v0 = vrot.slane %v2729_v7, 2  ;;  %vm791_vm12 = vcmp.ge.s32.totalorder %v9440_v23, 0  ;;  %vm807_vm13 = vcmp.lt.s32.totalorder %v9440_v23, 64  ;;  %v13711_v23 = vmov 0 }
 0x23b   : > { %v4302_v58 = vsel %vm4250_vm2, %v453_v22, 0.0  ;;  %vm2255_vm3 = vmand %vm13705_vm7, %vm13704_vm15  ;;  %vm13709_vm2 = vcmask 654336   ;;  %vm13710_vm15 = vcmp.lt.s32.totalorder %v9868_v6, 64  ;;  %v145_v22 = vadd.s32 1280, %v13379_v56 }
 0x23c   : > { %2793 = vst [vmem:[#allocation2 + $0x240] ss:$-124 sps:$4 sm:$0xc1] %v2761_v0   ;;  %v4334_v1 = vrot.slane %v4302_v58, 4  ;;  %vm2271_vm4 = vmand %vm2255_vm3, %vm13706_vm9  ;;  %6319 = vmatmul.mubr.msk.f32.gmra.mrb[14].mxu0 %vm13709_vm2, %v9780_v62  ;;  %vm13714_vm9 = vcmp.lt.s32.totalorder %v9476_v39, 64 }
 0x23d   : > { %vm3874_vm11 = vmand %vm13708_vm10, %vm13707_vm0  ;;  %v2386_v29 = vsel %vm2271_vm4, %v2354_v3, 0.0  ;;  %5417 = vmatprep.mubr.f32.mxu0 %v13442_v50  ;;  %vm13713_vm0 = vcmp.ge.s32.totalorder %v9476_v39, 0  ;;  %v162_v0 = vadd.s32 %v13393_v12, %v145_v22 }
 0x23e   : > { %4366 = vst [vmem:[#allocation2 + $0x3b8] sm:$0x70] %v4334_v1  ;;  %vm3890_vm8 = vmand %vm3874_vm11, %vm13710_vm15  ;;  %vm13715_vm11 = vcmask 523264   ;;  %vm13716_vm15 = vcmask 654336   ;;  %v13732_v1 = vmov 0 }
 0x23f   : > { %2402 = vst [vmem:[#allocation2 + $0x1c0] sm:$0x7] %v2386_v29  ;;  %v3942_v47 = vsel %vm3890_vm8, %v2354_v3, 0.0  ;;  %vm10096_vm3 = vmand %vm791_vm12, %vm807_vm13  ;;  %v2143_v42 = vsel %vm13715_vm11, %v9623_v59, %v10093_v5  ;;  %vm13717_vm8 = vcmp.ge.s32.totalorder %v9856_v13, 0  ;;  %vm13718_vm12 = vcmp.lt.s32.totalorder %v9856_v13, 64  ;;  %v10123_v59 = vpop.permute.xlu1 %1907 }
 0x240   : > { %v13712_v23 = vsel %vm10096_vm3, 4294967295, %v13711_v23  ;;  %v3974_v10 = vrot.slane %v3942_v47, 2  ;;  %vm839_vm4 = vmand %vm10096_vm3, %vm13713_vm0  ;;  %6320 = vmatmul.mubr.msk.f32.gmra.mrb[16].mxu0 %vm13716_vm15, %v9838_v38  ;;  %v163_v3 = vadd.s32 %v13393_v12, %v146_v26  ;;  %v1008_v47 = vadd.s32 1, %v9896_v61  ;;  %v5078_v26 = vld [vmem:[#allocation2 + $0x3b0] sm:$0xff] }
 0x241   : > { %vm855_vm2 = vmand %vm839_vm4, %vm13714_vm9  ;;  %5423 = vmatprep.mubr.f32.mxu0 %v13442_v50  ;;  %vm13719_vm4 = vcmp.ge.s32.totalorder %v9451_v30, 0  ;;  %v10200_v61 = vand.u32 63, %v162_v0 }
 0x242   : > { %4006 = vst [vmem:[#allocation2 + $0x3b8] ss:$-124 sps:$4 sm:$0xc1] %v3974_v10   ;;  %v911_v40 = vsel %vm855_vm2, %v7326_v19, 0.0  ;;  %vm2044_vm13 = vmand %vm10096_vm3, %vm13717_vm8  ;;  %vm13720_vm2 = vcmp.lt.s32.totalorder %v9451_v30, 64  ;;  %vm13721_vm8 = vcmp.ge.s32.totalorder %v9868_v6, 0 }
 0x243   : > { %v943_v60 = vrot.slane %v911_v40, 2  ;;  %vm2060_vm0 = vmand %vm2044_vm13, %vm13718_vm12  ;;  %vm13722_vm12 = vcmp.lt.s32.totalorder %v9868_v6, 64  ;;  %v10169_v49 = vpop.permute.xlu1 %1423 }
 0x244   : > { %vm2973_vm9 = vmand %vm10096_vm3, %vm13719_vm4  ;;  %v2175_v39 = vsel %vm2060_vm0, %v2143_v42, 0.0  ;;  %6321 = vmatmul.mubr.msk.f32.gmra.mrb[18].mxu0 %vm13716_vm15, %v9911_v32  ;;  %vm13723_vm4 = vcmask 531456   ;;  %vm1024_vm3 = vcmp.ge.s32.totalorder %v1008_v47, 0 }
 0x245   : > { %975 = vst [vmem:[#allocation2 + $0xc0] ss:$-124 sps:$4 sm:$0xc1] %v943_v60   ;;  %vm2989_vm11 = vmand %vm2973_vm9, %vm13720_vm2  ;;  %v2207_v19 = vrot.slane %v2175_v39, 3  ;;  %5429 = vmatprep.mubr.f32.mxu0 %v13442_v50  ;;  %v1932_v31 = vsel %vm13723_vm4, %v9579_v55, %v10123_v59  ;;  %vm13724_vm9 = vcmp.ge.s32.totalorder %v9856_v13, 0  ;;  %vm13726_vm4 = vcmask 506880  }
 0x246   : > { %v3038_v51 = vsel %vm2989_vm11, %v9997_v4, 0.0  ;;  %vm3726_vm13 = vmand %vm13692_vm1, %vm13721_vm8  ;;  %v10144_v4 = vpop.permute.xlu0 %2492  ;;  %vm13725_vm1 = vcmp.lt.s32.totalorder %v9856_v13, 64  ;;  %v10206_v39 = vand.u32 63, %v163_v3 }
 0x247   : > { %v3070_v44 = vrot.slane %v3038_v51, 4  ;;  %vm3742_vm0 = vmand %vm3726_vm13, %vm13722_vm12  ;;  %2239 = vst [vmem:[#allocation2 + $0x140] sm:$0xe0] %v2207_v19  ;;  %v2517_v11 = vsel %vm13726_vm4, %v9708_v20, %v10144_v4 }
 0x248   : > { %v3794_v45 = vsel %vm3742_vm0, %v2143_v42, 0.0  ;;  %vm1833_vm2 = vmand %vm9848_vm6, %vm13724_vm9  ;;  %6322 = vmatmul.mubr.msk.f32.gmra.mrb[20].mxu0 %vm13716_vm15, %v9986_v2  ;;  %vm1300_vm15 = vcmp.ge.s32.totalorder %v1284_v54, 0  ;;  %v195_v42 = vshra.s32 %v163_v3, 6  ;;  %v519_v22 = vadd.s32 4294967295, %v10206_v39 }
 0x249   : > { %3102 = vst [vmem:[#allocation2 + $0x240] sm:$0x70] %v3070_v44  ;;  %v3826_v15 = vrot.slane %v3794_v45, 5  ;;  %vm1849_vm11 = vmand %vm1833_vm2, %vm13725_vm1  ;;  %5435 = vmatprep.mubr.f32.mxu0 %v13442_v50  ;;  %vm13727_vm2 = vnez %v13676_v24 }
 0x24a   : > { %vm3626_vm13 = vmand %vm13580_vm5, %vm13721_vm8  ;;  %v1964_v55 = vsel %vm1849_vm11, %v1932_v31, 0.0  ;;  %vm1316_vm8 = vcmp.lt.s32.totalorder %v1284_v54, 64  ;;  %v10204_v60 = vpop.permute.xlu0 %1148  ;;  %v518_v54 = vadd.s32 4294967295, %v10200_v61 }
 0x24b   : > { %3858 = vst [vmem:[#allocation2 + $0x338] sm:$0x38] %v3826_v15  ;;  %vm3642_vm0 = vmand %vm3626_vm13, %vm13722_vm12  ;;  %v1996_v41 = vrot.slane %v1964_v55, 6  ;;  %vm13728_vm13 = vcmask 654336   ;;  %vm13729_vm12 = vcmp.ge.s32.totalorder %v9868_v6, 0  ;;  %v13741_v15 = vmov 0 }
 0x24c   : > { %v3694_v7 = vsel %vm3642_vm0, %v1932_v31, 0.0  ;;  %vm2418_vm5 = vmand %vm13727_vm2, %vm13724_vm9  ;;  %6323 = vmatmul.mubr.msk.f32.gmra.mrb[22].mxu0 %vm13728_vm13, %v10034_v25  ;;  %vm13730_vm0 = vnez %v13515_v35  ;;  %vm13731_vm9 = vcmp.lt.s32.totalorder %v9868_v6, 64  ;;  %vm13734_vm13 = vcmask 1031168  }
 0x24d   : > { %2028 = vst [vmem:[#allocation2 + $0x140] sm:$0x1c] %v1996_v41  ;;  %3710 = vst [vmem:[#allocation2 + $0x338] sm:$0x7] %v3694_v7  ;;  %5607 = vmatprep.mubr.f32.mxu0 %v13442_v50  ;;  %v1447_v29 = vsel %vm13734_vm13, %v9900_v52, %v10169_v49  ;;  %v194_v6 = vshra.s32 %v162_v0, 6  ;;  %v10216_v31 = vand.u32 63, %v195_v42 }
 0x24e   : > { %vm2434_vm11 = vmand %vm2418_vm5, %vm13725_vm1 }
 0x24f   : > { %vm4038_vm4 = vmand %vm13730_vm0, %vm13729_vm12  ;;  %v2549_v20 = vsel %vm2434_vm11, %v2517_v11, 0.0  ;;  %vm13735_vm11 = vcmp.ge.s32.totalorder %v9934_v48, 0  ;;  %v10212_v51 = vand.u32 63, %v194_v6  ;;  %v10241_v41 = vadd.s32 4294967294, %v10216_v31 }
 0x250   : > { %vm4054_vm5 = vmand %vm4038_vm4, %vm13731_vm9  ;;  %v2581_v13 = vrot.slane %v2549_v20, 5  ;;  %vm13736_vm4 = vcmp.lt.s32.totalorder %v9934_v48, 64  ;;  %v5062_v20 = vld [vmem:[#allocation2 + $0x330] sm:$0xff]  ;;  %v13752_v6 = vmov 0 }
 0x251   : > { %v4106_v58 = vsel %vm4054_vm5, %v2517_v11, 0.0  ;;  %vm10182_vm1 = vmand %vm1300_vm15, %vm1316_vm8  ;;  %vm13737_vm8 = vcmp.ge.s32.totalorder %v9451_v30, 0  ;;  %vm13738_vm5 = vcmp.lt.s32.totalorder %v9451_v30, 64  ;;  %v10234_v55 = vadd.s32 4294967294, %v10212_v51 }
 0x252   : > { %v13733_v1 = vsel %vm10182_vm1, 4294967295, %v13732_v1  ;;  %2613 = vst [vmem:[#allocation2 + $0x1c0] sm:$0x38] %v2581_v13  ;;  %v4138_v10 = vrot.slane %v4106_v58, 7  ;;  %vm1348_vm12 = vmand %vm10182_vm1, %vm13735_vm11  ;;  %vm1040_vm11 = vcmp.lt.s32.totalorder %v1008_v47, 64  ;;  %v6433_v13 = vpack.c.bf16 %v5078_v26, %v5062_v20  ;;  %v5094_v20 = vld [vmem:[#allocation2 + $0x430] sm:$0xff] }
 0x253   : > { %vm1364_vm15 = vmand %vm1348_vm12, %vm13736_vm4  ;;  %vm13739_vm12 = vcmp.ge.s32.totalorder %v9969_v27, 0 }
 0x254   : > { %4170 = vst [vmem:[#allocation2 + $0x3b8] sm:$0xe] %v4138_v10  ;;  %vm3283_vm9 = vmand %vm13727_vm2, %vm13737_vm8  ;;  %v1479_v52 = vsel %vm1364_vm15, %v1447_v29, 0.0  ;;  %vm13740_vm15 = vcmp.lt.s32.totalorder %v9969_v27, 64  ;;  %v5063_v11 = vld [vmem:[#allocation2 + $0x338] sm:$0xff]  ;;  %vm13749_vm2 = vcmp.lt.s32.totalorder %v9969_v27, 64  ;;  %v10252_v10 = vpop.permute.xlu1 %660 }
 0x255   : > { %vm3299_vm13 = vmand %vm3283_vm9, %vm13738_vm5  ;;  %v1511_v40 = vrot.slane %v1479_v52, 4  ;;  %vm13743_vm5 = vcmask 1039360  }
 0x256   : > { %vm4839_vm4 = vmand %vm13730_vm0, %vm13739_vm12  ;;  %v3351_v19 = vsel %vm3299_vm13, %v1447_v29, 0.0  ;;  %v1172_v35 = vsel %vm13743_vm5, %v9786_v33, %v10204_v60  ;;  %vm13744_vm0 = vcmp.ge.s32.totalorder %v9934_v48, 0  ;;  %vm13746_vm12 = vcmp.ge.s32.totalorder %v9451_v30, 0 }
 0x257   : > { %vm4855_vm8 = vmand %vm4839_vm4, %vm13740_vm15  ;;  %1543 = vst [vmem:[#allocation2 + $0xc8] sm:$0x70] %v1511_v40  ;;  %v3383_v44 = vrot.slane %v3351_v19, 6  ;;  %vm13747_vm15 = vcmp.lt.s32.totalorder %v9451_v30, 64  ;;  %vm534_vm5 = vcmp.ge.s32.totalorder %v518_v54, 0  ;;  %v10297_v19 = vadd.s32 2, %v9902_v14 }
 0x258   : > { %v4907_v45 = vsel %vm4855_vm8, %v1447_v29, 0.0  ;;  %vm10218_vm9 = vmand %vm1024_vm3, %vm1040_vm11  ;;  %vm13745_vm3 = vcmp.lt.s32.totalorder %v9934_v48, 64  ;;  %v659_v29 = vpop.permute.xlu0 %658 }
 0x259   : > { %v13742_v15 = vsel %vm10218_vm9, 4294967295, %v13741_v15  ;;  %3415 = vst [vmem:[#allocation2 + $0x2c0] sm:$0x1c] %v3383_v44  ;;  %4923 = vst [vmem:[#allocation2 + $0x4b8] sm:$0x7] %v4907_v45 }
 0x25a   : > { %vm1072_vm13 = vmand %vm10218_vm9, %vm13744_vm0  ;;  %vm550_vm0 = vcmp.lt.s32.totalorder %v518_v54, 64 }
 0x25b   : > { %vm1088_vm11 = vmand %vm1072_vm13, %vm13745_vm3  ;;  %v5079_v7 = vld [vmem:[#allocation2 + $0x3b8] sm:$0xff]  ;;  %vm13748_vm13 = vcmp.ge.s32.totalorder %v9969_v27, 0 }
 0x25c   : > { %vm3118_vm4 = vmand %vm13705_vm7, %vm13746_vm12  ;;  %v1204_v33 = vsel %vm1088_vm11, %v1172_v35, 0.0  ;;  %v6431_v0 = vpack.c.bf16 %v5079_v7, %v5063_v11  ;;  %vm535_vm11 = vcmp.ge.s32.totalorder %v519_v22, 0  ;;  %vm551_vm12 = vcmp.lt.s32.totalorder %v519_v22, 64  ;;  %v5110_v22 = vld [vmem:[#allocation2 + $0x4b0] sm:$0xff] }
 0x25d   : > { %vm3134_vm8 = vmand %vm3118_vm4, %vm13747_vm15  ;;  %v1236_v48 = vrot.slane %v1204_v33, 7  ;;  %vm12609_vm4 = vcmp.ge.s32.totalorder %v10234_v55, 0  ;;  %vm12611_vm15 = vcmp.ge.s32.totalorder %v10241_v41, 0 }
 0x25e   : > { %vm4690_vm3 = vmand %vm13708_vm10, %vm13748_vm13  ;;  %v3187_v3 = vsel %vm3134_vm8, %v1172_v35, 0.0  ;;  %6432 = vmatprep.subr.bf16.mxu1 %v6431_v0 }
 0x25f   : > { %vm4706_vm1 = vmand %vm4690_vm3, %vm13749_vm2  ;;  %1268 = vst [vmem:[#allocation2 + $0xc8] sm:$0xe] %v1236_v48  ;;  %v3219_v58 = vrot.slane %v3187_v3, 1  ;;  %6434 = vmatpush1.bf16.msra.mxu1 %v6433_v13  ;;  %vm12612_vm2 = vcmp.lt.s32.totalorder %v10234_v55, 64  ;;  %vm12616_vm3 = vcmp.ge.s32.totalorder %v9902_v14, 0  ;;  %v6437_v13 = vpack.c.bf16 %v5110_v22, %v5094_v20  ;;  %v10352_v22 = vpop.permute.xlu1 %1152 }
 0x260   : > { %v4759_v47 = vsel %vm4706_vm1, %v1172_v35, 0.0  ;;  %vm10257_vm10 = vmand %vm534_vm5, %vm550_vm0  ;;  %vm13754_vm0 = vcmask 7168   ;;  %vm12613_vm1 = vcmp.ge.s32.totalorder %v10212_v51, 0  ;;  %v5111_v7 = vld [vmem:[#allocation2 + $0x4b8] sm:$0xff] }
 0x261   : > { %3251 = vst [vmem:[#allocation2 + $0x2c0] ss:$-124 sps:$4 sm:$0x83] %v3219_v58   ;;  %v4791_v27 = vrot.slane %v4759_v47, 3  ;;  %vm10264_vm8 = vmand %vm535_vm11, %vm551_vm12  ;;  %v681_v42 = vsel %vm13754_vm0, %v9945_v36, %v659_v29  ;;  %v10289_v36 = vadd.s32 2, %v9451_v30  ;;  %v1010_v47 = vadd.s32 1, %v10206_v39 }
 0x262   : > { %v13753_v6 = vsel %vm10264_vm8, 4294967295, %v13752_v6  ;;  %vm582_vm5 = vmand %vm10257_vm10, %vm12609_vm4  ;;  %vm13756_vm4 = vcmp.lt.s32.totalorder %v10241_v41, 64 }
 0x263   : > { %4823 = vst [vmem:[#allocation2 + $0x438] sm:$0xe0] %v4791_v27  ;;  %vm583_vm13 = vmand %vm10264_vm8, %vm12611_vm15  ;;  %vm12614_vm15 = vcmp.lt.s32.totalorder %v10212_v51, 64 }
 0x264   : > { %vm13755_vm11 = vmmov %vm13754_vm0  ;;  %vm12615_vm0 = vcmp.lt.s32.totalorder %v9902_v14, 64 }
 0x265   : > { %v682_v52 = vsel %vm13755_vm11, %v659_v29, %v10252_v10  ;;  %vm598_vm12 = vmand %vm582_vm5, %vm12612_vm2  ;;  %v1009_v29 = vadd.s32 1, %v10200_v61 }
 0x266   : > { %vm599_vm7 = vmand %vm583_vm13, %vm13756_vm4  ;;  %v713_v40 = vsel %vm598_vm12, %v681_v42, 0.0  ;;  %vm12622_vm12 = vcmp.ge.s32.totalorder %v10289_v36, 0 }
 0x267   : > { %vm2826_vm11 = vmand %vm9955_vm14, %vm12616_vm3  ;;  %v714_v44 = vsel %vm599_vm7, %v682_v52, 0.0  ;;  %v745_v45 = vrot.slane %v713_v40, 5  ;;  %vm13757_vm7 = vnez %v13689_v34  ;;  %vm1041_vm8 = vcmp.lt.s32.totalorder %v1009_v29, 64 }
 0x268   : > { %vm2827_vm4 = vmand %vm10257_vm10, %vm12613_vm1  ;;  %v746_v35 = vrot.slane %v714_v44, 5  ;;  %vm12623_vm1 = vcmp.ge.s32.totalorder %v10297_v19, 0 }
 0x269   : > { %vm2842_vm5 = vmand %vm2826_vm11, %vm12615_vm0  ;;  %777 = vst [vmem:[#allocation2 + $0x50] sm:$0x38] %v745_v45 }
 0x26a   : > { %vm2843_vm13 = vmand %vm2827_vm4, %vm12614_vm15  ;;  %778 = vst [vmem:[#allocation2 + $0x58] sm:$0x38] %v746_v35  ;;  %v2894_v54 = vsel %vm2842_vm5, %v681_v42, 0.0  ;;  %v5095_v11 = vld [vmem:[#allocation2 + $0x438] sm:$0xff]  ;;  %vm12617_vm4 = vcmp.lt.s32.totalorder %v10289_v36, 64  ;;  %vm12621_vm5 = vcmp.lt.s32.totalorder %v10297_v19, 64 }
 0x26b   : > { %vm2974_vm2 = vmand %vm13757_vm7, %vm12616_vm3  ;;  %v2895_v26 = vsel %vm2843_vm13, %v682_v52, 0.0  ;;  %v2926_v33 = vrot.slane %v2894_v54, 7  ;;  %v6435_v0 = vpack.c.bf16 %v5111_v7, %v5095_v11  ;;  %v10349_v35 = vld [vmem:[%s6671_s23 + $0x30] sm:$0x77]  ;;  %v13764_v11 = vmov 0 }
 0x26c   : > { %vm2990_vm11 = vmand %vm2974_vm2, %vm12615_vm0  ;;  %v2927_v48 = vrot.slane %v2895_v26, 7  ;;  %vm13758_vm0 = vnez %v13712_v23  ;;  %v13762_v26 = vmov 0 }
 0x26d   : > { %v3039_v3 = vsel %vm2990_vm11, %v8400_v57, 0.0  ;;  %vm4383_vm13 = vmand %vm9848_vm6, %vm12622_vm12  ;;  %2958 = vst [vmem:[#allocation2 + $0x248] sm:$0xe] %v2926_v33  ;;  %6436 = vmatprep.subr.bf16.mxu1 %v6435_v0  ;;  %vm13759_vm6 = vcmask 654336  }
 0x26e   : > { %v3071_v58 = vrot.slane %v3039_v3, 4  ;;  %vm4384_vm2 = vmand %vm9955_vm14, %vm12623_vm1  ;;  %2959 = vst [vmem:[#allocation2 + $0x250] sm:$0xe] %v2927_v48  ;;  %6438 = vmatpush1.bf16.msra.mxu1 %v6437_v13  ;;  %v1285_v3 = vadd.s32 2, %v10200_v61 }
 0x26f   : > { %vm4399_vm11 = vmand %vm4383_vm13, %vm12617_vm4  ;;  %vm1025_vm4 = vcmp.ge.s32.totalorder %v1009_v29, 0 }
 0x270   : > { %3103 = vst [vmem:[#allocation2 + $0x248] sm:$0x70] %v3071_v58  ;;  %vm4400_vm15 = vmand %vm4384_vm2, %vm12621_vm5  ;;  %v4451_v27 = vsel %vm4399_vm11, %v681_v42, 0.0  ;;  %vm13760_vm2 = vcmp.lt.s32.totalorder %v10289_v36, 64  ;;  %vm1026_vm5 = vcmp.ge.s32.totalorder %v1010_v47, 0 }
 0x271   : > { %vm4547_vm3 = vmand %vm13758_vm0, %vm12622_vm12  ;;  %v4452_v40 = vsel %vm4400_vm15, %v682_v52, 0.0  ;;  %v4483_v44 = vrot.slane %v4451_v27, 1  ;;  %6324 = vmatmul.mubr.msk.f32.vlgmr.msra.gmra.mrb[12].mxu1 %vm13759_vm6, %v10067_v8  ;;  %vm1042_vm12 = vcmp.lt.s32.totalorder %v1010_v47, 64  ;;  %vm13761_vm15 = vcmp.lt.s32.totalorder %v10297_v19, 64  ;;  %v1151_v52 = vpop.permute.xlu0 %1150 }
 0x272   : > { %vm4548_vm13 = vmand %vm13757_vm7, %vm12623_vm1  ;;  %v4484_v45 = vrot.slane %v4452_v40, 1  ;;  %5512 = vmatprep.mubr.f32.mxu1 %v13442_v50  ;;  %vm13774_vm1 = vcmp.ge.s32.totalorder %v9902_v14, 0 }
 0x273   : > { %vm4563_vm11 = vmand %vm4547_vm3, %vm13760_vm2  ;;  %4515 = vst [vmem:[#allocation2 + $0x440] ss:$-124 sps:$4 sm:$0x83] %v4483_v44  }
 0x274   : > { %vm4564_vm0 = vmand %vm4548_vm13, %vm13761_vm15  ;;  %v4611_v42 = vsel %vm4563_vm11, %v8400_v57, 0.0  ;;  %4516 = vst [vmem:[#allocation2 + $0x448] ss:$-124 sps:$4 sm:$0x83] %v4484_v45   ;;  %vm13766_vm13 = vcmask 654336   ;;  %vm13768_vm11 = vcmask 1039360   ;;  %v10417_v45 = vpop.permute.xlu1 %1427 }
 0x275   : > { %v4612_v54 = vsel %vm4564_vm0, %v10349_v35, 0.0  ;;  %v4643_v8 = vrot.slane %v4611_v42, 6  ;;  %vm10356_vm6 = vmand %vm1025_vm4, %vm1041_vm8  ;;  %6325 = vmatmul.mubr.msk.f32.gmra.mrb[14].mxu1 %vm13766_vm13, %v9780_v62  ;;  %vm13767_vm0 = vcmp.ge.s32.totalorder %v10234_v55, 0  ;;  %v1173_v7 = vsel %vm13768_vm11, %v10204_v60, %v1151_v52  ;;  %v1426_v27 = vpop.permute.xlu0 %1425 }
 0x276   : > { %v13763_v26 = vsel %vm10356_vm6, 4294967295, %v13762_v26  ;;  %v4644_v33 = vrot.slane %v4612_v54, 6  ;;  %vm10360_vm3 = vmand %vm1026_vm5, %vm1042_vm12  ;;  %5518 = vmatprep.mubr.f32.mxu1 %v13442_v50  ;;  %vm13769_vm8 = vcmp.ge.s32.totalorder %v10241_v41, 0  ;;  %vm13771_vm5 = vcmp.lt.s32.totalorder %v10234_v55, 64 }
 0x277   : > { %v13765_v11 = vsel %vm10360_vm3, 4294967295, %v13764_v11  ;;  %4675 = vst [vmem:[#allocation2 + $0x440] sm:$0x1c] %v4643_v8  ;;  %vm1073_vm2 = vmand %vm10356_vm6, %vm13767_vm0  ;;  %vm13772_vm13 = vcmp.lt.s32.totalorder %v10241_v41, 64  ;;  %v13785_v42 = vmov 0  ;;  %v13787_v54 = vmov 0 }
 0x278   : > { %4676 = vst [vmem:[#allocation2 + $0x448] sm:$0x1c] %v4644_v33  ;;  %vm1074_vm12 = vmand %vm10360_vm3, %vm13769_vm8  ;;  %vm13775_vm8 = vcmp.ge.s32.totalorder %v10212_v51, 0 }
 0x279   : > { %vm13770_vm4 = vmmov %vm13768_vm11  ;;  %vm13773_vm11 = vcmask 654336  }
 0x27a   : > { %v1174_v62 = vsel %vm13770_vm4, %v1151_v52, %v10352_v22  ;;  %vm1089_vm15 = vmand %vm1073_vm2, %vm13771_vm5  ;;  %6326 = vmatmul.mubr.msk.f32.gmra.mrb[16].mxu1 %vm13773_vm11, %v9838_v38  ;;  %v1286_v38 = vadd.s32 2, %v10206_v39 }
 0x27b   : > { %vm1090_vm0 = vmand %vm1074_vm12, %vm13772_vm13  ;;  %v1205_v48 = vsel %vm1089_vm15, %v1173_v7, 0.0  ;;  %5524 = vmatprep.mubr.f32.mxu1 %v13442_v50  ;;  %vm13776_vm12 = vcmp.lt.s32.totalorder %v9902_v14, 64  ;;  %vm13779_vm13 = vcmp.ge.s32.totalorder %v10289_v36, 0 }
 0x27c   : > { %vm3119_vm7 = vmand %vm10218_vm9, %vm13774_vm1  ;;  %v1206_v60 = vsel %vm1090_vm0, %v1174_v62, 0.0  ;;  %v1237_v0 = vrot.slane %v1205_v48, 7  ;;  %vm13777_vm1 = vcmp.lt.s32.totalorder %v10212_v51, 64  ;;  %vm13780_vm0 = vnez %v13651_v63 }
 0x27d   : > { %vm3120_vm2 = vmand %vm10356_vm6, %vm13775_vm8  ;;  %v1238_v20 = vrot.slane %v1206_v60, 7  ;;  %vm1318_vm3 = vcmp.lt.s32.totalorder %v1286_v38, 64  ;;  %vm13784_vm6 = vcmask 654336   ;;  %v10459_v48 = vadd.s32 4294967295, %v9902_v14 }
 0x27e   : > { %vm3135_vm4 = vmand %vm3119_vm7, %vm13776_vm12  ;;  %1269 = vst [vmem:[#allocation2 + $0xd0] sm:$0xe] %v1237_v0  ;;  %vm13781_vm7 = vcmp.ge.s32.totalorder %v10297_v19, 0  ;;  %vm1317_vm12 = vcmp.lt.s32.totalorder %v1285_v3, 64  ;;  %v10464_v0 = vadd.s32 4294967295, %v10212_v51 }
 0x27f   : > { %vm3136_vm5 = vmand %vm3120_vm2, %vm13777_vm1  ;;  %1270 = vst [vmem:[#allocation2 + $0xd8] sm:$0xe] %v1238_v20  ;;  %v3188_v13 = vsel %vm3135_vm4, %v1173_v7, 0.0  ;;  %vm1301_vm2 = vcmp.ge.s32.totalorder %v1285_v3, 0  ;;  %vm13782_vm4 = vcmp.lt.s32.totalorder %v10289_v36, 64 }
 0x280   : > { %vm13778_vm15 = vmmov %vm13773_vm11  ;;  %v3189_v58 = vsel %vm3136_vm5, %v1174_v62, 0.0  ;;  %v3220_v29 = vrot.slane %v3188_v13, 1  ;;  %v10478_v13 = vadd.s32 1, %v9451_v30 }
 0x281   : > { %6327 = vmatmul.mubr.msk.f32.gmra.mrb[18].mxu1 %vm13778_vm15, %v9911_v32  ;;  %vm4691_vm11 = vmand %vm13780_vm0, %vm13779_vm13  ;;  %v3221_v47 = vrot.slane %v3189_v58, 1  ;;  %vm1302_vm15 = vcmp.ge.s32.totalorder %v1286_v38, 0  ;;  %vm13783_vm13 = vcmp.lt.s32.totalorder %v10297_v19, 64  ;;  %vm13797_vm0 = vnez %v13733_v1  ;;  %v1683_v58 = vpop.permute.xlu0 %1682 }
 0x282   : > { %5530 = vmatprep.mubr.f32.mxu1 %v13442_v50  ;;  %vm4692_vm8 = vmand %vm10218_vm9, %vm13781_vm7  ;;  %3252 = vst [vmem:[#allocation2 + $0x2c8] ss:$-124 sps:$4 sm:$0x83] %v3220_v29   ;;  %vm13812_vm9 = vcmp.lt.s32.totalorder %v10459_v48, 64 }
 0x283   : > { %vm4707_vm1 = vmand %vm4691_vm11, %vm13782_vm4  ;;  %3253 = vst [vmem:[#allocation2 + $0x2d0] ss:$-124 sps:$4 sm:$0x83] %v3221_v47   ;;  %vm13790_vm4 = vcmask 1031168   ;;  %v10482_v47 = vpop.permute.xlu1 %1684 }
 0x284   : > { %vm4708_vm5 = vmand %vm4692_vm8, %vm13783_vm13  ;;  %v4760_v32 = vsel %vm4707_vm1, %v1173_v7, 0.0  ;;  %vm13789_vm8 = vcmp.ge.s32.totalorder %v10234_v55, 0  ;;  %vm13793_vm1 = vcmask 654336  }
 0x285   : > { %6328 = vmatmul.mubr.msk.f32.gmra.mrb[20].mxu1 %vm13784_vm6, %v9986_v2  ;;  %v4761_v40 = vsel %vm4708_vm5, %v1174_v62, 0.0  ;;  %v4792_v44 = vrot.slane %v4760_v32, 3  ;;  %vm10419_vm7 = vmand %vm1301_vm2, %vm1317_vm12  ;;  %v1448_v2 = vsel %vm13790_vm4, %v10169_v49, %v1426_v27  ;;  %vm13791_vm2 = vcmp.ge.s32.totalorder %v10241_v41, 0 }
 0x286   : > { %v13786_v42 = vsel %vm10419_vm7, 4294967295, %v13785_v42  ;;  %5536 = vmatprep.mubr.f32.mxu1 %v13442_v50  ;;  %v4793_v52 = vrot.slane %v4761_v40, 3  ;;  %vm10424_vm11 = vmand %vm1302_vm15, %vm1318_vm3  ;;  %vm13794_vm15 = vcmp.lt.s32.totalorder %v10234_v55, 64  ;;  %vm13795_vm5 = vcmp.lt.s32.totalorder %v10241_v41, 64 }
 0x287   : > { %v13788_v54 = vsel %vm10424_vm11, 4294967295, %v13787_v54  ;;  %4824 = vst [vmem:[#allocation2 + $0x440] sm:$0xe0] %v4792_v44  ;;  %vm1349_vm6 = vmand %vm10419_vm7, %vm13789_vm8  ;;  %v226_v62 = vadd.s32 4294967294, %v10200_v61  ;;  %v10486_v32 = vadd.s32 1, %v9902_v14 }
 0x288   : > { %4825 = vst [vmem:[#allocation2 + $0x448] sm:$0xe0] %v4793_v52  ;;  %vm1350_vm12 = vmand %vm10424_vm11, %vm13791_vm2  ;;  %vm12633_vm11 = vcmp.ge.s32.totalorder %v10459_v48, 0 }
 0x289   : > { %vm13792_vm3 = vmmov %vm13790_vm4  ;;  %6329 = vmatmul.mubr.msk.f32.gmra.mrb[22].mxu1 %vm13793_vm1, %v10034_v25  ;;  %vm13796_vm4 = vcmp.ge.s32.totalorder %v9902_v14, 0 }
 0x28a   : > { %v1449_v8 = vsel %vm13792_vm3, %v1426_v27, %v10417_v45  ;;  %vm1365_vm13 = vmand %vm1349_vm6, %vm13794_vm15  ;;  %5708 = vmatprep.mubr.f32.mxu1 %v13442_v50  ;;  %vm13798_vm3 = vcmp.ge.s32.totalorder %v10212_v51, 0  ;;  %vm13799_vm6 = vcmp.lt.s32.totalorder %v9902_v14, 64  ;;  %v147_v27 = vadd.s32 1536, %v13379_v56 }
 0x28b   : > { %vm1366_vm8 = vmand %vm1350_vm12, %vm13795_vm5  ;;  %v1480_v49 = vsel %vm1365_vm13, %v1448_v2, 0.0  ;;  %vm13800_vm12 = vcmp.lt.s32.totalorder %v10212_v51, 64  ;;  %vm13801_vm5 = vcmp.ge.s32.totalorder %v10289_v36, 0 }
 0x28c   : > { %vm3284_vm2 = vmand %vm13797_vm0, %vm13796_vm4  ;;  %v1481_v33 = vsel %vm1366_vm8, %v1449_v8, 0.0  ;;  %v1512_v7 = vrot.slane %v1480_v49, 4  ;;  %vm13802_vm8 = vnez %v13676_v24 }
 0x28d   : > { %vm3285_vm1 = vmand %vm10419_vm7, %vm13798_vm3  ;;  %v1513_v25 = vrot.slane %v1481_v33, 4  ;;  %vm12638_vm7 = vcmp.lt.s32.totalorder %v10478_v13, 64  ;;  %v10522_v33 = vpop.permute.xlu1 %431 }
 0x28e   : > { %vm3300_vm15 = vmand %vm3284_vm2, %vm13799_vm6  ;;  %1544 = vst [vmem:[#allocation2 + $0xd0] sm:$0x70] %v1512_v7  ;;  %vm13803_vm2 = vcmp.ge.s32.totalorder %v10297_v19, 0  ;;  %vm242_vm6 = vcmp.ge.s32.totalorder %v226_v62, 0 }
 0x28f   : > { %vm3301_vm13 = vmand %vm3285_vm1, %vm13800_vm12  ;;  %1545 = vst [vmem:[#allocation2 + $0xd8] sm:$0x70] %v1513_v25  ;;  %v3352_v60 = vsel %vm3300_vm15, %v1448_v2, 0.0  ;;  %vm258_vm1 = vcmp.lt.s32.totalorder %v226_v62, 64  ;;  %vm13804_vm15 = vcmp.lt.s32.totalorder %v10289_v36, 64 }
 0x290   : > { %vm4840_vm4 = vmand %vm13802_vm8, %vm13801_vm5  ;;  %v3353_v20 = vsel %vm3301_vm13, %v1449_v8, 0.0  ;;  %v3384_v3 = vrot.slane %v3352_v60, 6  ;;  %vm13805_vm13 = vcmp.lt.s32.totalorder %v10297_v19, 64 }
 0x291   : > { %vm4841_vm3 = vmand %vm13797_vm0, %vm13803_vm2  ;;  %v3385_v38 = vrot.slane %v3353_v20, 6  ;;  %vm13809_vm2 = vcmask 539648   ;;  %v227_v20 = vadd.s32 4294967294, %v10206_v39 }
 0x292   : > { %vm4856_vm12 = vmand %vm4840_vm4, %vm13804_vm15  ;;  %3416 = vst [vmem:[#allocation2 + $0x2c8] sm:$0x1c] %v3384_v3  ;;  %vm13808_vm15 = vnez %v13694_v46  ;;  %v1706_v44 = vsel %vm13809_vm2, %v9874_v43, %v1683_v58 }
 0x293   : > { %vm4857_vm5 = vmand %vm4841_vm3, %vm13805_vm13  ;;  %3417 = vst [vmem:[#allocation2 + $0x2d0] sm:$0x1c] %v3385_v38  ;;  %v4908_v29 = vsel %vm4856_vm12, %v1448_v2, 0.0  ;;  %vm12641_vm13 = vcmp.lt.s32.totalorder %v10464_v0, 64  ;;  %v164_v2 = vadd.s32 %v13393_v12, %v147_v27 }
 0x294   : > { %v4909_v40 = vsel %vm4857_vm5, %v1449_v8, 0.0  ;;  %4924 = vst [vmem:[#allocation2 + $0x4c0] sm:$0x7] %v4908_v29  ;;  %vm10491_vm4 = vmand %vm242_vm6, %vm258_vm1  ;;  %vm13810_vm5 = vcmp.ge.s32.totalorder %v10464_v0, 0  ;;  %vm12640_vm1 = vcmp.ge.s32.totalorder %v10478_v13, 0 }
 0x295   : > { %4925 = vst [vmem:[#allocation2 + $0x4c8] sm:$0x7] %v4909_v40  ;;  %vm1591_vm12 = vmand %vm13808_vm15, %vm12633_vm11  ;;  %vm12639_vm11 = vcmp.ge.s32.totalorder %v10486_v32, 0  ;;  %v196_v25 = vshra.s32 %v164_v2, 6  ;;  %v10543_v29 = vand.u32 63, %v164_v2 }
 0x296   : > { %vm1592_vm6 = vmand %vm10491_vm4, %vm13810_vm5  ;;  %vm13813_vm5 = vnez %v13551_v9  ;;  %v13821_v9 = vmov 0 }
 0x297   : > { %vm13811_vm3 = vmmov %vm13809_vm2 }
 0x298   : > { %v1707_v52 = vsel %vm13811_vm3, %v1683_v58, %v10482_v47  ;;  %vm1623_vm8 = vmand %vm1591_vm12, %vm13812_vm9  ;;  %vm12637_vm3 = vcmp.lt.s32.totalorder %v10486_v32, 64  ;;  %v10541_v58 = vadd.s32 4294967295, %v10216_v31 }
 0x299   : > { %vm1624_vm2 = vmand %vm1592_vm6, %vm12641_vm13  ;;  %v1738_v43 = vsel %vm1623_vm8, %v1706_v44, 0.0  ;;  %vm13814_vm6 = vcmask 15360  }
 0x29a   : > { %vm3463_vm0 = vmand %vm13813_vm5, %vm12640_vm1  ;;  %v1739_v8 = vsel %vm1624_vm2, %v1707_v52, 0.0  ;;  %v1770_v49 = vrot.slane %v1738_v43, 1  ;;  %v454_v60 = vsel %vm13814_vm6, %v10015_v21, %v10522_v33  ;;  %vm13815_vm2 = vcmp.ge.s32.totalorder %v10234_v55, 0 }
 0x29b   : > { %vm3464_vm9 = vmand %vm13808_vm15, %vm12639_vm11  ;;  %v1771_v7 = vrot.slane %v1739_v8, 1  ;;  %v10548_v21 = vadd.s32 1, %v10212_v51  ;;  %vm259_vm11 = vcmp.lt.s32.totalorder %v227_v20, 64  ;;  %v228_v43 = vadd.s32 4294967294, %v10543_v29  ;;  %v4984_v8 = vld [vmem:[#allocation2 + $0xc0] sm:$0xff] }
 0x29c   : > { %vm3495_vm8 = vmand %vm3463_vm0, %vm12638_vm7  ;;  %1802 = vst [vmem:[#allocation2 + $0x148] ss:$-124 sps:$4 sm:$0x83] %v1770_v49   ;;  %vm243_vm7 = vcmp.ge.s32.totalorder %v227_v20, 0  ;;  %v4969_v49 = vld [vmem:[#allocation2 + $0x48] sm:$0xff] }
 0x29d   : > { %vm3496_vm12 = vmand %vm3464_vm9, %vm12637_vm3  ;;  %1803 = vst [vmem:[#allocation2 + $0x150] ss:$-124 sps:$4 sm:$0x83] %v1771_v7   ;;  %v3547_v62 = vsel %vm3495_vm8, %v1706_v44, 0.0  ;;  %vm13816_vm9 = vcmp.lt.s32.totalorder %v10234_v55, 64  ;;  %v10554_v44 = vand.u32 63, %v196_v25 }
 0x29e   : > { %v3548_v3 = vsel %vm3496_vm12, %v1707_v52, 0.0  ;;  %v3579_v38 = vrot.slane %v3547_v62, 3  ;;  %vm322_vm0 = vmand %vm10491_vm4, %vm13815_vm2  ;;  %vm13817_vm12 = vcmp.ge.s32.totalorder %v9902_v14, 0  ;;  %vm13818_vm2 = vcmp.lt.s32.totalorder %v9902_v14, 64  ;;  %v10558_v52 = vpop.permute.xlu0 %1686 }
 0x29f   : > { %v3580_v27 = vrot.slane %v3548_v3, 3  ;;  %vm354_vm8 = vmand %vm322_vm0, %vm13816_vm9  ;;  %vm13819_vm0 = vcmp.ge.s32.totalorder %v10289_v36, 0 }
 0x2a0   : > { %3611 = vst [vmem:[#allocation2 + $0x2c0] sm:$0xe0] %v3579_v38  ;;  %vm2646_vm6 = vmand %vm13808_vm15, %vm13817_vm12  ;;  %v486_v40 = vsel %vm354_vm8, %v454_v60, 0.0  ;;  %vm12645_vm12 = vcmp.ge.s32.totalorder %v10541_v58, 0  ;;  %vm13820_vm8 = vcmp.lt.s32.totalorder %v10289_v36, 64  ;;  %v10579_v36 = vadd.s32 4294967294, %v10554_v44 }
 0x2a1   : > { %3612 = vst [vmem:[#allocation2 + $0x2c8] sm:$0xe0] %v3580_v27  ;;  %vm2678_vm3 = vmand %vm2646_vm6, %vm13818_vm2  ;;  %vm12643_vm6 = vcmp.lt.s32.totalorder %v10541_v58, 64  ;;  %vm12642_vm2 = vcmp.ge.s32.totalorder %v10548_v21, 0  ;;  %v4968_v38 = vld [vmem:[#allocation2 + $0x40] sm:$0xff] }
 0x2a2   : > { %502 = vst [vmem:[#allocation2 + $0x50] sm:$0x7] %v486_v40  ;;  %vm4219_vm9 = vmand %vm13813_vm5, %vm13819_vm0  ;;  %v2730_v2 = vsel %vm2678_vm3, %v454_v60, 0.0  ;;  %vm13823_vm5 = vcmask 539648   ;;  %vm244_vm3 = vcmp.ge.s32.totalorder %v228_v43, 0  ;;  %vm260_vm0 = vcmp.lt.s32.totalorder %v228_v43, 64  ;;  %v434_v20 = vpop.permute.xlu0 %433 }
 0x2a3   : > { %vm4251_vm1 = vmand %vm4219_vm9, %vm13820_vm8  ;;  %v2762_v14 = vrot.slane %v2730_v2, 2  ;;  %v4985_v7 = vld [vmem:[#allocation2 + $0xc8] sm:$0xff]  ;;  %v1708_v62 = vsel %vm13823_vm5, %v10482_v47, %v10558_v52  ;;  %v10594_v2 = vpop.permute.xlu1 %435  ;;  %vm12646_vm5 = vcmp.ge.s32.totalorder %v10579_v36, 0  ;;  %v13824_v43 = vmov 0 }
 0x2a4   : > { %v4303_v25 = vsel %vm4251_vm1, %v454_v60, 0.0  ;;  %vm10571_vm13 = vmand %vm243_vm7, %vm259_vm11  ;;  %v6439_v3 = vpack.c.bf16 %v4985_v7, %v4969_v49  ;;  %vm12644_vm7 = vcmp.lt.s32.totalorder %v10548_v21, 64  ;;  %v6441_v60 = vpack.c.bf16 %v4984_v8, %v4968_v38 }
 0x2a5   : > { %v13822_v9 = vsel %vm10571_vm13, 4294967295, %v13821_v9  ;;  %2794 = vst [vmem:[#allocation2 + $0x248] ss:$-124 sps:$4 sm:$0xc1] %v2762_v14   ;;  %v4335_v27 = vrot.slane %v4303_v25, 4  ;;  %vm1593_vm1 = vmand %vm10571_vm13, %vm12645_vm12  ;;  %vm12653_vm12 = vcmp.ge.s32.totalorder %v10216_v31, 0 }
 0x2a6   : > { %vm1625_vm11 = vmand %vm1593_vm1, %vm12643_vm6  ;;  %6440 = vmatprep.subr.bf16.mxu0 %v6439_v3  ;;  %vm12649_vm6 = vcmp.lt.s32.totalorder %v10579_v36, 64  ;;  %v10618_v25 = vadd.s32 2, %v10212_v51 }
 0x2a7   : > { %4367 = vst [vmem:[#allocation2 + $0x3c0] sm:$0x70] %v4335_v27  ;;  %vm3465_vm9 = vmand %vm10491_vm4, %vm12642_vm2  ;;  %v1740_v47 = vsel %vm1625_vm11, %v1708_v62, 0.0  ;;  %6442 = vmatpush1.bf16.msra.mxu0 %v6441_v60  ;;  %vm13826_vm2 = vcmp.ge.s32.totalorder %v10241_v41, 0 }
 0x2a8   : > { %vm3497_vm8 = vmand %vm3465_vm9, %vm12644_vm7  ;;  %v1772_v40 = vrot.slane %v1740_v47, 1  ;;  %vm13827_vm9 = vcmask 15360   ;;  %v1910_v47 = vpop.permute.xlu0 %1909 }
 0x2a9   : > { %v3549_v8 = vsel %vm3497_vm8, %v1708_v62, 0.0  ;;  %vm10597_vm1 = vmand %vm244_vm3, %vm260_vm0  ;;  %v455_v49 = vsel %vm13827_vm9, %v10522_v33, %v434_v20  ;;  %vm13829_vm8 = vcmp.lt.s32.totalorder %v10241_v41, 64 }
 0x2aa   : > { %v13825_v43 = vsel %vm10597_vm1, 4294967295, %v13824_v43  ;;  %1804 = vst [vmem:[#allocation2 + $0x158] ss:$-124 sps:$4 sm:$0x83] %v1772_v40   ;;  %v3581_v14 = vrot.slane %v3549_v8, 3  ;;  %vm323_vm11 = vmand %vm10571_vm13, %vm13826_vm2 }
 0x2ab   : > { %vm324_vm3 = vmand %vm10597_vm1, %vm12646_vm5 }
 0x2ac   : > { %vm13828_vm0 = vmmov %vm13827_vm9  ;;  %3613 = vst [vmem:[#allocation2 + $0x2d0] sm:$0xe0] %v3581_v14  ;;  %vm13830_vm9 = vcmp.ge.s32.totalorder %v10212_v51, 0  ;;  %v10682_v53 = vpop.permute.xlu0 %1913 }
 0x2ad   : > { %v456_v7 = vsel %vm13828_vm0, %v434_v20, %v10594_v2  ;;  %vm355_vm7 = vmand %vm323_vm11, %vm13829_vm8  ;;  %vm12652_vm0 = vcmp.lt.s32.totalorder %v10216_v31, 64  ;;  %vm13831_vm8 = vcmp.lt.s32.totalorder %v10212_v51, 64  ;;  %v1912_v20 = vpop.permute.xlu1 %1911 }
 0x2ae   : > { %vm356_vm2 = vmand %vm324_vm3, %vm12649_vm6  ;;  %v487_v33 = vsel %vm355_vm7, %v455_v49, 0.0  ;;  %vm12651_vm7 = vcmp.ge.s32.totalorder %v10618_v25, 0  ;;  %vm12650_vm6 = vcmp.lt.s32.totalorder %v10618_v25, 64 }
 0x2af   : > { %vm2647_vm5 = vmand %vm10491_vm4, %vm13830_vm9  ;;  %v488_v62 = vsel %vm356_vm2, %v456_v7, 0.0  ;;  %503 = vst [vmem:[#allocation2 + $0x58] sm:$0x7] %v487_v33  ;;  %vm13832_vm9 = vcmp.ge.s32.totalorder %v10297_v19, 0 }
 0x2b0   : > { %vm2648_vm11 = vmand %vm10571_vm13, %vm12653_vm12  ;;  %504 = vst [vmem:[#allocation2 + $0x60] sm:$0x7] %v488_v62  ;;  %vm13863_vm12 = vcmp.ge.s32.totalorder %v10241_v41, 0 }
 0x2b1   : > { %vm2679_vm1 = vmand %vm2647_vm5, %vm13831_vm8  ;;  %vm13833_vm8 = vcmp.lt.s32.totalorder %v10297_v19, 64  ;;  %v2121_v33 = vpop.permute.xlu1 %2120 }
 0x2b2   : > { %vm2680_vm3 = vmand %vm2648_vm11, %vm12652_vm0  ;;  %v2731_v3 = vsel %vm2679_vm1, %v455_v49, 0.0 }
 0x2b3   : > { %vm4220_vm2 = vmand %vm13808_vm15, %vm13832_vm9  ;;  %v2732_v38 = vsel %vm2680_vm3, %v456_v7, 0.0  ;;  %v2763_v27 = vrot.slane %v2731_v3, 2  ;;  %vm13834_vm15 = vcmp.ge.s32.totalorder %v10459_v48, 0  ;;  %vm13836_vm9 = vcmp.ge.s32.totalorder %v10464_v0, 0 }
 0x2b4   : > { %vm4221_vm5 = vmand %vm10491_vm4, %vm12651_vm7  ;;  %v2764_v60 = vrot.slane %v2732_v38, 2  ;;  %vm13835_vm4 = vcmask 531456  }
 0x2b5   : > { %vm4252_vm11 = vmand %vm4220_vm2, %vm13833_vm8  ;;  %2795 = vst [vmem:[#allocation2 + $0x250] ss:$-124 sps:$4 sm:$0xc1] %v2763_v27   ;;  %v1933_v30 = vsel %vm13835_vm4, %v10123_v59, %v1910_v47 }
 0x2b6   : > { %vm4253_vm1 = vmand %vm4221_vm5, %vm12650_vm6  ;;  %2796 = vst [vmem:[#allocation2 + $0x258] ss:$-124 sps:$4 sm:$0xc1] %v2764_v60   ;;  %v4304_v46 = vsel %vm4252_vm11, %v455_v49, 0.0  ;;  %vm13838_vm5 = vcmp.lt.s32.totalorder %v10459_v48, 64 }
 0x2b7   : > { %v4305_v40 = vsel %vm4253_vm1, %v456_v7, 0.0  ;;  %v4336_v8 = vrot.slane %v4304_v46, 4  ;;  %vm1834_vm3 = vmand %vm9955_vm14, %vm13834_vm15  ;;  %vm13839_vm1 = vcmp.lt.s32.totalorder %v10464_v0, 64  ;;  %vm13840_vm15 = vcmp.ge.s32.totalorder %v10478_v13, 0 }
 0x2b8   : > { %v4337_v14 = vrot.slane %v4305_v40, 4  ;;  %vm1835_vm2 = vmand %vm10257_vm10, %vm13836_vm9  ;;  %vm13842_vm9 = vcmp.ge.s32.totalorder %v10486_v32, 0 }
 0x2b9   : > { %vm13837_vm8 = vmmov %vm13835_vm4  ;;  %4368 = vst [vmem:[#allocation2 + $0x3c8] sm:$0x70] %v4336_v8  ;;  %vm13841_vm4 = vnez %v13662_v18 }
 0x2ba   : > { %v1934_v19 = vsel %vm13837_vm8, %v1910_v47, %v1912_v20  ;;  %vm1850_vm11 = vmand %vm1834_vm3, %vm13838_vm5  ;;  %4369 = vst [vmem:[#allocation2 + $0x3d0] sm:$0x70] %v4337_v14  ;;  %vm13843_vm3 = vcmp.lt.s32.totalorder %v10478_v13, 64 }
 0x2bb   : > { %vm1851_vm6 = vmand %vm1835_vm2, %vm13839_vm1  ;;  %v1965_v49 = vsel %vm1850_vm11, %v1933_v30, 0.0  ;;  %vm13844_vm2 = vcmp.lt.s32.totalorder %v10486_v32, 64  ;;  %vm13845_vm1 = vcmask 523264  }
 0x2bc   : > { %vm3627_vm7 = vmand %vm13841_vm4, %vm13840_vm15  ;;  %v1966_v59 = vsel %vm1851_vm6, %v1934_v19, 0.0  ;;  %v1997_v7 = vrot.slane %v1965_v49, 6  ;;  %v2144_v18 = vsel %vm13845_vm1, %v10093_v5, %v2121_v33  ;;  %vm13846_vm6 = vcmp.ge.s32.totalorder %v10459_v48, 0 }
 0x2bd   : > { %vm3628_vm8 = vmand %vm9955_vm14, %vm13842_vm9  ;;  %v1998_v62 = vrot.slane %v1966_v59, 6  ;;  %vm13847_vm15 = vnez %v13689_v34  ;;  %vm13849_vm9 = vcmp.ge.s32.totalorder %v10478_v13, 0  ;;  %vm13853_vm1 = vcmp.ge.s32.totalorder %v10541_v58, 0 }
 0x2be   : > { %vm3643_vm5 = vmand %vm3627_vm7, %vm13843_vm3  ;;  %2029 = vst [vmem:[#allocation2 + $0x148] sm:$0x1c] %v1997_v7  ;;  %vm13848_vm7 = vcmp.lt.s32.totalorder %v10459_v48, 64 }
 0x2bf   : > { %vm3644_vm11 = vmand %vm3628_vm8, %vm13844_vm2  ;;  %2030 = vst [vmem:[#allocation2 + $0x150] sm:$0x1c] %v1998_v62  ;;  %v3695_v3 = vsel %vm3643_vm5, %v1933_v30, 0.0  ;;  %vm13850_vm8 = vnez %v13712_v23  ;;  %vm13851_vm5 = vcmp.lt.s32.totalorder %v10478_v13, 64  ;;  %v10726_v30 = vpop.permute.xlu1 %2124 }
 0x2c0   : > { %v3696_v38 = vsel %vm3644_vm11, %v1934_v19, 0.0  ;;  %3711 = vst [vmem:[#allocation2 + $0x340] sm:$0x7] %v3695_v3  ;;  %vm2045_vm14 = vmand %vm13847_vm15, %vm13846_vm6  ;;  %vm13852_vm11 = vcmask 531456   ;;  %vm13854_vm6 = vnez %v13753_v6 }
 0x2c1   : > { %3712 = vst [vmem:[#allocation2 + $0x348] sm:$0x7] %v3696_v38  ;;  %vm2061_vm4 = vmand %vm2045_vm14, %vm13848_vm7  ;;  %v1935_v60 = vsel %vm13852_vm11, %v1912_v20, %v10682_v53  ;;  %vm13855_vm14 = vcmp.lt.s32.totalorder %v10541_v58, 64  ;;  %vm13857_vm11 = vcmp.lt.s32.totalorder %v10548_v21, 64 }
 0x2c2   : > { %vm3727_vm3 = vmand %vm13850_vm8, %vm13849_vm9  ;;  %v2176_v27 = vsel %vm2061_vm4, %v2144_v18, 0.0  ;;  %vm793_vm4 = vcmp.ge.s32.totalorder %v10200_v61, 0  ;;  %vm809_vm9 = vcmp.lt.s32.totalorder %v10200_v61, 64  ;;  %vm13856_vm8 = vcmp.ge.s32.totalorder %v10548_v21, 0 }
 0x2c3   : > { %vm3743_vm2 = vmand %vm3727_vm3, %vm13851_vm5  ;;  %v2208_v5 = vrot.slane %v2176_v27, 3  ;;  %vm794_vm5 = vcmp.ge.s32.totalorder %v10206_v39, 0  ;;  %v13860_v61 = vmov 0 }
 0x2c4   : > { %v3795_v47 = vsel %vm3743_vm2, %v2144_v18, 0.0  ;;  %vm1836_vm0 = vmand %vm13854_vm6, %vm13853_vm1  ;;  %vm810_vm2 = vcmp.lt.s32.totalorder %v10206_v39, 64  ;;  %v2123_v39 = vpop.permute.xlu0 %2122 }
 0x2c5   : > { %2240 = vst [vmem:[#allocation2 + $0x148] sm:$0xe0] %v2208_v5  ;;  %v3827_v46 = vrot.slane %v3795_v47, 5  ;;  %vm1852_vm7 = vmand %vm1836_vm0, %vm13855_vm14 }
 0x2c6   : > { %vm3629_vm3 = vmand %vm10257_vm10, %vm13856_vm8  ;;  %v1967_v23 = vsel %vm1852_vm7, %v1935_v60, 0.0  ;;  %vm13862_vm7 = vcmp.ge.s32.totalorder %v10234_v55, 0 }
 0x2c7   : > { %3859 = vst [vmem:[#allocation2 + $0x340] sm:$0x38] %v3827_v46  ;;  %vm3645_vm1 = vmand %vm3629_vm3, %vm13857_vm11  ;;  %v1999_v20 = vrot.slane %v1967_v23, 6  ;;  %vm13866_vm11 = vcmp.ge.s32.totalorder %v10464_v0, 0 }
 0x2c8   : > { %v3697_v40 = vsel %vm3645_vm1, %v1935_v60, 0.0  ;;  %vm10710_vm0 = vmand %vm793_vm4, %vm809_vm9  ;;  %vm13864_vm4 = vcmp.lt.s32.totalorder %v10234_v55, 64  ;;  %v2495_v46 = vpop.permute.xlu0 %2494 }
 0x2c9   : > { %2031 = vst [vmem:[#allocation2 + $0x158] sm:$0x1c] %v1999_v20  ;;  %3713 = vst [vmem:[#allocation2 + $0x350] sm:$0x7] %v3697_v40 }
 0x2ca   : > { %vm10714_vm14 = vmand %vm794_vm5, %vm810_vm2  ;;  %vm13865_vm5 = vcmp.lt.s32.totalorder %v10241_v41, 64 }
 0x2cb   : > { %v13861_v61 = vsel %vm10714_vm14, 4294967295, %v13860_v61  ;;  %vm841_vm8 = vmand %vm10710_vm0, %vm13862_vm7  ;;  %vm13868_vm7 = vcmp.ge.s32.totalorder %v10541_v58, 0 }
 0x2cc   : > { %vm842_vm3 = vmand %vm10714_vm14, %vm13863_vm12  ;;  %vm13867_vm12 = vcmask 523264  }
 0x2cd   : > { %vm857_vm9 = vmand %vm841_vm8, %vm13864_vm4  ;;  %v2145_v59 = vsel %vm13867_vm12, %v2121_v33, %v2123_v39  ;;  %vm13870_vm4 = vcmp.lt.s32.totalorder %v10464_v0, 64 }
 0x2ce   : > { %vm858_vm2 = vmand %vm842_vm3, %vm13865_vm5  ;;  %v913_v14 = vsel %vm857_vm9, %v8400_v57, 0.0  ;;  %vm13871_vm5 = vcmp.lt.s32.totalorder %v10541_v58, 64 }
 0x2cf   : > { %v914_v19 = vsel %vm858_vm2, %v10349_v35, 0.0  ;;  %v945_v49 = vrot.slane %v913_v14, 2  ;;  %vm2046_vm1 = vmand %vm10710_vm0, %vm13866_vm11  ;;  %vm13872_vm11 = vcmp.ge.s32.totalorder %v10212_v51, 0 }
 0x2d0   : > { %v946_v7 = vrot.slane %v914_v19, 2  ;;  %vm2047_vm8 = vmand %vm10714_vm14, %vm13868_vm7  ;;  %vm13873_vm7 = vcmp.ge.s32.totalorder %v10216_v31, 0 }
 0x2d1   : > { %vm13869_vm3 = vmmov %vm13867_vm12  ;;  %977 = vst [vmem:[#allocation2 + $0xd0] ss:$-124 sps:$4 sm:$0xc1] %v945_v49  }
 0x2d2   : > { %v2146_v55 = vsel %vm13869_vm3, %v2123_v39, %v10726_v30  ;;  %vm2062_vm9 = vmand %vm2046_vm1, %vm13870_vm4  ;;  %978 = vst [vmem:[#allocation2 + $0xd8] ss:$-124 sps:$4 sm:$0xc1] %v946_v7   ;;  %vm13874_vm1 = vcmp.lt.s32.totalorder %v10212_v51, 64  ;;  %v2497_v39 = vpop.permute.xlu1 %2496 }
 0x2d3   : > { %vm2063_vm2 = vmand %vm2047_vm8, %vm13871_vm5  ;;  %v2177_v57 = vsel %vm2062_vm9, %v2145_v59, 0.0  ;;  %vm13875_vm8 = vcmp.lt.s32.totalorder %v10216_v31, 64  ;;  %vm13876_vm5 = vcmp.ge.s32.totalorder %v10486_v32, 0 }
 0x2d4   : > { %vm2975_vm12 = vmand %vm10710_vm0, %vm13872_vm11  ;;  %v2178_v41 = vsel %vm2063_vm2, %v2146_v55, 0.0  ;;  %v2209_v33 = vrot.slane %v2177_v57, 3  ;;  %vm13877_vm11 = vcmp.ge.s32.totalorder %v10548_v21, 0 }
 0x2d5   : > { %vm2976_vm3 = vmand %vm10714_vm14, %vm13873_vm7  ;;  %v2210_v62 = vrot.slane %v2178_v41, 3  ;;  %vm13878_vm7 = vcmp.lt.s32.totalorder %v10486_v32, 64 }
 0x2d6   : > { %vm2991_vm4 = vmand %vm2975_vm12, %vm13874_vm1  ;;  %2241 = vst [vmem:[#allocation2 + $0x150] sm:$0xe0] %v2209_v33  ;;  %vm13879_vm1 = vcmp.lt.s32.totalorder %v10548_v21, 64  ;;  %v2332_v57 = vpop.permute.xlu1 %2331 }
 0x2d7   : > { %vm2992_vm9 = vmand %vm2976_vm3, %vm13875_vm8  ;;  %v3040_v3 = vsel %vm2991_vm4, %v10349_v35, 0.0  ;;  %2242 = vst [vmem:[#allocation2 + $0x158] sm:$0xe0] %v2210_v62  ;;  %v10811_v62 = vpop.permute.xlu0 %2498 }
 0x2d8   : > { %v3041_v18 = vsel %vm2992_vm9, %v8488_v17, 0.0  ;;  %v3072_v38 = vrot.slane %v3040_v3, 4  ;;  %vm3728_vm2 = vmand %vm13847_vm15, %vm13876_vm5  ;;  %v4970_v51 = vld [vmem:[#allocation2 + $0x50] sm:$0xff]  ;;  %vm13880_vm15 = vcmp.ge.s32.totalorder %v10618_v25, 0  ;;  %vm13881_vm9 = vcmp.lt.s32.totalorder %v10618_v25, 64 }
 0x2d9   : > { %v3073_v27 = vrot.slane %v3041_v18, 4  ;;  %vm3729_vm12 = vmand %vm10710_vm0, %vm13877_vm11  ;;  %v4971_v35 = vld [vmem:[#allocation2 + $0x58] sm:$0xff]  ;;  %v4986_v47 = vld [vmem:[#allocation2 + $0xd0] sm:$0xff]  ;;  %vm13883_vm11 = vnez %v13733_v1 }
 0x2da   : > { %3104 = vst [vmem:[#allocation2 + $0x250] sm:$0x70] %v3072_v38  ;;  %vm3744_vm3 = vmand %vm3728_vm2, %vm13878_vm7  ;;  %v4987_v5 = vld [vmem:[#allocation2 + $0xd8] sm:$0xff]  ;;  %v6461_v40 = vpack.c.bf16 %v4986_v47, %v4970_v51  ;;  %vm13882_vm2 = vcmp.ge.s32.totalorder %v10459_v48, 0  ;;  %vm13885_vm7 = vcmp.ge.s32.totalorder %v10464_v0, 0  ;;  %v10837_v51 = vpop.permute.xlu1 %2335 }
 0x2db   : > { %3105 = vst [vmem:[#allocation2 + $0x258] sm:$0x70] %v3073_v27  ;;  %vm3745_vm4 = vmand %vm3729_vm12, %vm13879_vm1  ;;  %v3796_v60 = vsel %vm3744_vm3, %v2145_v59, 0.0  ;;  %v6459_v34 = vpack.c.bf16 %v4987_v5, %v4971_v35  ;;  %vm13886_vm3 = vnez %v13786_v42 }
 0x2dc   : > { %vm4549_vm8 = vmand %vm10710_vm0, %vm13880_vm15  ;;  %v3797_v23 = vsel %vm3745_vm4, %v2146_v55, 0.0  ;;  %v3828_v20 = vrot.slane %v3796_v60, 5  ;;  %vm13884_vm0 = vcmask 506880   ;;  %vm13888_vm15 = vcmp.lt.s32.totalorder %v10459_v48, 64 }
 0x2dd   : > { %vm4565_vm5 = vmand %vm4549_vm8, %vm13881_vm9  ;;  %v3829_v14 = vrot.slane %v3797_v23, 5  ;;  %6460 = vmatprep.subr.bf16.mxu1 %v6459_v34  ;;  %v2518_v8 = vsel %vm13884_vm0, %v10144_v4, %v2495_v46  ;;  %vm13889_vm9 = vcmp.lt.s32.totalorder %v10464_v0, 64  ;;  %v5000_v34 = vld [vmem:[#allocation2 + $0x140] sm:$0xff]  ;;  %v1011_v23 = vadd.s32 1, %v10543_v29 }
 0x2de   : > { %v4613_v19 = vsel %vm4565_vm5, %v8488_v17, 0.0  ;;  %3860 = vst [vmem:[#allocation2 + $0x348] sm:$0x38] %v3828_v20  ;;  %6462 = vmatpush1.bf16.msra.mxu1 %v6461_v40  ;;  %vm2419_vm12 = vmand %vm13883_vm11, %vm13882_vm2  ;;  %vm13890_vm2 = vcmp.ge.s32.totalorder %v10478_v13, 0  ;;  %v5016_v20 = vld [vmem:[#allocation2 + $0x1c0] sm:$0xff]  ;;  %v5033_v40 = vld [vmem:[#allocation2 + $0x248] sm:$0xff] }
 0x2df   : > { %v4645_v49 = vrot.slane %v4613_v19, 6  ;;  %3861 = vst [vmem:[#allocation2 + $0x350] sm:$0x38] %v3829_v14  ;;  %vm2420_vm1 = vmand %vm13886_vm3, %vm13885_vm7  ;;  %vm13892_vm7 = vcmp.ge.s32.totalorder %v10486_v32, 0 }
 0x2e0   : > { %vm13887_vm4 = vmmov %vm13884_vm0  ;;  %vm13891_vm0 = vnez %v13676_v24 }
 0x2e1   : > { %v2519_v59 = vsel %vm13887_vm4, %v2495_v46, %v2497_v39  ;;  %vm2435_vm8 = vmand %vm2419_vm12, %vm13888_vm15  ;;  %4677 = vst [vmem:[#allocation2 + $0x450] sm:$0x1c] %v4645_v49  ;;  %vm13893_vm12 = vcmp.lt.s32.totalorder %v10478_v13, 64 }
 0x2e2   : > { %vm2436_vm5 = vmand %vm2420_vm1, %vm13889_vm9  ;;  %v2550_v7 = vsel %vm2435_vm8, %v2518_v8, 0.0  ;;  %vm13894_vm1 = vcmp.lt.s32.totalorder %v10486_v32, 64  ;;  %vm13895_vm9 = vcmask 515072  }
 0x2e3   : > { %vm4039_vm14 = vmand %vm13891_vm0, %vm13890_vm2  ;;  %v2551_v4 = vsel %vm2436_vm5, %v2519_v59, 0.0  ;;  %v2582_v55 = vrot.slane %v2550_v7, 5  ;;  %v2355_v24 = vsel %vm13895_vm9, %v10054_v16, %v2332_v57  ;;  %vm13896_vm5 = vcmp.ge.s32.totalorder %v10459_v48, 0  ;;  %v5049_v7 = vld [vmem:[#allocation2 + $0x2c8] sm:$0xff] }
 0x2e4   : > { %vm4040_vm4 = vmand %vm13883_vm11, %vm13892_vm7  ;;  %v2583_v41 = vrot.slane %v2551_v4, 5  ;;  %vm13897_vm11 = vnez %v13742_v15  ;;  %vm13899_vm7 = vcmp.ge.s32.totalorder %v10478_v13, 0  ;;  %vm13903_vm9 = vcmp.ge.s32.totalorder %v10541_v58, 0  ;;  %v5048_v4 = vld [vmem:[#allocation2 + $0x2c0] sm:$0xff] }
 0x2e5   : > { %vm4055_vm15 = vmand %vm4039_vm14, %vm13893_vm12  ;;  %2614 = vst [vmem:[#allocation2 + $0x1c8] sm:$0x38] %v2582_v55  ;;  %vm13898_vm14 = vcmp.lt.s32.totalorder %v10459_v48, 64  ;;  %v520_v55 = vadd.s32 4294967295, %v10543_v29 }
 0x2e6   : > { %vm4056_vm8 = vmand %vm4040_vm4, %vm13894_vm1  ;;  %2615 = vst [vmem:[#allocation2 + $0x1d0] sm:$0x38] %v2583_v41  ;;  %v4107_v33 = vsel %vm4055_vm15, %v2518_v8, 0.0  ;;  %vm13900_vm4 = vnez %v13651_v63  ;;  %vm13901_vm15 = vcmp.lt.s32.totalorder %v10478_v13, 64  ;;  %v2334_v63 = vpop.permute.xlu0 %2333 }
 0x2e7   : > { %v4108_v3 = vsel %vm4056_vm8, %v2519_v59, 0.0  ;;  %v4139_v18 = vrot.slane %v4107_v33, 7  ;;  %vm2256_vm2 = vmand %vm13897_vm11, %vm13896_vm5  ;;  %vm13902_vm8 = vcmask 506880   ;;  %vm13904_vm5 = vnez %v13788_v54 }
 0x2e8   : > { %v4140_v1 = vrot.slane %v4108_v3, 7  ;;  %vm2272_vm0 = vmand %vm2256_vm2, %vm13898_vm14  ;;  %v2520_v38 = vsel %vm13902_vm8, %v2497_v39, %v10811_v62  ;;  %vm13905_vm14 = vcmp.lt.s32.totalorder %v10541_v58, 64  ;;  %v5001_v39 = vld [vmem:[#allocation2 + $0x148] sm:$0xff]  ;;  %v6445_v59 = vpack.c.bf16 %v5016_v20, %v5000_v34 }
 0x2e9   : > { %4171 = vst [vmem:[#allocation2 + $0x3c0] sm:$0xe] %v4139_v18  ;;  %vm3875_vm12 = vmand %vm13900_vm4, %vm13899_vm7  ;;  %v2387_v16 = vsel %vm2272_vm0, %v2355_v24, 0.0  ;;  %vm13906_vm0 = vcmp.ge.s32.totalorder %v10548_v21, 0  ;;  %vm13907_vm4 = vcmp.lt.s32.totalorder %v10548_v21, 64  ;;  %v5113_v20 = vld [vmem:[#allocation2 + $0x4c8] sm:$0xff] }
 0x2ea   : > { %4172 = vst [vmem:[#allocation2 + $0x3c8] sm:$0xe] %v4140_v1  ;;  %vm3891_vm1 = vmand %vm3875_vm12, %vm13901_vm15  ;;  %vm13908_vm15 = vcmp.ge.s32.totalorder %v10464_v0, 0  ;;  %v5002_v1 = vld [vmem:[#allocation2 + $0x150] sm:$0xff] }
 0x2eb   : > { %2403 = vst [vmem:[#allocation2 + $0x1c8] sm:$0x7] %v2387_v16  ;;  %v3943_v27 = vsel %vm3891_vm1, %v2355_v24, 0.0  ;;  %vm2421_vm2 = vmand %vm13904_vm5, %vm13903_vm9  ;;  %vm13909_vm1 = vnez %v13763_v26  ;;  %vm13910_vm9 = vcmask 515072   ;;  %v13920_v24 = vmov 0 }
 0x2ec   : > { %v3975_v48 = vrot.slane %v3943_v27, 2  ;;  %vm2437_vm13 = vmand %vm2421_vm2, %vm13905_vm14  ;;  %v2356_v60 = vsel %vm13910_vm9, %v2332_v57, %v2334_v63  ;;  %vm13912_vm2 = vnez %v13765_v11  ;;  %v5032_v57 = vld [vmem:[#allocation2 + $0x240] sm:$0xff]  ;;  %v10893_v27 = vpop.permute.xlu0 %662 }
 0x2ed   : > { %vm4041_vm7 = vmand %vm13886_vm3, %vm13906_vm0  ;;  %v2552_v13 = vsel %vm2437_vm13, %v2520_v38, 0.0  ;;  %vm13911_vm13 = vcmp.ge.s32.totalorder %v10541_v58, 0  ;;  %vm1043_vm3 = vcmp.lt.s32.totalorder %v1011_v23, 64  ;;  %v6449_v3 = vpack.c.bf16 %v5048_v4, %v5032_v57  ;;  %v5097_v57 = vld [vmem:[#allocation2 + $0x448] sm:$0xff] }
 0x2ee   : > { %4007 = vst [vmem:[#allocation2 + $0x3c0] ss:$-124 sps:$4 sm:$0xc1] %v3975_v48   ;;  %vm4057_vm12 = vmand %vm4041_vm7, %vm13907_vm4  ;;  %v2584_v35 = vrot.slane %v2552_v13, 5  ;;  %vm13914_vm7 = vcmp.lt.s32.totalorder %v10464_v0, 64  ;;  %v10865_v0 = vpop.permute.xlu1 %1154  ;;  %v5003_v48 = vld [vmem:[#allocation2 + $0x158] sm:$0xff] }
 0x2ef   : > { %v4109_v5 = vsel %vm4057_vm12, %v2520_v38, 0.0  ;;  %vm2257_vm8 = vmand %vm13909_vm1, %vm13908_vm15  ;;  %vm13915_vm12 = vcmp.lt.s32.totalorder %v10541_v58, 64  ;;  %v6447_v58 = vpack.c.bf16 %v5049_v7, %v5033_v40  ;;  %v1287_v7 = vadd.s32 2, %v10543_v29 }
 0x2f0   : > { %2616 = vst [vmem:[#allocation2 + $0x1d8] sm:$0x38] %v2584_v35  ;;  %v4141_v47 = vrot.slane %v4109_v5, 7  ;;  %vm2258_vm14 = vmand %vm13912_vm2, %vm13911_vm13 }
 0x2f1   : > { %vm13913_vm0 = vmmov %vm13910_vm9  ;;  %vm13916_vm9 = vcmp.ge.s32.totalorder %v10486_v32, 0 }
 0x2f2   : > { %v2357_v46 = vsel %vm13913_vm0, %v2334_v63, %v10837_v51  ;;  %vm2273_vm4 = vmand %vm2257_vm8, %vm13914_vm7  ;;  %v5017_v14 = vld [vmem:[#allocation2 + $0x1c8] sm:$0xff]  ;;  %4173 = vst [vmem:[#allocation2 + $0x3d0] sm:$0xe] %v4141_v47  ;;  %vm13917_vm0 = vcmp.ge.s32.totalorder %v10548_v21, 0  ;;  %vm1027_vm7 = vcmp.ge.s32.totalorder %v1011_v23, 0  ;;  %v13929_v47 = vmov 0 }
 0x2f3   : > { %vm2274_vm15 = vmand %vm2258_vm14, %vm13915_vm12  ;;  %v2388_v19 = vsel %vm2273_vm4, %v2356_v60, 0.0  ;;  %v6443_v8 = vpack.c.bf16 %v5017_v14, %v5001_v39  ;;  %vm13918_vm14 = vcmp.lt.s32.totalorder %v10486_v32, 64  ;;  %vm13919_vm4 = vcmp.lt.s32.totalorder %v10548_v21, 64 }
 0x2f4   : > { %vm3876_vm13 = vmand %vm13897_vm11, %vm13916_vm9  ;;  %v2389_v49 = vsel %vm2274_vm15, %v2357_v46, 0.0  ;;  %2404 = vst [vmem:[#allocation2 + $0x1d0] sm:$0x7] %v2388_v19  ;;  %vm13922_vm9 = vcmask 1039360   ;;  %v10909_v23 = vadd.s32 4294967295, %v10554_v44 }
 0x2f5   : > { %vm3877_vm8 = vmand %vm13909_vm1, %vm13917_vm0  ;;  %2405 = vst [vmem:[#allocation2 + $0x1d8] sm:$0x7] %v2389_v49  ;;  %6444 = vmatprep.subr.bf16.mxu0 %v6443_v8  ;;  %v1175_v32 = vsel %vm13922_vm9, %v10352_v22, %v10865_v0  ;;  %v148_v22 = vadd.s32 1664, %v13379_v56  ;;  %vm552_vm9 = vcmp.lt.s32.totalorder %v520_v55, 64  ;;  %v5064_v39 = vld [vmem:[#allocation2 + $0x340] sm:$0xff] }
 0x2f6   : > { %vm3892_vm11 = vmand %vm3876_vm13, %vm13918_vm14  ;;  %6446 = vmatpush1.bf16.msra.mxu0 %v6445_v59  ;;  %vm13923_vm13 = vcmp.ge.s32.totalorder %v10579_v36, 0  ;;  %v5080_v14 = vld [vmem:[#allocation2 + $0x3c0] sm:$0xff]  ;;  %v10925_v59 = vpop.permute.xlu1 %1688 }
 0x2f7   : > { %vm3893_vm12 = vmand %vm3877_vm8, %vm13919_vm4  ;;  %v3944_v15 = vsel %vm3892_vm11, %v2356_v60, 0.0  ;;  %6448 = vmatprep.subr.bf16.mxu0 %v6447_v58  ;;  %vm13924_vm8 = vcmp.lt.s32.totalorder %v10579_v36, 64  ;;  %vm13926_vm11 = vcmp.lt.s32.totalorder %v10216_v31, 64  ;;  %v165_v26 = vadd.s32 %v13393_v12, %v148_v22  ;;  %v5096_v22 = vld [vmem:[#allocation2 + $0x440] sm:$0xff] }
 0x2f8   : > { %v3945_v41 = vsel %vm3893_vm12, %v2357_v46, 0.0  ;;  %v3976_v33 = vrot.slane %v3944_v15, 2  ;;  %vm10873_vm15 = vmand %vm1027_vm7, %vm1043_vm3  ;;  %vm13925_vm3 = vcmp.ge.s32.totalorder %v10216_v31, 0  ;;  %vm536_vm12 = vcmp.ge.s32.totalorder %v520_v55, 0 }
 0x2f9   : > { %v13921_v24 = vsel %vm10873_vm15, 4294967295, %v13920_v24  ;;  %v3977_v18 = vrot.slane %v3945_v41, 2  ;;  %vm1075_vm0 = vmand %vm10873_vm15, %vm13923_vm13  ;;  %vm13927_vm13 = vcmp.ge.s32.totalorder %v10618_v25, 0  ;;  %v197_v15 = vshra.s32 %v165_v26, 6 }
 0x2fa   : > { %4008 = vst [vmem:[#allocation2 + $0x3c8] ss:$-124 sps:$4 sm:$0xc1] %v3976_v33   ;;  %vm1091_vm14 = vmand %vm1075_vm0, %vm13924_vm8  ;;  %6450 = vmatpush1.bf16.msra.mxu0 %v6449_v3  ;;  %vm13928_vm8 = vcmp.lt.s32.totalorder %v10618_v25, 64  ;;  %v6453_v55 = vpack.c.bf16 %v5080_v14, %v5064_v39  ;;  %v6455_v33 = vpack.c.bf16 %v5113_v20, %v5097_v57 }
 0x2fb   : > { %4009 = vst [vmem:[#allocation2 + $0x3d0] ss:$-124 sps:$4 sm:$0xc1] %v3977_v18   ;;  %vm3121_vm7 = vmand %vm13912_vm2, %vm13925_vm3  ;;  %v1207_v21 = vsel %vm1091_vm14, %v1175_v32, 0.0  ;;  %v5018_v16 = vld [vmem:[#allocation2 + $0x1d0] sm:$0xff] }
 0x2fc   : > { %vm3137_vm4 = vmand %vm3121_vm7, %vm13926_vm11  ;;  %v1239_v38 = vrot.slane %v1207_v21, 7  ;;  %v5019_v63 = vld [vmem:[#allocation2 + $0x1d8] sm:$0xff]  ;;  %v6465_v13 = vpack.c.bf16 %v5018_v16, %v5002_v1  ;;  %vm13931_vm7 = vcmask 7168   ;;  %v10947_v21 = vand.u32 63, %v165_v26  ;;  %v10982_v26 = vld [vmem:[%s12402_s1] sm:$0xff] }
 0x2fd   : > { %vm4693_vm0 = vmand %vm13909_vm1, %vm13927_vm13  ;;  %v3190_v35 = vsel %vm3137_vm4, %v1175_v32, 0.0  ;;  %v6463_v5 = vpack.c.bf16 %v5019_v63, %v5003_v48  ;;  %v683_v46 = vsel %vm13931_vm7, %v10252_v10, %v10893_v27  ;;  %vm13932_vm1 = vcmp.ge.s32.totalorder %v10579_v36, 0 }
 0x2fe   : > { %vm4709_vm14 = vmand %vm4693_vm0, %vm13928_vm8  ;;  %1271 = vst [vmem:[#allocation2 + $0xe0] sm:$0xe] %v1239_v38  ;;  %v3222_v60 = vrot.slane %v3190_v35, 1  ;;  %vm13933_vm4 = vcmp.lt.s32.totalorder %v10579_v36, 64  ;;  %v10919_v10 = vadd.s32 1, %v10216_v31  ;;  %vm13935_vm0 = vcmp.lt.s32.totalorder %v10216_v31, 64 }
 0x2ff   : > { %v4762_v34 = vsel %vm4709_vm14, %v1175_v32, 0.0  ;;  %vm10901_vm3 = vmand %vm536_vm12, %vm552_vm9  ;;  %6464 = vmatprep.subr.bf16.mxu1 %v6463_v5  ;;  %vm13934_vm9 = vcmp.ge.s32.totalorder %v10216_v31, 0  ;;  %vm12659_vm14 = vcmp.ge.s32.totalorder %v10909_v23, 0  ;;  %vm13936_vm7 = vcmp.ge.s32.totalorder %v10618_v25, 0  ;;  %v5112_v32 = vld [vmem:[#allocation2 + $0x4c0] sm:$0xff] }
 0x300   : > { %v13930_v47 = vsel %vm10901_vm3, 4294967295, %v13929_v47  ;;  %3254 = vst [vmem:[#allocation2 + $0x2d8] ss:$-124 sps:$4 sm:$0x83] %v3222_v60   ;;  %v4794_v40 = vrot.slane %v4762_v34, 3  ;;  %vm584_vm11 = vmand %vm10901_vm3, %vm13932_vm1  ;;  %6466 = vmatpush1.bf16.msra.mxu1 %v6465_v13  ;;  %v10953_v16 = vand.u32 63, %v197_v15  ;;  %v6457_v38 = vpack.c.bf16 %v5112_v32, %v5096_v22 }
 0x301   : > { %vm600_vm12 = vmand %vm584_vm11, %vm13933_vm4  ;;  %v5065_v19 = vld [vmem:[#allocation2 + $0x348] sm:$0xff]  ;;  %vm12660_vm11 = vcmp.lt.s32.totalorder %v10909_v23, 64  ;;  %vm13937_vm4 = vcmp.lt.s32.totalorder %v10618_v25, 64  ;;  %v13941_v35 = vmov 0  ;;  %v521_v60 = vadd.s32 4294967295, %v10947_v21 }
 0x302   : > { %v5081_v8 = vld [vmem:[#allocation2 + $0x3c8] sm:$0xff]  ;;  %4826 = vst [vmem:[#allocation2 + $0x450] sm:$0xe0] %v4794_v40  ;;  %vm2828_vm13 = vmand %vm13854_vm6, %vm13934_vm9  ;;  %v715_v49 = vsel %vm600_vm12, %v683_v46, 0.0  ;;  %vm12662_vm9 = vcmp.ge.s32.totalorder %v10919_v10, 0  ;;  %v10993_v40 = vpop.permute.xlu1 %664 }
 0x303   : > { %v6451_v58 = vpack.c.bf16 %v5081_v8, %v5065_v19  ;;  %vm2844_vm8 = vmand %vm2828_vm13, %vm13935_vm0  ;;  %v747_v4 = vrot.slane %v715_v49, 5  ;;  %vm13938_vm13 = vcmask 539648   ;;  %v11006_v19 = vld [vmem:[%s12402_s1 + $0x8] sm:$0xff]  ;;  %v13953_v8 = vmov 0  ;;  %v11052_v15 = vld [vmem:[%s6671_s23 + $0x38] sm:$0x77] }
 0x304   : > { %vm4385_vm1 = vmand %vm10257_vm10, %vm13936_vm7  ;;  %v2896_v41 = vsel %vm2844_vm8, %v683_v46, 0.0  ;;  %v1709_v18 = vsel %vm13938_vm13, %v10558_v52, %v10925_v59  ;;  %vm13939_vm10 = vnez %v13825_v43  ;;  %vm12661_vm8 = vcmp.lt.s32.totalorder %v10919_v10, 64  ;;  %v10951_v52 = vpop.permute.xlu0 %1429 }
 0x305   : > { %6452 = vmatprep.subr.bf16.mxu0 %v6451_v58  ;;  %vm4401_vm12 = vmand %vm4385_vm1, %vm13937_vm4  ;;  %779 = vst [vmem:[#allocation2 + $0x60] sm:$0x38] %v747_v4  ;;  %v2928_v3 = vrot.slane %v2896_v41, 7  ;;  %vm1303_vm7 = vcmp.ge.s32.totalorder %v1287_v7, 0  ;;  %vm1319_vm4 = vcmp.lt.s32.totalorder %v1287_v7, 64  ;;  %v11025_v49 = vadd.s32 2, %v10216_v31 }
 0x306   : > { %6454 = vmatpush1.bf16.msra.mxu0 %v6453_v55  ;;  %v4453_v37 = vsel %vm4401_vm12, %v683_v46, 0.0  ;;  %vm1594_vm0 = vmand %vm13939_vm10, %vm12659_vm14  ;;  %vm13940_vm12 = vnez %v13822_v9  ;;  %v10975_v46 = vadd.s32 4294967294, %v10953_v16  ;;  %v13956_v7 = vmov 0  ;;  %v11037_v58 = vld [vmem:[%s12402_s1 + $0x10] sm:$0xff] }
 0x307   : > { %6456 = vmatprep.subr.bf16.mxu0 %v6455_v33  ;;  %2960 = vst [vmem:[#allocation2 + $0x258] sm:$0xe] %v2928_v3  ;;  %v4485_v1 = vrot.slane %v4453_v37, 1  ;;  %vm1626_vm1 = vmand %vm1594_vm0, %vm12660_vm11  ;;  %vm13943_vm11 = vcmask 1031168   ;;  %v229_v4 = vadd.s32 4294967294, %v10947_v21  ;;  %v5034_v41 = vld [vmem:[#allocation2 + $0x250] sm:$0xff] }
 0x308   : > { %vm3466_vm13 = vmand %vm13940_vm12, %vm12662_vm9  ;;  %v1741_v48 = vsel %vm1626_vm1, %v1709_v18, 0.0  ;;  %v1450_v5 = vsel %vm13943_vm11, %v10417_v45, %v10951_v52  ;;  %vm13944_vm1 = vcmp.ge.s32.totalorder %v10579_v36, 0  ;;  %vm13946_vm11 = vcmask 654336   ;;  %v11065_v33 = vld [vmem:[%s12402_s1 + $0x18] sm:$0xff]  ;;  %v11076_v22 = vpop.permute.xlu0 %437 }
 0x309   : > { %4517 = vst [vmem:[#allocation2 + $0x450] ss:$-124 sps:$4 sm:$0x83] %v4485_v1   ;;  %vm3498_vm14 = vmand %vm3466_vm13, %vm12661_vm8  ;;  %v1773_v63 = vrot.slane %v1741_v48, 1  ;;  %vm13948_vm8 = vcmp.lt.s32.totalorder %v10216_v31, 64  ;;  %vm553_vm9 = vcmp.lt.s32.totalorder %v521_v60, 64 }
 0x30a   : > { %6458 = vmatpush1.bf16.msra.mxu0 %v6457_v38  ;;  %v3550_v13 = vsel %vm3498_vm14, %v1709_v18, 0.0  ;;  %vm10962_vm0 = vmand %vm1303_vm7, %vm1319_vm4  ;;  %vm13945_vm14 = vcmp.lt.s32.totalorder %v10579_v36, 64  ;;  %vm13947_vm4 = vcmp.ge.s32.totalorder %v10216_v31, 0  ;;  %vm12671_vm15 = vcmp.ge.s32.totalorder %v10975_v46, 0  ;;  %v5050_v38 = vld [vmem:[#allocation2 + $0x2d0] sm:$0xff] }
 0x30b   : > { %v13942_v35 = vsel %vm10962_vm0, 4294967295, %v13941_v35  ;;  %1805 = vst [vmem:[#allocation2 + $0x160] ss:$-124 sps:$4 sm:$0x83] %v1773_v63   ;;  %v3582_v34 = vrot.slane %v3550_v13, 3  ;;  %vm1351_vm13 = vmand %vm10962_vm0, %vm13944_vm1  ;;  %vm13949_vm0 = vcmp.ge.s32.totalorder %v10618_v25, 0  ;;  %v6469_v63 = vpack.c.bf16 %v5050_v38, %v5034_v41 }
 0x30c   : > { %vm1367_vm7 = vmand %vm1351_vm13, %vm13945_vm14  ;;  %vm537_vm14 = vcmp.ge.s32.totalorder %v521_v60, 0 }
 0x30d   : > { %6330 = vmatmul.mubr.msk.f32.vlgmr.msra.gmra.mrb[24].mxu0 %vm13946_vm11, %v10982_v26  ;;  %3614 = vst [vmem:[#allocation2 + $0x2d8] sm:$0xe0] %v3582_v34  ;;  %vm3286_vm1 = vmand %vm13904_vm5, %vm13947_vm4  ;;  %v1482_v45 = vsel %vm1367_vm7, %v1450_v5, 0.0  ;;  %vm13950_vm11 = vnez %v13786_v42  ;;  %vm13951_vm7 = vcmp.lt.s32.totalorder %v10618_v25, 64  ;;  %v13961_v34 = vmov 0 }
 0x30e   : > { %5613 = vmatprep.mubr.f32.mxu0 %v13442_v50  ;;  %vm3302_vm13 = vmand %vm3286_vm1, %vm13948_vm8  ;;  %v1514_v20 = vrot.slane %v1482_v45, 4  ;;  %vm12670_vm8 = vcmp.lt.s32.totalorder %v10975_v46, 64  ;;  %vm13952_vm1 = vcmask 654336   ;;  %v5035_v3 = vld [vmem:[#allocation2 + $0x258] sm:$0xff] }
 0x30f   : > { %vm4842_vm2 = vmand %vm13950_vm11, %vm13949_vm0  ;;  %v3354_v39 = vsel %vm3302_vm13, %v1450_v5, 0.0  ;;  %vm796_vm13 = vcmp.ge.s32.totalorder %v10947_v21, 0  ;;  %vm13955_vm11 = vcmask 7168  }
 0x310   : > { %vm4858_vm4 = vmand %vm4842_vm2, %vm13951_vm7  ;;  %1546 = vst [vmem:[#allocation2 + $0xe0] sm:$0x70] %v1514_v20  ;;  %v3386_v14 = vrot.slane %v3354_v39, 6  ;;  %vm812_vm2 = vcmp.lt.s32.totalorder %v10947_v21, 64  ;;  %v684_v25 = vsel %vm13955_vm11, %v10893_v27, %v10993_v40  ;;  %v11111_v39 = vpop.permute.xlu1 %2337 }
 0x311   : > { %6331 = vmatmul.mubr.msk.f32.gmra.mrb[26].mxu0 %vm13952_vm1, %v11006_v19  ;;  %v4910_v42 = vsel %vm4858_vm4, %v1450_v5, 0.0  ;;  %vm11010_vm0 = vmand %vm537_vm14, %vm553_vm9  ;;  %vm12668_vm4 = vcmp.ge.s32.totalorder %v10554_v44, 0  ;;  %v11087_v5 = vld [vmem:[%s12402_s1 + $0x20] sm:$0xff] }
 0x312   : > { %v13954_v8 = vsel %vm11010_vm0, 4294967295, %v13953_v8  ;;  %5619 = vmatprep.mubr.f32.mxu0 %v13442_v50  ;;  %3418 = vst [vmem:[#allocation2 + $0x2d8] sm:$0x1c] %v3386_v14  ;;  %4926 = vst [vmem:[#allocation2 + $0x4d0] sm:$0x7] %v4910_v42  ;;  %v11116_v14 = vld [vmem:[%s12402_s1 + $0x28] sm:$0xff] }
 0x313   : > { %vm585_vm9 = vmand %vm11010_vm0, %vm12671_vm15 }
 0x314   : > { %vm601_vm14 = vmand %vm585_vm9, %vm12670_vm8  ;;  %vm12672_vm9 = vcmp.ge.s32.totalorder %v11025_v49, 0 }
 0x315   : > { %vm11029_vm7 = vmand %vm796_vm13, %vm812_vm2  ;;  %v716_v27 = vsel %vm601_vm14, %v684_v25, 0.0  ;;  %6332 = vmatmul.mubr.msk.f32.gmra.mrb[28].mxu0 %vm13952_vm1, %v11037_v58  ;;  %vm12669_vm13 = vcmp.lt.s32.totalorder %v10554_v44, 64  ;;  %vm12673_vm1 = vcmp.lt.s32.totalorder %v11025_v49, 64 }
 0x316   : > { %v13957_v7 = vsel %vm11029_vm7, 4294967295, %v13956_v7  ;;  %vm844_vm11 = vmand %vm11029_vm7, %vm12671_vm15  ;;  %v748_v31 = vrot.slane %v716_v27, 5  ;;  %5625 = vmatprep.mubr.f32.mxu0 %v13442_v50  ;;  %vm13974_vm7 = vcmp.lt.s32.totalorder %v10909_v23, 64 }
 0x317   : > { %vm860_vm2 = vmand %vm844_vm11, %vm12670_vm8  ;;  %vm261_vm8 = vcmp.lt.s32.totalorder %v229_v4, 64 }
 0x318   : > { %v916_v55 = vsel %vm860_vm2, %v11052_v15, 0.0  ;;  %vm2829_vm14 = vmand %vm10901_vm3, %vm12668_vm4  ;;  %780 = vst [vmem:[#allocation2 + $0x68] sm:$0x38] %v748_v31  ;;  %vm13958_vm2 = vcmask 654336  }
 0x319   : > { %v948_v57 = vrot.slane %v916_v55, 2  ;;  %vm2845_vm11 = vmand %vm2829_vm14, %vm12669_vm13  ;;  %6333 = vmatmul.mubr.msk.f32.gmra.mrb[30].mxu0 %vm13958_vm2, %v11065_v33  ;;  %v5051_v18 = vld [vmem:[#allocation2 + $0x2d8] sm:$0xff]  ;;  %vm245_vm13 = vcmp.ge.s32.totalorder %v229_v4, 0  ;;  %vm13959_vm2 = vnez %v13861_v61 }
 0x31a   : > { %vm4386_vm4 = vmand %vm13854_vm6, %vm12672_vm9  ;;  %v2897_v32 = vsel %vm2845_vm11, %v684_v25, 0.0  ;;  %5631 = vmatprep.mubr.f32.mxu0 %v13442_v50  ;;  %v6467_v1 = vpack.c.bf16 %v5051_v18, %v5035_v3  ;;  %v11172_v18 = vpop.permute.xlu1 %1915 }
 0x31b   : > { %980 = vst [vmem:[#allocation2 + $0xe8] ss:$-124 sps:$4 sm:$0xc1] %v948_v57   ;;  %vm4402_vm14 = vmand %vm4386_vm4, %vm12673_vm1  ;;  %v2929_v37 = vrot.slane %v2897_v32, 7  ;;  %vm13960_vm4 = vcmask 654336   ;;  %v13978_v57 = vmov 0 }
 0x31c   : > { %vm4550_vm11 = vmand %vm13959_vm2, %vm12672_vm9  ;;  %v4454_v48 = vsel %vm4402_vm14, %v684_v25, 0.0  ;;  %6468 = vmatprep.subr.bf16.mxu1 %v6467_v1  ;;  %vm13963_vm14 = vcmask 15360  }
 0x31d   : > { %vm4566_vm15 = vmand %vm4550_vm11, %vm12673_vm1  ;;  %2961 = vst [vmem:[#allocation2 + $0x260] sm:$0xe] %v2929_v37  ;;  %v4486_v13 = vrot.slane %v4454_v48, 1  ;;  %6334 = vmatmul.mubr.msk.f32.gmra.mrb[32].mxu0 %vm13960_vm4, %v11087_v5  ;;  %v457_v45 = vsel %vm13963_vm14, %v10594_v2, %v11076_v22  ;;  %6470 = vmatpush1.bf16.msra.mxu1 %v6469_v63  ;;  %vm13964_vm11 = vcmp.ge.s32.totalorder %v10975_v46, 0  ;;  %vm13967_vm14 = vcmask 654336  }
 0x31e   : > { %v4614_v60 = vsel %vm4566_vm15, %v11052_v15, 0.0  ;;  %vm11093_vm9 = vmand %vm245_vm13, %vm261_vm8  ;;  %5637 = vmatprep.mubr.f32.mxu0 %v13442_v50  ;;  %vm13965_vm15 = vcmp.lt.s32.totalorder %v10975_v46, 64  ;;  %vm13966_vm13 = vcmp.ge.s32.totalorder %v10554_v44, 0  ;;  %v1288_v48 = vadd.s32 2, %v10947_v21 }
 0x31f   : > { %v13962_v34 = vsel %vm11093_vm9, 4294967295, %v13961_v34  ;;  %v4646_v20 = vrot.slane %v4614_v60, 6  ;;  %4518 = vst [vmem:[#allocation2 + $0x458] ss:$-124 sps:$4 sm:$0x83] %v4486_v13   ;;  %vm325_vm4 = vmand %vm11093_vm9, %vm13964_vm11  ;;  %vm13968_vm11 = vcmp.lt.s32.totalorder %v10554_v44, 64 }
 0x320   : > { %vm357_vm8 = vmand %vm325_vm4, %vm13965_vm15  ;;  %vm13969_vm15 = vcmp.ge.s32.totalorder %v11025_v49, 0  ;;  %vm13971_vm9 = vcmask 515072   ;;  %v149_v63 = vadd.s32 1792, %v13379_v56  ;;  %v150_v13 = vadd.s32 1920, %v13379_v56  ;;  %v11212_v56 = vpop.permute.xlu1 %1431 }
 0x321   : > { %4678 = vst [vmem:[#allocation2 + $0x458] sm:$0x1c] %v4646_v20  ;;  %vm2649_vm1 = vmand %vm13939_vm10, %vm13966_vm13  ;;  %v489_v2 = vsel %vm357_vm8, %v457_v45, 0.0  ;;  %6335 = vmatmul.mubr.msk.f32.gmra.mrb[34].mxu0 %vm13967_vm14, %v11116_v14  ;;  %vm13970_vm13 = vcmp.lt.s32.totalorder %v11025_v49, 64  ;;  %v2358_v27 = vsel %vm13971_vm9, %v10837_v51, %v11111_v39  ;;  %vm13973_vm14 = vnez %v13921_v24  ;;  %v11146_v51 = vpop.permute.xlu0 %2126 }
 0x322   : > { %vm2681_vm4 = vmand %vm2649_vm1, %vm13968_vm11  ;;  %505 = vst [vmem:[#allocation2 + $0x68] sm:$0x7] %v489_v2  ;;  %5809 = vmatprep.mubr.f32.mxu0 %v13442_v50  ;;  %vm13972_vm1 = vcmp.ge.s32.totalorder %v10909_v23, 0  ;;  %v166_v6 = vadd.s32 %v13393_v12, %v149_v63  ;;  %v167_v2 = vadd.s32 %v13393_v12, %v150_v13 }
 0x323   : > { %vm4222_vm8 = vmand %vm13940_vm12, %vm13969_vm15  ;;  %v2733_v42 = vsel %vm2681_vm4, %v457_v45, 0.0  ;;  %vm795_vm4 = vcmp.ge.s32.totalorder %v10543_v29, 0  ;;  %vm811_vm15 = vcmp.lt.s32.totalorder %v10543_v29, 64 }
 0x324   : > { %vm4254_vm10 = vmand %vm4222_vm8, %vm13970_vm13  ;;  %v2765_v25 = vrot.slane %v2733_v42, 2  ;;  %vm13975_vm8 = vcmp.ge.s32.totalorder %v10919_v10, 0  ;;  %vm13976_vm13 = vnez %v13765_v11  ;;  %v198_v12 = vshra.s32 %v166_v6, 6 }
 0x325   : > { %v4306_v31 = vsel %vm4254_vm10, %v457_v45, 0.0  ;;  %vm2259_vm11 = vmand %vm13973_vm14, %vm13972_vm1  ;;  %vm13977_vm10 = vcmp.lt.s32.totalorder %v10919_v10, 64  ;;  %v14019_v11 = vmov 0 }
 0x326   : > { %2797 = vst [vmem:[#allocation2 + $0x260] ss:$-124 sps:$4 sm:$0xc1] %v2765_v25   ;;  %v4338_v4 = vrot.slane %v4306_v31, 4  ;;  %vm2275_vm12 = vmand %vm2259_vm11, %vm13974_vm7  ;;  %vm13980_vm7 = vcmp.ge.s32.totalorder %v10579_v36, 0  ;;  %v14000_v25 = vmov 0 }
 0x327   : > { %vm3878_vm9 = vmand %vm13976_vm13, %vm13975_vm8  ;;  %v2390_v9 = vsel %vm2275_vm12, %v2358_v27, 0.0  ;;  %vm13981_vm12 = vcmp.lt.s32.totalorder %v10579_v36, 64  ;;  %v1012_v31 = vadd.s32 1, %v10947_v21  ;;  %v11240_v21 = vand.u32 63, %v166_v6 }
 0x328   : > { %4370 = vst [vmem:[#allocation2 + $0x3d8] sm:$0x70] %v4338_v4  ;;  %vm3894_vm0 = vmand %vm3878_vm9, %vm13977_vm10  ;;  %vm13982_vm9 = vcmask 523264  }
 0x329   : > { %2406 = vst [vmem:[#allocation2 + $0x1e0] sm:$0x7] %v2390_v9  ;;  %v3946_v55 = vsel %vm3894_vm0, %v2358_v27, 0.0  ;;  %vm11148_vm1 = vmand %vm795_vm4, %vm811_vm15  ;;  %v2147_v29 = vsel %vm13982_vm9, %v10726_v30, %v11146_v51  ;;  %vm13983_vm0 = vcmp.ge.s32.totalorder %v10909_v23, 0  ;;  %vm13984_vm15 = vcmp.lt.s32.totalorder %v10909_v23, 64 }
 0x32a   : > { %v13979_v57 = vsel %vm11148_vm1, 4294967295, %v13978_v57  ;;  %v3978_v41 = vrot.slane %v3946_v55, 2  ;;  %vm843_vm11 = vmand %vm11148_vm1, %vm13980_vm7  ;;  %vm13985_vm7 = vcmp.ge.s32.totalorder %v10554_v44, 0  ;;  %vm13987_vm9 = vcmp.ge.s32.totalorder %v10919_v10, 0 }
 0x32b   : > { %vm859_vm8 = vmand %vm843_vm11, %vm13981_vm12  ;;  %vm13986_vm12 = vcmp.lt.s32.totalorder %v10554_v44, 64 }
 0x32c   : > { %4010 = vst [vmem:[#allocation2 + $0x3d8] ss:$-124 sps:$4 sm:$0xc1] %v3978_v41   ;;  %v915_v32 = vsel %vm859_vm8, %v8488_v17, 0.0  ;;  %vm2048_vm4 = vmand %vm11148_vm1, %vm13983_vm0  ;;  %v11246_v41 = vand.u32 63, %v167_v2 }
 0x32d   : > { %v947_v3 = vrot.slane %v915_v32, 2  ;;  %vm2064_vm10 = vmand %vm2048_vm4, %vm13984_vm15  ;;  %vm13988_vm4 = vcmp.lt.s32.totalorder %v10919_v10, 64  ;;  %v11252_v32 = vand.u32 63, %v198_v12  ;;  %v11337_v12 = vadd.s32 2, %v10953_v16 }
 0x32e   : > { %vm2977_vm11 = vmand %vm11148_vm1, %vm13985_vm7  ;;  %v2179_v36 = vsel %vm2064_vm10, %v2147_v29, 0.0  ;;  %vm13989_vm10 = vcmask 531456   ;;  %vm13990_vm7 = vcmp.ge.s32.totalorder %v10909_v23, 0 }
 0x32f   : > { %979 = vst [vmem:[#allocation2 + $0xe0] ss:$-124 sps:$4 sm:$0xc1] %v947_v3   ;;  %vm2993_vm8 = vmand %vm2977_vm11, %vm13986_vm12  ;;  %v2211_v17 = vrot.slane %v2179_v36, 3  ;;  %v1936_v1 = vsel %vm13989_vm10, %v10682_v53, %v11172_v18 }
 0x330   : > { %v3042_v30 = vsel %vm2993_vm8, %v11052_v15, 0.0  ;;  %vm3730_vm0 = vmand %vm13959_vm2, %vm13987_vm9  ;;  %v11190_v15 = vpop.permute.xlu0 %2500  ;;  %vm13991_vm2 = vcmp.lt.s32.totalorder %v10909_v23, 64 }
 0x331   : > { %v3074_v37 = vrot.slane %v3042_v30, 4  ;;  %vm3746_vm15 = vmand %vm3730_vm0, %vm13988_vm4  ;;  %2243 = vst [vmem:[#allocation2 + $0x160] sm:$0xe0] %v2211_v17  ;;  %v14009_v30 = vmov 0 }
 0x332   : > { %v3798_v38 = vsel %vm3746_vm15, %v2147_v29, 0.0  ;;  %vm1837_vm11 = vmand %vm10901_vm3, %vm13990_vm7  ;;  %vm13994_vm15 = vcmask 506880  }
 0x333   : > { %3106 = vst [vmem:[#allocation2 + $0x260] sm:$0x70] %v3074_v37  ;;  %v3830_v61 = vrot.slane %v3798_v38, 5  ;;  %vm1853_vm12 = vmand %vm1837_vm11, %vm13991_vm2  ;;  %v2521_v45 = vsel %vm13994_vm15, %v10811_v62, %v11190_v15  ;;  %v522_v37 = vadd.s32 4294967295, %v11240_v21  ;;  %v11274_v38 = vadd.s32 4294967294, %v11252_v32 }
 0x334   : > { %vm13992_vm8 = vmmov %vm13987_vm9  ;;  %v1968_v53 = vsel %vm1853_vm12, %v1936_v1, 0.0  ;;  %vm1304_vm12 = vcmp.ge.s32.totalorder %v1288_v48, 0  ;;  %v11244_v55 = vpop.permute.xlu0 %1156 }
 0x335   : > { %vm3630_vm9 = vmand %vm13854_vm6, %vm13992_vm8  ;;  %3862 = vst [vmem:[#allocation2 + $0x358] sm:$0x38] %v3830_v61  ;;  %v2000_v60 = vrot.slane %v1968_v53, 6  ;;  %vm1320_vm8 = vcmp.lt.s32.totalorder %v1288_v48, 64  ;;  %v5082_v61 = vld [vmem:[#allocation2 + $0x3d0] sm:$0xff] }
 0x336   : > { %vm13993_vm0 = vmmov %vm13988_vm4 }
 0x337   : > { %vm3646_vm4 = vmand %vm3630_vm9, %vm13993_vm0  ;;  %2032 = vst [vmem:[#allocation2 + $0x160] sm:$0x1c] %v2000_v60  ;;  %vm13998_vm9 = vcmp.ge.s32.totalorder %v10919_v10, 0  ;;  %v5066_v60 = vld [vmem:[#allocation2 + $0x350] sm:$0xff] }
 0x338   : > { %v3698_v20 = vsel %vm3646_vm4, %v1936_v1, 0.0  ;;  %vm13995_vm10 = vmmov %vm13990_vm7  ;;  %vm13996_vm7 = vnez %v13942_v35  ;;  %vm13999_vm4 = vcmp.lt.s32.totalorder %v10919_v10, 64  ;;  %v199_v10 = vshra.s32 %v167_v2, 6 }
 0x339   : > { %vm2422_vm11 = vmand %vm13996_vm7, %vm13995_vm10  ;;  %3714 = vst [vmem:[#allocation2 + $0x358] sm:$0x7] %v3698_v20  ;;  %v523_v1 = vadd.s32 4294967295, %v11246_v41  ;;  %v6473_v20 = vpack.c.bf16 %v5082_v61, %v5066_v60  ;;  %v1013_v60 = vadd.s32 1, %v11240_v21 }
 0x33a   : > { %vm13997_vm6 = vmmov %vm13991_vm2  ;;  %v11256_v36 = vand.u32 63, %v199_v10 }
 0x33b   : > { %vm2438_vm2 = vmand %vm2422_vm11, %vm13997_vm6  ;;  %vm14002_vm11 = vcmask 1031168   ;;  %vm14003_vm6 = vcmp.ge.s32.totalorder %v10975_v46, 0 }
 0x33c   : > { %vm4042_vm0 = vmand %vm13904_vm5, %vm13998_vm9  ;;  %v2553_v62 = vsel %vm2438_vm2, %v2521_v45, 0.0  ;;  %v1451_v27 = vsel %vm14002_vm11, %v10951_v52, %v11212_v56  ;;  %vm14004_vm9 = vcmp.lt.s32.totalorder %v10975_v46, 64  ;;  %vm1028_vm11 = vcmp.ge.s32.totalorder %v1012_v31, 0 }
 0x33d   : > { %vm4058_vm15 = vmand %vm4042_vm0, %vm13999_vm4  ;;  %v2585_v42 = vrot.slane %v2553_v62, 5  ;;  %vm14006_vm4 = vcmp.lt.s32.totalorder %v10554_v44, 64  ;;  %v11281_v48 = vadd.s32 4294967294, %v11256_v36  ;;  %v667_v62 = vpop.permute.xlu0 %666 }
 0x33e   : > { %v4110_v23 = vsel %vm4058_vm15, %v2521_v45, 0.0  ;;  %vm11222_vm10 = vmand %vm1304_vm12, %vm1320_vm8  ;;  %vm14005_vm8 = vcmp.ge.s32.totalorder %v10554_v44, 0 }
 0x33f   : > { %v14001_v25 = vsel %vm11222_vm10, 4294967295, %v14000_v25  ;;  %2617 = vst [vmem:[#allocation2 + $0x1e0] sm:$0x38] %v2585_v42  ;;  %v4142_v4 = vrot.slane %v4110_v23, 7  ;;  %vm1352_vm2 = vmand %vm11222_vm10, %vm14003_vm6  ;;  %vm1044_vm6 = vcmp.lt.s32.totalorder %v1012_v31, 64  ;;  %v11292_v42 = vpop.permute.xlu1 %668  ;;  %v14022_v23 = vmov 0 }
 0x340   : > { %vm1368_vm12 = vmand %vm1352_vm2, %vm14004_vm9  ;;  %vm14007_vm2 = vcmp.ge.s32.totalorder %v11025_v49, 0  ;;  %v5067_v63 = vld [vmem:[#allocation2 + $0x358] sm:$0xff]  ;;  %14018 = vst [vmem:[#allocation17_spill] sm:$0xff] %v11292_v42 }
 0x341   : > { %4174 = vst [vmem:[#allocation2 + $0x3d8] sm:$0xe] %v4142_v4  ;;  %vm3287_vm0 = vmand %vm13996_vm7, %vm14005_vm8  ;;  %v1483_v52 = vsel %vm1368_vm12, %v1451_v27, 0.0  ;;  %vm14008_vm12 = vcmp.lt.s32.totalorder %v11025_v49, 64  ;;  %vm14017_vm7 = vcmp.lt.s32.totalorder %v11025_v49, 64 }
 0x342   : > { %vm3303_vm15 = vmand %vm3287_vm0, %vm14006_vm4  ;;  %v1515_v9 = vrot.slane %v1483_v52, 4  ;;  %vm14011_vm4 = vcmask 1039360  }
 0x343   : > { %vm4843_vm9 = vmand %vm13904_vm5, %vm14007_vm2  ;;  %v3355_v29 = vsel %vm3303_vm15, %v1451_v27, 0.0  ;;  %v1176_v54 = vsel %vm14011_vm4, %v10865_v0, %v11244_v55  ;;  %vm14012_vm5 = vcmp.ge.s32.totalorder %v10975_v46, 0  ;;  %vm14014_vm2 = vcmp.ge.s32.totalorder %v10554_v44, 0 }
 0x344   : > { %vm4859_vm8 = vmand %vm4843_vm9, %vm14008_vm12  ;;  %1547 = vst [vmem:[#allocation2 + $0xe8] sm:$0x70] %v1515_v9  ;;  %v3387_v3 = vrot.slane %v3355_v29, 6  ;;  %vm14015_vm12 = vcmp.lt.s32.totalorder %v10554_v44, 64  ;;  %vm538_vm4 = vcmp.ge.s32.totalorder %v522_v37, 0 }
 0x345   : > { %v4911_v17 = vsel %vm4859_vm8, %v1451_v27, 0.0  ;;  %vm11258_vm0 = vmand %vm1028_vm11, %vm1044_vm6  ;;  %vm14013_vm11 = vcmp.lt.s32.totalorder %v10975_v46, 64 }
 0x346   : > { %v14010_v30 = vsel %vm11258_vm0, 4294967295, %v14009_v30  ;;  %3419 = vst [vmem:[#allocation2 + $0x2e0] sm:$0x1c] %v3387_v3  ;;  %4927 = vst [vmem:[#allocation2 + $0x4d8] sm:$0x7] %v4911_v17  ;;  %v5114_v3 = vld [vmem:[#allocation2 + $0x4d0] sm:$0xff] }
 0x347   : > { %vm1076_vm15 = vmand %vm11258_vm0, %vm14012_vm5  ;;  %vm554_vm5 = vcmp.lt.s32.totalorder %v522_v37, 64 }
 0x348   : > { %vm1092_vm6 = vmand %vm1076_vm15, %vm14013_vm11  ;;  %v5083_v53 = vld [vmem:[#allocation2 + $0x3d8] sm:$0xff]  ;;  %vm14016_vm15 = vcmp.ge.s32.totalorder %v11025_v49, 0 }
 0x349   : > { %vm3122_vm9 = vmand %vm13973_vm14, %vm14014_vm2  ;;  %v1208_v0 = vsel %vm1092_vm6, %v1176_v54, 0.0  ;;  %v6471_v13 = vpack.c.bf16 %v5083_v53, %v5067_v63  ;;  %vm539_vm6 = vcmp.ge.s32.totalorder %v523_v1, 0  ;;  %vm555_vm2 = vcmp.lt.s32.totalorder %v523_v1, 64  ;;  %v5098_v63 = vld [vmem:[#allocation2 + $0x450] sm:$0xff] }
 0x34a   : > { %vm3138_vm8 = vmand %vm3122_vm9, %vm14015_vm12  ;;  %v1240_v46 = vrot.slane %v1208_v0, 7  ;;  %vm12684_vm9 = vcmp.ge.s32.totalorder %v11274_v38, 0  ;;  %vm12686_vm12 = vcmp.ge.s32.totalorder %v11281_v48, 0 }
 0x34b   : > { %vm4694_vm11 = vmand %vm13976_vm13, %vm14016_vm15  ;;  %v3191_v45 = vsel %vm3138_vm8, %v1176_v54, 0.0  ;;  %6472 = vmatprep.subr.bf16.mxu1 %v6471_v13 }
 0x34c   : > { %vm4710_vm10 = vmand %vm4694_vm11, %vm14017_vm7  ;;  %1272 = vst [vmem:[#allocation2 + $0xe8] sm:$0xe] %v1240_v46  ;;  %v3223_v6 = vrot.slane %v3191_v45, 1  ;;  %6474 = vmatpush1.bf16.msra.mxu1 %v6473_v20  ;;  %vm12689_vm7 = vcmp.lt.s32.totalorder %v11274_v38, 64  ;;  %vm12693_vm11 = vcmp.ge.s32.totalorder %v10953_v16, 0  ;;  %v6477_v46 = vpack.c.bf16 %v5114_v3, %v5098_v63 }
 0x34d   : > { %v4763_v2 = vsel %vm4710_vm10, %v1176_v54, 0.0  ;;  %vm11297_vm13 = vmand %vm538_vm4, %vm554_vm5  ;;  %vm14025_vm5 = vcmask 7168   ;;  %vm12690_vm10 = vcmp.ge.s32.totalorder %v11252_v32, 0  ;;  %v5115_v1 = vld [vmem:[#allocation2 + $0x4d8] sm:$0xff]  ;;  %v1014_v45 = vadd.s32 1, %v11246_v41 }
 0x34e   : > { %v14020_v11 = vsel %vm11297_vm13, 4294967295, %v14019_v11  ;;  %3255 = vst [vmem:[#allocation2 + $0x2e0] ss:$-124 sps:$4 sm:$0x83] %v3223_v6   ;;  %v4795_v49 = vrot.slane %v4763_v2, 3  ;;  %vm11304_vm8 = vmand %vm539_vm6, %vm555_vm2  ;;  %v685_v27 = vsel %vm14025_vm5, %v10993_v40, %v667_v62  ;;  %v11329_v40 = vadd.s32 2, %v10554_v44 }
 0x34f   : > { %14021 = vst [vmem:[#allocation18_spill] sm:$0xff] %v14020_v11  ;;  %v14023_v23 = vsel %vm11304_vm8, 4294967295, %v14022_v23  ;;  %vm586_vm4 = vmand %vm11297_vm13, %vm12684_vm9  ;;  %vm14027_vm9 = vcmp.lt.s32.totalorder %v11281_v48, 64 }
 0x350   : > { %14024 = vst [vmem:[#allocation12_spill] sm:$0xff] %v14023_v23  ;;  %4827 = vst [vmem:[#allocation2 + $0x458] sm:$0xe0] %v4795_v49 }
 0x351   : > { %vm587_vm15 = vmand %vm11304_vm8, %vm12686_vm12  ;;  %vm12691_vm12 = vcmp.lt.s32.totalorder %v11252_v32, 64 }
 0x352   : > { %vm14026_vm6 = vmmov %vm14025_vm5  ;;  %vm12692_vm5 = vcmp.lt.s32.totalorder %v10953_v16, 64 }
 0x353   : > { %v686_v31 = vsel %vm14026_vm6, %v667_v62, %v11292_v42  ;;  %vm602_vm2 = vmand %vm586_vm4, %vm12689_vm7  ;;  %vm14028_vm6 = vnez %v13954_v8 }
 0x354   : > { %vm603_vm14 = vmand %vm587_vm15, %vm14027_vm9  ;;  %v717_v4 = vsel %vm602_vm2, %v685_v27, 0.0  ;;  %vm12698_vm2 = vcmp.ge.s32.totalorder %v11329_v40, 0 }
 0x355   : > { %vm2830_vm8 = vmand %vm14028_vm6, %vm12693_vm11  ;;  %v718_v10 = vsel %vm603_vm14, %v686_v31, 0.0  ;;  %v749_v52 = vrot.slane %v717_v4, 5  ;;  %vm14029_vm14 = vnez %v13957_v7 }
 0x356   : > { %vm2831_vm9 = vmand %vm11297_vm13, %vm12690_vm10  ;;  %v750_v9 = vrot.slane %v718_v10, 5  ;;  %vm12700_vm10 = vcmp.ge.s32.totalorder %v11337_v12, 0  ;;  %vm14030_vm13 = vcmask 654336   ;;  %v11392_v10 = vpop.permute.xlu1 %1160 }
 0x357   : > { %vm2846_vm4 = vmand %vm2830_vm8, %vm12692_vm5  ;;  %781 = vst [vmem:[#allocation2 + $0x70] sm:$0x38] %v749_v52  ;;  %v5099_v37 = vld [vmem:[#allocation2 + $0x458] sm:$0xff]  ;;  %v14034_v52 = vmov 0 }
 0x358   : > { %vm2847_vm15 = vmand %vm2831_vm9, %vm12691_vm12  ;;  %782 = vst [vmem:[#allocation2 + $0x78] sm:$0x38] %v750_v9  ;;  %v2898_v29 = vsel %vm2846_vm4, %v685_v27, 0.0  ;;  %vm12694_vm9 = vcmp.lt.s32.totalorder %v11329_v40, 64  ;;  %v6475_v0 = vpack.c.bf16 %v5115_v1, %v5099_v37  ;;  %vm12697_vm4 = vcmp.lt.s32.totalorder %v11337_v12, 64 }
 0x359   : > { %vm2978_vm7 = vmand %vm14029_vm14, %vm12693_vm11  ;;  %v2899_v17 = vsel %vm2847_vm15, %v686_v31, 0.0  ;;  %v2930_v54 = vrot.slane %v2898_v29, 7  ;;  %vm1029_vm11 = vcmp.ge.s32.totalorder %v1013_v60, 0  ;;  %14033 = vst [vmem:[#allocation10_spill] sm:$0xff] %v11392_v10  ;;  %v14036_v29 = vmov 0 }
 0x35a   : > { %vm2994_vm8 = vmand %vm2978_vm7, %vm12692_vm5  ;;  %v2931_v61 = vrot.slane %v2899_v17, 7  ;;  %6476 = vmatprep.subr.bf16.mxu1 %v6475_v0  ;;  %v1289_v1 = vadd.s32 2, %v11240_v21 }
 0x35b   : > { %v3043_v53 = vsel %vm2994_vm8, %v8974_v28, 0.0  ;;  %vm4387_vm15 = vmand %vm10901_vm3, %vm12698_vm2  ;;  %2962 = vst [vmem:[#allocation2 + $0x268] sm:$0xe] %v2930_v54  ;;  %6478 = vmatpush1.bf16.msra.mxu1 %v6477_v46 }
 0x35c   : > { %v3075_v13 = vrot.slane %v3043_v53, 4  ;;  %vm4388_vm7 = vmand %vm14028_vm6, %vm12700_vm10  ;;  %2963 = vst [vmem:[#allocation2 + $0x270] sm:$0xe] %v2931_v61 }
 0x35d   : > { %vm4403_vm8 = vmand %vm4387_vm15, %vm12694_vm9  ;;  %vm1045_vm9 = vcmp.lt.s32.totalorder %v1013_v60, 64 }
 0x35e   : > { %3107 = vst [vmem:[#allocation2 + $0x268] sm:$0x70] %v3075_v13  ;;  %vm4404_vm12 = vmand %vm4388_vm7, %vm12697_vm4  ;;  %v4455_v20 = vsel %vm4403_vm8, %v685_v27, 0.0  ;;  %6336 = vmatmul.mubr.msk.f32.vlgmr.msra.gmra.mrb[24].mxu1 %vm14030_vm13, %v10982_v26  ;;  %vm14031_vm7 = vcmp.lt.s32.totalorder %v11329_v40, 64  ;;  %vm1030_vm4 = vcmp.ge.s32.totalorder %v1014_v45, 0  ;;  %v1159_v27 = vpop.permute.xlu0 %1158 }
 0x35f   : > { %vm4551_vm5 = vmand %vm11148_vm1, %vm12698_vm2  ;;  %v4456_v6 = vsel %vm4404_vm12, %v686_v31, 0.0  ;;  %v4487_v62 = vrot.slane %v4455_v20, 1  ;;  %vm1046_vm2 = vcmp.lt.s32.totalorder %v1014_v45, 64  ;;  %5714 = vmatprep.mubr.f32.mxu1 %v13442_v50  ;;  %vm14032_vm12 = vcmp.lt.s32.totalorder %v11337_v12, 64  ;;  %v11389_v31 = vld [vmem:[%s6671_s23 + $0x40] sm:$0x77]  ;;  %v11457_v45 = vpop.permute.xlu1 %1435 }
 0x360   : > { %vm4552_vm15 = vmand %vm14029_vm14, %vm12700_vm10  ;;  %v4488_v2 = vrot.slane %v4456_v6, 1  ;;  %vm14046_vm10 = vcmp.ge.s32.totalorder %v10953_v16, 0  ;;  %14057 = vst [vmem:[#allocation25_spill] sm:$0xff] %v11457_v45  ;;  %v14058_v20 = vmov 0 }
 0x361   : > { %vm4567_vm8 = vmand %vm4551_vm5, %vm14031_vm7  ;;  %4519 = vst [vmem:[#allocation2 + $0x460] ss:$-124 sps:$4 sm:$0x83] %v4487_v62   ;;  %v14060_v62 = vmov 0 }
 0x362   : > { %vm4568_vm1 = vmand %vm4552_vm15, %vm14032_vm12  ;;  %v4615_v49 = vsel %vm4567_vm8, %v8974_v28, 0.0  ;;  %4520 = vst [vmem:[#allocation2 + $0x468] ss:$-124 sps:$4 sm:$0x83] %v4488_v2   ;;  %vm14038_vm15 = vcmask 654336   ;;  %vm14040_vm8 = vcmask 1039360   ;;  %v1434_v46 = vpop.permute.xlu0 %1433 }
 0x363   : > { %v4616_v4 = vsel %vm4568_vm1, %v11389_v31, 0.0  ;;  %v4647_v26 = vrot.slane %v4615_v49, 6  ;;  %vm11396_vm13 = vmand %vm1029_vm11, %vm1045_vm9  ;;  %6337 = vmatmul.mubr.msk.f32.gmra.mrb[26].mxu1 %vm14038_vm15, %v11006_v19  ;;  %vm14039_vm1 = vcmp.ge.s32.totalorder %v11274_v38, 0  ;;  %v1177_v3 = vsel %vm14040_vm8, %v11244_v55, %v1159_v27 }
 0x364   : > { %v14035_v52 = vsel %vm11396_vm13, 4294967295, %v14034_v52  ;;  %v4648_v9 = vrot.slane %v4616_v4, 6  ;;  %vm11400_vm5 = vmand %vm1030_vm4, %vm1046_vm2  ;;  %5720 = vmatprep.mubr.f32.mxu1 %v13442_v50  ;;  %vm14041_vm11 = vcmp.ge.s32.totalorder %v11281_v48, 0  ;;  %vm14043_vm4 = vcmp.lt.s32.totalorder %v11274_v38, 64 }
 0x365   : > { %v14037_v29 = vsel %vm11400_vm5, 4294967295, %v14036_v29  ;;  %4679 = vst [vmem:[#allocation2 + $0x460] sm:$0x1c] %v4647_v26  ;;  %vm1077_vm7 = vmand %vm11396_vm13, %vm14039_vm1  ;;  %vm14044_vm15 = vcmp.lt.s32.totalorder %v11281_v48, 64  ;;  %v230_v4 = vadd.s32 4294967294, %v11240_v21  ;;  %v11499_v26 = vadd.s32 4294967295, %v10953_v16 }
 0x366   : > { %4680 = vst [vmem:[#allocation2 + $0x468] sm:$0x1c] %v4648_v9  ;;  %vm1078_vm2 = vmand %vm11400_vm5, %vm14041_vm11  ;;  %vm14047_vm11 = vcmp.ge.s32.totalorder %v11252_v32, 0 }
 0x367   : > { %vm14042_vm9 = vmmov %vm14040_vm8  ;;  %vm14045_vm8 = vcmask 654336  }
 0x368   : > { %v1178_v19 = vsel %vm14042_vm9, %v1159_v27, %v11392_v10  ;;  %vm1093_vm12 = vmand %vm1077_vm7, %vm14043_vm4  ;;  %6338 = vmatmul.mubr.msk.f32.gmra.mrb[28].mxu1 %vm14045_vm8, %v11037_v58  ;;  %v1290_v58 = vadd.s32 2, %v11246_v41 }
 0x369   : > { %vm1094_vm1 = vmand %vm1078_vm2, %vm14044_vm15  ;;  %v1209_v17 = vsel %vm1093_vm12, %v1177_v3, 0.0  ;;  %5726 = vmatprep.mubr.f32.mxu1 %v13442_v50  ;;  %vm14048_vm2 = vcmp.lt.s32.totalorder %v10953_v16, 64  ;;  %vm14051_vm15 = vcmp.ge.s32.totalorder %v11329_v40, 0 }
 0x36a   : > { %vm3123_vm14 = vmand %vm11258_vm0, %vm14046_vm10  ;;  %v1210_v55 = vsel %vm1094_vm1, %v1178_v19, 0.0  ;;  %v1241_v54 = vrot.slane %v1209_v17, 7  ;;  %vm14049_vm10 = vcmp.lt.s32.totalorder %v11252_v32, 64  ;;  %vm14052_vm1 = vnez %v13921_v24 }
 0x36b   : > { %vm3124_vm7 = vmand %vm11396_vm13, %vm14047_vm11  ;;  %v1242_v37 = vrot.slane %v1210_v55, 7  ;;  %vm1322_vm5 = vcmp.lt.s32.totalorder %v1290_v58, 64  ;;  %vm14056_vm13 = vcmask 654336  }
 0x36c   : > { %vm3139_vm9 = vmand %vm3123_vm14, %vm14048_vm2  ;;  %1273 = vst [vmem:[#allocation2 + $0xf0] sm:$0xe] %v1241_v54  ;;  %vm14053_vm14 = vcmp.ge.s32.totalorder %v11337_v12, 0  ;;  %vm1321_vm2 = vcmp.lt.s32.totalorder %v1289_v1, 64  ;;  %v11518_v54 = vadd.s32 1, %v10554_v44 }
 0x36d   : > { %vm3140_vm4 = vmand %vm3124_vm7, %vm14049_vm10  ;;  %1274 = vst [vmem:[#allocation2 + $0xf8] sm:$0xe] %v1242_v37  ;;  %v3192_v61 = vsel %vm3139_vm9, %v1177_v3, 0.0  ;;  %vm1305_vm7 = vcmp.ge.s32.totalorder %v1289_v1, 0  ;;  %vm14054_vm9 = vcmp.lt.s32.totalorder %v11329_v40, 64  ;;  %v1691_v37 = vpop.permute.xlu0 %1690 }
 0x36e   : > { %vm14050_vm12 = vmmov %vm14045_vm8  ;;  %v3193_v0 = vsel %vm3140_vm4, %v1178_v19, 0.0  ;;  %v3224_v63 = vrot.slane %v3192_v61, 1  ;;  %v11526_v61 = vadd.s32 1, %v10953_v16 }
 0x36f   : > { %6339 = vmatmul.mubr.msk.f32.gmra.mrb[30].mxu1 %vm14050_vm12, %v11065_v33  ;;  %vm4695_vm8 = vmand %vm14052_vm1, %vm14051_vm15  ;;  %v3225_v53 = vrot.slane %v3193_v0, 1  ;;  %vm1306_vm12 = vcmp.ge.s32.totalorder %v1290_v58, 0  ;;  %vm14055_vm15 = vcmp.lt.s32.totalorder %v11337_v12, 64  ;;  %vm14070_vm1 = vnez %v14001_v25  ;;  %v11522_v58 = vpop.permute.xlu1 %1692 }
 0x370   : > { %5732 = vmatprep.mubr.f32.mxu1 %v13442_v50  ;;  %vm4696_vm11 = vmand %vm11258_vm0, %vm14053_vm14  ;;  %3256 = vst [vmem:[#allocation2 + $0x2e8] ss:$-124 sps:$4 sm:$0x83] %v3224_v63   ;;  %vm12712_vm0 = vcmp.ge.s32.totalorder %v11499_v26, 0  ;;  %vm12715_vm3 = vcmp.lt.s32.totalorder %v11526_v61, 64 }
 0x371   : > { %vm4711_vm10 = vmand %vm4695_vm8, %vm14054_vm9  ;;  %3257 = vst [vmem:[#allocation2 + $0x2f0] ss:$-124 sps:$4 sm:$0x83] %v3225_v53   ;;  %vm14063_vm9 = vcmask 1031168  }
 0x372   : > { %vm4712_vm4 = vmand %vm4696_vm11, %vm14055_vm15  ;;  %v4764_v33 = vsel %vm4711_vm10, %v1177_v3, 0.0  ;;  %vm14062_vm11 = vcmp.ge.s32.totalorder %v11274_v38, 0  ;;  %vm14066_vm10 = vcmask 654336   ;;  %v11504_v3 = vadd.s32 4294967295, %v11252_v32 }
 0x373   : > { %6340 = vmatmul.mubr.msk.f32.gmra.mrb[32].mxu1 %vm14056_vm13, %v11087_v5  ;;  %v4765_v13 = vsel %vm4712_vm4, %v1178_v19, 0.0  ;;  %v4796_v60 = vrot.slane %v4764_v33, 3  ;;  %vm11459_vm14 = vmand %vm1305_vm7, %vm1321_vm2  ;;  %v1452_v5 = vsel %vm14063_vm9, %v11212_v56, %v1434_v46  ;;  %vm14064_vm7 = vcmp.ge.s32.totalorder %v11281_v48, 0 }
 0x374   : > { %v14059_v20 = vsel %vm11459_vm14, 4294967295, %v14058_v20  ;;  %5738 = vmatprep.mubr.f32.mxu1 %v13442_v50  ;;  %v4797_v6 = vrot.slane %v4765_v13, 3  ;;  %vm11464_vm8 = vmand %vm1306_vm12, %vm1322_vm5  ;;  %vm14067_vm12 = vcmp.lt.s32.totalorder %v11274_v38, 64  ;;  %vm14068_vm4 = vcmp.lt.s32.totalorder %v11281_v48, 64  ;;  %v11559_v13 = vpop.permute.xlu1 %439 }
 0x375   : > { %v14061_v62 = vsel %vm11464_vm8, 4294967295, %v14060_v62  ;;  %4828 = vst [vmem:[#allocation2 + $0x460] sm:$0xe0] %v4796_v60  ;;  %vm1353_vm13 = vmand %vm11459_vm14, %vm14062_vm11 }
 0x376   : > { %4829 = vst [vmem:[#allocation2 + $0x468] sm:$0xe0] %v4797_v6  ;;  %vm1354_vm2 = vmand %vm11464_vm8, %vm14064_vm7  ;;  %vm14085_vm8 = vcmp.lt.s32.totalorder %v11499_v26, 64  ;;  %v11565_v6 = vpop.permute.xlu0 %1694 }
 0x377   : > { %vm14065_vm5 = vmmov %vm14063_vm9  ;;  %6341 = vmatmul.mubr.msk.f32.gmra.mrb[34].mxu1 %vm14066_vm10, %v11116_v14  ;;  %vm14069_vm9 = vcmp.ge.s32.totalorder %v10953_v16, 0  ;;  %14087 = vst [vmem:[#allocation7_spill] sm:$0xff] %v11565_v6 }
 0x378   : > { %v1453_v2 = vsel %vm14065_vm5, %v1434_v46, %v11457_v45  ;;  %vm1369_vm15 = vmand %vm1353_vm13, %vm14067_vm12  ;;  %5910 = vmatprep.mubr.f32.mxu1 %v13442_v50  ;;  %vm14071_vm5 = vcmp.ge.s32.totalorder %v11252_v32, 0  ;;  %vm14072_vm13 = vcmp.lt.s32.totalorder %v10953_v16, 64 }
 0x379   : > { %vm1370_vm11 = vmand %vm1354_vm2, %vm14068_vm4  ;;  %v1484_v56 = vsel %vm1369_vm15, %v1452_v5, 0.0  ;;  %vm14073_vm2 = vcmp.lt.s32.totalorder %v11252_v32, 64  ;;  %vm14074_vm4 = vcmp.ge.s32.totalorder %v11329_v40, 0 }
 0x37a   : > { %vm3288_vm7 = vmand %vm14070_vm1, %vm14069_vm9  ;;  %v1485_v49 = vsel %vm1370_vm11, %v1453_v2, 0.0  ;;  %v1516_v27 = vrot.slane %v1484_v56, 4  ;;  %vm14075_vm11 = vnez %v13942_v35  ;;  %v231_v56 = vadd.s32 4294967294, %v11246_v41 }
 0x37b   : > { %vm3289_vm10 = vmand %vm11459_vm14, %vm14071_vm5  ;;  %v1517_v14 = vrot.slane %v1485_v49, 4 }
 0x37c   : > { %vm3304_vm12 = vmand %vm3288_vm7, %vm14072_vm13  ;;  %1548 = vst [vmem:[#allocation2 + $0xf0] sm:$0x70] %v1516_v27  ;;  %vm14076_vm7 = vcmp.ge.s32.totalorder %v11337_v12, 0  ;;  %vm246_vm13 = vcmp.ge.s32.totalorder %v230_v4, 0 }
 0x37d   : > { %vm3305_vm15 = vmand %vm3289_vm10, %vm14073_vm2  ;;  %1549 = vst [vmem:[#allocation2 + $0xf8] sm:$0x70] %v1517_v14  ;;  %v3356_v9 = vsel %vm3304_vm12, %v1452_v5, 0.0  ;;  %vm262_vm10 = vcmp.lt.s32.totalorder %v230_v4, 64  ;;  %vm14077_vm12 = vcmp.lt.s32.totalorder %v11329_v40, 64  ;;  %v11580_v14 = vadd.s32 4294967295, %v11256_v36 }
 0x37e   : > { %vm4844_vm9 = vmand %vm14075_vm11, %vm14074_vm4  ;;  %v3357_v19 = vsel %vm3305_vm15, %v1453_v2, 0.0  ;;  %v3388_v17 = vrot.slane %v3356_v9, 6  ;;  %vm14078_vm15 = vcmp.lt.s32.totalorder %v11337_v12, 64  ;;  %v11589_v9 = vadd.s32 1, %v11252_v32 }
 0x37f   : > { %vm4845_vm5 = vmand %vm14070_vm1, %vm14076_vm7  ;;  %v3389_v55 = vrot.slane %v3357_v19, 6  ;;  %vm14082_vm7 = vcmask 539648   ;;  %v1918_v19 = vpop.permute.xlu1 %1917 }
 0x380   : > { %vm4860_vm2 = vmand %vm4844_vm9, %vm14077_vm12  ;;  %3420 = vst [vmem:[#allocation2 + $0x2e8] sm:$0x1c] %v3388_v17  ;;  %v1710_v44 = vsel %vm14082_vm7, %v10925_v59, %v1691_v37  ;;  %v11593_v17 = vpop.permute.xlu0 %441 }
 0x381   : > { %vm4861_vm4 = vmand %vm4845_vm5, %vm14078_vm15  ;;  %3421 = vst [vmem:[#allocation2 + $0x2f0] sm:$0x1c] %v3389_v55  ;;  %v4912_v1 = vsel %vm4860_vm2, %v1452_v5, 0.0  ;;  %vm14081_vm5 = vnez %v13962_v34  ;;  %vm12717_vm15 = vcmp.lt.s32.totalorder %v11504_v3, 64 }
 0x382   : > { %v4913_v0 = vsel %vm4861_vm4, %v1453_v2, 0.0  ;;  %4928 = vst [vmem:[#allocation2 + $0x4e0] sm:$0x7] %v4912_v1  ;;  %vm11529_vm9 = vmand %vm246_vm13, %vm262_vm10  ;;  %vm14083_vm4 = vcmp.ge.s32.totalorder %v11504_v3, 0  ;;  %vm12721_vm10 = vcmp.ge.s32.totalorder %v11518_v54, 0  ;;  %v4973_v1 = vld [vmem:[#allocation2 + $0x68] sm:$0xff] }
 0x383   : > { %4929 = vst [vmem:[#allocation2 + $0x4e8] sm:$0x7] %v4913_v0  ;;  %vm1595_vm2 = vmand %vm14081_vm5, %vm12712_vm0  ;;  %vm12716_vm0 = vcmp.ge.s32.totalorder %v11526_v61, 0 }
 0x384   : > { %vm1596_vm13 = vmand %vm11529_vm9, %vm14083_vm4  ;;  %vm14086_vm4 = vnez %v13825_v43 }
 0x385   : > { %vm14084_vm12 = vmmov %vm14082_vm7  ;;  %vm12718_vm7 = vcmp.lt.s32.totalorder %v11518_v54, 64 }
 0x386   : > { %v1711_v53 = vsel %vm14084_vm12, %v1691_v37, %v11522_v58  ;;  %vm1627_vm14 = vmand %vm1595_vm2, %vm14085_vm8  ;;  %vm14089_vm2 = vcmp.ge.s32.totalorder %v11274_v38, 0  ;;  %v4988_v37 = vld [vmem:[#allocation2 + $0xe0] sm:$0xff] }
 0x387   : > { %vm1628_vm11 = vmand %vm1596_vm13, %vm12717_vm15  ;;  %v1742_v59 = vsel %vm1627_vm14, %v1710_v44, 0.0 }
 0x388   : > { %vm3467_vm1 = vmand %vm14086_vm4, %vm12721_vm10  ;;  %v1743_v33 = vsel %vm1628_vm11, %v1711_v53, 0.0  ;;  %v1774_v46 = vrot.slane %v1742_v59, 1  ;;  %vm14088_vm11 = vcmask 15360  }
 0x389   : > { %vm3468_vm8 = vmand %vm14081_vm5, %vm12716_vm0  ;;  %v1775_v60 = vrot.slane %v1743_v33, 1  ;;  %v458_v2 = vsel %vm14088_vm11, %v11076_v22, %v11559_v13  ;;  %vm263_vm0 = vcmp.lt.s32.totalorder %v231_v56, 64  ;;  %v4972_v33 = vld [vmem:[#allocation2 + $0x60] sm:$0xff] }
 0x38a   : > { %vm3499_vm14 = vmand %vm3467_vm1, %vm12718_vm7  ;;  %1806 = vst [vmem:[#allocation2 + $0x168] ss:$-124 sps:$4 sm:$0x83] %v1774_v46   ;;  %vm14090_vm1 = vcmp.lt.s32.totalorder %v11274_v38, 64  ;;  %vm12719_vm7 = vcmp.ge.s32.totalorder %v11589_v9, 0  ;;  %v6481_v46 = vpack.c.bf16 %v4988_v37, %v4972_v33  ;;  %v5205_v33 = vpop.f32.mrb[0].mxu0 }
 0x38b   : > { %vm3500_vm12 = vmand %vm3468_vm8, %vm12715_vm3  ;;  %1807 = vst [vmem:[#allocation2 + $0x170] ss:$-124 sps:$4 sm:$0x83] %v1775_v60   ;;  %v3551_v5 = vsel %vm3499_vm14, %v1710_v44, 0.0  ;;  %vm14091_vm14 = vcmp.ge.s32.totalorder %v10953_v16, 0  ;;  %vm247_vm3 = vcmp.ge.s32.totalorder %v231_v56, 0  ;;  %v11622_v60 = vpop.permute.xlu1 %1921 }
 0x38c   : > { %v3552_v49 = vsel %vm3500_vm12, %v1711_v53, 0.0  ;;  %v3583_v27 = vrot.slane %v3551_v5, 3  ;;  %vm326_vm13 = vmand %vm11529_vm9, %vm14089_vm2  ;;  %vm14092_vm12 = vcmp.lt.s32.totalorder %v10953_v16, 64  ;;  %14098 = vst [vmem:[#allocation11_spill] sm:$0xff] %v11622_v60  ;;  %v1920_v5 = vpop.permute.xlu0 %1919  ;;  %v12161_v53 = vld [vmem:[%s12402_s1] sm:$0xff] }
 0x38d   : > { %v3584_v4 = vrot.slane %v3552_v49, 3  ;;  %vm358_vm8 = vmand %vm326_vm13, %vm14090_vm1  ;;  %vm14093_vm13 = vcmp.ge.s32.totalorder %v11329_v40, 0 }
 0x38e   : > { %3615 = vst [vmem:[#allocation2 + $0x2e0] sm:$0xe0] %v3583_v27  ;;  %vm2650_vm11 = vmand %vm14081_vm5, %vm14091_vm14  ;;  %v490_v22 = vsel %vm358_vm8, %v458_v2, 0.0  ;;  %vm12733_vm8 = vcmp.ge.s32.totalorder %v11580_v14, 0  ;;  %vm14094_vm14 = vcmp.lt.s32.totalorder %v11329_v40, 64 }
 0x38f   : > { %3616 = vst [vmem:[#allocation2 + $0x2e8] sm:$0xe0] %v3584_v4  ;;  %vm2682_vm2 = vmand %vm2650_vm11, %vm14092_vm12  ;;  %vm12722_vm11 = vcmp.lt.s32.totalorder %v11580_v14, 64  ;;  %v11647_v37 = vpop.permute.xlu1 %2130 }
 0x390   : > { %506 = vst [vmem:[#allocation2 + $0x70] sm:$0x7] %v490_v22  ;;  %vm4223_vm1 = vmand %vm14086_vm4, %vm14093_vm13  ;;  %v2734_v55 = vsel %vm2682_vm2, %v458_v2, 0.0  ;;  %vm14097_vm4 = vcmask 539648  }
 0x391   : > { %vm4255_vm15 = vmand %vm4223_vm1, %vm14094_vm14  ;;  %v2766_v16 = vrot.slane %v2734_v55, 2  ;;  %v4989_v0 = vld [vmem:[#allocation2 + $0xe8] sm:$0xff]  ;;  %v1712_v43 = vsel %vm14097_vm4, %v11522_v58, %v11565_v6  ;;  %vm14099_vm1 = vcmask 531456   ;;  %vm14100_vm14 = vcmp.ge.s32.totalorder %v11499_v26, 0 }
 0x392   : > { %v4307_v44 = vsel %vm4255_vm15, %v458_v2, 0.0  ;;  %vm11603_vm12 = vmand %vm247_vm3, %vm263_vm0  ;;  %v6479_v59 = vpack.c.bf16 %v4989_v0, %v4973_v1  ;;  %vm12720_vm3 = vcmp.lt.s32.totalorder %v11589_v9, 64  ;;  %v1937_v56 = vsel %vm14099_vm1, %v11172_v18, %v1918_v19 }
 0x393   : > { %2798 = vst [vmem:[#allocation2 + $0x268] ss:$-124 sps:$4 sm:$0xc1] %v2766_v16   ;;  %v4339_v40 = vrot.slane %v4307_v44, 4  ;;  %vm1597_vm2 = vmand %vm11603_vm12, %vm12733_vm8  ;;  %vm14103_vm1 = vcmp.lt.s32.totalorder %v11518_v54, 64 }
 0x394   : > { %vm1629_vm0 = vmand %vm1597_vm2, %vm12722_vm11  ;;  %6480 = vmatprep.subr.bf16.mxu0 %v6479_v59  ;;  %vm14101_vm2 = vcmp.lt.s32.totalorder %v11499_v26, 64 }
 0x395   : > { %4371 = vst [vmem:[#allocation2 + $0x3e0] sm:$0x70] %v4339_v40  ;;  %vm3469_vm15 = vmand %vm11529_vm9, %vm12719_vm7  ;;  %v1744_v58 = vsel %vm1629_vm0, %v1712_v43, 0.0  ;;  %6482 = vmatpush1.bf16.msra.mxu0 %v6481_v46  ;;  %vm14102_vm7 = vnez %v13930_v47  ;;  %v11649_v47 = vpop.permute.xlu0 %2128  ;;  %v5306_v40 = vpop.f32.mrb[0].mxu1 }
 0x396   : > { %vm3501_vm13 = vmand %vm3469_vm15, %vm12720_vm3  ;;  %v1776_v2 = vrot.slane %v1744_v58, 1  ;;  %vm14104_vm3 = vcmask 15360   ;;  %v5308_v46 = vpop.f32.mrb[1].mxu1 }
 0x397   : > { %v3553_v49 = vsel %vm3501_vm13, %v1712_v43, 0.0  ;;  %vm1838_vm4 = vmand %vm14028_vm6, %vm14100_vm14  ;;  %v459_v22 = vsel %vm14104_vm3, %v11559_v13, %v11593_v17  ;;  %vm14105_vm14 = vcmp.ge.s32.totalorder %v11281_v48, 0  ;;  %v11670_v43 = vpop.permute.xlu1 %2502 }
 0x398   : > { %1808 = vst [vmem:[#allocation2 + $0x178] ss:$-124 sps:$4 sm:$0x83] %v1776_v2   ;;  %v3585_v27 = vrot.slane %v3553_v49, 3  ;;  %vm1854_vm0 = vmand %vm1838_vm4, %vm14101_vm2 }
 0x399   : > { %vm3631_vm15 = vmand %vm14102_vm7, %vm12721_vm10  ;;  %v1969_v4 = vsel %vm1854_vm0, %v1937_v56, 0.0  ;;  %vm14106_vm7 = vcmp.lt.s32.totalorder %v11281_v48, 64  ;;  %vm14107_vm0 = vcmp.ge.s32.totalorder %v11252_v32, 0  ;;  %vm14110_vm10 = vcmp.lt.s32.totalorder %v11337_v12, 64  ;;  %v11672_v59 = vpop.permute.xlu0 %2132 }
 0x39a   : > { %3617 = vst [vmem:[#allocation2 + $0x2f0] sm:$0xe0] %v3585_v27  ;;  %vm3647_vm13 = vmand %vm3631_vm15, %vm14103_vm1  ;;  %v2001_v18 = vrot.slane %v1969_v4, 6  ;;  %vm14108_vm15 = vcmp.lt.s32.totalorder %v11252_v32, 64 }
 0x39b   : > { %v3699_v55 = vsel %vm3647_vm13, %v1937_v56, 0.0  ;;  %vm327_vm4 = vmand %vm11603_vm12, %vm14105_vm14  ;;  %vm14109_vm13 = vcmp.ge.s32.totalorder %v11337_v12, 0  ;;  %v5312_v56 = vpop.f32.mrb[2].mxu1 }
 0x39c   : > { %2033 = vst [vmem:[#allocation2 + $0x168] sm:$0x1c] %v2001_v18  ;;  %3715 = vst [vmem:[#allocation2 + $0x360] sm:$0x7] %v3699_v55  ;;  %v11688_v4 = vpop.f32.mrb[3].mxu1 }
 0x39d   : > { %vm359_vm2 = vmand %vm327_vm4, %vm14106_vm7  ;;  %vm14111_vm4 = vcmp.ge.s32.totalorder %v11504_v3, 0  ;;  %vm14112_vm7 = vnez %v14020_v11  ;;  %v11699_v8 = vpop.f32.mrb[4].mxu1 }
 0x39e   : > { %vm2651_vm3 = vmand %vm11529_vm9, %vm14107_vm0  ;;  %v491_v13 = vsel %vm359_vm2, %v459_v22, 0.0  ;;  %vm14113_vm0 = vcmask 531456  }
 0x39f   : > { %vm2683_vm1 = vmand %vm2651_vm3, %vm14108_vm15  ;;  %507 = vst [vmem:[#allocation2 + $0x78] sm:$0x7] %v491_v13  ;;  %v1938_v44 = vsel %vm14113_vm0, %v1918_v19, %v1920_v5  ;;  %vm14116_vm3 = vcmp.lt.s32.totalorder %v11504_v3, 64  ;;  %v5207_v19 = vpop.f32.mrb[1].mxu0  ;;  %v11705_v13 = vpop.f32.mrb[5].mxu1 }
 0x3a0   : > { %vm4224_vm14 = vmand %vm14081_vm5, %vm14109_vm13  ;;  %v2735_v16 = vsel %vm2683_vm1, %v459_v22, 0.0  ;;  %vm14114_vm5 = vnez %v14023_v23  ;;  %vm14117_vm1 = vcmp.lt.s32.totalorder %v11580_v14, 64  ;;  %v5211_v2 = vpop.f32.mrb[2].mxu0 }
 0x3a1   : > { %vm4256_vm11 = vmand %vm4224_vm14, %vm14110_vm10  ;;  %v2767_v1 = vrot.slane %v2735_v16, 2  ;;  %vm14118_vm14 = vcmp.ge.s32.totalorder %v11526_v61, 0  ;;  %v5213_v27 = vpop.f32.mrb[3].mxu0 }
 0x3a2   : > { %v4308_v0 = vsel %vm4256_vm11, %v459_v22, 0.0  ;;  %vm1839_vm2 = vmand %vm14112_vm7, %vm14111_vm4  ;;  %v11697_v22 = vpop.f32.mrb[4].mxu0 }
 0x3a3   : > { %2799 = vst [vmem:[#allocation2 + $0x270] ss:$-124 sps:$4 sm:$0xc1] %v2767_v1   ;;  %v4340_v34 = vrot.slane %v4308_v0, 4  ;;  %vm1840_vm10 = vmand %vm14114_vm5, %vm12733_vm8  ;;  %v11703_v55 = vpop.f32.mrb[5].mxu0  ;;  %v5324_v0 = vpop.f32.mrb[6].mxu1 }
 0x3a4   : > { %vm14115_vm11 = vmmov %vm14113_vm0  ;;  %v5223_v1 = vpop.f32.mrb[6].mxu0  ;;  %v5326_v50 = vpop.f32.mrb[7].mxu1 }
 0x3a5   : > { %v1939_v12 = vsel %vm14115_vm11, %v1920_v5, %v11622_v60  ;;  %vm1855_vm15 = vmand %vm1839_vm2, %vm14116_vm3  ;;  %4372 = vst [vmem:[#allocation2 + $0x3e8] sm:$0x70] %v4340_v34  ;;  %vm14119_vm2 = vcmp.ge.s32.totalorder %v11589_v9, 0  ;;  %vm813_vm11 = vcmp.lt.s32.totalorder %v11240_v21, 64  ;;  %v5225_v60 = vpop.f32.mrb[7].mxu0 }
 0x3a6   : > { %vm1856_vm13 = vmand %vm1840_vm10, %vm14117_vm1  ;;  %v1970_v58 = vsel %vm1855_vm15, %v1938_v44, 0.0  ;;  %vm797_vm10 = vcmp.ge.s32.totalorder %v11240_v21, 0  ;;  %vm14121_vm15 = vcmp.lt.s32.totalorder %v11589_v9, 64 }
 0x3a7   : > { %vm3632_vm4 = vmand %vm14028_vm6, %vm14118_vm14  ;;  %v1971_v5 = vsel %vm1856_vm13, %v1939_v12, 0.0  ;;  %v2002_v49 = vrot.slane %v1970_v58, 6  ;;  %vm14120_vm6 = vcmp.lt.s32.totalorder %v11526_v61, 64  ;;  %vm14124_vm14 = vcmp.ge.s32.totalorder %v11274_v38, 0 }
 0x3a8   : > { %vm3633_vm0 = vmand %vm14112_vm7, %vm14119_vm2  ;;  %v2003_v18 = vrot.slane %v1971_v5, 6  ;;  %v5947_v5 = vmax.f32 %v5223_v1, 0.0  ;;  %vm14125_vm2 = vcmask 523264   ;;  %v5330_v1 = vpop.f32.mrb[8].mxu1 }
 0x3a9   : > { %vm3648_vm3 = vmand %vm3632_vm4, %vm14120_vm6  ;;  %2034 = vst [vmem:[#allocation2 + $0x170] sm:$0x1c] %v2002_v49  ;;  %v5949_v49 = vmax.f32 %v5324_v0, 0.0  ;;  %v5965_v6 = vmax.f32 %v5330_v1, 0.0  ;;  %v5332_v23 = vpop.f32.mrb[9].mxu1  ;;  %vm14128_vm6 = vcmp.ge.s32.totalorder %v11499_v26, 0 }
 0x3aa   : > { %vm3649_vm1 = vmand %vm3633_vm0, %vm14121_vm15  ;;  %2035 = vst [vmem:[#allocation2 + $0x178] sm:$0x1c] %v2003_v18  ;;  %v3700_v16 = vsel %vm3648_vm3, %v1938_v44, 0.0  ;;  %v11726_v44 = vsel %vm14125_vm2, %v11146_v51, %v11649_v47  ;;  %v5950_v18 = vmax.f32 %v5326_v50, 0.0  ;;  %v5995_v0 = vadd.f32 %v5947_v5, %v5205_v33  ;;  %v5336_v10 = vpop.f32.mrb[10].mxu1 }
 0x3ab   : > { %v3701_v34 = vsel %vm3649_vm1, %v1939_v12, 0.0  ;;  %3716 = vst [vmem:[#allocation2 + $0x368] sm:$0x7] %v3700_v16  ;;  %vm11715_vm13 = vmand %vm797_vm10, %vm813_vm11  ;;  %v5948_v12 = vmax.f32 %v5225_v60, 0.0  ;;  %v5229_v16 = vpop.f32.mrb[8].mxu0  ;;  %vm14127_vm10 = vcmp.lt.s32.totalorder %v11274_v38, 64  ;;  %vm14129_vm3 = vnez %v13957_v7 }
 0x3ac   : > { %3717 = vst [vmem:[#allocation2 + $0x370] sm:$0x7] %v3701_v34  ;;  %vm845_vm4 = vmand %vm11715_vm13, %vm14124_vm14  ;;  %v5997_v34 = vadd.f32 %v5949_v49, %v5306_v40  ;;  %v5963_v45 = vmax.f32 %v5229_v16, 0.0  ;;  %v5231_v11 = vpop.f32.mrb[9].mxu0  ;;  %v5998_v50 = vadd.f32 %v5950_v18, %v5308_v46  ;;  %vm14130_vm1 = vcmp.ge.s32.totalorder %v11504_v3, 0  ;;  %v5338_v49 = vpop.f32.mrb[11].mxu1 }
 0x3ad   : > { %vm14126_vm0 = vmmov %vm14125_vm2  ;;  %v5996_v60 = vadd.f32 %v5948_v12, %v5207_v19  ;;  %v5235_v42 = vpop.f32.mrb[10].mxu0  ;;  %v6043_v33 = vmax.f32 %v5995_v0, 0.0  ;;  %v6013_v12 = vadd.f32 %v5965_v6, %v5312_v56  ;;  %v11752_v1 = vpop.f32.mrb[12].mxu1  ;;  %v5966_v56 = vmax.f32 %v5332_v23, 0.0 }
 0x3ae   : > { %v11731_v21 = vsel %vm14126_vm0, %v11649_v47, %v11647_v37  ;;  %vm861_vm11 = vmand %vm845_vm4, %vm14127_vm10  ;;  %v5964_v47 = vmax.f32 %v5231_v11, 0.0  ;;  %v6045_v40 = vmax.f32 %v5997_v34, 0.0  ;;  %v5237_v5 = vpop.f32.mrb[11].mxu0  ;;  %vm14131_vm4 = vcmp.lt.s32.totalorder %v11499_v26, 64  ;;  %v11770_v34 = vpop.f32.mrb[13].mxu1 }
 0x3af   : > { %v917_v51 = vsel %vm861_vm11, %v8974_v28, 0.0  ;;  %vm2049_vm15 = vmand %vm14129_vm3, %vm14128_vm6  ;;  %v6011_v28 = vadd.f32 %v5963_v45, %v5211_v2  ;;  %v6044_v11 = vmax.f32 %v5996_v60, 0.0  ;;  %v6046_v46 = vmax.f32 %v5998_v50, 0.0  ;;  %v11750_v16 = vpop.f32.mrb[12].mxu0  ;;  %6091 = vst [vmem:[%s11764_s15] sm:$0xff] %v6043_v33 }
 0x3b0   : > { %v949_v38 = vrot.slane %v917_v51, 2  ;;  %vm2050_vm14 = vmand %vm11715_vm13, %vm14130_vm1  ;;  %v6012_v18 = vadd.f32 %v5964_v47, %v5213_v27  ;;  %vm14134_vm0 = vcmp.lt.s32.totalorder %v11504_v3, 64  ;;  %6093 = vst [vmem:[%s11764_s15 + $0x10] sm:$0xff] %v6045_v40  ;;  %v5979_v27 = vmax.f32 %v5235_v42, 0.0  ;;  %v11768_v0 = vpop.f32.mrb[13].mxu0  ;;  %v11783_v47 = vpop.f32.mrb[14].mxu1 }
 0x3b1   : > { %vm11746_vm2 = vmand %vm2049_vm15, %vm14131_vm4  ;;  %v6059_v6 = vmax.f32 %v6011_v28, 0.0  ;;  %vm14137_vm11 = vcmp.ge.s32.totalorder %v11252_v32, 0  ;;  %6092 = vst [vmem:[%s11764_s15 + $0x8] sm:$0xff] %v6044_v11  ;;  %v6061_v50 = vmax.f32 %v6013_v12, 0.0  ;;  %v11781_v42 = vpop.f32.mrb[14].mxu0  ;;  %vm14138_vm15 = vcmp.lt.s32.totalorder %v11252_v32, 64 }
 0x3b2   : > { %981 = vst [vmem:[#allocation2 + $0xf0] ss:$-124 sps:$4 sm:$0xc1] %v949_v38   ;;  %vm11756_vm10 = vmand %vm2050_vm14, %vm14134_vm0  ;;  %v2180_v2 = vsel %vm11746_vm2, %v11726_v44, 0.0  ;;  %v6060_v23 = vmax.f32 %v6012_v18, 0.0  ;;  %v6014_v40 = vadd.f32 %v5966_v56, %v11688_v4  ;;  %v6027_v28 = vadd.f32 %v5979_v27, %v11697_v22  ;;  %v11794_v11 = vpop.f32.mrb[15].mxu0 }
 0x3b3   : > { %vm2979_vm6 = vmand %vm11715_vm13, %vm14137_vm11  ;;  %v2181_v51 = vsel %vm11756_vm10, %v11731_v21, 0.0  ;;  %v2212_v60 = vrot.slane %v2180_v2, 3  ;;  %6094 = vst [vmem:[%s11764_s15 + $0x18] sm:$0xff] %v6046_v46  ;;  %v5981_v19 = vmax.f32 %v5336_v10, 0.0  ;;  %v11796_v46 = vpop.f32.mrb[15].mxu1  ;;  %vm14141_vm14 = vcmp.ge.s32.totalorder %v11518_v54, 0 }
 0x3b4   : > { %vm11787_vm1 = vmand %vm2979_vm6, %vm14138_vm15  ;;  %v2213_v33 = vrot.slane %v2181_v51, 3  ;;  %6107 = vst [vmem:[%s11764_s15 + $0x80] sm:$0xff] %v6059_v6  ;;  %vm14142_vm4 = vnez %v13979_v57  ;;  %vm798_vm0 = vcmp.ge.s32.totalorder %v11246_v41, 0  ;;  %v5980_v10 = vmax.f32 %v5237_v5, 0.0  ;;  %v11812_v22 = vpop.f32.mrb[16].mxu0  ;;  %v11814_v45 = vpop.f32.mrb[16].mxu1 }
 0x3b5   : > { %v3044_v12 = vsel %vm11787_vm1, %v11389_v31, 0.0  ;;  %vm11805_vm2 = vmand %vm14142_vm4, %vm14141_vm14  ;;  %2244 = vst [vmem:[#allocation2 + $0x168] sm:$0xe0] %v2212_v60  ;;  %v5982_v4 = vmax.f32 %v5338_v49, 0.0  ;;  %vm14145_vm10 = vcmp.ge.s32.totalorder %v11526_v61, 0  ;;  %v6062_v6 = vmax.f32 %v6014_v40, 0.0 }
 0x3b6   : > { %6109 = vst [vmem:[%s11764_s15 + $0x90] sm:$0xff] %v6061_v50  ;;  %6108 = vst [vmem:[%s11764_s15 + $0x88] sm:$0xff] %v6060_v23  ;;  %v3076_v2 = vrot.slane %v3044_v12, 4  ;;  %v6075_v56 = vmax.f32 %v6027_v28, 0.0  ;;  %v6029_v5 = vadd.f32 %v5981_v19, %v11699_v8  ;;  %v11825_v49 = vpop.f32.mrb[17].mxu0  ;;  %v11827_v27 = vpop.f32.mrb[17].mxu1  ;;  %v6028_v8 = vadd.f32 %v5980_v10, %v11703_v55 }
 0x3b7   : > { %vm11820_vm11 = vmand %vm14129_vm3, %vm14145_vm10  ;;  %2245 = vst [vmem:[#allocation2 + $0x170] sm:$0xe0] %v2213_v33  ;;  %vm14148_vm6 = vcmp.lt.s32.totalorder %v11518_v54, 64  ;;  %vm14151_vm3 = vcmask 506880   ;;  %vm814_vm1 = vcmp.lt.s32.totalorder %v11246_v41, 64  ;;  %v6030_v60 = vadd.f32 %v5982_v4, %v11705_v13  ;;  %v5425_v50 = vpop.f32.mrb[18].mxu0 }
 0x3b8   : > { %vm11833_vm15 = vmand %vm11805_vm2, %vm14148_vm6  ;;  %v2522_v51 = vsel %vm14151_vm3, %v11190_v15, %v11670_v43  ;;  %v5526_v23 = vpop.f32.mrb[18].mxu1  ;;  %3108 = vst [vmem:[#allocation2 + $0x270] sm:$0x70] %v3076_v2  ;;  %vm14152_vm14 = vcmp.lt.s32.totalorder %v11526_v61, 64  ;;  %v6077_v15 = vmax.f32 %v6029_v5, 0.0  ;;  %v5951_v33 = vmax.f32 %v5425_v50, 0.0 }
 0x3b9   : > { %vm3748_vm4 = vmand %vm11820_vm11, %vm14152_vm14  ;;  %v3799_v38 = vsel %vm11833_vm15, %v11726_v44, 0.0  ;;  %6110 = vst [vmem:[%s11764_s15 + $0x98] sm:$0xff] %v6062_v6  ;;  %v5953_v55 = vmax.f32 %v5526_v23, 0.0  ;;  %v5427_v40 = vpop.f32.mrb[19].mxu0  ;;  %v5528_v13 = vpop.f32.mrb[19].mxu1  ;;  %vm14153_vm2 = vcmp.ge.s32.totalorder %v11499_v26, 0  ;;  %vm14154_vm10 = vnez %v14001_v25 }
 0x3ba   : > { %6123 = vst [vmem:[%s11764_s15 + $0x100] sm:$0xff] %v6075_v56  ;;  %v3800_v28 = vsel %vm3748_vm4, %v11731_v21, 0.0  ;;  %v3831_v19 = vrot.slane %v3799_v38, 5  ;;  %vm2423_vm11 = vmand %vm14154_vm10, %vm14153_vm2  ;;  %v6076_v12 = vmax.f32 %v6028_v8, 0.0  ;;  %v6078_v44 = vmax.f32 %v6030_v60, 0.0  ;;  %v5431_v57 = vpop.f32.mrb[20].mxu0 }
 0x3bb   : > { %v3832_v18 = vrot.slane %v3800_v28, 5  ;;  %vm14155_vm6 = vcmp.lt.s32.totalorder %v11499_v26, 64  ;;  %vm14158_vm3 = vcmask 523264   ;;  %6125 = vst [vmem:[%s11764_s15 + $0x110] sm:$0xff] %v6077_v15  ;;  %v5999_v4 = vadd.f32 %v5951_v33, %v11750_v16  ;;  %v5532_v6 = vpop.f32.mrb[20].mxu1  ;;  %v5433_v8 = vpop.f32.mrb[21].mxu0 }
 0x3bc   : > { %vm11859_vm15 = vmand %vm2423_vm11, %vm14155_vm6  ;;  %v11866_v21 = vsel %vm14158_vm3, %v11647_v37, %v11672_v59  ;;  %v6001_v2 = vadd.f32 %v5953_v55, %v11752_v1  ;;  %3863 = vst [vmem:[#allocation2 + $0x360] sm:$0x38] %v3831_v19  ;;  %vm14159_vm14 = vcmp.ge.s32.totalorder %v11518_v54, 0  ;;  %vm14160_vm4 = vnez %v13942_v35  ;;  %v5534_v16 = vpop.f32.mrb[21].mxu1  ;;  %v5437_v23 = vpop.f32.mrb[22].mxu0 }
 0x3bd   : > { %vm4043_vm2 = vmand %vm14160_vm4, %vm14159_vm14  ;;  %v2554_v56 = vsel %vm11859_vm15, %v2522_v51, 0.0  ;;  %6124 = vst [vmem:[%s11764_s15 + $0x108] sm:$0xff] %v6076_v12  ;;  %v5952_v37 = vmax.f32 %v5427_v40, 0.0  ;;  %v5954_v5 = vmax.f32 %v5528_v13, 0.0  ;;  %v5967_v7 = vmax.f32 %v5431_v57, 0.0  ;;  %v5538_v13 = vpop.f32.mrb[22].mxu1  ;;  %v2505_v57 = vpop.permute.xlu0 %2504 }
 0x3be   : > { %6126 = vst [vmem:[%s11764_s15 + $0x118] sm:$0xff] %v6078_v44  ;;  %3864 = vst [vmem:[#allocation2 + $0x368] sm:$0x38] %v3832_v18  ;;  %vm14161_vm11 = vcmp.lt.s32.totalorder %v11518_v54, 64  ;;  %v2586_v1 = vrot.slane %v2554_v56, 5  ;;  %v6047_v60 = vmax.f32 %v5999_v4, 0.0 }
 0x3bf   : > { %vm4059_vm6 = vmand %vm4043_vm2, %vm14161_vm11  ;;  %v6049_v35 = vmax.f32 %v6001_v2, 0.0  ;;  %v5969_v50 = vmax.f32 %v5532_v6, 0.0  ;;  %v6000_v33 = vadd.f32 %v5952_v37, %v11768_v0  ;;  %v6002_v55 = vadd.f32 %v5954_v5, %v11770_v34  ;;  %v5439_v28 = vpop.f32.mrb[23].mxu0  ;;  %v5540_v34 = vpop.f32.mrb[23].mxu1  ;;  %v5038_v15 = vld [vmem:[#allocation2 + $0x270] sm:$0xff] }
 0x3c0   : > { %v4111_v38 = vsel %vm4059_vm6, %v2522_v51, 0.0  ;;  %vm11885_vm15 = vmand %vm798_vm0, %vm814_vm1  ;;  %v6015_v40 = vadd.f32 %v5967_v7, %v11781_v42  ;;  %2618 = vst [vmem:[#allocation2 + $0x1e8] sm:$0x38] %v2586_v1  ;;  %vm14164_vm3 = vcmp.ge.s32.totalorder %v11281_v48, 0  ;;  %v5968_v51 = vmax.f32 %v5433_v8, 0.0  ;;  %v11925_v37 = vpop.permute.xlu1 %2506 }
 0x3c1   : > { %v4143_v19 = vrot.slane %v4111_v38, 7  ;;  %vm846_vm14 = vmand %vm11885_vm15, %vm14164_vm3  ;;  %6095 = vst [vmem:[%s11764_s15 + $0x20] sm:$0xff] %v6047_v60  ;;  %v6017_v41 = vadd.f32 %v5969_v50, %v11783_v47  ;;  %v5970_v0 = vmax.f32 %v5534_v16, 0.0  ;;  %vm14165_vm0 = vcmp.lt.s32.totalorder %v11281_v48, 64 }
 0x3c2   : > { %6097 = vst [vmem:[%s11764_s15 + $0x30] sm:$0xff] %v6049_v35  ;;  %vm862_vm1 = vmand %vm846_vm14, %vm14165_vm0  ;;  %v6048_v42 = vmax.f32 %v6000_v33, 0.0  ;;  %v6050_v12 = vmax.f32 %v6002_v55, 0.0  ;;  %v6063_v44 = vmax.f32 %v6015_v40, 0.0  ;;  %v5983_v18 = vmax.f32 %v5437_v23, 0.0 }
 0x3c3   : > { %4175 = vst [vmem:[#allocation2 + $0x3e0] sm:$0xe] %v4143_v19  ;;  %v918_v10 = vsel %vm862_vm1, %v11389_v31, 0.0  ;;  %vm2051_vm4 = vmand %vm11885_vm15, %vm12733_vm8  ;;  %v6065_v47 = vmax.f32 %v6017_v41, 0.0  ;;  %v6016_v4 = vadd.f32 %v5968_v51, %v11794_v11  ;;  %vm14166_vm2 = vcmp.lt.s32.totalorder %v11580_v14, 64  ;;  %v4990_v51 = vld [vmem:[#allocation2 + $0xf0] sm:$0xff] }
 0x3c4   : > { %v950_v2 = vrot.slane %v918_v10, 2  ;;  %vm11909_vm11 = vmand %vm2051_vm4, %vm14166_vm2  ;;  %6096 = vst [vmem:[%s11764_s15 + $0x28] sm:$0xff] %v6048_v42  ;;  %v6018_v31 = vadd.f32 %v5970_v0, %v11796_v46  ;;  %v6031_v6 = vadd.f32 %v5983_v18, %v11812_v22  ;;  %v5985_v56 = vmax.f32 %v5538_v13, 0.0  ;;  %v11958_v40 = vpop.permute.xlu1 %2339  ;;  %v4974_v13 = vld [vmem:[#allocation2 + $0x70] sm:$0xff]  ;;  %v11977_v18 = vpop.permute.xlu0 %2717 }
 0x3c5   : > { %6098 = vst [vmem:[%s11764_s15 + $0x38] sm:$0xff] %v6050_v12  ;;  %6111 = vst [vmem:[%s11764_s15 + $0xa0] sm:$0xff] %v6063_v44  ;;  %vm14169_vm6 = vcmp.ge.s32.totalorder %v11589_v9, 0  ;;  %v2182_v11 = vsel %vm11909_vm11, %v11866_v21, 0.0  ;;  %v6064_v5 = vmax.f32 %v6016_v4, 0.0  ;;  %v5984_v7 = vmax.f32 %v5439_v28, 0.0 }
 0x3c6   : > { %vm3733_vm3 = vmand %vm11715_vm13, %vm14169_vm6  ;;  %6113 = vst [vmem:[%s11764_s15 + $0xb0] sm:$0xff] %v6065_v47  ;;  %v5986_v8 = vmax.f32 %v5540_v34, 0.0  ;;  %vm14170_vm14 = vcmp.lt.s32.totalorder %v11589_v9, 64  ;;  %v2214_v46 = vrot.slane %v2182_v11, 3  ;;  %v6066_v22 = vmax.f32 %v6018_v31, 0.0  ;;  %v14190_v4 = vld [vmem:[#allocation15_spill] sm:$0xff] }
 0x3c7   : > { %982 = vst [vmem:[#allocation2 + $0xf8] ss:$-124 sps:$4 sm:$0xc1] %v950_v2   ;;  %vm3749_vm0 = vmand %vm3733_vm3, %vm14170_vm14  ;;  %v6079_v16 = vmax.f32 %v6031_v6, 0.0  ;;  %v6033_v1 = vadd.f32 %v5985_v56, %v11814_v45  ;;  %vm14171_vm1 = vcmp.ge.s32.totalorder %v11504_v3, 0  ;;  %vm14172_vm4 = vnez %v14059_v20  ;;  %v5020_v56 = vld [vmem:[#allocation2 + $0x1e0] sm:$0xff] }
 0x3c8   : > { %v3801_v60 = vsel %vm3749_vm0, %v11866_v21, 0.0  ;;  %vm2424_vm2 = vmand %vm14172_vm4, %vm14171_vm1  ;;  %vm14173_vm11 = vcmask 506880   ;;  %6112 = vst [vmem:[%s11764_s15 + $0xa8] sm:$0xff] %v6064_v5  ;;  %v6032_v50 = vadd.f32 %v5984_v7, %v11825_v49  ;;  %v6034_v23 = vadd.f32 %v5986_v8, %v11827_v27  ;;  %v12014_v48 = vpop.permute.xlu1 %2343  ;;  %v2342_v6 = vpop.permute.xlu0 %2341  ;;  %v5037_v11 = vld [vmem:[#allocation2 + $0x268] sm:$0xff] }
 0x3c9   : > { %v2523_v35 = vsel %vm14173_vm11, %v11670_v43, %v2505_v57  ;;  %2246 = vst [vmem:[#allocation2 + $0x178] sm:$0xe0] %v2214_v46  ;;  %v3833_v38 = vrot.slane %v3801_v60, 5  ;;  %vm14174_vm6 = vnez %v14061_v62  ;;  %vm14175_vm14 = vmmov %vm14173_vm11  ;;  %v6081_v43 = vmax.f32 %v6033_v1, 0.0  ;;  %v5005_v7 = vld [vmem:[#allocation2 + $0x168] sm:$0xff] }
 0x3ca   : > { %vm2425_vm3 = vmand %vm14174_vm6, %vm12733_vm8  ;;  %v2524_v45 = vsel %vm14175_vm14, %v2505_v57, %v11925_v37  ;;  %6114 = vst [vmem:[%s11764_s15 + $0xb8] sm:$0xff] %v6066_v22  ;;  %vm14176_vm0 = vcmp.lt.s32.totalorder %v11504_v3, 64  ;;  %v6080_v49 = vmax.f32 %v6032_v50, 0.0  ;;  %v6082_v27 = vmax.f32 %v6034_v23, 0.0  ;;  %v5004_v57 = vld [vmem:[#allocation2 + $0x160] sm:$0xff]  ;;  %v5053_v1 = vld [vmem:[#allocation2 + $0x2e8] sm:$0xff] }
 0x3cb   : > { %6127 = vst [vmem:[%s11764_s15 + $0x120] sm:$0xff] %v6079_v16  ;;  %vm2440_vm1 = vmand %vm2424_vm2, %vm14176_vm0  ;;  %vm14177_vm11 = vcmp.lt.s32.totalorder %v11580_v14, 64  ;;  %vm14178_vm8 = vcmp.ge.s32.totalorder %v11526_v61, 0  ;;  %vm14179_vm2 = vcmp.ge.s32.totalorder %v11589_v9, 0  ;;  %v6501_v42 = vpack.c.bf16 %v4990_v51, %v4974_v13  ;;  %v5052_v23 = vld [vmem:[#allocation2 + $0x2e0] sm:$0xff]  ;;  %v5006_v51 = vld [vmem:[#allocation2 + $0x170] sm:$0xff] }
 0x3cc   : > { %3865 = vst [vmem:[#allocation2 + $0x370] sm:$0x38] %v3833_v38  ;;  %vm2441_vm7 = vmand %vm2425_vm3, %vm14177_vm11  ;;  %v2555_v21 = vsel %vm2440_vm1, %v2523_v35, 0.0  ;;  %vm14180_vm3 = vcmp.lt.s32.totalorder %v11526_v61, 64  ;;  %vm14183_vm11 = vcmp.ge.s32.totalorder %v11499_v26, 0  ;;  %v11983_v47 = vadd.s32 2, %v11252_v32  ;;  %v12039_v38 = vpop.permute.xlu1 %3175 }
 0x3cd   : > { %6129 = vst [vmem:[%s11764_s15 + $0x130] sm:$0xff] %v6081_v43  ;;  %vm4044_vm14 = vmand %vm14154_vm10, %vm14178_vm8  ;;  %v2556_v33 = vsel %vm2441_vm7, %v2524_v45, 0.0  ;;  %v2587_v55 = vrot.slane %v2555_v21, 5  ;;  %vm14181_vm8 = vcmp.lt.s32.totalorder %v11589_v9, 64  ;;  %vm14182_vm10 = vcmask 515072   ;;  %v5036_v43 = vld [vmem:[#allocation2 + $0x260] sm:$0xff] }
 0x3ce   : > { %6128 = vst [vmem:[%s11764_s15 + $0x128] sm:$0xff] %v6080_v49  ;;  %6130 = vst [vmem:[%s11764_s15 + $0x138] sm:$0xff] %v6082_v27  ;;  %v2588_v28 = vrot.slane %v2556_v33, 5  ;;  %v4975_v19 = vld [vmem:[#allocation2 + $0x78] sm:$0xff]  ;;  %v2359_v34 = vsel %vm14182_vm10, %v11111_v39, %v11958_v40  ;;  %v6485_v16 = vpack.c.bf16 %v5020_v56, %v5004_v57  ;;  %v6487_v50 = vpack.c.bf16 %v5053_v1, %v5037_v11  ;;  %v12047_v27 = vpop.permute.xlu0 %2881 }
 0x3cf   : > { %vm4045_vm0 = vmand %vm14172_vm4, %vm14179_vm2  ;;  %v4991_v41 = vld [vmem:[#allocation2 + $0xf8] sm:$0xff]  ;;  %2619 = vst [vmem:[#allocation2 + $0x1f0] sm:$0x38] %v2587_v55  ;;  %vm14184_vm2 = vnez %v14010_v30  ;;  %vm14188_vm4 = vcmp.lt.s32.totalorder %v11518_v54, 64 }
 0x3d0   : > { %vm4060_vm1 = vmand %vm4044_vm14, %vm14180_vm3  ;;  %v6499_v25 = vpack.c.bf16 %v4991_v41, %v4975_v19  ;;  %2620 = vst [vmem:[#allocation2 + $0x1f8] sm:$0x38] %v2588_v28  ;;  %v14208_v41 = vld [vmem:[#allocation17_spill] sm:$0xff] }
 0x3d1   : > { %vm4061_vm7 = vmand %vm4045_vm0, %vm14181_vm8  ;;  %v4112_v0 = vsel %vm4060_vm1, %v2523_v35, 0.0  ;;  %vm14185_vm0 = vcmp.lt.s32.totalorder %v11499_v26, 64  ;;  %vm2636_vm1 = vcmp.ge.s32.totalorder %v11256_v36, 0  ;;  %vm14186_vm8 = vcmp.ge.s32.totalorder %v11518_v54, 0 }
 0x3d2   : > { %v4113_v12 = vsel %vm4061_vm7, %v2524_v45, 0.0  ;;  %v4144_v44 = vrot.slane %v4112_v0, 7  ;;  %vm2260_vm14 = vmand %vm14184_vm2, %vm14183_vm11  ;;  %6500 = vmatprep.subr.bf16.mxu1 %v6499_v25  ;;  %vm14187_vm7 = vnez %v13921_v24  ;;  %vm12737_vm11 = vcmp.lt.s32.totalorder %v11256_v36, 64  ;;  %v12073_v28 = vpop.permute.xlu0 %3339 }
 0x3d3   : > { %v4145_v10 = vrot.slane %v4113_v12, 7  ;;  %vm2276_vm3 = vmand %vm2260_vm14, %vm14185_vm0  ;;  %6502 = vmatpush1.bf16.msra.mxu1 %v6501_v42  ;;  %vm14189_vm14 = vcmask 15360   ;;  %v12214_v42 = vld [vmem:[%s12402_s1 + $0x10] sm:$0xff] }
 0x3d4   : > { %4176 = vst [vmem:[#allocation2 + $0x3e8] sm:$0xe] %v4144_v44  ;;  %vm3879_vm10 = vmand %vm14187_vm7, %vm14186_vm8  ;;  %v2391_v39 = vsel %vm2276_vm3, %v2359_v34, 0.0  ;;  %v2719_v32 = vsel %vm14189_vm14, %v11593_v17, %v11977_v18  ;;  %vm12736_vm8 = vcmp.ge.s32.totalorder %v11983_v47, 0  ;;  %vm12735_vm7 = vcmp.lt.s32.totalorder %v11983_v47, 64 }
 0x3d5   : > { %4177 = vst [vmem:[#allocation2 + $0x3f0] sm:$0xe] %v4145_v10  ;;  %vm3895_vm6 = vmand %vm3879_vm10, %vm14188_vm4 }
 0x3d6   : > { %2407 = vst [vmem:[#allocation2 + $0x1e8] sm:$0x7] %v2391_v39  ;;  %v3947_v26 = vsel %vm3895_vm6, %v2359_v34, 0.0  ;;  %vm2652_vm0 = vmand %vm11603_vm12, %vm2636_vm1 }
 0x3d7   : > { %v3979_v24 = vrot.slane %v3947_v26, 2  ;;  %vm2684_vm3 = vmand %vm2652_vm0, %vm12737_vm11 }
 0x3d8   : > { %vm2980_vm4 = vmand %vm11885_vm15, %vm2636_vm1  ;;  %v2736_v54 = vsel %vm2684_vm3, %v2719_v32, 0.0  ;;  %vm14191_vm3 = vcmp.ge.s32.totalorder %v11504_v3, 0 }
 0x3d9   : > { %4011 = vst [vmem:[#allocation2 + $0x3e0] ss:$-124 sps:$4 sm:$0xc1] %v3979_v24   ;;  %vm2996_vm6 = vmand %vm2980_vm4, %vm12737_vm11  ;;  %v2768_v17 = vrot.slane %v2736_v54, 2  ;;  %vm14192_vm4 = vnez %v14035_v52  ;;  %v5007_v52 = vld [vmem:[#allocation2 + $0x178] sm:$0xff] }
 0x3da   : > { %v3045_v2 = vsel %vm2996_vm6, %v14190_v4, 0.0  ;;  %vm4225_vm10 = vmand %vm11529_vm9, %vm12736_vm8 }
 0x3db   : > { %v3077_v31 = vrot.slane %v3045_v2, 4  ;;  %vm4257_vm14 = vmand %vm4225_vm10, %vm12735_vm7  ;;  %2800 = vst [vmem:[#allocation2 + $0x278] ss:$-124 sps:$4 sm:$0xc1] %v2768_v17   ;;  %vm14193_vm10 = vcmask 515072   ;;  %v14215_v17 = vld [vmem:[#allocation7_spill] sm:$0xff] }
 0x3dc   : > { %vm4553_vm0 = vmand %vm11715_vm13, %vm12736_vm8  ;;  %v4309_v5 = vsel %vm4257_vm14, %v2719_v32, 0.0  ;;  %v2360_v58 = vsel %vm14193_vm10, %v11958_v40, %v2342_v6  ;;  %vm14194_vm13 = vcmp.ge.s32.totalorder %v11580_v14, 0  ;;  %vm14195_vm14 = vnez %v14037_v29  ;;  %v3536_v40 = vpop.permute.xlu1 %3535  ;;  %v14213_v32 = vld [vmem:[#allocation18_spill] sm:$0xff]  ;;  %v5117_v2 = vld [vmem:[#allocation2 + $0x4e8] sm:$0xff] }
 0x3dd   : > { %v5021_v63 = vld [vmem:[#allocation2 + $0x1e8] sm:$0xff]  ;;  %3109 = vst [vmem:[#allocation2 + $0x278] sm:$0x70] %v3077_v31  ;;  %vm4569_vm9 = vmand %vm4553_vm0, %vm12735_vm7  ;;  %v4341_v8 = vrot.slane %v4309_v5, 4  ;;  %v3784_v31 = vpop.permute.xlu0 %3783 }
 0x3de   : > { %v6483_v46 = vpack.c.bf16 %v5021_v63, %v5005_v7  ;;  %v4617_v22 = vsel %vm4569_vm9, %v14190_v4, 0.0  ;;  %vm2261_vm6 = vmand %vm14192_vm4, %vm14191_vm3  ;;  %vm14197_vm9 = vcmp.lt.s32.totalorder %v11504_v3, 64  ;;  %v6489_v3 = vpack.c.bf16 %v5052_v23, %v5036_v43  ;;  %v14217_v5 = vld [vmem:[#allocation25_spill] sm:$0xff] }
 0x3df   : > { %v4649_v60 = vrot.slane %v4617_v22, 6  ;;  %4373 = vst [vmem:[#allocation2 + $0x3f0] sm:$0x70] %v4341_v8  ;;  %vm2262_vm0 = vmand %vm14195_vm14, %vm14194_vm13  ;;  %vm14199_vm13 = vcmp.ge.s32.totalorder %v11526_v61, 0 }
 0x3e0   : > { %vm14196_vm7 = vmmov %vm14193_vm10  ;;  %6484 = vmatprep.subr.bf16.mxu0 %v6483_v46  ;;  %vm14198_vm10 = vcmp.lt.s32.totalorder %v11580_v14, 64  ;;  %v14203_v14 = vld [vmem:[#allocation10_spill] sm:$0xff]  ;;  %v3932_v24 = vpop.permute.xlu1 %3931  ;;  %v5084_v56 = vld [vmem:[#allocation2 + $0x3e0] sm:$0xff] }
 0x3e1   : > { %v2361_v35 = vsel %vm14196_vm7, %v2342_v6, %v12014_v48  ;;  %vm2277_vm3 = vmand %vm2261_vm6, %vm14197_vm9  ;;  %6486 = vmatpush1.bf16.msra.mxu0 %v6485_v16  ;;  %4681 = vst [vmem:[#allocation2 + $0x470] sm:$0x1c] %v4649_v60  ;;  %vm14200_vm6 = vcmp.ge.s32.totalorder %v11589_v9, 0  ;;  %v5068_v6 = vld [vmem:[#allocation2 + $0x360] sm:$0xff]  ;;  %v12112_v16 = vadd.s32 2, %v11256_v36  ;;  %v5101_v60 = vld [vmem:[#allocation2 + $0x468] sm:$0xff] }
 0x3e2   : > { %vm2278_vm8 = vmand %vm2262_vm0, %vm14198_vm10  ;;  %v2392_v45 = vsel %vm2277_vm3, %v2360_v58, 0.0  ;;  %6488 = vmatprep.subr.bf16.mxu0 %v6487_v50  ;;  %vm14201_vm0 = vcmp.lt.s32.totalorder %v11526_v61, 64  ;;  %vm14202_vm10 = vcmp.lt.s32.totalorder %v11589_v9, 64  ;;  %v12067_v61 = vadd.s32 1, %v11256_v36 }
 0x3e3   : > { %vm3880_vm7 = vmand %vm14184_vm2, %vm14199_vm13  ;;  %v2393_v49 = vsel %vm2278_vm8, %v2361_v35, 0.0  ;;  %2408 = vst [vmem:[#allocation2 + $0x1f0] sm:$0x7] %v2392_v45  ;;  %vm14204_vm2 = vcmask 1039360   ;;  %vm14205_vm13 = vcmp.lt.s32.totalorder %v11256_v36, 64  ;;  %v6493_v1 = vpack.c.bf16 %v5084_v56, %v5068_v6  ;;  %v5116_v45 = vld [vmem:[#allocation2 + $0x4e0] sm:$0xff] }
 0x3e4   : > { %vm3881_vm9 = vmand %vm14192_vm4, %vm14200_vm6  ;;  %2409 = vst [vmem:[#allocation2 + $0x1f8] sm:$0x7] %v2393_v49  ;;  %v3177_v21 = vsel %vm14204_vm2, %v14203_v14, %v12039_v38  ;;  %vm14206_vm6 = vcmp.ge.s32.totalorder %v11983_v47, 0  ;;  %v4292_v50 = vpop.permute.xlu1 %4291  ;;  %v6495_v23 = vpack.c.bf16 %v5117_v2, %v5101_v60 }
 0x3e5   : > { %vm3896_vm3 = vmand %vm3880_vm7, %vm14201_vm0  ;;  %6490 = vmatpush1.bf16.msra.mxu0 %v6489_v3  ;;  %v5100_v3 = vld [vmem:[#allocation2 + $0x460] sm:$0xff] }
 0x3e6   : > { %vm3897_vm11 = vmand %vm3881_vm9, %vm14202_vm10  ;;  %v3948_v30 = vsel %vm3896_vm3, %v2360_v58, 0.0  ;;  %vm14207_vm9 = vcmp.lt.s32.totalorder %v11983_v47, 64  ;;  %vm14209_vm3 = vcmask 7168  }
 0x3e7   : > { %v3949_v33 = vsel %vm3897_vm11, %v2361_v35, 0.0  ;;  %v3980_v55 = vrot.slane %v3948_v30, 2  ;;  %vm3125_vm8 = vmand %vm14195_vm14, %vm2636_vm1  ;;  %v2883_v25 = vsel %vm14209_vm3, %v14208_v41, %v12047_v27  ;;  %vm14216_vm3 = vcmask 539648   ;;  %v12126_v30 = vpop.f32.mrb[24].mxu0 }
 0x3e8   : > { %v3981_v13 = vrot.slane %v3949_v33, 2  ;;  %vm3141_vm7 = vmand %vm3125_vm8, %vm14205_vm13  ;;  %vm3454_vm8 = vcmp.ge.s32.totalorder %v12067_v61, 0  ;;  %v3537_v4 = vsel %vm14216_vm3, %v14215_v17, %v3536_v40  ;;  %vm14222_vm3 = vnez %v14059_v20  ;;  %v4096_v20 = vpop.permute.xlu0 %4095  ;;  %v12133_v14 = vpop.f32.mrb[25].mxu0 }
 0x3e9   : > { %4012 = vst [vmem:[#allocation2 + $0x3e8] ss:$-124 sps:$4 sm:$0xc1] %v3980_v55   ;;  %vm4697_vm11 = vmand %vm14192_vm4, %vm14206_vm6  ;;  %v3194_v9 = vsel %vm3141_vm7, %v3177_v21, 0.0  ;;  %vm14214_vm7 = vnez %v14213_v32  ;;  %v3684_v40 = vpop.permute.xlu1 %3683 }
 0x3ea   : > { %4013 = vst [vmem:[#allocation2 + $0x3f0] ss:$-124 sps:$4 sm:$0xc1] %v3981_v13   ;;  %vm4713_vm0 = vmand %vm4697_vm11, %vm14207_vm9  ;;  %v3226_v19 = vrot.slane %v3194_v9, 1  ;;  %v5022_v0 = vld [vmem:[#allocation2 + $0x1f0] sm:$0xff]  ;;  %vm3486_vm11 = vcmp.lt.s32.totalorder %v12067_v61, 64 }
 0x3eb   : > { %v4766_v34 = vsel %vm4713_vm0, %v3177_v21, 0.0  ;;  %vm2832_vm4 = vmand %vm14114_vm5, %vm2636_vm1  ;;  %v5023_v12 = vld [vmem:[#allocation2 + $0x1f8] sm:$0xff]  ;;  %v6505_v44 = vpack.c.bf16 %v5022_v0, %v5006_v51  ;;  %v12148_v13 = vpop.f32.mrb[26].mxu0  ;;  %v14229_v0 = vmov 0.0  }
 0x3ec   : > { %3258 = vst [vmem:[#allocation2 + $0x2f8] ss:$-124 sps:$4 sm:$0x83] %v3226_v19   ;;  %v4798_v10 = vrot.slane %v4766_v34, 3  ;;  %vm14211_vm10 = vmmov %vm14205_vm13  ;;  %v6503_v39 = vpack.c.bf16 %v5023_v12, %v5007_v52  ;;  %v12152_v19 = vpop.f32.mrb[27].mxu0  ;;  %v4440_v41 = vpop.permute.xlu0 %4439 }
 0x3ed   : > { %vm2848_vm2 = vmand %vm2832_vm4, %vm14211_vm10  ;;  %v6580_v34 = vld [vmem:[%s6671_s23 + $0x48] sm:$0x77] }
 0x3ee   : > { %vm14212_vm13 = vmmov %vm14206_vm6  ;;  %v2900_v26 = vsel %vm2848_vm2, %v2883_v25, 0.0  ;;  %4830 = vst [vmem:[#allocation2 + $0x470] sm:$0xe0] %v4798_v10  ;;  %6504 = vmatprep.subr.bf16.mxu1 %v6503_v39  ;;  %vm14218_vm2 = vcmask 1031168   ;;  %v12175_v10 = vpop.f32.mrb[28].mxu0 }
 0x3ef   : > { %vm4389_vm6 = vmand %vm14214_vm7, %vm14212_vm13  ;;  %v2932_v54 = vrot.slane %v2900_v26, 7  ;;  %6506 = vmatpush1.bf16.msra.mxu1 %v6505_v44  ;;  %v3341_v7 = vsel %vm14218_vm2, %v14217_v5, %v12073_v28  ;;  %vm14219_vm13 = vnez %v14061_v62  ;;  %vm14224_vm2 = vcmask 515072  }
 0x3f0   : > { %vm4405_vm0 = vmand %vm4389_vm6, %vm14207_vm9  ;;  %v5069_v63 = vld [vmem:[#allocation2 + $0x368] sm:$0xff]  ;;  %vm14220_vm6 = vcmp.lt.s32.totalorder %v11256_v36, 64  ;;  %v3933_v36 = vsel %vm14224_vm2, %v12014_v48, %v3932_v24  ;;  %v6497_v48 = vpack.c.bf16 %v5116_v45, %v5100_v3  ;;  %v5054_v24 = vld [vmem:[#allocation2 + $0x2f0] sm:$0xff] }
 0x3f1   : > { %v4457_v57 = vsel %vm4405_vm0, %v2883_v25, 0.0  ;;  %vm3470_vm4 = vmand %vm11603_vm12, %vm3454_vm8  ;;  %2964 = vst [vmem:[#allocation2 + $0x278] sm:$0xe] %v2932_v54  ;;  %v5085_v8 = vld [vmem:[#allocation2 + $0x3e8] sm:$0xff]  ;;  %vm14221_vm0 = vcmp.ge.s32.totalorder %v11983_v47, 0  ;;  %v12181_v54 = vpop.f32.mrb[29].mxu0  ;;  %v6509_v2 = vpack.c.bf16 %v5054_v24, %v5038_v15 }
 0x3f2   : > { %v4489_v11 = vrot.slane %v4457_v57, 1  ;;  %vm3502_vm10 = vmand %vm3470_vm4, %vm3486_vm11  ;;  %v6491_v22 = vpack.c.bf16 %v5085_v8, %v5069_v63  ;;  %v12190_v57 = vld [vmem:[%s12402_s1 + $0x8] sm:$0xff]  ;;  %v5627_v5 = vpop.f32.mrb[30].mxu0 }
 0x3f3   : > { %v3554_v46 = vsel %vm3502_vm10, %v3537_v4, 0.0  ;;  %vm3290_vm7 = vmand %vm14219_vm13, %vm2636_vm1  ;;  %vm14223_vm1 = vcmp.lt.s32.totalorder %v11983_v47, 64  ;;  %v4897_v4 = vpop.permute.xlu1 %4896  ;;  %v5955_v61 = vmax.f32 %v5627_v5, 0.0 }
 0x3f4   : > { %4521 = vst [vmem:[#allocation2 + $0x470] ss:$-124 sps:$4 sm:$0x83] %v4489_v11   ;;  %v3586_v58 = vrot.slane %v3554_v46, 3  ;;  %vm3306_vm9 = vmand %vm3290_vm7, %vm14220_vm6  ;;  %6492 = vmatprep.subr.bf16.mxu0 %v6491_v22  ;;  %v4749_v11 = vpop.permute.xlu0 %4748 }
 0x3f5   : > { %vm4846_vm4 = vmand %vm14222_vm3, %vm14221_vm0  ;;  %v3358_v35 = vsel %vm3306_vm9, %v3341_v7, 0.0  ;;  %6494 = vmatpush1.bf16.msra.mxu0 %v6493_v1  ;;  %vm14225_vm9 = vcmask 523264   ;;  %vm4210_vm0 = vcmp.ge.s32.totalorder %v12112_v16, 0  ;;  %v6003_v62 = vadd.f32 %v5955_v61, %v12126_v30 }
 0x3f6   : > { %3618 = vst [vmem:[#allocation2 + $0x2f8] sm:$0xe0] %v3586_v58  ;;  %vm4862_vm10 = vmand %vm4846_vm4, %vm14223_vm1  ;;  %v3390_v43 = vrot.slane %v3358_v35, 6  ;;  %6496 = vmatprep.subr.bf16.mxu0 %v6495_v23  ;;  %v3785_v47 = vsel %vm14225_vm9, %v11672_v59, %v3784_v31  ;;  %vm4242_vm4 = vcmp.lt.s32.totalorder %v12112_v16, 64  ;;  %v6583_v23 = vld [vmem:[%s12402_s1 + $0x18] sm:$0xff] }
 0x3f7   : > { %v4914_v49 = vsel %vm4862_vm10, %v3341_v7, 0.0  ;;  %vm3882_vm7 = vmand %vm14195_vm14, %vm3454_vm8  ;;  %vm14226_vm10 = vcmask 15360   ;;  %v5629_v7 = vpop.f32.mrb[31].mxu0 }
 0x3f8   : > { %3422 = vst [vmem:[#allocation2 + $0x2f8] sm:$0x1c] %v3390_v43  ;;  %4930 = vst [vmem:[#allocation2 + $0x4f0] sm:$0x7] %v4914_v49  ;;  %v4293_v59 = vsel %vm14226_vm10, %v11977_v18, %v4292_v50  ;;  %v5039_v12 = vld [vmem:[#allocation2 + $0x278] sm:$0xff]  ;;  %vm14231_vm10 = vcmask 531456  }
 0x3f9   : > { %vm3898_vm6 = vmand %vm3882_vm7, %vm3486_vm11  ;;  %6498 = vmatpush1.bf16.msra.mxu0 %v6497_v48  ;;  %v5956_v8 = vmax.f32 %v5629_v7, 0.0  ;;  %v5633_v1 = vpop.f32.mrb[32].mxu0 }
 0x3fa   : > { %v3950_v21 = vsel %vm3898_vm6, %v3933_v36, 0.0  ;;  %vm3734_vm3 = vmand %vm11885_vm15, %vm3454_vm8  ;;  %v5971_v60 = vmax.f32 %v5633_v1, 0.0  ;;  %v5635_v35 = vpop.f32.mrb[33].mxu0 }
 0x3fb   : > { %v3982_v33 = vrot.slane %v3950_v21, 2  ;;  %vm3750_vm1 = vmand %vm3734_vm3, %vm3486_vm11  ;;  %vm14228_vm3 = vcmask 506880   ;;  %v6004_v58 = vadd.f32 %v5956_v8, %v12133_v14  ;;  %v5972_v45 = vmax.f32 %v5635_v35, 0.0  ;;  %v5639_v49 = vpop.f32.mrb[34].mxu0  ;;  %v5086_v21 = vld [vmem:[#allocation2 + $0x3f0] sm:$0xff] }
 0x3fc   : > { %v3802_v55 = vsel %vm3750_vm1, %v3785_v47, 0.0  ;;  %vm4226_vm2 = vmand %vm11603_vm12, %vm4210_vm0  ;;  %vm14227_vm12 = vcmask 654336   ;;  %v4097_v51 = vsel %vm14228_vm3, %v11925_v37, %v4096_v20  ;;  %v14230_v37 = vld [vmem:[#allocation11_spill] sm:$0xff]  ;;  %v6019_v16 = vadd.f32 %v5971_v60, %v12148_v13  ;;  %v5641_v30 = vpop.f32.mrb[35].mxu0  ;;  %v6584_v47 = vld [vmem:[%s12402_s1 + $0x20] sm:$0xff] }
 0x3fd   : > { %4014 = vst [vmem:[#allocation2 + $0x3f8] ss:$-124 sps:$4 sm:$0xc1] %v3982_v33   ;;  %v3834_v9 = vrot.slane %v3802_v55, 5  ;;  %vm4258_vm7 = vmand %vm4226_vm2, %vm4242_vm4  ;;  %6342 = vmatmul.mubr.msk.f32.vlgmr.msra.gmra.mrb[36].mxu0 %vm14227_vm12, %v12161_v53  ;;  %v3685_v32 = vsel %vm14231_vm10, %v14230_v37, %v3684_v40  ;;  %v6052_v29 = vmax.f32 %v6004_v58, 0.0  ;;  %v6020_v36 = vadd.f32 %v5972_v45, %v12152_v19 }
 0x3fe   : > { %vm4554_vm6 = vmand %vm11885_vm15, %vm4210_vm0  ;;  %v4310_v18 = vsel %vm4258_vm7, %v4293_v59, 0.0  ;;  %5815 = vmatprep.mubr.f32.mxu0 %v14229_v0  ;;  %v6067_v20 = vmax.f32 %v6019_v16, 0.0  ;;  %v5987_v3 = vmax.f32 %v5639_v49, 0.0  ;;  %v5988_v14 = vmax.f32 %v5641_v30, 0.0 }
 0x3ff   : > { %3866 = vst [vmem:[#allocation2 + $0x378] sm:$0x38] %v3834_v9  ;;  %vm4570_vm9 = vmand %vm4554_vm6, %vm4242_vm4  ;;  %v4342_v25 = vrot.slane %v4310_v18, 4  ;;  %v5055_v44 = vld [vmem:[#allocation2 + $0x2f8] sm:$0xff]  ;;  %v6068_v48 = vmax.f32 %v6020_v36, 0.0  ;;  %v5070_v9 = vld [vmem:[#allocation2 + $0x370] sm:$0xff] }
 0x400   : > { %v4618_v52 = vsel %vm4570_vm9, %v6580_v34, 0.0  ;;  %vm4046_vm15 = vmand %vm14219_vm13, %vm3454_vm8  ;;  %v6507_v26 = vpack.c.bf16 %v5055_v44, %v5039_v12  ;;  %vm14234_vm9 = vcmask 1031168   ;;  %6100 = vst [vmem:[%s11764_s15 + $0x48] sm:$0xff] %v6052_v29  ;;  %v6035_v33 = vadd.f32 %v5987_v3, %v12175_v10  ;;  %v5102_v12 = vld [vmem:[#allocation2 + $0x470] sm:$0xff] }
 0x401   : > { %v4650_v39 = vrot.slane %v4618_v52, 6  ;;  %4374 = vst [vmem:[#allocation2 + $0x3f8] sm:$0x70] %v4342_v25  ;;  %vm4062_vm1 = vmand %vm4046_vm15, %vm3486_vm11  ;;  %v6036_v40 = vadd.f32 %v5988_v14, %v12181_v54  ;;  %v6513_v18 = vpack.c.bf16 %v5086_v21, %v5070_v9 }
 0x402   : > { %v4114_v17 = vsel %vm4062_vm1, %v4097_v51, 0.0  ;;  %vm3634_vm2 = vmand %vm14114_vm5, %vm3454_vm8  ;;  %6508 = vmatprep.subr.bf16.mxu1 %v6507_v26  ;;  %vm14236_vm1 = vcmask 1039360   ;;  %6115 = vst [vmem:[%s11764_s15 + $0xc0] sm:$0xff] %v6067_v20  ;;  %v6083_v19 = vmax.f32 %v6035_v33, 0.0  ;;  %v5118_v51 = vld [vmem:[#allocation2 + $0x4f0] sm:$0xff] }
 0x403   : > { %vm14232_vm7 = vmmov %vm14227_vm12  ;;  %4682 = vst [vmem:[#allocation2 + $0x478] sm:$0x1c] %v4650_v39  ;;  %v4146_v31 = vrot.slane %v4114_v17, 7  ;;  %vm14233_vm12 = vcmask 7168   ;;  %6510 = vmatpush1.bf16.msra.mxu1 %v6509_v2  ;;  %v6084_v25 = vmax.f32 %v6036_v40, 0.0  ;;  %v6517_v44 = vpack.c.bf16 %v5118_v51, %v5102_v12 }
 0x404   : > { %6343 = vmatmul.mubr.msk.f32.gmra.mrb[38].mxu0 %vm14232_vm7, %v12190_v57  ;;  %vm3650_vm6 = vmand %vm3634_vm2, %vm3486_vm11  ;;  %v4441_v6 = vsel %vm14233_vm12, %v12047_v27, %v4440_v41  ;;  %v4898_v27 = vsel %vm14234_vm9, %v12073_v28, %v4897_v4  ;;  %v4750_v28 = vsel %vm14236_vm1, %v12039_v38, %v4749_v11  ;;  %v6051_v38 = vmax.f32 %v6003_v62, 0.0  ;;  %6116 = vst [vmem:[%s11764_s15 + $0xc8] sm:$0xff] %v6068_v48  ;;  %v6585_v41 = vld [vmem:[%s12402_s1 + $0x28] sm:$0xff] }
 0x405   : > { %5821 = vmatprep.mubr.f32.mxu0 %v14229_v0  ;;  %v3702_v56 = vsel %vm3650_vm6, %v3685_v32, 0.0  ;;  %vm4390_vm8 = vmand %vm14114_vm5, %vm4210_vm0  ;;  %4178 = vst [vmem:[#allocation2 + $0x3f8] sm:$0xe] %v4146_v31 }
 0x406   : > { %3718 = vst [vmem:[#allocation2 + $0x378] sm:$0x7] %v3702_v56  ;;  %vm4406_vm11 = vmand %vm4390_vm8, %vm4242_vm4 }
 0x407   : > { %v4458_v63 = vsel %vm4406_vm11, %v4441_v6, 0.0  ;;  %vm4847_vm3 = vmand %vm14219_vm13, %vm4210_vm0  ;;  %6099 = vst [vmem:[%s11764_s15 + $0x40] sm:$0xff] %v6051_v38 }
 0x408   : > { %vm14235_vm5 = vmmov %vm14232_vm7  ;;  %v4490_v46 = vrot.slane %v4458_v63, 1  ;;  %6131 = vst [vmem:[%s11764_s15 + $0x140] sm:$0xff] %v6083_v19 }
 0x409   : > { %6344 = vmatmul.mubr.msk.f32.gmra.mrb[40].mxu0 %vm14235_vm5, %v12214_v42  ;;  %vm4863_vm15 = vmand %vm4847_vm3, %vm4242_vm4  ;;  %6132 = vst [vmem:[%s11764_s15 + $0x148] sm:$0xff] %v6084_v25 }
 0x40a   : > { %5827 = vmatprep.mubr.f32.mxu0 %v14229_v0  ;;  %v4915_v22 = vsel %vm4863_vm15, %v4898_v27, 0.0  ;;  %vm4698_vm13 = vmand %vm14195_vm14, %vm4210_vm0  ;;  %4522 = vst [vmem:[#allocation2 + $0x478] ss:$-124 sps:$4 sm:$0x83] %v4490_v46  }
 0x40b   : > { %4931 = vst [vmem:[#allocation2 + $0x4f8] sm:$0x7] %v4915_v22  ;;  %vm4714_vm10 = vmand %vm4698_vm13, %vm4242_vm4 }
 0x40c   : > { %v4767_v50 = vsel %vm4714_vm10, %v4750_v28, 0.0  ;;  %vm14237_vm2 = vmmov %vm14235_vm5 }
 0x40d   : > { %6345 = vmatmul.mubr.msk.f32.gmra.mrb[42].mxu0 %vm14237_vm2, %v6583_v23  ;;  %v4799_v43 = vrot.slane %v4767_v50, 3  ;;  %vm14238_vm14 = vmmov %vm14237_vm2  ;;  %v5071_v59 = vld [vmem:[#allocation2 + $0x378] sm:$0xff] }
 0x40e   : > { %5833 = vmatprep.mubr.f32.mxu0 %v14229_v0  ;;  %vm14239_vm0 = vmmov %vm14237_vm2 }
 0x40f   : > { %4831 = vst [vmem:[#allocation2 + $0x478] sm:$0xe0] %v4799_v43  ;;  %vm14240_vm4 = vmmov %vm14239_vm0 }
 0x410   : > { %vm14241_vm7 = vmmov %vm14239_vm0 }
 0x411   : > { %6346 = vmatmul.mubr.msk.f32.gmra.mrb[44].mxu0 %vm14238_vm14, %v6584_v47  ;;  %v5087_v55 = vld [vmem:[#allocation2 + $0x3f8] sm:$0xff]  ;;  %vm14242_vm6 = vmmov %vm14239_vm0 }
 0x412   : > { %5839 = vmatprep.mubr.f32.mxu0 %v14229_v0  ;;  %v6511_v13 = vpack.c.bf16 %v5087_v55, %v5071_v59  ;;  %v5119_v34 = vld [vmem:[#allocation2 + $0x4f8] sm:$0xff]  ;;  %vm14243_vm12 = vmmov %vm14239_vm0 }
 0x413   : > { %vm14244_vm8 = vmmov %vm14239_vm0 }
 0x414   : > { %6512 = vmatprep.subr.bf16.mxu1 %v6511_v13  ;;  %vm14245_vm11 = vmmov %vm14239_vm0 }
 0x415   : > { %6347 = vmatmul.mubr.msk.f32.gmra.mrb[46].mxu0 %vm14239_vm0, %v6585_v41  ;;  %6514 = vmatpush1.bf16.msra.mxu1 %v6513_v18 }
 0x416   : > { %v5103_v15 = vld [vmem:[#allocation2 + $0x478] sm:$0xff] }
 0x417   : > { %v6515_v52 = vpack.c.bf16 %v5119_v34, %v5103_v15 }
 0x419   : > { %6516 = vmatprep.subr.bf16.mxu1 %v6515_v52 }
 0x41a   : > { %6518 = vmatpush1.bf16.msra.mxu1 %v6517_v44 }
 0x41d   : > { %6348 = vmatmul.mubr.msk.f32.vlgmr.msra.gmra.mrb[36].mxu1 %vm14240_vm4, %v12161_v53 }
 0x41e   : > { %5916 = vmatprep.mubr.f32.mxu1 %v14229_v0 }
 0x421   : > { %6349 = vmatmul.mubr.msk.f32.gmra.mrb[38].mxu1 %vm14241_vm7, %v12190_v57 }
 0x422   : > { %5922 = vmatprep.mubr.f32.mxu1 %v14229_v0 }
 0x425   : > { %6350 = vmatmul.mubr.msk.f32.gmra.mrb[40].mxu1 %vm14242_vm6, %v12214_v42 }
 0x426   : > { %5928 = vmatprep.mubr.f32.mxu1 %v14229_v0 }
 0x429   : > { %6351 = vmatmul.mubr.msk.f32.gmra.mrb[42].mxu1 %vm14243_vm12, %v6583_v23 }
 0x42a   : > { %5934 = vmatprep.mubr.f32.mxu1 %v14229_v0 }
 0x42d   : > { %6352 = vmatmul.mubr.msk.f32.gmra.mrb[44].mxu1 %vm14244_vm8, %v6584_v47 }
 0x42e   : > { %5940 = vmatprep.mubr.f32.mxu1 %v14229_v0 }
 0x431   : > { %6353 = vmatmul.mubr.msk.f32.gmra.mrb[46].mxu1 %vm14245_vm11, %v6585_v41  ;;  %v5710_v53 = vpop.f32.mrb[24].mxu1 }
 0x432   : > { %v5712_v10 = vpop.f32.mrb[25].mxu1 }
 0x436   : > { %v5716_v39 = vpop.f32.mrb[26].mxu1 }
 0x437   : > { %v5718_v37 = vpop.f32.mrb[27].mxu1 }
 0x43b   : > { %v5722_v32 = vpop.f32.mrb[28].mxu1 }
 0x43c   : > { %v5724_v26 = vpop.f32.mrb[29].mxu1 }
 0x442   : > { %v5728_v24 = vpop.f32.mrb[30].mxu1 }
 0x443   : > { %v5957_v54 = vmax.f32 %v5728_v24, 0.0  ;;  %v5730_v17 = vpop.f32.mrb[31].mxu1 }
 0x444   : > { %v5958_v4 = vmax.f32 %v5730_v17, 0.0 }
 0x445   : > { %v6005_v2 = vadd.f32 %v5957_v54, %v5710_v53 }
 0x446   : > { %v6006_v57 = vadd.f32 %v5958_v4, %v5712_v10  ;;  %v5734_v31 = vpop.f32.mrb[32].mxu1 }
 0x447   : > { %v6053_v6 = vmax.f32 %v6005_v2, 0.0  ;;  %v5973_v0 = vmax.f32 %v5734_v31, 0.0  ;;  %v5736_v56 = vpop.f32.mrb[33].mxu1 }
 0x448   : > { %v6054_v11 = vmax.f32 %v6006_v57, 0.0  ;;  %v5974_v5 = vmax.f32 %v5736_v56, 0.0 }
 0x449   : > { %6101 = vst [vmem:[%s11764_s15 + $0x50] sm:$0xff] %v6053_v6  ;;  %v6021_v27 = vadd.f32 %v5973_v0, %v5716_v39 }
 0x44a   : > { %6102 = vst [vmem:[%s11764_s15 + $0x58] sm:$0xff] %v6054_v11  ;;  %v6022_v61 = vadd.f32 %v5974_v5, %v5718_v37  ;;  %v5740_v7 = vpop.f32.mrb[34].mxu1 }
 0x44b   : > { %v6069_v63 = vmax.f32 %v6021_v27, 0.0  ;;  %v5989_v42 = vmax.f32 %v5740_v7, 0.0  ;;  %v5742_v8 = vpop.f32.mrb[35].mxu1 }
 0x44c   : > { %v6070_v46 = vmax.f32 %v6022_v61, 0.0  ;;  %v5990_v28 = vmax.f32 %v5742_v8, 0.0 }
 0x44d   : > { %6117 = vst [vmem:[%s11764_s15 + $0xd0] sm:$0xff] %v6069_v63  ;;  %v6037_v62 = vadd.f32 %v5989_v42, %v5722_v32 }
 0x44e   : > { %6118 = vst [vmem:[%s11764_s15 + $0xd8] sm:$0xff] %v6070_v46  ;;  %v6038_v22 = vadd.f32 %v5990_v28, %v5724_v26 }
 0x44f   : > { %v6085_v58 = vmax.f32 %v6037_v62, 0.0  ;;  %v6161_v62 = vld [vmem:[%s11764_s15] sm:$0xff] (%p6661_p4) }
 0x450   : > { %v6086_v1 = vmax.f32 %v6038_v22, 0.0  ;;  %v6163_v22 = vld [vmem:[%s11764_s15 + $0x8] sm:$0xff] (%p6661_p4)  ;;  %6162 = vst [vmem:[%s12296_s5] sm:$0xff] (%p6661_p4), %v6161_v62 }
 0x451   : > { %6133 = vst [vmem:[%s11764_s15 + $0x150] sm:$0xff] %v6085_v58  ;;  %v6165_v58 = vld [vmem:[%s11764_s15 + $0x10] sm:$0xff] (%p6661_p4)  ;;  %6164 = vst [vmem:[%s12296_s5 + $0x8] sm:$0xff] (%p6661_p4), %v6163_v22 }
 0x452   : > { %6134 = vst [vmem:[%s11764_s15 + $0x158] sm:$0xff] %v6086_v1  ;;  %v6167_v1 = vld [vmem:[%s11764_s15 + $0x18] sm:$0xff] (%p6661_p4)  ;;  %6166 = vst [vmem:[%s12296_s5 + $0x10] sm:$0xff] (%p6661_p4), %v6165_v58 }
 0x453   : > { %6168 = vst [vmem:[%s12296_s5 + $0x18] sm:$0xff] (%p6661_p4), %v6167_v1 }
 0x4d0   : > { %v5811_v38 = vpop.f32.mrb[36].mxu0 }
 0x4d1   : > { %v5813_v60 = vpop.f32.mrb[37].mxu0 }
 0x4d7   : > { %v5817_v35 = vpop.f32.mrb[38].mxu0 }
 0x4d8   : > { %v5819_v50 = vpop.f32.mrb[39].mxu0 }
 0x4dc   : > { %v5823_v23 = vpop.f32.mrb[40].mxu0 }
 0x4dd   : > { %v5825_v29 = vpop.f32.mrb[41].mxu0 }
 0x4e0   : > { %v5829_v45 = vpop.f32.mrb[42].mxu0 }
 0x4e1   : > { %v5959_v43 = vmax.f32 %v5829_v45, 0.0  ;;  %v5831_v16 = vpop.f32.mrb[43].mxu0  ;;  %v6181_v45 = vld [vmem:[%s11764_s15 + $0x50] sm:$0xff] (%p6661_p4) }
 0x4e2   : > { %v5960_v36 = vmax.f32 %v5831_v16, 0.0  ;;  %6182 = vst [vmem:[%s12296_s5 + $0x50] sm:$0xff] (%p6661_p4), %v6181_v45 }
 0x4e3   : > { %v6007_v49 = vadd.f32 %v5959_v43, %v5811_v38  ;;  %v6169_v38 = vld [vmem:[%s11764_s15 + $0x20] sm:$0xff] (%p6661_p4)  ;;  %v6183_v43 = vld [vmem:[%s11764_s15 + $0x58] sm:$0xff] (%p6661_p4) }
 0x4e4   : > { %v6008_v20 = vadd.f32 %v5960_v36, %v5813_v60  ;;  %v5835_v3 = vpop.f32.mrb[44].mxu0  ;;  %v6171_v60 = vld [vmem:[%s11764_s15 + $0x28] sm:$0xff] (%p6661_p4)  ;;  %6170 = vst [vmem:[%s12296_s5 + $0x20] sm:$0xff] (%p6661_p4), %v6169_v38  ;;  %6184 = vst [vmem:[%s12296_s5 + $0x58] sm:$0xff] (%p6661_p4), %v6183_v43 }
 0x4e5   : > { %v6055_v30 = vmax.f32 %v6007_v49, 0.0  ;;  %v5975_v47 = vmax.f32 %v5835_v3, 0.0  ;;  %v5837_v48 = vpop.f32.mrb[45].mxu0  ;;  %6172 = vst [vmem:[%s12296_s5 + $0x28] sm:$0xff] (%p6661_p4), %v6171_v60  ;;  %v6193_v3 = vld [vmem:[%s11764_s15 + $0x80] sm:$0xff] (%p6661_p4) }
 0x4e6   : > { %v6056_v14 = vmax.f32 %v6008_v20, 0.0  ;;  %v5976_v21 = vmax.f32 %v5837_v48, 0.0  ;;  %6194 = vst [vmem:[%s12296_s5 + $0x100] sm:$0xff] (%p6661_p4), %v6193_v3  ;;  %v6199_v48 = vld [vmem:[%s11764_s15 + $0x98] sm:$0xff] (%p6661_p4) }
 0x4e7   : > { %6103 = vst [vmem:[%s11764_s15 + $0x60] sm:$0xff] %v6055_v30  ;;  %v6023_v33 = vadd.f32 %v5975_v47, %v5817_v35  ;;  %v6173_v35 = vld [vmem:[%s11764_s15 + $0x30] sm:$0xff] (%p6661_p4)  ;;  %v6195_v30 = vld [vmem:[%s11764_s15 + $0x88] sm:$0xff] (%p6661_p4)  ;;  %6200 = vst [vmem:[%s12296_s5 + $0x118] sm:$0xff] (%p6661_p4), %v6199_v48 }
 0x4e8   : > { %6104 = vst [vmem:[%s11764_s15 + $0x68] sm:$0xff] %v6056_v14  ;;  %v6024_v59 = vadd.f32 %v5976_v21, %v5819_v50  ;;  %v5841_v55 = vpop.f32.mrb[46].mxu0  ;;  %v6175_v50 = vld [vmem:[%s11764_s15 + $0x38] sm:$0xff] (%p6661_p4)  ;;  %6174 = vst [vmem:[%s12296_s5 + $0x30] sm:$0xff] (%p6661_p4), %v6173_v35  ;;  %v6197_v47 = vld [vmem:[%s11764_s15 + $0x90] sm:$0xff] (%p6661_p4) }
 0x4e9   : > { %v6071_v40 = vmax.f32 %v6023_v33, 0.0  ;;  %v5991_v13 = vmax.f32 %v5841_v55, 0.0  ;;  %v5843_v9 = vpop.f32.mrb[47].mxu0  ;;  %6176 = vst [vmem:[%s12296_s5 + $0x38] sm:$0xff] (%p6661_p4), %v6175_v50  ;;  %6196 = vst [vmem:[%s12296_s5 + $0x108] sm:$0xff] (%p6661_p4), %v6195_v30  ;;  %v6201_v14 = vld [vmem:[%s11764_s15 + $0xa0] sm:$0xff] (%p6661_p4) }
 0x4ea   : > { %v6072_v19 = vmax.f32 %v6024_v59, 0.0  ;;  %v5992_v18 = vmax.f32 %v5843_v9, 0.0  ;;  %6198 = vst [vmem:[%s12296_s5 + $0x110] sm:$0xff] (%p6661_p4), %v6197_v47  ;;  %6202 = vst [vmem:[%s12296_s5 + $0x120] sm:$0xff] (%p6661_p4), %v6201_v14  ;;  %v6203_v21 = vld [vmem:[%s11764_s15 + $0xa8] sm:$0xff] (%p6661_p4)  ;;  %v6205_v33 = vld [vmem:[%s11764_s15 + $0xb0] sm:$0xff] (%p6661_p4) }
 0x4eb   : > { %6119 = vst [vmem:[%s11764_s15 + $0xe0] sm:$0xff] %v6071_v40  ;;  %v6039_v41 = vadd.f32 %v5991_v13, %v5823_v23  ;;  %v6177_v23 = vld [vmem:[%s11764_s15 + $0x40] sm:$0xff] (%p6661_p4)  ;;  %v6207_v59 = vld [vmem:[%s11764_s15 + $0xb8] sm:$0xff] (%p6661_p4)  ;;  %6204 = vst [vmem:[%s12296_s5 + $0x128] sm:$0xff] (%p6661_p4), %v6203_v21 }
 0x4ec   : > { %6120 = vst [vmem:[%s11764_s15 + $0xe8] sm:$0xff] %v6072_v19  ;;  %v6040_v25 = vadd.f32 %v5992_v18, %v5825_v29  ;;  %6178 = vst [vmem:[%s12296_s5 + $0x40] sm:$0xff] (%p6661_p4), %v6177_v23  ;;  %v6179_v29 = vld [vmem:[%s11764_s15 + $0x48] sm:$0xff] (%p6661_p4)  ;;  %v6209_v55 = vld [vmem:[%s11764_s15 + $0xc0] sm:$0xff] (%p6661_p4) }
 0x4ed   : > { %v6087_v51 = vmax.f32 %v6039_v41, 0.0  ;;  %6180 = vst [vmem:[%s12296_s5 + $0x48] sm:$0xff] (%p6661_p4), %v6179_v29  ;;  %6206 = vst [vmem:[%s12296_s5 + $0x130] sm:$0xff] (%p6661_p4), %v6205_v33  ;;  %v6211_v40 = vld [vmem:[%s11764_s15 + $0xc8] sm:$0xff] (%p6661_p4)  ;;  %v6213_v13 = vld [vmem:[%s11764_s15 + $0xd0] sm:$0xff] (%p6661_p4) }
 0x4ee   : > { %v6088_v15 = vmax.f32 %v6040_v25, 0.0  ;;  %v6185_v16 = vld [vmem:[%s11764_s15 + $0x60] sm:$0xff] (%p6661_p4)  ;;  %6208 = vst [vmem:[%s12296_s5 + $0x138] sm:$0xff] (%p6661_p4), %v6207_v59  ;;  %6210 = vst [vmem:[%s12296_s5 + $0x140] sm:$0xff] (%p6661_p4), %v6209_v55  ;;  %v6215_v9 = vld [vmem:[%s11764_s15 + $0xd8] sm:$0xff] (%p6661_p4) }
 0x4ef   : > { %6135 = vst [vmem:[%s11764_s15 + $0x160] sm:$0xff] %v6087_v51  ;;  %v6187_v36 = vld [vmem:[%s11764_s15 + $0x68] sm:$0xff] (%p6661_p4)  ;;  %6186 = vst [vmem:[%s12296_s5 + $0x60] sm:$0xff] (%p6661_p4), %v6185_v16  ;;  %v6225_v51 = vld [vmem:[%s11764_s15 + $0x100] sm:$0xff] (%p6661_p4) }
 0x4f0   : > { %6136 = vst [vmem:[%s11764_s15 + $0x168] sm:$0xff] %v6088_v15  ;;  %v5912_v34 = vpop.f32.mrb[36].mxu1  ;;  %6188 = vst [vmem:[%s12296_s5 + $0x68] sm:$0xff] (%p6661_p4), %v6187_v36  ;;  %v6227_v15 = vld [vmem:[%s11764_s15 + $0x108] sm:$0xff] (%p6661_p4) }
 0x4f1   : > { %v5914_v52 = vpop.f32.mrb[37].mxu1  ;;  %6212 = vst [vmem:[%s12296_s5 + $0x148] sm:$0xff] (%p6661_p4), %v6211_v40  ;;  %6214 = vst [vmem:[%s12296_s5 + $0x150] sm:$0xff] (%p6661_p4), %v6213_v13 }
 0x4f2   : > { %v6217_v19 = vld [vmem:[%s11764_s15 + $0xe0] sm:$0xff] (%p6661_p4)  ;;  %6216 = vst [vmem:[%s12296_s5 + $0x158] sm:$0xff] (%p6661_p4), %v6215_v9  ;;  %6226 = vst [vmem:[%s12296_s5 + $0x200] sm:$0xff] (%p6661_p4), %v6225_v51 }
 0x4f3   : > { %v6219_v18 = vld [vmem:[%s11764_s15 + $0xe8] sm:$0xff] (%p6661_p4)  ;;  %6218 = vst [vmem:[%s12296_s5 + $0x160] sm:$0xff] (%p6661_p4), %v6217_v19  ;;  %6228 = vst [vmem:[%s12296_s5 + $0x208] sm:$0xff] (%p6661_p4), %v6227_v15 }
 0x4f4   : > { %v5918_v12 = vpop.f32.mrb[38].mxu1  ;;  %6220 = vst [vmem:[%s12296_s5 + $0x168] sm:$0xff] (%p6661_p4), %v6219_v18 }
 0x4f5   : > { %v5920_v44 = vpop.f32.mrb[39].mxu1 }
 0x4f8   : > { %v5924_v53 = vpop.f32.mrb[40].mxu1 }
 0x4f9   : > { %v5926_v10 = vpop.f32.mrb[41].mxu1 }
 0x4fc   : > { %v5930_v39 = vpop.f32.mrb[42].mxu1 }
 0x4fd   : > { %v5961_v37 = vmax.f32 %v5930_v39, 0.0  ;;  %v5932_v32 = vpop.f32.mrb[43].mxu1  ;;  %v6241_v39 = vld [vmem:[%s11764_s15 + $0x140] sm:$0xff] (%p6661_p4) }
 0x4fe   : > { %v5962_v26 = vmax.f32 %v5932_v32, 0.0  ;;  %6242 = vst [vmem:[%s12296_s5 + $0x240] sm:$0xff] (%p6661_p4), %v6241_v39  ;;  %v6245_v32 = vld [vmem:[%s11764_s15 + $0x150] sm:$0xff] (%p6661_p4) }
 0x4ff   : > { %v6009_v24 = vadd.f32 %v5961_v37, %v5912_v34  ;;  %v6229_v34 = vld [vmem:[%s11764_s15 + $0x110] sm:$0xff] (%p6661_p4)  ;;  %v6243_v37 = vld [vmem:[%s11764_s15 + $0x148] sm:$0xff] (%p6661_p4)  ;;  %6246 = vst [vmem:[%s12296_s5 + $0x250] sm:$0xff] (%p6661_p4), %v6245_v32 }
 0x500   : > { %v6010_v54 = vadd.f32 %v5962_v26, %v5914_v52  ;;  %v5936_v17 = vpop.f32.mrb[44].mxu1  ;;  %v6231_v52 = vld [vmem:[%s11764_s15 + $0x118] sm:$0xff] (%p6661_p4)  ;;  %6230 = vst [vmem:[%s12296_s5 + $0x210] sm:$0xff] (%p6661_p4), %v6229_v34  ;;  %6244 = vst [vmem:[%s12296_s5 + $0x248] sm:$0xff] (%p6661_p4), %v6243_v37 }
 0x501   : > { %v6057_v4 = vmax.f32 %v6009_v24, 0.0  ;;  %v5977_v2 = vmax.f32 %v5936_v17, 0.0  ;;  %v5938_v57 = vpop.f32.mrb[45].mxu1  ;;  %6232 = vst [vmem:[%s12296_s5 + $0x218] sm:$0xff] (%p6661_p4), %v6231_v52  ;;  %v6247_v26 = vld [vmem:[%s11764_s15 + $0x158] sm:$0xff] (%p6661_p4)  ;;  %v6249_v24 = vld [vmem:[%s11764_s15 + $0x160] sm:$0xff] (%p6661_p4) }
 0x502   : > { %v6058_v31 = vmax.f32 %v6010_v54, 0.0  ;;  %v5978_v6 = vmax.f32 %v5938_v57, 0.0  ;;  %6248 = vst [vmem:[%s12296_s5 + $0x258] sm:$0xff] (%p6661_p4), %v6247_v26  ;;  %6250 = vst [vmem:[%s12296_s5 + $0x260] sm:$0xff] (%p6661_p4), %v6249_v24  ;;  %v6251_v54 = vld [vmem:[%s11764_s15 + $0x168] sm:$0xff] (%p6661_p4) }
 0x503   : > { %6105 = vst [vmem:[%s11764_s15 + $0x70] sm:$0xff] %v6057_v4  ;;  %v6025_v0 = vadd.f32 %v5977_v2, %v5918_v12  ;;  %v6233_v12 = vld [vmem:[%s11764_s15 + $0x120] sm:$0xff] (%p6661_p4)  ;;  %6252 = vst [vmem:[%s12296_s5 + $0x268] sm:$0xff] (%p6661_p4), %v6251_v54 }
 0x504   : > { %6106 = vst [vmem:[%s11764_s15 + $0x78] sm:$0xff] %v6058_v31  ;;  %v6026_v56 = vadd.f32 %v5978_v6, %v5920_v44  ;;  %v5942_v11 = vpop.f32.mrb[46].mxu1  ;;  %v6235_v44 = vld [vmem:[%s11764_s15 + $0x128] sm:$0xff] (%p6661_p4)  ;;  %6234 = vst [vmem:[%s12296_s5 + $0x220] sm:$0xff] (%p6661_p4), %v6233_v12 }
 0x505   : > { %v6073_v5 = vmax.f32 %v6025_v0, 0.0  ;;  %v5993_v27 = vmax.f32 %v5942_v11, 0.0  ;;  %v5944_v61 = vpop.f32.mrb[47].mxu1  ;;  %6236 = vst [vmem:[%s12296_s5 + $0x228] sm:$0xff] (%p6661_p4), %v6235_v44 }
 0x506   : > { %v6074_v7 = vmax.f32 %v6026_v56, 0.0  ;;  %v5994_v63 = vmax.f32 %v5944_v61, 0.0  ;;  %6145 = sbr.rel (!%p6661_p4) target bundleno = 1301 (0x515), region = 32 }
 0x507   : > { %6121 = vst [vmem:[%s11764_s15 + $0xf0] sm:$0xff] %v6073_v5  ;;  %v6041_v42 = vadd.f32 %v5993_v27, %v5924_v53  ;;  %v6237_v53 = vld [vmem:[%s11764_s15 + $0x130] sm:$0xff] (%p6661_p4) }
 0x508   : > { %6122 = vst [vmem:[%s11764_s15 + $0xf8] sm:$0xff] %v6074_v7  ;;  %v6042_v8 = vadd.f32 %v5994_v63, %v5926_v10  ;;  %6238 = vst [vmem:[%s12296_s5 + $0x230] sm:$0xff] (%p6661_p4), %v6237_v53  ;;  %v6239_v10 = vld [vmem:[%s11764_s15 + $0x138] sm:$0xff] (%p6661_p4) }
 0x509   : > { %v6089_v46 = vmax.f32 %v6041_v42, 0.0  ;;  %6240 = vst [vmem:[%s12296_s5 + $0x238] sm:$0xff] (%p6661_p4), %v6239_v10 }
 0x50a   : > { %v6090_v28 = vmax.f32 %v6042_v8, 0.0  ;;  %v6189_v49 = vld [vmem:[%s11764_s15 + $0x70] sm:$0xff] (%p6661_p4) }
 0x50b   : > { %6137 = vst [vmem:[%s11764_s15 + $0x170] sm:$0xff] %v6089_v46  ;;  %6190 = vst [vmem:[%s12296_s5 + $0x70] sm:$0xff] (%p6661_p4), %v6189_v49  ;;  %v6191_v20 = vld [vmem:[%s11764_s15 + $0x78] sm:$0xff] (%p6661_p4) }
 0x50c   : > { %6138 = vst [vmem:[%s11764_s15 + $0x178] sm:$0xff] %v6090_v28  ;;  %6192 = vst [vmem:[%s12296_s5 + $0x78] sm:$0xff] (%p6661_p4), %v6191_v20 }
 0x50e   : > { %v6221_v41 = vld [vmem:[%s11764_s15 + $0xf0] sm:$0xff] }
 0x50f   : > { %v6223_v25 = vld [vmem:[%s11764_s15 + $0xf8] sm:$0xff]  ;;  %6222 = vst [vmem:[%s12296_s5 + $0x170] sm:$0xff] %v6221_v41 }
 0x510   : > { %6224 = vst [vmem:[%s12296_s5 + $0x178] sm:$0xff] %v6223_v25 }
 0x512   : > { %v6253_v17 = vld [vmem:[%s11764_s15 + $0x170] sm:$0xff] }
 0x513   : > { %v6255_v4 = vld [vmem:[%s11764_s15 + $0x178] sm:$0xff]  ;;  %6254 = vst [vmem:[%s12296_s5 + $0x270] sm:$0xff] %v6253_v17 }
 0x514   : > { %6256 = vst [vmem:[%s12296_s5 + $0x278] sm:$0xff] %v6255_v4 }
 0x515 PF: > { %p9_p7 = scmp.ge.s32.totalorder %s6651_s13, 4   ;;  %s14246_s9 = smov %s6604_s10 }
 0x516   : > { %s14247_s10 = smov %s6659_s16  ;;  %s14248_s11 = smov %s6651_s13 }
 0x517   :  { %11 = sbr.rel (!%p9_p7) target bundleno = 2 (0x2), region = 81 }

</bundles_post_ra>
